<compile_context>
chip_gen: v7x
topology: tpu7x:2x2x1
jax: 0.10.0
libtpu: 0.0.40
codegen_flags: <defaults>
</compile_context>

<pallas_src>
import functools

import jax
import jax.numpy as jnp
from jax.experimental import pallas as pl
from jax.experimental.pallas import tpu as pltpu

feature_num = 128
nc = 3
BN_EPS = 1e-5


def _round_up(x, m):
    return ((x + m - 1) // m) * m


# ----------------------------------------------------------------------------
# Pallas kernel: (bf16 x bf16 -> f32) matmul + per-channel scale/shift + act
# ----------------------------------------------------------------------------
def _fused_matmul_bn_act_kernel(x_ref, w_ref, scale_ref, shift_ref, o_ref, *, act):
    y = jnp.dot(x_ref[...], w_ref[...], preferred_element_type=jnp.float32)
    y = y * scale_ref[...] + shift_ref[...]
    if act == "relu":
        y = jnp.maximum(y, 0.0)
    elif act == "tanh":
        y = jnp.tanh(y)
    o_ref[...] = y.astype(o_ref.dtype)


def fused_matmul_bn_act(x_all, w_all, scale, shift, act):
    """act((x_all @ w_all) * scale + shift) for P independent GEMMs.

    x_all: (P, M, K)   w_all: (P, K, N)   scale/shift: (N,) float32.
    Returns (P, M, N) bfloat16 (MXU accumulation and epilogue in f32).
    """
    P, M, Kd = x_all.shape
    Nd = w_all.shape[2]

    # Full-K tiles (no reduction grid axis / accumulator), 256-wide M/N tiles
    # where the problem allows.
    tm = min(256, _round_up(M, 16))
    tn = min(256, _round_up(Nd, 128))
    Mp = _round_up(M, tm)
    Np = _round_up(Nd, tn)
    Kp = _round_up(Kd, 128)

    xp = jnp.pad(x_all, ((0, 0), (0, Mp - M), (0, Kp - Kd))).astype(jnp.bfloat16)
    wp = jnp.pad(w_all, ((0, 0), (0, Kp - Kd), (0, Np - Nd))).astype(jnp.bfloat16)
    sp = jnp.pad(scale.astype(jnp.float32), (0, Np - Nd)).reshape(1, Np)
    tp = jnp.pad(shift.astype(jnp.float32), (0, Np - Nd)).reshape(1, Np)

    kernel = functools.partial(_fused_matmul_bn_act_kernel, act=act)
    out = pl.pallas_call(
        kernel,
        out_shape=jax.ShapeDtypeStruct((P, Mp, Np), jnp.bfloat16),
        grid_spec=pltpu.PrefetchScalarGridSpec(
            num_scalar_prefetch=0,
            grid=(P, Mp // tm, Np // tn),
            in_specs=[
                pl.BlockSpec((None, tm, Kp), lambda p, i, j: (p, i, 0)),
                pl.BlockSpec((None, Kp, tn), lambda p, i, j: (p, 0, j)),
                pl.BlockSpec((1, tn), lambda p, i, j: (0, j)),
                pl.BlockSpec((1, tn), lambda p, i, j: (0, j)),
            ],
            out_specs=pl.BlockSpec((None, tm, tn), lambda p, i, j: (p, i, j)),
        ),
        compiler_params=pltpu.CompilerParams(
            dimension_semantics=("parallel", "parallel", "parallel")),
    )(xp, wp, sp, tp)
    return out[:, :M, :Nd]


# ----------------------------------------------------------------------------
# ConvTranspose2d layers (sub-pixel decomposition) + fused Pallas GEMM
# ----------------------------------------------------------------------------
def _subpixel_weight_mats(w):
    """w: (Cin, Cout, 4, 4) ConvTranspose2d weight -> (4, 4*Cin, Cout) bf16.

    Phase p = 2*ry + rx produces output pixels (2y+ry, 2x+rx); its 2x2 taps are
    the stride-2 subsampling of the spatially flipped kernel, K ordered (a, b,
    cin) to match the patch matrices.
    """
    Cin, Cout = w.shape[0], w.shape[1]
    wf = w[:, :, ::-1, ::-1].astype(jnp.bfloat16)          # spatial flip
    mats = []
    for ry in (0, 1):
        for rx in (0, 1):
            ws = wf[:, :, ry::2, rx::2]                    # (Cin, Cout, 2, 2)
            mats.append(jnp.transpose(ws, (2, 3, 0, 1)).reshape(4 * Cin, Cout))
    return jnp.stack(mats, axis=0)


def _subpixel_patches(x_nhwc):
    """x: (N, H, W, Cin) -> (4, N*H*W, 4*Cin) per-phase 2x2 patch matrices."""
    # TODO(synk): patch extraction is still materialized in HBM by XLA (4x the
    # activation bytes); fully fusing the shifted-window reads into the kernel
    # DMA is not implemented.
    N, H, W, Cin = x_nhwc.shape
    xp = jnp.pad(x_nhwc, ((0, 0), (1, 1), (1, 1), (0, 0)))
    phases = []
    for ry in (0, 1):
        for rx in (0, 1):
            wins = [xp[:, ry + a:ry + a + H, rx + b:rx + b + W, :]
                    for a in (0, 1) for b in (0, 1)]
            p = jnp.stack(wins, axis=3)                    # (N, H, W, 4, Cin)
            phases.append(p.reshape(N * H * W, 4 * Cin))
    return jnp.stack(phases, axis=0)


def conv_transpose_s2_layer(x_nhwc, w, scale, shift, act):
    """ConvTranspose2d(K=4, stride=2, pad=1) + scale/shift + act, NHWC in/out."""
    N, H, W, _ = x_nhwc.shape
    Cout = w.shape[1]
    patches = _subpixel_patches(x_nhwc)                    # (4, N*H*W, 4*Cin)
    w_mats = _subpixel_weight_mats(w)                      # (4, 4*Cin, Cout)
    out = fused_matmul_bn_act(patches, w_mats, scale, shift, act)
    out = out.reshape(2, 2, N, H, W, Cout)                 # (ry, rx, n, y, x, c)
    out = jnp.transpose(out, (2, 3, 0, 4, 1, 5))           # (n, y, ry, x, rx, c)
    return out.reshape(N, 2 * H, 2 * W, Cout)


def conv_transpose_1x1_input_layer(z2d, w, scale, shift, act):
    """ConvTranspose2d(K=4, stride=1, pad=0) on a 1x1 spatial input.

    out[n, kh, kw, co] = sum_ci z[n, ci] * w[ci, co, kh, kw]: a single GEMM
    whose output columns are ordered (kh, kw, co).
    """
    Cin, Cout, K, _ = w.shape
    N = z2d.shape[0]
    w_mat = jnp.transpose(w, (0, 2, 3, 1)).reshape(Cin, K * K * Cout)
    out = fused_matmul_bn_act(z2d[None], w_mat[None],
                              jnp.tile(scale, K * K), jnp.tile(shift, K * K), act)
    return out[0].reshape(N, K, K, Cout)


# ----------------------------------------------------------------------------
# Generator parameters + forward
# ----------------------------------------------------------------------------
def init_generator_params(key, latent_dim):
    chans = [latent_dim, feature_num * 8, feature_num * 4,
             feature_num * 2, feature_num, nc]
    params = []
    for li in range(5):
        key, kw, kb, kg, kbe, km, kv = jax.random.split(key, 7)
        cin, cout = chans[li], chans[li + 1]
        layer = {
            "w": 0.02 * jax.random.normal(kw, (cin, cout, 4, 4), jnp.float32),
            "b": 0.01 * jax.random.normal(kb, (cout,), jnp.float32),
            "gamma": None, "beta": None, "rmean": None, "rvar": None,
        }
        if li < 4:  # layers followed by BatchNorm2d
            layer["gamma"] = 1.0 + 0.1 * jax.random.normal(kg, (cout,), jnp.float32)
            layer["beta"] = 0.1 * jax.random.normal(kbe, (cout,), jnp.float32)
            layer["rmean"] = 0.1 * jax.random.normal(km, (cout,), jnp.float32)
            layer["rvar"] = jax.random.uniform(kv, (cout,), jnp.float32, 0.5, 1.5)
        params.append(layer)
    return params


def _fold_bn(p, has_bn):
    if has_bn:
        s = p["gamma"] / jnp.sqrt(p["rvar"] + BN_EPS)
        shift = p["beta"] + (p["b"] - p["rmean"]) * s      # conv bias folded in
    else:
        s = jnp.ones_like(p["b"])
        shift = p["b"]
    return s, shift


def generator_forward(params, z):
    """z: (N, latent_dim, 1, 1) NCHW -> (N, nc, 64, 64) NCHW (Generator.forward)."""
    # TODO(synk): BatchNorm2d is eval-mode only (running stats folded into the
    # fused scale/shift); training-mode batch statistics are not modeled.
    N = z.shape[0]
    x2d = z.reshape(N, -1).astype(jnp.bfloat16)
    s, t = _fold_bn(params[0], True)
    x = conv_transpose_1x1_input_layer(x2d, params[0]["w"], s, t, "relu")
    for li in range(1, 5):
        has_bn = li < 4
        s, t = _fold_bn(params[li], has_bn)
        act = "relu" if has_bn else "tanh"
        x = conv_transpose_s2_layer(x, params[li]["w"], s, t, act)
    return jnp.transpose(x, (0, 3, 1, 2)).astype(jnp.float32)   # NHWC -> NCHW


# ----------------------------------------------------------------------------
# Pure-JAX f32 reference (no Pallas) for validation
# ----------------------------------------------------------------------------
def _conv_transpose_ref(x, w, b, stride, pad):
    K = w.shape[2]
    wt = jnp.transpose(w[:, :, ::-1, ::-1], (1, 0, 2, 3))        # OIHW
    y = jax.lax.conv_general_dilated(
        x, wt, window_strides=(1, 1),
        padding=[(K - 1 - pad, K - 1 - pad)] * 2,
        lhs_dilation=(stride, stride),
        dimension_numbers=("NCHW", "OIHW", "NCHW"))
    return y + b.reshape(1, -1, 1, 1)


def generator_reference(params, z):
    strides = [1, 2, 2, 2, 2]
    pads = [0, 1, 1, 1, 1]
    x = z
    for li, p in enumerate(params):
        x = _conv_transpose_ref(x, p["w"], p["b"], strides[li], pads[li])
        if li < 4:
            inv = (p["gamma"] / jnp.sqrt(p["rvar"] + BN_EPS)).reshape(1, -1, 1, 1)
            x = (x - p["rmean"].reshape(1, -1, 1, 1)) * inv \
                + p["beta"].reshape(1, -1, 1, 1)
            x = jnp.maximum(x, 0.0)
        else:
            x = jnp.tanh(x)
    return x


if __name__ == "__main__":
    latent_dim = 16
    batch = 2
    key = jax.random.PRNGKey(0)
    kp, kz = jax.random.split(key)
    params = init_generator_params(kp, latent_dim)
    z = jax.random.normal(kz, (batch, latent_dim, 1, 1), jnp.float32)

    out = jax.block_until_ready(jax.jit(generator_forward)(params, z))

    assert out.shape == (batch, nc, 64, 64), out.shape
    assert bool(jnp.all(jnp.isfinite(out)))

    ref = jax.block_until_ready(jax.jit(generator_reference)(params, z))
    max_err = float(jnp.max(jnp.abs(out - ref)))
    assert max_err < 5e-2, f"max abs err vs f32 reference: {max_err}"
    print("KERNEL_OK")
</pallas_src>

<mosaic_0001>
module attributes {stable_mosaic.version = 11 : i64} {
  func.func @_fused_matmul_bn_act_kernel(%arg0: i32, %arg1: i32, %arg2: i32, %arg3: memref<1x16x128xbf16, #tpu.memory_space<vmem>>, %arg4: memref<1x128x256xbf16, #tpu.memory_space<vmem>>, %arg5: memref<1x256xf32, #tpu.memory_space<vmem>>, %arg6: memref<1x256xf32, #tpu.memory_space<vmem>>, %arg7: memref<1x16x256xbf16, #tpu.memory_space<vmem>>) attributes {dimension_semantics = [#tpu.dimension_semantics<parallel>, #tpu.dimension_semantics<parallel>, #tpu.dimension_semantics<parallel>], iteration_bounds = array<i64: 1, 1, 64>, scalar_prefetch = 0 : i64, scratch_operands = 0 : i64, tpu.core_type = #tpu.core_type<tc>, window_params = [{transform_indices = @transform_0, window_bounds = array<i64: 1, 16, 128>}, {transform_indices = @transform_1, window_bounds = array<i64: 1, 128, 256>}, {transform_indices = @transform_2, window_bounds = array<i64: 1, 256>}, {transform_indices = @transform_3, window_bounds = array<i64: 1, 256>}, {transform_indices = @transform_4, window_bounds = array<i64: 1, 16, 256>}]} {
    %c0 = arith.constant 0 : index
    %c0_0 = arith.constant 0 : index
    %c0_1 = arith.constant 0 : index
    %0 = vector.load %arg3[%c0, %c0_0, %c0_1] : memref<1x16x128xbf16, #tpu.memory_space<vmem>>, vector<1x16x128xbf16>
    %1 = vector.shape_cast %0 : vector<1x16x128xbf16> to vector<16x128xbf16>
    %c0_2 = arith.constant 0 : index
    %c0_3 = arith.constant 0 : index
    %c0_4 = arith.constant 0 : index
    %2 = vector.load %arg4[%c0_2, %c0_3, %c0_4] : memref<1x128x256xbf16, #tpu.memory_space<vmem>>, vector<1x128x256xbf16>
    %3 = vector.shape_cast %2 : vector<1x128x256xbf16> to vector<128x256xbf16>
    %cst = arith.constant dense<0.000000e+00> : vector<16x256xf32>
    %4 = tpu.matmul %1, %3, %cst {dimension_numbers = #tpu.dot_dimension_numbers<[1], [0], [0], [1], [0, 0, 1, 1], [], []>} : vector<16x128xbf16>, vector<128x256xbf16>, vector<16x256xf32> -> vector<16x256xf32>
    %c0_5 = arith.constant 0 : index
    %c0_6 = arith.constant 0 : index
    %5 = vector.load %arg5[%c0_5, %c0_6] : memref<1x256xf32, #tpu.memory_space<vmem>>, vector<1x256xf32>
    %6 = vector.broadcast %5 : vector<1x256xf32> to vector<16x256xf32>
    %7 = arith.mulf %4, %6 : vector<16x256xf32>
    %c0_7 = arith.constant 0 : index
    %c0_8 = arith.constant 0 : index
    %8 = vector.load %arg6[%c0_7, %c0_8] : memref<1x256xf32, #tpu.memory_space<vmem>>, vector<1x256xf32>
    %9 = vector.broadcast %8 : vector<1x256xf32> to vector<16x256xf32>
    %10 = arith.addf %7, %9 : vector<16x256xf32>
    %cst_9 = arith.constant 0.000000e+00 : f32
    %11 = vector.broadcast %cst_9 : f32 to vector<16x256xf32>
    %12 = arith.maximumf %10, %11 : vector<16x256xf32>
    %13 = arith.truncf %12 : vector<16x256xf32> to vector<16x256xbf16>
    %c0_10 = arith.constant 0 : index
    %c0_11 = arith.constant 0 : index
    %c0_12 = arith.constant 0 : index
    %14 = vector.load %arg7[%c0_10, %c0_11, %c0_12] : memref<1x16x256xbf16, #tpu.memory_space<vmem>>, vector<1x16x256xbf16>
    %15 = vector.shape_cast %14 : vector<1x16x256xbf16> to vector<16x256xbf16>
    %16 = vector.shape_cast %13 : vector<16x256xbf16> to vector<1x16x256xbf16>
    tpu.vector_store %arg7[%c0_10, %c0_11, %c0_12], %16 {strides = array<i32>} : memref<1x16x256xbf16, #tpu.memory_space<vmem>>, vector<1x16x256xbf16>,
    return
  }
  func.func @transform_0(%arg0: i32, %arg1: i32, %arg2: i32) -> (i32, i32, i32) {
    %c0_i32 = arith.constant 0 : i32
    %c0_i32_0 = arith.constant 0 : i32
    return %arg0, %arg1, %c0_i32 : i32, i32, i32
  }
  func.func @transform_1(%arg0: i32, %arg1: i32, %arg2: i32) -> (i32, i32, i32) {
    %c0_i32 = arith.constant 0 : i32
    %c0_i32_0 = arith.constant 0 : i32
    return %arg0, %c0_i32, %arg2 : i32, i32, i32
  }
  func.func @transform_2(%arg0: i32, %arg1: i32, %arg2: i32) -> (i32, i32) {
    %c0_i32 = arith.constant 0 : i32
    %c0_i32_0 = arith.constant 0 : i32
    return %c0_i32, %arg2 : i32, i32
  }
  func.func @transform_3(%arg0: i32, %arg1: i32, %arg2: i32) -> (i32, i32) {
    %c0_i32 = arith.constant 0 : i32
    %c0_i32_0 = arith.constant 0 : i32
    return %c0_i32, %arg2 : i32, i32
  }
  func.func @transform_4(%arg0: i32, %arg1: i32, %arg2: i32) -> (i32, i32, i32) {
    %c0_i32 = arith.constant 0 : i32
    return %arg0, %arg1, %arg2 : i32, i32, i32
  }
}

module attributes {stable_mosaic.version = 11 : i64} {
  func.func @_fused_matmul_bn_act_kernel(%arg0: i32, %arg1: i32, %arg2: i32, %arg3: memref<1x32x4096xbf16, #tpu.memory_space<vmem>>, %arg4: memref<1x4096x256xbf16, #tpu.memory_space<vmem>>, %arg5: memref<1x256xf32, #tpu.memory_space<vmem>>, %arg6: memref<1x256xf32, #tpu.memory_space<vmem>>, %arg7: memref<1x32x256xbf16, #tpu.memory_space<vmem>>) attributes {dimension_semantics = [#tpu.dimension_semantics<parallel>, #tpu.dimension_semantics<parallel>, #tpu.dimension_semantics<parallel>], iteration_bounds = array<i64: 4, 1, 2>, scalar_prefetch = 0 : i64, scratch_operands = 0 : i64, tpu.core_type = #tpu.core_type<tc>, window_params = [{transform_indices = @transform_0, window_bounds = array<i64: 1, 32, 4096>}, {transform_indices = @transform_1, window_bounds = array<i64: 1, 4096, 256>}, {transform_indices = @transform_2, window_bounds = array<i64: 1, 256>}, {transform_indices = @transform_3, window_bounds = array<i64: 1, 256>}, {transform_indices = @transform_4, window_bounds = array<i64: 1, 32, 256>}]} {
    %c0 = arith.constant 0 : index
    %c0_0 = arith.constant 0 : index
    %c0_1 = arith.constant 0 : index
    %0 = vector.load %arg3[%c0, %c0_0, %c0_1] : memref<1x32x4096xbf16, #tpu.memory_space<vmem>>, vector<1x32x4096xbf16>
    %1 = vector.shape_cast %0 : vector<1x32x4096xbf16> to vector<32x4096xbf16>
    %c0_2 = arith.constant 0 : index
    %c0_3 = arith.constant 0 : index
    %c0_4 = arith.constant 0 : index
    %2 = vector.load %arg4[%c0_2, %c0_3, %c0_4] : memref<1x4096x256xbf16, #tpu.memory_space<vmem>>, vector<1x4096x256xbf16>
    %3 = vector.shape_cast %2 : vector<1x4096x256xbf16> to vector<4096x256xbf16>
    %cst = arith.constant dense<0.000000e+00> : vector<32x256xf32>
    %4 = tpu.matmul %1, %3, %cst {dimension_numbers = #tpu.dot_dimension_numbers<[1], [0], [0], [1], [0, 0, 1, 1], [], []>} : vector<32x4096xbf16>, vector<4096x256xbf16>, vector<32x256xf32> -> vector<32x256xf32>
    %c0_5 = arith.constant 0 : index
    %c0_6 = arith.constant 0 : index
    %5 = vector.load %arg5[%c0_5, %c0_6] : memref<1x256xf32, #tpu.memory_space<vmem>>, vector<1x256xf32>
    %6 = vector.broadcast %5 : vector<1x256xf32> to vector<32x256xf32>
    %7 = arith.mulf %4, %6 : vector<32x256xf32>
    %c0_7 = arith.constant 0 : index
    %c0_8 = arith.constant 0 : index
    %8 = vector.load %arg6[%c0_7, %c0_8] : memref<1x256xf32, #tpu.memory_space<vmem>>, vector<1x256xf32>
    %9 = vector.broadcast %8 : vector<1x256xf32> to vector<32x256xf32>
    %10 = arith.addf %7, %9 : vector<32x256xf32>
    %cst_9 = arith.constant 0.000000e+00 : f32
    %11 = vector.broadcast %cst_9 : f32 to vector<32x256xf32>
    %12 = arith.maximumf %10, %11 : vector<32x256xf32>
    %13 = arith.truncf %12 : vector<32x256xf32> to vector<32x256xbf16>
    %c0_10 = arith.constant 0 : index
    %c0_11 = arith.constant 0 : index
    %c0_12 = arith.constant 0 : index
    %14 = vector.load %arg7[%c0_10, %c0_11, %c0_12] : memref<1x32x256xbf16, #tpu.memory_space<vmem>>, vector<1x32x256xbf16>
    %15 = vector.shape_cast %14 : vector<1x32x256xbf16> to vector<32x256xbf16>
    %16 = vector.shape_cast %13 : vector<32x256xbf16> to vector<1x32x256xbf16>
    tpu.vector_store %arg7[%c0_10, %c0_11, %c0_12], %16 {strides = array<i32>} : memref<1x32x256xbf16, #tpu.memory_space<vmem>>, vector<1x32x256xbf16>,
    return
  }
  func.func @transform_0(%arg0: i32, %arg1: i32, %arg2: i32) -> (i32, i32, i32) {
    %c0_i32 = arith.constant 0 : i32
    %c0_i32_0 = arith.constant 0 : i32
    return %arg0, %arg1, %c0_i32 : i32, i32, i32
  }
  func.func @transform_1(%arg0: i32, %arg1: i32, %arg2: i32) -> (i32, i32, i32) {
    %c0_i32 = arith.constant 0 : i32
    %c0_i32_0 = arith.constant 0 : i32
    return %arg0, %c0_i32, %arg2 : i32, i32, i32
  }
  func.func @transform_2(%arg0: i32, %arg1: i32, %arg2: i32) -> (i32, i32) {
    %c0_i32 = arith.constant 0 : i32
    %c0_i32_0 = arith.constant 0 : i32
    return %c0_i32, %arg2 : i32, i32
  }
  func.func @transform_3(%arg0: i32, %arg1: i32, %arg2: i32) -> (i32, i32) {
    %c0_i32 = arith.constant 0 : i32
    %c0_i32_0 = arith.constant 0 : i32
    return %c0_i32, %arg2 : i32, i32
  }
  func.func @transform_4(%arg0: i32, %arg1: i32, %arg2: i32) -> (i32, i32, i32) {
    %c0_i32 = arith.constant 0 : i32
    return %arg0, %arg1, %arg2 : i32, i32, i32
  }
}

module attributes {stable_mosaic.version = 11 : i64} {
  func.func @_fused_matmul_bn_act_kernel(%arg0: i32, %arg1: i32, %arg2: i32, %arg3: memref<1x128x2048xbf16, #tpu.memory_space<vmem>>, %arg4: memref<1x2048x256xbf16, #tpu.memory_space<vmem>>, %arg5: memref<1x256xf32, #tpu.memory_space<vmem>>, %arg6: memref<1x256xf32, #tpu.memory_space<vmem>>, %arg7: memref<1x128x256xbf16, #tpu.memory_space<vmem>>) attributes {dimension_semantics = [#tpu.dimension_semantics<parallel>, #tpu.dimension_semantics<parallel>, #tpu.dimension_semantics<parallel>], iteration_bounds = array<i64: 4, 1, 1>, scalar_prefetch = 0 : i64, scratch_operands = 0 : i64, tpu.core_type = #tpu.core_type<tc>, window_params = [{transform_indices = @transform_0, window_bounds = array<i64: 1, 128, 2048>}, {transform_indices = @transform_1, window_bounds = array<i64: 1, 2048, 256>}, {transform_indices = @transform_2, window_bounds = array<i64: 1, 256>}, {transform_indices = @transform_3, window_bounds = array<i64: 1, 256>}, {transform_indices = @transform_4, window_bounds = array<i64: 1, 128, 256>}]} {
    %c0 = arith.constant 0 : index
    %c0_0 = arith.constant 0 : index
    %c0_1 = arith.constant 0 : index
    %0 = vector.load %arg3[%c0, %c0_0, %c0_1] : memref<1x128x2048xbf16, #tpu.memory_space<vmem>>, vector<1x128x2048xbf16>
    %1 = vector.shape_cast %0 : vector<1x128x2048xbf16> to vector<128x2048xbf16>
    %c0_2 = arith.constant 0 : index
    %c0_3 = arith.constant 0 : index
    %c0_4 = arith.constant 0 : index
    %2 = vector.load %arg4[%c0_2, %c0_3, %c0_4] : memref<1x2048x256xbf16, #tpu.memory_space<vmem>>, vector<1x2048x256xbf16>
    %3 = vector.shape_cast %2 : vector<1x2048x256xbf16> to vector<2048x256xbf16>
    %cst = arith.constant dense<0.000000e+00> : vector<128x256xf32>
    %4 = tpu.matmul %1, %3, %cst {dimension_numbers = #tpu.dot_dimension_numbers<[1], [0], [0], [1], [0, 0, 1, 1], [], []>} : vector<128x2048xbf16>, vector<2048x256xbf16>, vector<128x256xf32> -> vector<128x256xf32>
    %c0_5 = arith.constant 0 : index
    %c0_6 = arith.constant 0 : index
    %5 = vector.load %arg5[%c0_5, %c0_6] : memref<1x256xf32, #tpu.memory_space<vmem>>, vector<1x256xf32>
    %6 = vector.broadcast %5 : vector<1x256xf32> to vector<128x256xf32>
    %7 = arith.mulf %4, %6 : vector<128x256xf32>
    %c0_7 = arith.constant 0 : index
    %c0_8 = arith.constant 0 : index
    %8 = vector.load %arg6[%c0_7, %c0_8] : memref<1x256xf32, #tpu.memory_space<vmem>>, vector<1x256xf32>
    %9 = vector.broadcast %8 : vector<1x256xf32> to vector<128x256xf32>
    %10 = arith.addf %7, %9 : vector<128x256xf32>
    %cst_9 = arith.constant 0.000000e+00 : f32
    %11 = vector.broadcast %cst_9 : f32 to vector<128x256xf32>
    %12 = arith.maximumf %10, %11 : vector<128x256xf32>
    %13 = arith.truncf %12 : vector<128x256xf32> to vector<128x256xbf16>
    %c0_10 = arith.constant 0 : index
    %c0_11 = arith.constant 0 : index
    %c0_12 = arith.constant 0 : index
    %14 = vector.load %arg7[%c0_10, %c0_11, %c0_12] : memref<1x128x256xbf16, #tpu.memory_space<vmem>>, vector<1x128x256xbf16>
    %15 = vector.shape_cast %14 : vector<1x128x256xbf16> to vector<128x256xbf16>
    %16 = vector.shape_cast %13 : vector<128x256xbf16> to vector<1x128x256xbf16>
    tpu.vector_store %arg7[%c0_10, %c0_11, %c0_12], %16 {strides = array<i32>} : memref<1x128x256xbf16, #tpu.memory_space<vmem>>, vector<1x128x256xbf16>,
    return
  }
  func.func @transform_0(%arg0: i32, %arg1: i32, %arg2: i32) -> (i32, i32, i32) {
    %c0_i32 = arith.constant 0 : i32
    %c0_i32_0 = arith.constant 0 : i32
    return %arg0, %arg1, %c0_i32 : i32, i32, i32
  }
  func.func @transform_1(%arg0: i32, %arg1: i32, %arg2: i32) -> (i32, i32, i32) {
    %c0_i32 = arith.constant 0 : i32
    %c0_i32_0 = arith.constant 0 : i32
    return %arg0, %c0_i32, %arg2 : i32, i32, i32
  }
  func.func @transform_2(%arg0: i32, %arg1: i32, %arg2: i32) -> (i32, i32) {
    %c0_i32 = arith.constant 0 : i32
    %c0_i32_0 = arith.constant 0 : i32
    return %c0_i32, %arg2 : i32, i32
  }
  func.func @transform_3(%arg0: i32, %arg1: i32, %arg2: i32) -> (i32, i32) {
    %c0_i32 = arith.constant 0 : i32
    %c0_i32_0 = arith.constant 0 : i32
    return %c0_i32, %arg2 : i32, i32
  }
  func.func @transform_4(%arg0: i32, %arg1: i32, %arg2: i32) -> (i32, i32, i32) {
    %c0_i32 = arith.constant 0 : i32
    return %arg0, %arg1, %arg2 : i32, i32, i32
  }
}

module attributes {stable_mosaic.version = 11 : i64} {
  func.func @_fused_matmul_bn_act_kernel(%arg0: i32, %arg1: i32, %arg2: i32, %arg3: memref<1x256x1024xbf16, #tpu.memory_space<vmem>>, %arg4: memref<1x1024x128xbf16, #tpu.memory_space<vmem>>, %arg5: memref<1x128xf32, #tpu.memory_space<vmem>>, %arg6: memref<1x128xf32, #tpu.memory_space<vmem>>, %arg7: memref<1x256x128xbf16, #tpu.memory_space<vmem>>) attributes {dimension_semantics = [#tpu.dimension_semantics<parallel>, #tpu.dimension_semantics<parallel>, #tpu.dimension_semantics<parallel>], iteration_bounds = array<i64: 4, 2, 1>, scalar_prefetch = 0 : i64, scratch_operands = 0 : i64, tpu.core_type = #tpu.core_type<tc>, window_params = [{transform_indices = @transform_0, window_bounds = array<i64: 1, 256, 1024>}, {transform_indices = @transform_1, window_bounds = array<i64: 1, 1024, 128>}, {transform_indices = @transform_2, window_bounds = array<i64: 1, 128>}, {transform_indices = @transform_3, window_bounds = array<i64: 1, 128>}, {transform_indices = @transform_4, window_bounds = array<i64: 1, 256, 128>}]} {
    %c0 = arith.constant 0 : index
    %c0_0 = arith.constant 0 : index
    %c0_1 = arith.constant 0 : index
    %0 = vector.load %arg3[%c0, %c0_0, %c0_1] : memref<1x256x1024xbf16, #tpu.memory_space<vmem>>, vector<1x256x1024xbf16>
    %1 = vector.shape_cast %0 : vector<1x256x1024xbf16> to vector<256x1024xbf16>
    %c0_2 = arith.constant 0 : index
    %c0_3 = arith.constant 0 : index
    %c0_4 = arith.constant 0 : index
    %2 = vector.load %arg4[%c0_2, %c0_3, %c0_4] : memref<1x1024x128xbf16, #tpu.memory_space<vmem>>, vector<1x1024x128xbf16>
    %3 = vector.shape_cast %2 : vector<1x1024x128xbf16> to vector<1024x128xbf16>
    %cst = arith.constant dense<0.000000e+00> : vector<256x128xf32>
    %4 = tpu.matmul %1, %3, %cst {dimension_numbers = #tpu.dot_dimension_numbers<[1], [0], [0], [1], [0, 0, 1, 1], [], []>} : vector<256x1024xbf16>, vector<1024x128xbf16>, vector<256x128xf32> -> vector<256x128xf32>
    %c0_5 = arith.constant 0 : index
    %c0_6 = arith.constant 0 : index
    %5 = vector.load %arg5[%c0_5, %c0_6] : memref<1x128xf32, #tpu.memory_space<vmem>>, vector<1x128xf32>
    %6 = vector.broadcast %5 : vector<1x128xf32> to vector<256x128xf32>
    %7 = arith.mulf %4, %6 : vector<256x128xf32>
    %c0_7 = arith.constant 0 : index
    %c0_8 = arith.constant 0 : index
    %8 = vector.load %arg6[%c0_7, %c0_8] : memref<1x128xf32, #tpu.memory_space<vmem>>, vector<1x128xf32>
    %9 = vector.broadcast %8 : vector<1x128xf32> to vector<256x128xf32>
    %10 = arith.addf %7, %9 : vector<256x128xf32>
    %cst_9 = arith.constant 0.000000e+00 : f32
    %11 = vector.broadcast %cst_9 : f32 to vector<256x128xf32>
    %12 = arith.maximumf %10, %11 : vector<256x128xf32>
    %13 = arith.truncf %12 : vector<256x128xf32> to vector<256x128xbf16>
    %c0_10 = arith.constant 0 : index
    %c0_11 = arith.constant 0 : index
    %c0_12 = arith.constant 0 : index
    %14 = vector.load %arg7[%c0_10, %c0_11, %c0_12] : memref<1x256x128xbf16, #tpu.memory_space<vmem>>, vector<1x256x128xbf16>
    %15 = vector.shape_cast %14 : vector<1x256x128xbf16> to vector<256x128xbf16>
    %16 = vector.shape_cast %13 : vector<256x128xbf16> to vector<1x256x128xbf16>
    tpu.vector_store %arg7[%c0_10, %c0_11, %c0_12], %16 {strides = array<i32>} : memref<1x256x128xbf16, #tpu.memory_space<vmem>>, vector<1x256x128xbf16>,
    return
  }
  func.func @transform_0(%arg0: i32, %arg1: i32, %arg2: i32) -> (i32, i32, i32) {
    %c0_i32 = arith.constant 0 : i32
    %c0_i32_0 = arith.constant 0 : i32
    return %arg0, %arg1, %c0_i32 : i32, i32, i32
  }
  func.func @transform_1(%arg0: i32, %arg1: i32, %arg2: i32) -> (i32, i32, i32) {
    %c0_i32 = arith.constant 0 : i32
    %c0_i32_0 = arith.constant 0 : i32
    return %arg0, %c0_i32, %arg2 : i32, i32, i32
  }
  func.func @transform_2(%arg0: i32, %arg1: i32, %arg2: i32) -> (i32, i32) {
    %c0_i32 = arith.constant 0 : i32
    %c0_i32_0 = arith.constant 0 : i32
    return %c0_i32, %arg2 : i32, i32
  }
  func.func @transform_3(%arg0: i32, %arg1: i32, %arg2: i32) -> (i32, i32) {
    %c0_i32 = arith.constant 0 : i32
    %c0_i32_0 = arith.constant 0 : i32
    return %c0_i32, %arg2 : i32, i32
  }
  func.func @transform_4(%arg0: i32, %arg1: i32, %arg2: i32) -> (i32, i32, i32) {
    %c0_i32 = arith.constant 0 : i32
    return %arg0, %arg1, %arg2 : i32, i32, i32
  }
}

module attributes {stable_mosaic.version = 11 : i64} {
  func.func @_fused_matmul_bn_act_kernel(%arg0: i32, %arg1: i32, %arg2: i32, %arg3: memref<1x256x512xbf16, #tpu.memory_space<vmem>>, %arg4: memref<1x512x128xbf16, #tpu.memory_space<vmem>>, %arg5: memref<1x128xf32, #tpu.memory_space<vmem>>, %arg6: memref<1x128xf32, #tpu.memory_space<vmem>>, %arg7: memref<1x256x128xbf16, #tpu.memory_space<vmem>>) attributes {dimension_semantics = [#tpu.dimension_semantics<parallel>, #tpu.dimension_semantics<parallel>, #tpu.dimension_semantics<parallel>], iteration_bounds = array<i64: 4, 8, 1>, scalar_prefetch = 0 : i64, scratch_operands = 0 : i64, tpu.core_type = #tpu.core_type<tc>, window_params = [{transform_indices = @transform_0, window_bounds = array<i64: 1, 256, 512>}, {transform_indices = @transform_1, window_bounds = array<i64: 1, 512, 128>}, {transform_indices = @transform_2, window_bounds = array<i64: 1, 128>}, {transform_indices = @transform_3, window_bounds = array<i64: 1, 128>}, {transform_indices = @transform_4, window_bounds = array<i64: 1, 256, 128>}]} {
    %c0 = arith.constant 0 : index
    %c0_0 = arith.constant 0 : index
    %c0_1 = arith.constant 0 : index
    %0 = vector.load %arg3[%c0, %c0_0, %c0_1] : memref<1x256x512xbf16, #tpu.memory_space<vmem>>, vector<1x256x512xbf16>
    %1 = vector.shape_cast %0 : vector<1x256x512xbf16> to vector<256x512xbf16>
    %c0_2 = arith.constant 0 : index
    %c0_3 = arith.constant 0 : index
    %c0_4 = arith.constant 0 : index
    %2 = vector.load %arg4[%c0_2, %c0_3, %c0_4] : memref<1x512x128xbf16, #tpu.memory_space<vmem>>, vector<1x512x128xbf16>
    %3 = vector.shape_cast %2 : vector<1x512x128xbf16> to vector<512x128xbf16>
    %cst = arith.constant dense<0.000000e+00> : vector<256x128xf32>
    %4 = tpu.matmul %1, %3, %cst {dimension_numbers = #tpu.dot_dimension_numbers<[1], [0], [0], [1], [0, 0, 1, 1], [], []>} : vector<256x512xbf16>, vector<512x128xbf16>, vector<256x128xf32> -> vector<256x128xf32>
    %c0_5 = arith.constant 0 : index
    %c0_6 = arith.constant 0 : index
    %5 = vector.load %arg5[%c0_5, %c0_6] : memref<1x128xf32, #tpu.memory_space<vmem>>, vector<1x128xf32>
    %6 = vector.broadcast %5 : vector<1x128xf32> to vector<256x128xf32>
    %7 = arith.mulf %4, %6 : vector<256x128xf32>
    %c0_7 = arith.constant 0 : index
    %c0_8 = arith.constant 0 : index
    %8 = vector.load %arg6[%c0_7, %c0_8] : memref<1x128xf32, #tpu.memory_space<vmem>>, vector<1x128xf32>
    %9 = vector.broadcast %8 : vector<1x128xf32> to vector<256x128xf32>
    %10 = arith.addf %7, %9 : vector<256x128xf32>
    %11 = math.tanh %10 : vector<256x128xf32>
    %12 = arith.truncf %11 : vector<256x128xf32> to vector<256x128xbf16>
    %c0_9 = arith.constant 0 : index
    %c0_10 = arith.constant 0 : index
    %c0_11 = arith.constant 0 : index
    %13 = vector.load %arg7[%c0_9, %c0_10, %c0_11] : memref<1x256x128xbf16, #tpu.memory_space<vmem>>, vector<1x256x128xbf16>
    %14 = vector.shape_cast %13 : vector<1x256x128xbf16> to vector<256x128xbf16>
    %15 = vector.shape_cast %12 : vector<256x128xbf16> to vector<1x256x128xbf16>
    tpu.vector_store %arg7[%c0_9, %c0_10, %c0_11], %15 {strides = array<i32>} : memref<1x256x128xbf16, #tpu.memory_space<vmem>>, vector<1x256x128xbf16>,
    return
  }
  func.func @transform_0(%arg0: i32, %arg1: i32, %arg2: i32) -> (i32, i32, i32) {
    %c0_i32 = arith.constant 0 : i32
    %c0_i32_0 = arith.constant 0 : i32
    return %arg0, %arg1, %c0_i32 : i32, i32, i32
  }
  func.func @transform_1(%arg0: i32, %arg1: i32, %arg2: i32) -> (i32, i32, i32) {
    %c0_i32 = arith.constant 0 : i32
    %c0_i32_0 = arith.constant 0 : i32
    return %arg0, %c0_i32, %arg2 : i32, i32, i32
  }
  func.func @transform_2(%arg0: i32, %arg1: i32, %arg2: i32) -> (i32, i32) {
    %c0_i32 = arith.constant 0 : i32
    %c0_i32_0 = arith.constant 0 : i32
    return %c0_i32, %arg2 : i32, i32
  }
  func.func @transform_3(%arg0: i32, %arg1: i32, %arg2: i32) -> (i32, i32) {
    %c0_i32 = arith.constant 0 : i32
    %c0_i32_0 = arith.constant 0 : i32
    return %c0_i32, %arg2 : i32, i32
  }
  func.func @transform_4(%arg0: i32, %arg1: i32, %arg2: i32) -> (i32, i32, i32) {
    %c0_i32 = arith.constant 0 : i32
    return %arg0, %arg1, %arg2 : i32, i32, i32
  }
}

</mosaic_0001>

<bundles_post_ra>
// kernel: generator_forward.5
= control target key start
LH: loop header
LB: loop body
LE: loop exit
PB: predicated region body
PF: predicated region fallthrough
CT: control target
= control target key end

     0   :  { %s928_s15 = smov 0   ;;  %s930_s16 = smov 0   ;;  %s1032_s0 = inlined_call_operand.vmem [shape: bf16[1,16,128], index: 0, kind: input, shape index: {}]   ;;  %s1033_s1 = inlined_call_operand.vmem [shape: bf16[1,128,16384], index: 1, kind: input, shape index: {}]   ;;  %s1034_s2 = inlined_call_operand.vmem [shape: f32[1,16384], index: 2, kind: input, shape index: {}]   ;;  %s1035_s3 = inlined_call_operand.vmem [shape: f32[1,16384], index: 3, kind: input, shape index: {}]   ;;  %s1036_s4 = inlined_call_operand.vmem [shape: bf16[1,16,16384], index: 4, kind: output, shape index: {}]  }
   0x1   :  { %s932_s17 = smov 0   ;;  %s934_s18 = smov 0  }
   0x2   :  { %s936_s19 = smov 0  }
   0x3 LB: > { %s26_s20 = sadd.s32 1, %s896_s18  ;;  %s755_s21 = sadd.s32 4294967295, %s900_s19   ;;  %s900_s19 = sphi %s936_s19, %s14_s19   ;;  %s896_s18 = sphi %s934_s18, %s1041_s18   ;;  %s892_s17 = sphi %s932_s17, %s1040_s17   ;;  %s888_s16 = sphi %s930_s16, %s1039_s16   ;;  %s884_s15 = sphi %s928_s15, %s1038_s15  }
   0x4   : > { %p27_p0 = scmp.ge.s32.totalorder %s26_s20, 64  ;;  %p77_p1 = scmp.ne.s32.totalorder %s888_s16, %s884_s15 }
   0x5   : > { %p78_p2 = scmp.eq.s32.totalorder %s900_s19, 0  ;;  %p163_p4 = scmp.eq.s32.totalorder %s755_s21, 63 }
   0x6   : > { %s1043_s20 = smov (%p27_p0, %s26_s20), 0  ;;  %s70_s23 = sadd.s32 1, %s888_s16 }
   0x7   : > { %p79_p3 = por %p78_p2, %p77_p1  ;;  %s66_s22 = ssub.s32 %s896_s18, %s1043_s20 }
   0x8   : > { %p68_p5 = scmp.eq.s32.totalorder %s66_s22, 0  ;;  %p963_p6 = por %p163_p4, %p77_p1 }
   0x9   : > { %p759_p7 = scmp.ge.s32.totalorder %s900_s19, 64 }
   0xa   : > { %s968_s25 = scalar_select %p68_p5, %s888_s16, %s70_s23  }
   0xb   : > { %198 = sbr.rel (%p759_p7) target bundleno = 38 (0x26), region = 20 }
  0x12   : > { %201 = sbr.rel (!%p79_p3) target bundleno = 38 (0x26), region = 24  ;;  %s203_s26 = sand.u32 (%p79_p3), 1, %s888_s16  }
  0x13   : > { %s792_s27 = sshll.u32 (%p79_p3), %s896_s18, 3  ;;  %s760_s28 = sshll.u32 (%p79_p3), %s203_s26, 7 }
  0x14   : > { %s976_s5 = scalar_lea.vmem (%p79_p3), %s1033_s1, %s792_s27  ;;  %s205_s6 = scalar_lea.vmem (%p79_p3), [#allocation2], %s760_s28 }
  0x15   : > { %v268_v0 = vld [vmem:[%s976_s5] sm:$0xff] (%p79_p3) }
  0x16   : > { %v270_v1 = vld [vmem:[%s976_s5 + $0x200] sm:$0xff] (%p79_p3)  ;;  %269 = vst [vmem:[%s205_s6] sm:$0xff] (%p79_p3), %v268_v0 }
  0x17   : > { %v272_v2 = vld [vmem:[%s976_s5 + $0x400] sm:$0xff] (%p79_p3)  ;;  %271 = vst [vmem:[%s205_s6 + $0x8] sm:$0xff] (%p79_p3), %v270_v1 }
  0x18   : > { %273 = vst [vmem:[%s205_s6 + $0x10] sm:$0xff] (%p79_p3), %v272_v2  ;;  %v274_v3 = vld [vmem:[%s976_s5 + $0x600] sm:$0xff] (%p79_p3) }
  0x19   : > { %v276_v4 = vld [vmem:[%s976_s5 + $0x800] sm:$0xff]  ;;  %275 = vst [vmem:[%s205_s6 + $0x18] sm:$0xff] %v274_v3 }
  0x1a   : > { %v278_v5 = vld [vmem:[%s976_s5 + $0xa00] sm:$0xff]  ;;  %277 = vst [vmem:[%s205_s6 + $0x20] sm:$0xff] %v276_v4 }
  0x1b   : > { %279 = vst [vmem:[%s205_s6 + $0x28] sm:$0xff] %v278_v5  ;;  %v280_v6 = vld [vmem:[%s976_s5 + $0xc00] sm:$0xff] }
  0x1c   : > { %v282_v7 = vld [vmem:[%s976_s5 + $0xe00] sm:$0xff]  ;;  %281 = vst [vmem:[%s205_s6 + $0x30] sm:$0xff] %v280_v6 }
  0x1d   : > { %v284_v8 = vld [vmem:[%s976_s5 + $0x1000] sm:$0xff]  ;;  %283 = vst [vmem:[%s205_s6 + $0x38] sm:$0xff] %v282_v7 }
  0x1e   : > { %285 = vst [vmem:[%s205_s6 + $0x40] sm:$0xff] %v284_v8  ;;  %v286_v9 = vld [vmem:[%s976_s5 + $0x1200] sm:$0xff] }
  0x1f   : > { %v288_v10 = vld [vmem:[%s976_s5 + $0x1400] sm:$0xff]  ;;  %287 = vst [vmem:[%s205_s6 + $0x48] sm:$0xff] %v286_v9 }
  0x20   : > { %v290_v11 = vld [vmem:[%s976_s5 + $0x1600] sm:$0xff]  ;;  %289 = vst [vmem:[%s205_s6 + $0x50] sm:$0xff] %v288_v10 }
  0x21   : > { %291 = vst [vmem:[%s205_s6 + $0x58] sm:$0xff] %v290_v11  ;;  %v292_v12 = vld [vmem:[%s976_s5 + $0x1800] sm:$0xff] }
  0x22   : > { %v294_v13 = vld [vmem:[%s976_s5 + $0x1a00] sm:$0xff]  ;;  %293 = vst [vmem:[%s205_s6 + $0x60] sm:$0xff] %v292_v12 }
  0x23   : > { %v296_v14 = vld [vmem:[%s976_s5 + $0x1c00] sm:$0xff]  ;;  %295 = vst [vmem:[%s205_s6 + $0x68] sm:$0xff] %v294_v13 }
  0x24   : > { %297 = vst [vmem:[%s205_s6 + $0x70] sm:$0xff] %v296_v14  ;;  %v298_v15 = vld [vmem:[%s976_s5 + $0x1e00] sm:$0xff] }
  0x25   : > { %299 = vst [vmem:[%s205_s6 + $0x78] sm:$0xff] %v298_v15 }
  0x26 PF: > { %p763_p8 = scmp.ge.s32.totalorder %s900_s19, 1  ;;  %p320_p9 = scmp.lt.s32.totalorder %s900_s19, 65 }
  0x28   : > { %p321_p10 = pnand %p763_p8, %p320_p9 }
  0x29   : > { %s327_s7 = sand.u32 (!%p321_p10), 1, %s884_s15   ;;  %v902_v16 = vmov (!%p321_p10), 0   ;;  %v861_v33 = vld [vmem:[%s1032_s0] sm:$0xff] (!%p321_p10)   ;;  %s766_s12 = sshll.u32 (!%p321_p10), %s892_s17, 1  ;;  %v541_v34 = vlaneseq (!%p321_p10) }
  0x2a   : > { %324 = sbr.rel (%p321_p10) target bundleno = 309 (0x135), region = 70  ;;  %s764_s8 = sshll.u32 (!%p321_p10), %s327_s7, 7  ;;  %528 = vmatprep.mubr.bf16.mxu0 (!%p321_p10), %v902_v16 }
  0x2b   : > { %s329_s9 = scalar_lea.vmem (!%p321_p10), [#allocation2], %s764_s8  ;;  %p380_p11 = scmp.lt.s32.totalorder (!%p321_p10), %s766_s12, 127  ;;  %v542_v35 = vshrl.u32 (!%p321_p10), %v541_v34, 7 }
  0x2c   : > { %v837_v17 = vld [vmem:[%s329_s9 + $0x4] ss:$8 sps:$4 sm:$0xff] (!%p321_p10)   ;;  %v839_v18 = vld [vmem:[%s329_s9] ss:$8 sps:$4 sm:$0xff] (!%p321_p10)   ;;  %v840_v19 = vld [vmem:[%s329_s9 + $0x14] ss:$8 sps:$4 sm:$0xff] (!%p321_p10)  }
  0x2d   : > { %496 = vmatprep.subr.bf16.mxu0 (!%p321_p10), %v837_v17  ;;  %v842_v20 = vld [vmem:[%s329_s9 + $0x10] ss:$8 sps:$4 sm:$0xff] (!%p321_p10)   ;;  %v843_v21 = vld [vmem:[%s329_s9 + $0x24] ss:$8 sps:$4 sm:$0xff] (!%p321_p10)   ;;  %v845_v22 = vld [vmem:[%s329_s9 + $0x20] ss:$8 sps:$4 sm:$0xff] (!%p321_p10)  }
  0x2e   : > { %497 = vmatpush1.bf16.msra.mxu0 (!%p321_p10), %v839_v18  ;;  %v846_v23 = vld [vmem:[%s329_s9 + $0x34] ss:$8 sps:$4 sm:$0xff] (!%p321_p10)   ;;  %v848_v24 = vld [vmem:[%s329_s9 + $0x30] ss:$8 sps:$4 sm:$0xff] (!%p321_p10)   ;;  %v849_v25 = vld [vmem:[%s329_s9 + $0x44] ss:$8 sps:$4 sm:$0xff] (!%p321_p10)  }
  0x2f   : > { %498 = vmatprep.subr.bf16.mxu0 (!%p321_p10), %v840_v19  ;;  %v851_v26 = vld [vmem:[%s329_s9 + $0x40] ss:$8 sps:$4 sm:$0xff] (!%p321_p10)   ;;  %v852_v27 = vld [vmem:[%s329_s9 + $0x54] ss:$8 sps:$4 sm:$0xff] (!%p321_p10)   ;;  %v854_v28 = vld [vmem:[%s329_s9 + $0x50] ss:$8 sps:$4 sm:$0xff] (!%p321_p10)  }
  0x30   : > { %v855_v29 = vld [vmem:[%s329_s9 + $0x64] ss:$8 sps:$4 sm:$0xff] (!%p321_p10)   ;;  %v857_v30 = vld [vmem:[%s329_s9 + $0x60] ss:$8 sps:$4 sm:$0xff] (!%p321_p10)   ;;  %v858_v31 = vld [vmem:[%s329_s9 + $0x74] ss:$8 sps:$4 sm:$0xff] (!%p321_p10)  }
  0x31   : > { %v860_v32 = vld [vmem:[%s329_s9 + $0x70] ss:$8 sps:$4 sm:$0xff]   ;;  %s1045_s12 = smov (!%p380_p11, %s766_s12), 127  ;;  %v543_v36 = vsub.s32 0, %v542_v35  ;;  %v547_v38 = vsub.s32 1, %v542_v35  ;;  %s765_s27 = sshll.u32 %s327_s7, 4 }
  0x32   : > { %499 = vmatpush1.bf16.msra.mxu0 %v842_v20  ;;  %s382_s21 = scalar_lea.vmem %s1034_s2, %s1045_s12  ;;  %s387_s26 = scalar_lea.vmem %s1035_s3, %s1045_s12 }
  0x33   : > { %500 = vmatprep.subr.bf16.mxu0 %v843_v21  ;;  %v539_v37 = vld [vmem:[%s382_s21] sm:$0x3]  ;;  %s367_s28 = scalar_lea.vmem [#allocation3], %s765_s27  ;;  %s795_s29 = sshll.u32 (%p963_p6), %s892_s17, 3 }
  0x34   : > { %v555_v39 = vld [vmem:[%s387_s26] sm:$0x3]  ;;  %v544_v40 = vrot.slane %v539_v37, %v543_v36  ;;  %v548_v41 = vrot.slane %v539_v37, %v547_v38  ;;  %s603_s5 = scalar_lea.vmem (%p963_p6), %s1036_s4, %s795_s29 }
  0x35   : > { %v560_v42 = vrot.slane %v555_v39, %v543_v36  ;;  %v564_v44 = vrot.slane %v555_v39, %v547_v38 }
  0x36   : > { %501 = vmatpush1.bf16.msra.mxu0 %v845_v22 }
  0x37   : > { %502 = vmatprep.subr.bf16.mxu0 %v846_v23 }
  0x3a   : > { %503 = vmatpush1.bf16.msra.mxu0 %v848_v24 }
  0x3b   : > { %504 = vmatprep.subr.bf16.mxu0 %v849_v25 }
  0x3e   : > { %505 = vmatpush1.bf16.msra.mxu0 %v851_v26 }
  0x3f   : > { %506 = vmatprep.subr.bf16.mxu0 %v852_v27 }
  0x42   : > { %507 = vmatpush1.bf16.msra.mxu0 %v854_v28 }
  0x43   : > { %508 = vmatprep.subr.bf16.mxu0 %v855_v29 }
  0x46   : > { %509 = vmatpush1.bf16.msra.mxu0 %v857_v30 }
  0x47   : > { %510 = vmatprep.subr.bf16.mxu0 %v858_v31 }
  0x4a   : > { %511 = vmatpush1.bf16.msra.mxu0 %v860_v32 }
  0x4d   : > { %529 = vmatmul.mubr.bf16.vlgmr.msra.gmra.mrb[0].mxu0 %v861_v33 }
 0x120   : > { %v530_v43 = vpop.f32.mrb[0].mxu0 }
 0x121   : > { %v551_v45 = vmul.f32 %v544_v40, %v530_v43  ;;  %v532_v46 = vpop.f32.mrb[1].mxu0 }
 0x122   : > { %v552_v47 = vmul.f32 %v548_v41, %v532_v46  ;;  %v534_v48 = vpop.f32.mrb[2].mxu0 }
 0x123   : > { %v567_v49 = vadd.f32 %v560_v42, %v551_v45  ;;  %v553_v50 = vmul.f32 %v544_v40, %v534_v48  ;;  %v536_v51 = vpop.f32.mrb[3].mxu0 }
 0x124   : > { %v568_v52 = vadd.f32 %v564_v44, %v552_v47  ;;  %v554_v53 = vmul.f32 %v548_v41, %v536_v51 }
 0x125   : > { %v571_v54 = vmax.f32 %v567_v49, 0.0  ;;  %v569_v55 = vadd.f32 %v560_v42, %v553_v50 }
 0x126   : > { %v572_v56 = vmax.f32 %v568_v52, 0.0  ;;  %v570_v57 = vadd.f32 %v564_v44, %v554_v53  ;;  %595 = sbr.rel (!%p963_p6) target bundleno = 309 (0x135), region = 78 }
 0x127   : > { %v573_v58 = vmax.f32 %v569_v55, 0.0 }
 0x128   : > { %v793_v59 = vpack.c.bf16 %v572_v56, %v571_v54  ;;  %v574_v60 = vmax.f32 %v570_v57, 0.0 }
 0x12a   : > { %587 = vst [vmem:[%s367_s28] sm:$0xff] %v793_v59  ;;  %v794_v61 = vpack.c.bf16 %v574_v60, %v573_v58 }
 0x12c   : > { %588 = vst [vmem:[%s367_s28 + $0x8] sm:$0xff] %v794_v61 }
 0x131   : > { %v633_v62 = vld [vmem:[%s367_s28] sm:$0xff] }
 0x132   : > { %634 = vst [vmem:[%s603_s5] sm:$0xff] %v633_v62 }
 0x133   : > { %v635_v63 = vld [vmem:[%s367_s28 + $0x8] sm:$0xff] }
 0x134   : > { %636 = vst [vmem:[%s603_s5 + $0x200] sm:$0xff] %v635_v63 }
 0x135 PF: > { %s14_s19 = sadd.s32 1, %s900_s19   ;;  %s1038_s15 = smov %s888_s16 }
 0x136   : > { %p11_p12 = scmp.ge.s32.totalorder %s14_s19, 66   ;;  %s1039_s16 = smov %s968_s25 }
 0x137   : > { %s1040_s17 = smov %s896_s18  ;;  %s1041_s18 = smov %s1043_s20 }
 0x138   :  { %13 = sbr.rel (!%p11_p12) target bundleno = 3 (0x3), region = 156 }

// kernel: squeeze.1
= control target key start
LH: loop header
LB: loop body
LE: loop exit
PB: predicated region body
PF: predicated region fallthrough
CT: control target
= control target key end

     0   :  { %s4293_s0 = inlined_call_operand.vmem [shape: bf16[1,2,16384], index: 0, kind: input, shape index: {}]   ;;  %s4294_s1 = inlined_call_operand.vmem [shape: bf16[2,4,4,1024], index: 1, kind: output, shape index: {}]  }
   0x1   :  { %v3451_v0 = vld [vmem:[%s4293_s0 + $0x7f] sm:$0x1]  ;;  %v3452_v1 = vld [vmem:[%s4293_s0 + $0x7e] sm:$0x1]  ;;  %v3453_v2 = vld [vmem:[%s4293_s0 + $0x7d] sm:$0x1] }
   0x2   :  { %v17_v3 = vunpack.c.l.bf16 %v3451_v0  ;;  %v33_v4 = vunpack.c.l.bf16 %v3452_v1  ;;  %v49_v5 = vunpack.c.l.bf16 %v3453_v2  ;;  %v3454_v6 = vld [vmem:[%s4293_s0 + $0x7c] sm:$0x1]  ;;  %v3455_v7 = vld [vmem:[%s4293_s0 + $0x7b] sm:$0x1]  ;;  %v3456_v8 = vld [vmem:[%s4293_s0 + $0x7a] sm:$0x1] }
   0x3   :  { %v65_v9 = vunpack.c.l.bf16 %v3454_v6  ;;  %v81_v10 = vunpack.c.l.bf16 %v3455_v7  ;;  %v97_v11 = vunpack.c.l.bf16 %v3456_v8  ;;  %v3457_v12 = vld [vmem:[%s4293_s0 + $0x79] sm:$0x1]  ;;  %v3458_v13 = vld [vmem:[%s4293_s0 + $0x78] sm:$0x1]  ;;  %v3459_v14 = vld [vmem:[%s4293_s0 + $0x77] sm:$0x1] }
   0x4   :  { %20 = vst [vmem:[#allocation1 + $0x3f8] sm:$0x3] %v17_v3  ;;  %36 = vst [vmem:[#allocation1 + $0x3f0] sm:$0x3] %v33_v4  ;;  %v113_v15 = vunpack.c.l.bf16 %v3457_v12  ;;  %v129_v16 = vunpack.c.l.bf16 %v3458_v13  ;;  %v145_v17 = vunpack.c.l.bf16 %v3459_v14  ;;  %v3460_v18 = vld [vmem:[%s4293_s0 + $0x76] sm:$0x1] }
   0x5   :  { %52 = vst [vmem:[#allocation1 + $0x3e8] sm:$0x3] %v49_v5  ;;  %v3461_v19 = vld [vmem:[%s4293_s0 + $0x75] sm:$0x1]  ;;  %v3462_v20 = vld [vmem:[%s4293_s0 + $0x74] sm:$0x1]  ;;  %v161_v21 = vunpack.c.l.bf16 %v3460_v18 }
   0x6   :  { %68 = vst [vmem:[#allocation1 + $0x3e0] sm:$0x3] %v65_v9  ;;  %84 = vst [vmem:[#allocation1 + $0x3d8] sm:$0x3] %v81_v10  ;;  %v177_v22 = vunpack.c.l.bf16 %v3461_v19  ;;  %v193_v23 = vunpack.c.l.bf16 %v3462_v20  ;;  %v3463_v24 = vld [vmem:[%s4293_s0 + $0x73] sm:$0x1] }
   0x7   :  { %100 = vst [vmem:[#allocation1 + $0x3d0] sm:$0x3] %v97_v11  ;;  %v3464_v25 = vld [vmem:[%s4293_s0 + $0x72] sm:$0x1]  ;;  %v3465_v26 = vld [vmem:[%s4293_s0 + $0x71] sm:$0x1]  ;;  %v209_v27 = vunpack.c.l.bf16 %v3463_v24 }
   0x8   :  { %116 = vst [vmem:[#allocation1 + $0x3c8] sm:$0x3] %v113_v15  ;;  %132 = vst [vmem:[#allocation1 + $0x3c0] sm:$0x3] %v129_v16  ;;  %v225_v28 = vunpack.c.l.bf16 %v3464_v25  ;;  %v241_v29 = vunpack.c.l.bf16 %v3465_v26  ;;  %v3466_v30 = vld [vmem:[%s4293_s0 + $0x70] sm:$0x1] }
   0x9   :  { %148 = vst [vmem:[#allocation1 + $0x3b8] sm:$0x3] %v145_v17  ;;  %v3467_v31 = vld [vmem:[%s4293_s0 + $0x6f] sm:$0x1]  ;;  %v3468_v32 = vld [vmem:[%s4293_s0 + $0x6e] sm:$0x1]  ;;  %v257_v33 = vunpack.c.l.bf16 %v3466_v30 }
   0xa   :  { %164 = vst [vmem:[#allocation1 + $0x3b0] sm:$0x3] %v161_v21  ;;  %180 = vst [vmem:[#allocation1 + $0x3a8] sm:$0x3] %v177_v22  ;;  %v273_v34 = vunpack.c.l.bf16 %v3467_v31  ;;  %v289_v35 = vunpack.c.l.bf16 %v3468_v32  ;;  %v3469_v36 = vld [vmem:[%s4293_s0 + $0x6d] sm:$0x1] }
   0xb   :  { %196 = vst [vmem:[#allocation1 + $0x3a0] sm:$0x3] %v193_v23  ;;  %v3470_v37 = vld [vmem:[%s4293_s0 + $0x6c] sm:$0x1]  ;;  %v3471_v38 = vld [vmem:[%s4293_s0 + $0x6b] sm:$0x1]  ;;  %v305_v39 = vunpack.c.l.bf16 %v3469_v36 }
   0xc   :  { %212 = vst [vmem:[#allocation1 + $0x398] sm:$0x3] %v209_v27  ;;  %228 = vst [vmem:[#allocation1 + $0x390] sm:$0x3] %v225_v28  ;;  %v321_v40 = vunpack.c.l.bf16 %v3470_v37  ;;  %v337_v41 = vunpack.c.l.bf16 %v3471_v38  ;;  %v3472_v42 = vld [vmem:[%s4293_s0 + $0x6a] sm:$0x1] }
   0xd   :  { %244 = vst [vmem:[#allocation1 + $0x388] sm:$0x3] %v241_v29  ;;  %v3473_v43 = vld [vmem:[%s4293_s0 + $0x69] sm:$0x1]  ;;  %v3474_v44 = vld [vmem:[%s4293_s0 + $0x68] sm:$0x1]  ;;  %v353_v45 = vunpack.c.l.bf16 %v3472_v42 }
   0xe   :  { %260 = vst [vmem:[#allocation1 + $0x380] sm:$0x3] %v257_v33  ;;  %276 = vst [vmem:[#allocation1 + $0x378] sm:$0x3] %v273_v34  ;;  %v369_v46 = vunpack.c.l.bf16 %v3473_v43  ;;  %v385_v47 = vunpack.c.l.bf16 %v3474_v44  ;;  %v3475_v48 = vld [vmem:[%s4293_s0 + $0x67] sm:$0x1] }
   0xf   :  { %292 = vst [vmem:[#allocation1 + $0x370] sm:$0x3] %v289_v35  ;;  %v3476_v49 = vld [vmem:[%s4293_s0 + $0x66] sm:$0x1]  ;;  %v3477_v50 = vld [vmem:[%s4293_s0 + $0x65] sm:$0x1]  ;;  %v401_v51 = vunpack.c.l.bf16 %v3475_v48 }
  0x10   :  { %308 = vst [vmem:[#allocation1 + $0x368] sm:$0x3] %v305_v39  ;;  %324 = vst [vmem:[#allocation1 + $0x360] sm:$0x3] %v321_v40  ;;  %v417_v52 = vunpack.c.l.bf16 %v3476_v49  ;;  %v433_v53 = vunpack.c.l.bf16 %v3477_v50  ;;  %v3478_v54 = vld [vmem:[%s4293_s0 + $0x64] sm:$0x1] }
  0x11   :  { %340 = vst [vmem:[#allocation1 + $0x358] sm:$0x3] %v337_v41  ;;  %v3479_v55 = vld [vmem:[%s4293_s0 + $0x63] sm:$0x1]  ;;  %v3480_v56 = vld [vmem:[%s4293_s0 + $0x62] sm:$0x1]  ;;  %v449_v57 = vunpack.c.l.bf16 %v3478_v54 }
  0x12   :  { %356 = vst [vmem:[#allocation1 + $0x350] sm:$0x3] %v353_v45  ;;  %372 = vst [vmem:[#allocation1 + $0x348] sm:$0x3] %v369_v46  ;;  %v465_v58 = vunpack.c.l.bf16 %v3479_v55  ;;  %v481_v59 = vunpack.c.l.bf16 %v3480_v56  ;;  %v3481_v60 = vld [vmem:[%s4293_s0 + $0x61] sm:$0x1] }
  0x13   :  { %388 = vst [vmem:[#allocation1 + $0x340] sm:$0x3] %v385_v47  ;;  %v3482_v61 = vld [vmem:[%s4293_s0 + $0x60] sm:$0x1]  ;;  %v3483_v62 = vld [vmem:[%s4293_s0 + $0x5f] sm:$0x1]  ;;  %v497_v63 = vunpack.c.l.bf16 %v3481_v60 }
  0x14   :  { %404 = vst [vmem:[#allocation1 + $0x338] sm:$0x3] %v401_v51  ;;  %420 = vst [vmem:[#allocation1 + $0x330] sm:$0x3] %v417_v52  ;;  %v513_v0 = vunpack.c.l.bf16 %v3482_v61  ;;  %v529_v1 = vunpack.c.l.bf16 %v3483_v62  ;;  %v3484_v2 = vld [vmem:[%s4293_s0 + $0x5e] sm:$0x1] }
  0x15   :  { %436 = vst [vmem:[#allocation1 + $0x328] sm:$0x3] %v433_v53  ;;  %v3485_v3 = vld [vmem:[%s4293_s0 + $0x5d] sm:$0x1]  ;;  %v3486_v4 = vld [vmem:[%s4293_s0 + $0x5c] sm:$0x1]  ;;  %v545_v5 = vunpack.c.l.bf16 %v3484_v2 }
  0x16   :  { %452 = vst [vmem:[#allocation1 + $0x320] sm:$0x3] %v449_v57  ;;  %468 = vst [vmem:[#allocation1 + $0x318] sm:$0x3] %v465_v58  ;;  %v561_v6 = vunpack.c.l.bf16 %v3485_v3  ;;  %v577_v7 = vunpack.c.l.bf16 %v3486_v4  ;;  %v3487_v8 = vld [vmem:[%s4293_s0 + $0x5b] sm:$0x1] }
  0x17   :  { %484 = vst [vmem:[#allocation1 + $0x310] sm:$0x3] %v481_v59  ;;  %v3488_v9 = vld [vmem:[%s4293_s0 + $0x5a] sm:$0x1]  ;;  %v3489_v10 = vld [vmem:[%s4293_s0 + $0x59] sm:$0x1]  ;;  %v593_v11 = vunpack.c.l.bf16 %v3487_v8 }
  0x18   :  { %500 = vst [vmem:[#allocation1 + $0x308] sm:$0x3] %v497_v63  ;;  %516 = vst [vmem:[#allocation1 + $0x300] sm:$0x3] %v513_v0  ;;  %v609_v12 = vunpack.c.l.bf16 %v3488_v9  ;;  %v625_v13 = vunpack.c.l.bf16 %v3489_v10  ;;  %v3490_v14 = vld [vmem:[%s4293_s0 + $0x58] sm:$0x1] }
  0x19   :  { %532 = vst [vmem:[#allocation1 + $0x2f8] sm:$0x3] %v529_v1  ;;  %v3491_v15 = vld [vmem:[%s4293_s0 + $0x57] sm:$0x1]  ;;  %v3492_v16 = vld [vmem:[%s4293_s0 + $0x56] sm:$0x1]  ;;  %v641_v17 = vunpack.c.l.bf16 %v3490_v14 }
  0x1a   :  { %548 = vst [vmem:[#allocation1 + $0x2f0] sm:$0x3] %v545_v5  ;;  %564 = vst [vmem:[#allocation1 + $0x2e8] sm:$0x3] %v561_v6  ;;  %v657_v18 = vunpack.c.l.bf16 %v3491_v15  ;;  %v673_v19 = vunpack.c.l.bf16 %v3492_v16  ;;  %v3493_v20 = vld [vmem:[%s4293_s0 + $0x55] sm:$0x1] }
  0x1b   :  { %580 = vst [vmem:[#allocation1 + $0x2e0] sm:$0x3] %v577_v7  ;;  %v3494_v21 = vld [vmem:[%s4293_s0 + $0x54] sm:$0x1]  ;;  %v3495_v22 = vld [vmem:[%s4293_s0 + $0x53] sm:$0x1]  ;;  %v689_v23 = vunpack.c.l.bf16 %v3493_v20 }
  0x1c   :  { %596 = vst [vmem:[#allocation1 + $0x2d8] sm:$0x3] %v593_v11  ;;  %612 = vst [vmem:[#allocation1 + $0x2d0] sm:$0x3] %v609_v12  ;;  %v705_v24 = vunpack.c.l.bf16 %v3494_v21  ;;  %v721_v25 = vunpack.c.l.bf16 %v3495_v22  ;;  %v3496_v26 = vld [vmem:[%s4293_s0 + $0x52] sm:$0x1] }
  0x1d   :  { %628 = vst [vmem:[#allocation1 + $0x2c8] sm:$0x3] %v625_v13  ;;  %v3497_v27 = vld [vmem:[%s4293_s0 + $0x51] sm:$0x1]  ;;  %v3498_v28 = vld [vmem:[%s4293_s0 + $0x50] sm:$0x1]  ;;  %v737_v29 = vunpack.c.l.bf16 %v3496_v26 }
  0x1e   :  { %644 = vst [vmem:[#allocation1 + $0x2c0] sm:$0x3] %v641_v17  ;;  %660 = vst [vmem:[#allocation1 + $0x2b8] sm:$0x3] %v657_v18  ;;  %v753_v30 = vunpack.c.l.bf16 %v3497_v27  ;;  %v769_v31 = vunpack.c.l.bf16 %v3498_v28  ;;  %v3499_v32 = vld [vmem:[%s4293_s0 + $0x4f] sm:$0x1] }
  0x1f   :  { %676 = vst [vmem:[#allocation1 + $0x2b0] sm:$0x3] %v673_v19  ;;  %v3500_v33 = vld [vmem:[%s4293_s0 + $0x4e] sm:$0x1]  ;;  %v3501_v34 = vld [vmem:[%s4293_s0 + $0x4d] sm:$0x1]  ;;  %v785_v35 = vunpack.c.l.bf16 %v3499_v32 }
  0x20   :  { %692 = vst [vmem:[#allocation1 + $0x2a8] sm:$0x3] %v689_v23  ;;  %708 = vst [vmem:[#allocation1 + $0x2a0] sm:$0x3] %v705_v24  ;;  %v801_v36 = vunpack.c.l.bf16 %v3500_v33  ;;  %v817_v37 = vunpack.c.l.bf16 %v3501_v34  ;;  %v3502_v38 = vld [vmem:[%s4293_s0 + $0x4c] sm:$0x1] }
  0x21   :  { %724 = vst [vmem:[#allocation1 + $0x298] sm:$0x3] %v721_v25  ;;  %v3503_v39 = vld [vmem:[%s4293_s0 + $0x4b] sm:$0x1]  ;;  %v3504_v40 = vld [vmem:[%s4293_s0 + $0x4a] sm:$0x1]  ;;  %v833_v41 = vunpack.c.l.bf16 %v3502_v38 }
  0x22   :  { %740 = vst [vmem:[#allocation1 + $0x290] sm:$0x3] %v737_v29  ;;  %756 = vst [vmem:[#allocation1 + $0x288] sm:$0x3] %v753_v30  ;;  %v849_v42 = vunpack.c.l.bf16 %v3503_v39  ;;  %v865_v43 = vunpack.c.l.bf16 %v3504_v40  ;;  %v3505_v44 = vld [vmem:[%s4293_s0 + $0x49] sm:$0x1] }
  0x23   :  { %772 = vst [vmem:[#allocation1 + $0x280] sm:$0x3] %v769_v31  ;;  %v3506_v45 = vld [vmem:[%s4293_s0 + $0x48] sm:$0x1]  ;;  %v3507_v46 = vld [vmem:[%s4293_s0 + $0x47] sm:$0x1]  ;;  %v881_v47 = vunpack.c.l.bf16 %v3505_v44 }
  0x24   :  { %788 = vst [vmem:[#allocation1 + $0x278] sm:$0x3] %v785_v35  ;;  %804 = vst [vmem:[#allocation1 + $0x270] sm:$0x3] %v801_v36  ;;  %v897_v48 = vunpack.c.l.bf16 %v3506_v45  ;;  %v913_v49 = vunpack.c.l.bf16 %v3507_v46  ;;  %v3508_v50 = vld [vmem:[%s4293_s0 + $0x46] sm:$0x1] }
  0x25   :  { %820 = vst [vmem:[#allocation1 + $0x268] sm:$0x3] %v817_v37  ;;  %v3509_v51 = vld [vmem:[%s4293_s0 + $0x45] sm:$0x1]  ;;  %v3510_v52 = vld [vmem:[%s4293_s0 + $0x44] sm:$0x1]  ;;  %v929_v53 = vunpack.c.l.bf16 %v3508_v50 }
  0x26   :  { %836 = vst [vmem:[#allocation1 + $0x260] sm:$0x3] %v833_v41  ;;  %852 = vst [vmem:[#allocation1 + $0x258] sm:$0x3] %v849_v42  ;;  %v945_v54 = vunpack.c.l.bf16 %v3509_v51  ;;  %v961_v55 = vunpack.c.l.bf16 %v3510_v52  ;;  %v3511_v56 = vld [vmem:[%s4293_s0 + $0x43] sm:$0x1] }
  0x27   :  { %868 = vst [vmem:[#allocation1 + $0x250] sm:$0x3] %v865_v43  ;;  %v3512_v57 = vld [vmem:[%s4293_s0 + $0x42] sm:$0x1]  ;;  %v3513_v58 = vld [vmem:[%s4293_s0 + $0x41] sm:$0x1]  ;;  %v977_v59 = vunpack.c.l.bf16 %v3511_v56 }
  0x28   :  { %884 = vst [vmem:[#allocation1 + $0x248] sm:$0x3] %v881_v47  ;;  %900 = vst [vmem:[#allocation1 + $0x240] sm:$0x3] %v897_v48  ;;  %v993_v60 = vunpack.c.l.bf16 %v3512_v57  ;;  %v1009_v61 = vunpack.c.l.bf16 %v3513_v58  ;;  %v3514_v62 = vld [vmem:[%s4293_s0 + $0x40] sm:$0x1] }
  0x29   :  { %916 = vst [vmem:[#allocation1 + $0x238] sm:$0x3] %v913_v49  ;;  %v3515_v63 = vld [vmem:[%s4293_s0 + $0x3f] sm:$0x1]  ;;  %v3516_v0 = vld [vmem:[%s4293_s0 + $0x3e] sm:$0x1]  ;;  %v1025_v1 = vunpack.c.l.bf16 %v3514_v62 }
  0x2a   :  { %932 = vst [vmem:[#allocation1 + $0x230] sm:$0x3] %v929_v53  ;;  %948 = vst [vmem:[#allocation1 + $0x228] sm:$0x3] %v945_v54  ;;  %v1041_v2 = vunpack.c.l.bf16 %v3515_v63  ;;  %v1057_v3 = vunpack.c.l.bf16 %v3516_v0  ;;  %v3517_v4 = vld [vmem:[%s4293_s0 + $0x3d] sm:$0x1] }
  0x2b   :  { %964 = vst [vmem:[#allocation1 + $0x220] sm:$0x3] %v961_v55  ;;  %v3518_v5 = vld [vmem:[%s4293_s0 + $0x3c] sm:$0x1]  ;;  %v3519_v6 = vld [vmem:[%s4293_s0 + $0x3b] sm:$0x1]  ;;  %v1073_v7 = vunpack.c.l.bf16 %v3517_v4 }
  0x2c   :  { %980 = vst [vmem:[#allocation1 + $0x218] sm:$0x3] %v977_v59  ;;  %996 = vst [vmem:[#allocation1 + $0x210] sm:$0x3] %v993_v60  ;;  %v1089_v8 = vunpack.c.l.bf16 %v3518_v5  ;;  %v1105_v9 = vunpack.c.l.bf16 %v3519_v6  ;;  %v3520_v10 = vld [vmem:[%s4293_s0 + $0x3a] sm:$0x1] }
  0x2d   :  { %1012 = vst [vmem:[#allocation1 + $0x208] sm:$0x3] %v1009_v61  ;;  %v3521_v11 = vld [vmem:[%s4293_s0 + $0x39] sm:$0x1]  ;;  %v3522_v12 = vld [vmem:[%s4293_s0 + $0x38] sm:$0x1]  ;;  %v1121_v13 = vunpack.c.l.bf16 %v3520_v10 }
  0x2e   :  { %1028 = vst [vmem:[#allocation1 + $0x200] sm:$0x3] %v1025_v1  ;;  %1044 = vst [vmem:[#allocation1 + $0x1f8] sm:$0x3] %v1041_v2  ;;  %v1137_v14 = vunpack.c.l.bf16 %v3521_v11  ;;  %v1153_v15 = vunpack.c.l.bf16 %v3522_v12  ;;  %v3523_v16 = vld [vmem:[%s4293_s0 + $0x37] sm:$0x1] }
  0x2f   :  { %1060 = vst [vmem:[#allocation1 + $0x1f0] sm:$0x3] %v1057_v3  ;;  %v3524_v17 = vld [vmem:[%s4293_s0 + $0x36] sm:$0x1]  ;;  %v3525_v18 = vld [vmem:[%s4293_s0 + $0x35] sm:$0x1]  ;;  %v1169_v19 = vunpack.c.l.bf16 %v3523_v16 }
  0x30   :  { %1076 = vst [vmem:[#allocation1 + $0x1e8] sm:$0x3] %v1073_v7  ;;  %1092 = vst [vmem:[#allocation1 + $0x1e0] sm:$0x3] %v1089_v8  ;;  %v1185_v20 = vunpack.c.l.bf16 %v3524_v17  ;;  %v1201_v21 = vunpack.c.l.bf16 %v3525_v18  ;;  %v3526_v22 = vld [vmem:[%s4293_s0 + $0x34] sm:$0x1] }
  0x31   :  { %1108 = vst [vmem:[#allocation1 + $0x1d8] sm:$0x3] %v1105_v9  ;;  %v3527_v23 = vld [vmem:[%s4293_s0 + $0x33] sm:$0x1]  ;;  %v3528_v24 = vld [vmem:[%s4293_s0 + $0x32] sm:$0x1]  ;;  %v1217_v25 = vunpack.c.l.bf16 %v3526_v22 }
  0x32   :  { %1124 = vst [vmem:[#allocation1 + $0x1d0] sm:$0x3] %v1121_v13  ;;  %1140 = vst [vmem:[#allocation1 + $0x1c8] sm:$0x3] %v1137_v14  ;;  %v1233_v26 = vunpack.c.l.bf16 %v3527_v23  ;;  %v1249_v27 = vunpack.c.l.bf16 %v3528_v24  ;;  %v3529_v28 = vld [vmem:[%s4293_s0 + $0x31] sm:$0x1] }
  0x33   :  { %1156 = vst [vmem:[#allocation1 + $0x1c0] sm:$0x3] %v1153_v15  ;;  %v3530_v29 = vld [vmem:[%s4293_s0 + $0x30] sm:$0x1]  ;;  %v3531_v30 = vld [vmem:[%s4293_s0 + $0x2f] sm:$0x1]  ;;  %v1265_v31 = vunpack.c.l.bf16 %v3529_v28 }
  0x34   :  { %1172 = vst [vmem:[#allocation1 + $0x1b8] sm:$0x3] %v1169_v19  ;;  %1188 = vst [vmem:[#allocation1 + $0x1b0] sm:$0x3] %v1185_v20  ;;  %v1281_v32 = vunpack.c.l.bf16 %v3530_v29  ;;  %v1297_v33 = vunpack.c.l.bf16 %v3531_v30  ;;  %v3532_v34 = vld [vmem:[%s4293_s0 + $0x2e] sm:$0x1] }
  0x35   :  { %1204 = vst [vmem:[#allocation1 + $0x1a8] sm:$0x3] %v1201_v21  ;;  %v3533_v35 = vld [vmem:[%s4293_s0 + $0x2d] sm:$0x1]  ;;  %v3534_v36 = vld [vmem:[%s4293_s0 + $0x2c] sm:$0x1]  ;;  %v1313_v37 = vunpack.c.l.bf16 %v3532_v34 }
  0x36   :  { %1220 = vst [vmem:[#allocation1 + $0x1a0] sm:$0x3] %v1217_v25  ;;  %1236 = vst [vmem:[#allocation1 + $0x198] sm:$0x3] %v1233_v26  ;;  %v1329_v38 = vunpack.c.l.bf16 %v3533_v35  ;;  %v1345_v39 = vunpack.c.l.bf16 %v3534_v36  ;;  %v3535_v40 = vld [vmem:[%s4293_s0 + $0x2b] sm:$0x1] }
  0x37   :  { %1252 = vst [vmem:[#allocation1 + $0x190] sm:$0x3] %v1249_v27  ;;  %v3536_v41 = vld [vmem:[%s4293_s0 + $0x2a] sm:$0x1]  ;;  %v3537_v42 = vld [vmem:[%s4293_s0 + $0x29] sm:$0x1]  ;;  %v1361_v43 = vunpack.c.l.bf16 %v3535_v40 }
  0x38   :  { %1268 = vst [vmem:[#allocation1 + $0x188] sm:$0x3] %v1265_v31  ;;  %1284 = vst [vmem:[#allocation1 + $0x180] sm:$0x3] %v1281_v32  ;;  %v1377_v44 = vunpack.c.l.bf16 %v3536_v41  ;;  %v1393_v45 = vunpack.c.l.bf16 %v3537_v42  ;;  %v3538_v46 = vld [vmem:[%s4293_s0 + $0x28] sm:$0x1] }
  0x39   :  { %1300 = vst [vmem:[#allocation1 + $0x178] sm:$0x3] %v1297_v33  ;;  %v3539_v47 = vld [vmem:[%s4293_s0 + $0x27] sm:$0x1]  ;;  %v3540_v48 = vld [vmem:[%s4293_s0 + $0x26] sm:$0x1]  ;;  %v1409_v49 = vunpack.c.l.bf16 %v3538_v46 }
  0x3a   :  { %1316 = vst [vmem:[#allocation1 + $0x170] sm:$0x3] %v1313_v37  ;;  %1332 = vst [vmem:[#allocation1 + $0x168] sm:$0x3] %v1329_v38  ;;  %v1425_v50 = vunpack.c.l.bf16 %v3539_v47  ;;  %v1441_v51 = vunpack.c.l.bf16 %v3540_v48  ;;  %v3541_v52 = vld [vmem:[%s4293_s0 + $0x25] sm:$0x1] }
  0x3b   :  { %1348 = vst [vmem:[#allocation1 + $0x160] sm:$0x3] %v1345_v39  ;;  %v3542_v53 = vld [vmem:[%s4293_s0 + $0x24] sm:$0x1]  ;;  %v3543_v54 = vld [vmem:[%s4293_s0 + $0x23] sm:$0x1]  ;;  %v1457_v55 = vunpack.c.l.bf16 %v3541_v52 }
  0x3c   :  { %1364 = vst [vmem:[#allocation1 + $0x158] sm:$0x3] %v1361_v43  ;;  %1380 = vst [vmem:[#allocation1 + $0x150] sm:$0x3] %v1377_v44  ;;  %v1473_v56 = vunpack.c.l.bf16 %v3542_v53  ;;  %v1489_v57 = vunpack.c.l.bf16 %v3543_v54  ;;  %v3544_v58 = vld [vmem:[%s4293_s0 + $0x22] sm:$0x1] }
  0x3d   :  { %1396 = vst [vmem:[#allocation1 + $0x148] sm:$0x3] %v1393_v45  ;;  %v3545_v59 = vld [vmem:[%s4293_s0 + $0x21] sm:$0x1]  ;;  %v3546_v60 = vld [vmem:[%s4293_s0 + $0x20] sm:$0x1]  ;;  %v1505_v61 = vunpack.c.l.bf16 %v3544_v58 }
  0x3e   :  { %1412 = vst [vmem:[#allocation1 + $0x140] sm:$0x3] %v1409_v49  ;;  %1428 = vst [vmem:[#allocation1 + $0x138] sm:$0x3] %v1425_v50  ;;  %v1521_v62 = vunpack.c.l.bf16 %v3545_v59  ;;  %v1537_v63 = vunpack.c.l.bf16 %v3546_v60  ;;  %v3547_v0 = vld [vmem:[%s4293_s0 + $0x1f] sm:$0x1] }
  0x3f   :  { %1444 = vst [vmem:[#allocation1 + $0x130] sm:$0x3] %v1441_v51  ;;  %v3548_v1 = vld [vmem:[%s4293_s0 + $0x1e] sm:$0x1]  ;;  %v3549_v2 = vld [vmem:[%s4293_s0 + $0x1d] sm:$0x1]  ;;  %v1553_v3 = vunpack.c.l.bf16 %v3547_v0 }
  0x40   :  { %1460 = vst [vmem:[#allocation1 + $0x128] sm:$0x3] %v1457_v55  ;;  %1476 = vst [vmem:[#allocation1 + $0x120] sm:$0x3] %v1473_v56  ;;  %v1569_v4 = vunpack.c.l.bf16 %v3548_v1  ;;  %v1585_v5 = vunpack.c.l.bf16 %v3549_v2  ;;  %v3550_v6 = vld [vmem:[%s4293_s0 + $0x1c] sm:$0x1] }
  0x41   :  { %1492 = vst [vmem:[#allocation1 + $0x118] sm:$0x3] %v1489_v57  ;;  %v3551_v7 = vld [vmem:[%s4293_s0 + $0x1b] sm:$0x1]  ;;  %v3552_v8 = vld [vmem:[%s4293_s0 + $0x1a] sm:$0x1]  ;;  %v1601_v9 = vunpack.c.l.bf16 %v3550_v6 }
  0x42   :  { %1508 = vst [vmem:[#allocation1 + $0x110] sm:$0x3] %v1505_v61  ;;  %1524 = vst [vmem:[#allocation1 + $0x108] sm:$0x3] %v1521_v62  ;;  %v1617_v10 = vunpack.c.l.bf16 %v3551_v7  ;;  %v1633_v11 = vunpack.c.l.bf16 %v3552_v8  ;;  %v3553_v12 = vld [vmem:[%s4293_s0 + $0x19] sm:$0x1] }
  0x43   :  { %1540 = vst [vmem:[#allocation1 + $0x100] sm:$0x3] %v1537_v63  ;;  %v3554_v13 = vld [vmem:[%s4293_s0 + $0x18] sm:$0x1]  ;;  %v3555_v14 = vld [vmem:[%s4293_s0 + $0x17] sm:$0x1]  ;;  %v1649_v15 = vunpack.c.l.bf16 %v3553_v12 }
  0x44   :  { %1556 = vst [vmem:[#allocation1 + $0xf8] sm:$0x3] %v1553_v3  ;;  %1572 = vst [vmem:[#allocation1 + $0xf0] sm:$0x3] %v1569_v4  ;;  %v1665_v16 = vunpack.c.l.bf16 %v3554_v13  ;;  %v1681_v17 = vunpack.c.l.bf16 %v3555_v14  ;;  %v3556_v18 = vld [vmem:[%s4293_s0 + $0x16] sm:$0x1] }
  0x45   :  { %1588 = vst [vmem:[#allocation1 + $0xe8] sm:$0x3] %v1585_v5  ;;  %v3557_v19 = vld [vmem:[%s4293_s0 + $0x15] sm:$0x1]  ;;  %v3558_v20 = vld [vmem:[%s4293_s0 + $0x14] sm:$0x1]  ;;  %v1697_v21 = vunpack.c.l.bf16 %v3556_v18 }
  0x46   :  { %1604 = vst [vmem:[#allocation1 + $0xe0] sm:$0x3] %v1601_v9  ;;  %1620 = vst [vmem:[#allocation1 + $0xd8] sm:$0x3] %v1617_v10  ;;  %v1713_v22 = vunpack.c.l.bf16 %v3557_v19  ;;  %v1729_v23 = vunpack.c.l.bf16 %v3558_v20  ;;  %v3559_v24 = vld [vmem:[%s4293_s0 + $0x13] sm:$0x1] }
  0x47   :  { %1636 = vst [vmem:[#allocation1 + $0xd0] sm:$0x3] %v1633_v11  ;;  %v3560_v25 = vld [vmem:[%s4293_s0 + $0x12] sm:$0x1]  ;;  %v3561_v26 = vld [vmem:[%s4293_s0 + $0x11] sm:$0x1]  ;;  %v1745_v27 = vunpack.c.l.bf16 %v3559_v24 }
  0x48   :  { %1652 = vst [vmem:[#allocation1 + $0xc8] sm:$0x3] %v1649_v15  ;;  %1668 = vst [vmem:[#allocation1 + $0xc0] sm:$0x3] %v1665_v16  ;;  %v1761_v28 = vunpack.c.l.bf16 %v3560_v25  ;;  %v1777_v29 = vunpack.c.l.bf16 %v3561_v26  ;;  %v3562_v30 = vld [vmem:[%s4293_s0 + $0x10] sm:$0x1] }
  0x49   :  { %1684 = vst [vmem:[#allocation1 + $0xb8] sm:$0x3] %v1681_v17  ;;  %v3563_v31 = vld [vmem:[%s4293_s0 + $0xf] sm:$0x1]  ;;  %v3564_v32 = vld [vmem:[%s4293_s0 + $0xe] sm:$0x1]  ;;  %v1793_v33 = vunpack.c.l.bf16 %v3562_v30 }
  0x4a   :  { %1700 = vst [vmem:[#allocation1 + $0xb0] sm:$0x3] %v1697_v21  ;;  %1716 = vst [vmem:[#allocation1 + $0xa8] sm:$0x3] %v1713_v22  ;;  %v1809_v34 = vunpack.c.l.bf16 %v3563_v31  ;;  %v1825_v35 = vunpack.c.l.bf16 %v3564_v32  ;;  %v3565_v36 = vld [vmem:[%s4293_s0 + $0xd] sm:$0x1] }
  0x4b   :  { %1732 = vst [vmem:[#allocation1 + $0xa0] sm:$0x3] %v1729_v23  ;;  %v3566_v37 = vld [vmem:[%s4293_s0 + $0xc] sm:$0x1]  ;;  %v3567_v38 = vld [vmem:[%s4293_s0 + $0xb] sm:$0x1]  ;;  %v1841_v39 = vunpack.c.l.bf16 %v3565_v36 }
  0x4c   :  { %1748 = vst [vmem:[#allocation1 + $0x98] sm:$0x3] %v1745_v27  ;;  %1764 = vst [vmem:[#allocation1 + $0x90] sm:$0x3] %v1761_v28  ;;  %v1857_v40 = vunpack.c.l.bf16 %v3566_v37  ;;  %v1873_v41 = vunpack.c.l.bf16 %v3567_v38  ;;  %v3568_v42 = vld [vmem:[%s4293_s0 + $0xa] sm:$0x1] }
  0x4d   :  { %1780 = vst [vmem:[#allocation1 + $0x88] sm:$0x3] %v1777_v29  ;;  %v3569_v43 = vld [vmem:[%s4293_s0 + $0x9] sm:$0x1]  ;;  %v3570_v44 = vld [vmem:[%s4293_s0 + $0x8] sm:$0x1]  ;;  %v1889_v45 = vunpack.c.l.bf16 %v3568_v42 }
  0x4e   :  { %1796 = vst [vmem:[#allocation1 + $0x80] sm:$0x3] %v1793_v33  ;;  %1812 = vst [vmem:[#allocation1 + $0x78] sm:$0x3] %v1809_v34  ;;  %v1905_v46 = vunpack.c.l.bf16 %v3569_v43  ;;  %v1921_v47 = vunpack.c.l.bf16 %v3570_v44  ;;  %v3571_v48 = vld [vmem:[%s4293_s0 + $0x7] sm:$0x1] }
  0x4f   :  { %1828 = vst [vmem:[#allocation1 + $0x70] sm:$0x3] %v1825_v35  ;;  %v3572_v49 = vld [vmem:[%s4293_s0 + $0x6] sm:$0x1]  ;;  %v3573_v50 = vld [vmem:[%s4293_s0 + $0x5] sm:$0x1]  ;;  %v1937_v51 = vunpack.c.l.bf16 %v3571_v48 }
  0x50   :  { %1844 = vst [vmem:[#allocation1 + $0x68] sm:$0x3] %v1841_v39  ;;  %1860 = vst [vmem:[#allocation1 + $0x60] sm:$0x3] %v1857_v40  ;;  %v1953_v52 = vunpack.c.l.bf16 %v3572_v49  ;;  %v1969_v53 = vunpack.c.l.bf16 %v3573_v50  ;;  %v3574_v54 = vld [vmem:[%s4293_s0 + $0x4] sm:$0x1] }
  0x51   :  { %1876 = vst [vmem:[#allocation1 + $0x58] sm:$0x3] %v1873_v41  ;;  %v3575_v55 = vld [vmem:[%s4293_s0 + $0x3] sm:$0x1]  ;;  %v3576_v56 = vld [vmem:[%s4293_s0 + $0x2] sm:$0x1]  ;;  %v1985_v57 = vunpack.c.l.bf16 %v3574_v54 }
  0x52   :  { %1892 = vst [vmem:[#allocation1 + $0x50] sm:$0x3] %v1889_v45  ;;  %1908 = vst [vmem:[#allocation1 + $0x48] sm:$0x3] %v1905_v46  ;;  %v2001_v58 = vunpack.c.l.bf16 %v3575_v55  ;;  %v2017_v59 = vunpack.c.l.bf16 %v3576_v56  ;;  %v3577_v60 = vld [vmem:[%s4293_s0 + $0x1] sm:$0x1] }
  0x53   :  { %1924 = vst [vmem:[#allocation1 + $0x40] sm:$0x3] %v1921_v47  ;;  %v2045_v61 = vld [vmem:[%s4293_s0] sm:$0x1]  ;;  %v2222_v62 = vld [vmem:[#allocation1 + $0xe8] sm:$0x3]   ;;  %v2032_v63 = vunpack.c.l.bf16 %v3577_v60 }
  0x54   :  { %1940 = vst [vmem:[#allocation1 + $0x38] sm:$0x3] %v1937_v51  ;;  %1956 = vst [vmem:[#allocation1 + $0x30] sm:$0x3] %v1953_v52  ;;  %v2046_v0 = vunpack.c.l.bf16 %v2045_v61  ;;  %v2204_v1 = vld [vmem:[#allocation1 + $0xd0] sm:$0x3]  }
  0x55   :  { %1972 = vst [vmem:[#allocation1 + $0x28] sm:$0x3] %v1969_v53  ;;  %v2210_v2 = vld [vmem:[#allocation1 + $0xd8] sm:$0x3]   ;;  %v2216_v3 = vld [vmem:[#allocation1 + $0xe0] sm:$0x3]  }
  0x56   :  { %2224 = vst [vmem:[#allocation0 + $0x2b] sm:$0x1] %v2222_v62   ;;  %2226 = vst [vmem:[#allocation0 + $0x12a] sm:$0x2] %v2222_v62   ;;  %v2186_v4 = vld [vmem:[#allocation1 + $0xb8] sm:$0x3]  }
  0x57   :  { %1988 = vst [vmem:[#allocation1 + $0x20] sm:$0x3] %v1985_v57  ;;  %2004 = vst [vmem:[#allocation1 + $0x18] sm:$0x3] %v2001_v58  ;;  %v2192_v5 = vld [vmem:[#allocation1 + $0xc0] sm:$0x3]  }
  0x58   :  { %2020 = vst [vmem:[#allocation1 + $0x10] sm:$0x3] %v2017_v59  ;;  %v2198_v6 = vld [vmem:[#allocation1 + $0xc8] sm:$0x3]   ;;  %2206 = vst [vmem:[#allocation0 + $0x13] sm:$0x1] %v2204_v1  }
  0x59   :  { %2208 = vst [vmem:[#allocation0 + $0x112] sm:$0x2] %v2204_v1   ;;  %2212 = vst [vmem:[#allocation0 + $0x1b] sm:$0x1] %v2210_v2   ;;  %v2168_v7 = vld [vmem:[#allocation1 + $0xa0] sm:$0x3]  }
  0x5a   :  { %2214 = vst [vmem:[#allocation0 + $0x11a] sm:$0x2] %v2210_v2   ;;  %2218 = vst [vmem:[#allocation0 + $0x23] sm:$0x1] %v2216_v3   ;;  %v2174_v8 = vld [vmem:[#allocation1 + $0xa8] sm:$0x3]  }
  0x5b   :  { %2220 = vst [vmem:[#allocation0 + $0x122] sm:$0x2] %v2216_v3   ;;  %2035 = vst [vmem:[#allocation1 + $0x8] sm:$0x3] %v2032_v63  ;;  %v2180_v9 = vld [vmem:[#allocation1 + $0xb0] sm:$0x3]  }
  0x5c   :  { %2048 = vst [vmem:[#allocation1] sm:$0x3] %v2046_v0  ;;  %2188 = vst [vmem:[#allocation0 + $0x3a] sm:$0x1] %v2186_v4   ;;  %v2150_v10 = vld [vmem:[#allocation1 + $0x88] sm:$0x3]  }
  0x5d   :  { %2190 = vst [vmem:[#allocation0 + $0x139] sm:$0x2] %v2186_v4   ;;  %2194 = vst [vmem:[#allocation0 + $0x3] sm:$0x1] %v2192_v5   ;;  %v2156_v11 = vld [vmem:[#allocation1 + $0x90] sm:$0x3]  }
  0x5e   :  { %2196 = vst [vmem:[#allocation0 + $0x102] sm:$0x2] %v2192_v5   ;;  %2200 = vst [vmem:[#allocation0 + $0xb] sm:$0x1] %v2198_v6   ;;  %v2162_v12 = vld [vmem:[#allocation1 + $0x98] sm:$0x3]  }
  0x5f   :  { %2202 = vst [vmem:[#allocation0 + $0x10a] sm:$0x2] %v2198_v6   ;;  %2170 = vst [vmem:[#allocation0 + $0x22] sm:$0x1] %v2168_v7   ;;  %v2132_v13 = vld [vmem:[#allocation1 + $0x70] sm:$0x3]  }
  0x60   :  { %2172 = vst [vmem:[#allocation0 + $0x121] sm:$0x2] %v2168_v7   ;;  %2176 = vst [vmem:[#allocation0 + $0x2a] sm:$0x1] %v2174_v8   ;;  %v2138_v14 = vld [vmem:[#allocation1 + $0x78] sm:$0x3]  }
  0x61   :  { %2178 = vst [vmem:[#allocation0 + $0x129] sm:$0x2] %v2174_v8   ;;  %2182 = vst [vmem:[#allocation0 + $0x32] sm:$0x1] %v2180_v9   ;;  %v2144_v15 = vld [vmem:[#allocation1 + $0x80] sm:$0x3]  }
  0x62   :  { %2184 = vst [vmem:[#allocation0 + $0x131] sm:$0x2] %v2180_v9   ;;  %2152 = vst [vmem:[#allocation0 + $0xa] sm:$0x1] %v2150_v10   ;;  %v2114_v16 = vld [vmem:[#allocation1 + $0x58] sm:$0x3]  }
  0x63   :  { %2154 = vst [vmem:[#allocation0 + $0x109] sm:$0x2] %v2150_v10   ;;  %2158 = vst [vmem:[#allocation0 + $0x12] sm:$0x1] %v2156_v11   ;;  %v2120_v17 = vld [vmem:[#allocation1 + $0x60] sm:$0x3]  }
  0x64   :  { %2160 = vst [vmem:[#allocation0 + $0x111] sm:$0x2] %v2156_v11   ;;  %2164 = vst [vmem:[#allocation0 + $0x1a] sm:$0x1] %v2162_v12   ;;  %v2126_v18 = vld [vmem:[#allocation1 + $0x68] sm:$0x3]  }
  0x65   :  { %2166 = vst [vmem:[#allocation0 + $0x119] sm:$0x2] %v2162_v12   ;;  %2134 = vst [vmem:[#allocation0 + $0x31] sm:$0x1] %v2132_v13   ;;  %v2096_v19 = vld [vmem:[#allocation1 + $0x40] sm:$0x3]  }
  0x66   :  { %2136 = vst [vmem:[#allocation0 + $0x130] sm:$0x2] %v2132_v13   ;;  %2140 = vst [vmem:[#allocation0 + $0x39] sm:$0x1] %v2138_v14   ;;  %v2102_v20 = vld [vmem:[#allocation1 + $0x48] sm:$0x3]  }
  0x67   :  { %2142 = vst [vmem:[#allocation0 + $0x138] sm:$0x2] %v2138_v14   ;;  %2146 = vst [vmem:[#allocation0 + $0x2] sm:$0x1] %v2144_v15   ;;  %v2108_v21 = vld [vmem:[#allocation1 + $0x50] sm:$0x3]  }
  0x68   :  { %2148 = vst [vmem:[#allocation0 + $0x101] sm:$0x2] %v2144_v15   ;;  %2116 = vst [vmem:[#allocation0 + $0x19] sm:$0x1] %v2114_v16   ;;  %v2078_v22 = vld [vmem:[#allocation1 + $0x28] sm:$0x3]  }
  0x69   :  { %2118 = vst [vmem:[#allocation0 + $0x118] sm:$0x2] %v2114_v16   ;;  %2122 = vst [vmem:[#allocation0 + $0x21] sm:$0x1] %v2120_v17   ;;  %v2084_v23 = vld [vmem:[#allocation1 + $0x30] sm:$0x3]  }
  0x6a   :  { %2124 = vst [vmem:[#allocation0 + $0x120] sm:$0x2] %v2120_v17   ;;  %2128 = vst [vmem:[#allocation0 + $0x29] sm:$0x1] %v2126_v18   ;;  %v2090_v24 = vld [vmem:[#allocation1 + $0x38] sm:$0x3]  }
  0x6b   :  { %2130 = vst [vmem:[#allocation0 + $0x128] sm:$0x2] %v2126_v18   ;;  %2098 = vst [vmem:[#allocation0 + $0x1] sm:$0x1] %v2096_v19   ;;  %v2060_v25 = vld [vmem:[#allocation1 + $0x10] sm:$0x3]  }
  0x6c   :  { %2100 = vst [vmem:[#allocation0 + $0x100] sm:$0x2] %v2096_v19   ;;  %2104 = vst [vmem:[#allocation0 + $0x9] sm:$0x1] %v2102_v20   ;;  %v2066_v26 = vld [vmem:[#allocation1 + $0x18] sm:$0x3]  }
  0x6d   :  { %2106 = vst [vmem:[#allocation0 + $0x108] sm:$0x2] %v2102_v20   ;;  %2110 = vst [vmem:[#allocation0 + $0x11] sm:$0x1] %v2108_v21   ;;  %v2072_v27 = vld [vmem:[#allocation1 + $0x20] sm:$0x3]  }
  0x6e   :  { %2112 = vst [vmem:[#allocation0 + $0x110] sm:$0x2] %v2108_v21   ;;  %2080 = vst [vmem:[#allocation0 + $0x28] sm:$0x1] %v2078_v22   ;;  %v2049_v28 = vld [vmem:[#allocation1] sm:$0x3]  }
  0x6f   :  { %2082 = vst [vmem:[#allocation0 + $0x127] sm:$0x2] %v2078_v22   ;;  %2086 = vst [vmem:[#allocation0 + $0x30] sm:$0x1] %v2084_v23   ;;  %v2054_v29 = vld [vmem:[#allocation1 + $0x8] sm:$0x3]  }
  0x70   :  { %2088 = vst [vmem:[#allocation0 + $0x12f] sm:$0x2] %v2084_v23   ;;  %2092 = vst [vmem:[#allocation0 + $0x38] sm:$0x1] %v2090_v24   ;;  %v2228_v30 = vld [vmem:[#allocation1 + $0xf0] sm:$0x3]  }
  0x71   :  { %2094 = vst [vmem:[#allocation0 + $0x137] sm:$0x2] %v2090_v24   ;;  %2062 = vst [vmem:[#allocation0 + $0x10] sm:$0x1] %v2060_v25   ;;  %v2234_v31 = vld [vmem:[#allocation1 + $0xf8] sm:$0x3]  }
  0x72   :  { %2064 = vst [vmem:[#allocation0 + $0x10f] sm:$0x2] %v2060_v25   ;;  %2068 = vst [vmem:[#allocation0 + $0x18] sm:$0x1] %v2066_v26   ;;  %v2240_v32 = vld [vmem:[#allocation1 + $0x100] sm:$0x3]  }
  0x73   :  { %2070 = vst [vmem:[#allocation0 + $0x117] sm:$0x2] %v2066_v26   ;;  %2074 = vst [vmem:[#allocation0 + $0x20] sm:$0x1] %v2072_v27   ;;  %v2246_v33 = vld [vmem:[#allocation1 + $0x108] sm:$0x3]  }
  0x74   :  { %2076 = vst [vmem:[#allocation0 + $0x11f] sm:$0x2] %v2072_v27   ;;  %2050 = vst [vmem:[#allocation0] sm:$0x1] %v2049_v28   ;;  %v2252_v34 = vld [vmem:[#allocation1 + $0x110] sm:$0x3]  }
  0x75   :  { %2052 = vst [vmem:[#allocation0 + $0xff] sm:$0x2] %v2049_v28   ;;  %2056 = vst [vmem:[#allocation0 + $0x8] sm:$0x1] %v2054_v29   ;;  %v2258_v35 = vld [vmem:[#allocation1 + $0x118] sm:$0x3]  }
  0x76   :  { %2058 = vst [vmem:[#allocation0 + $0x107] sm:$0x2] %v2054_v29   ;;  %2230 = vst [vmem:[#allocation0 + $0x33] sm:$0x1] %v2228_v30   ;;  %v2264_v36 = vld [vmem:[#allocation1 + $0x120] sm:$0x3]  }
  0x77   :  { %2232 = vst [vmem:[#allocation0 + $0x132] sm:$0x2] %v2228_v30   ;;  %2236 = vst [vmem:[#allocation0 + $0x3b] sm:$0x1] %v2234_v31   ;;  %v2270_v37 = vld [vmem:[#allocation1 + $0x128] sm:$0x3]  }
  0x78   :  { %2238 = vst [vmem:[#allocation0 + $0x13a] sm:$0x2] %v2234_v31   ;;  %2242 = vst [vmem:[#allocation0 + $0x40] sm:$0x1] %v2240_v32   ;;  %v2276_v38 = vld [vmem:[#allocation1 + $0x130] sm:$0x3]  }
  0x79   :  { %2244 = vst [vmem:[#allocation0 + $0x13f] sm:$0x2] %v2240_v32   ;;  %2248 = vst [vmem:[#allocation0 + $0x48] sm:$0x1] %v2246_v33   ;;  %v2282_v39 = vld [vmem:[#allocation1 + $0x138] sm:$0x3]  }
  0x7a   :  { %2250 = vst [vmem:[#allocation0 + $0x147] sm:$0x2] %v2246_v33   ;;  %2254 = vst [vmem:[#allocation0 + $0x50] sm:$0x1] %v2252_v34   ;;  %v2288_v40 = vld [vmem:[#allocation1 + $0x140] sm:$0x3]  }
  0x7b   :  { %2256 = vst [vmem:[#allocation0 + $0x14f] sm:$0x2] %v2252_v34   ;;  %2260 = vst [vmem:[#allocation0 + $0x58] sm:$0x1] %v2258_v35   ;;  %v2294_v41 = vld [vmem:[#allocation1 + $0x148] sm:$0x3]  }
  0x7c   :  { %2262 = vst [vmem:[#allocation0 + $0x157] sm:$0x2] %v2258_v35   ;;  %2266 = vst [vmem:[#allocation0 + $0x60] sm:$0x1] %v2264_v36   ;;  %v2300_v42 = vld [vmem:[#allocation1 + $0x150] sm:$0x3]  }
  0x7d   :  { %2268 = vst [vmem:[#allocation0 + $0x15f] sm:$0x2] %v2264_v36   ;;  %2272 = vst [vmem:[#allocation0 + $0x68] sm:$0x1] %v2270_v37   ;;  %v2306_v43 = vld [vmem:[#allocation1 + $0x158] sm:$0x3]  }
  0x7e   :  { %2274 = vst [vmem:[#allocation0 + $0x167] sm:$0x2] %v2270_v37   ;;  %2278 = vst [vmem:[#allocation0 + $0x70] sm:$0x1] %v2276_v38   ;;  %v2312_v44 = vld [vmem:[#allocation1 + $0x160] sm:$0x3]  }
  0x7f   :  { %2280 = vst [vmem:[#allocation0 + $0x16f] sm:$0x2] %v2276_v38   ;;  %2284 = vst [vmem:[#allocation0 + $0x78] sm:$0x1] %v2282_v39   ;;  %v2318_v45 = vld [vmem:[#allocation1 + $0x168] sm:$0x3]  }
  0x80   :  { %2286 = vst [vmem:[#allocation0 + $0x177] sm:$0x2] %v2282_v39   ;;  %2290 = vst [vmem:[#allocation0 + $0x41] sm:$0x1] %v2288_v40   ;;  %v2324_v46 = vld [vmem:[#allocation1 + $0x170] sm:$0x3]  }
  0x81   :  { %2292 = vst [vmem:[#allocation0 + $0x140] sm:$0x2] %v2288_v40   ;;  %2296 = vst [vmem:[#allocation0 + $0x49] sm:$0x1] %v2294_v41   ;;  %v2330_v47 = vld [vmem:[#allocation1 + $0x178] sm:$0x3]  }
  0x82   :  { %2298 = vst [vmem:[#allocation0 + $0x148] sm:$0x2] %v2294_v41   ;;  %2302 = vst [vmem:[#allocation0 + $0x51] sm:$0x1] %v2300_v42   ;;  %v2336_v48 = vld [vmem:[#allocation1 + $0x180] sm:$0x3]  }
  0x83   :  { %2304 = vst [vmem:[#allocation0 + $0x150] sm:$0x2] %v2300_v42   ;;  %2308 = vst [vmem:[#allocation0 + $0x59] sm:$0x1] %v2306_v43   ;;  %v2342_v49 = vld [vmem:[#allocation1 + $0x188] sm:$0x3]  }
  0x84   :  { %2310 = vst [vmem:[#allocation0 + $0x158] sm:$0x2] %v2306_v43   ;;  %2314 = vst [vmem:[#allocation0 + $0x61] sm:$0x1] %v2312_v44   ;;  %v2348_v50 = vld [vmem:[#allocation1 + $0x190] sm:$0x3]  }
  0x85   :  { %2316 = vst [vmem:[#allocation0 + $0x160] sm:$0x2] %v2312_v44   ;;  %2320 = vst [vmem:[#allocation0 + $0x69] sm:$0x1] %v2318_v45   ;;  %v2354_v51 = vld [vmem:[#allocation1 + $0x198] sm:$0x3]  }
  0x86   :  { %2322 = vst [vmem:[#allocation0 + $0x168] sm:$0x2] %v2318_v45   ;;  %2326 = vst [vmem:[#allocation0 + $0x71] sm:$0x1] %v2324_v46   ;;  %v2360_v52 = vld [vmem:[#allocation1 + $0x1a0] sm:$0x3]  }
  0x87   :  { %2328 = vst [vmem:[#allocation0 + $0x170] sm:$0x2] %v2324_v46   ;;  %2332 = vst [vmem:[#allocation0 + $0x79] sm:$0x1] %v2330_v47   ;;  %v2366_v53 = vld [vmem:[#allocation1 + $0x1a8] sm:$0x3]  }
  0x88   :  { %2334 = vst [vmem:[#allocation0 + $0x178] sm:$0x2] %v2330_v47   ;;  %2338 = vst [vmem:[#allocation0 + $0x42] sm:$0x1] %v2336_v48   ;;  %v2372_v54 = vld [vmem:[#allocation1 + $0x1b0] sm:$0x3]  }
  0x89   :  { %2340 = vst [vmem:[#allocation0 + $0x141] sm:$0x2] %v2336_v48   ;;  %2344 = vst [vmem:[#allocation0 + $0x4a] sm:$0x1] %v2342_v49   ;;  %v2378_v55 = vld [vmem:[#allocation1 + $0x1b8] sm:$0x3]  }
  0x8a   :  { %2346 = vst [vmem:[#allocation0 + $0x149] sm:$0x2] %v2342_v49   ;;  %2350 = vst [vmem:[#allocation0 + $0x52] sm:$0x1] %v2348_v50   ;;  %v2384_v56 = vld [vmem:[#allocation1 + $0x1c0] sm:$0x3]  }
  0x8b   :  { %2352 = vst [vmem:[#allocation0 + $0x151] sm:$0x2] %v2348_v50   ;;  %2356 = vst [vmem:[#allocation0 + $0x5a] sm:$0x1] %v2354_v51   ;;  %v2390_v57 = vld [vmem:[#allocation1 + $0x1c8] sm:$0x3]  }
  0x8c   :  { %2358 = vst [vmem:[#allocation0 + $0x159] sm:$0x2] %v2354_v51   ;;  %2362 = vst [vmem:[#allocation0 + $0x62] sm:$0x1] %v2360_v52   ;;  %v2396_v58 = vld [vmem:[#allocation1 + $0x1d0] sm:$0x3]  }
  0x8d   :  { %2364 = vst [vmem:[#allocation0 + $0x161] sm:$0x2] %v2360_v52   ;;  %2368 = vst [vmem:[#allocation0 + $0x6a] sm:$0x1] %v2366_v53   ;;  %v2402_v59 = vld [vmem:[#allocation1 + $0x1d8] sm:$0x3]  }
  0x8e   :  { %2370 = vst [vmem:[#allocation0 + $0x169] sm:$0x2] %v2366_v53   ;;  %2374 = vst [vmem:[#allocation0 + $0x72] sm:$0x1] %v2372_v54   ;;  %v2408_v60 = vld [vmem:[#allocation1 + $0x1e0] sm:$0x3]  }
  0x8f   :  { %2376 = vst [vmem:[#allocation0 + $0x171] sm:$0x2] %v2372_v54   ;;  %2380 = vst [vmem:[#allocation0 + $0x7a] sm:$0x1] %v2378_v55   ;;  %v2414_v61 = vld [vmem:[#allocation1 + $0x1e8] sm:$0x3]  }
  0x90   :  { %2382 = vst [vmem:[#allocation0 + $0x179] sm:$0x2] %v2378_v55   ;;  %2386 = vst [vmem:[#allocation0 + $0x43] sm:$0x1] %v2384_v56   ;;  %v2420_v62 = vld [vmem:[#allocation1 + $0x1f0] sm:$0x3]  }
  0x91   :  { %2388 = vst [vmem:[#allocation0 + $0x142] sm:$0x2] %v2384_v56   ;;  %2392 = vst [vmem:[#allocation0 + $0x4b] sm:$0x1] %v2390_v57   ;;  %v2426_v63 = vld [vmem:[#allocation1 + $0x1f8] sm:$0x3]  }
  0x92   :  { %2394 = vst [vmem:[#allocation0 + $0x14a] sm:$0x2] %v2390_v57   ;;  %2398 = vst [vmem:[#allocation0 + $0x53] sm:$0x1] %v2396_v58   ;;  %v2432_v0 = vld [vmem:[#allocation1 + $0x200] sm:$0x3]  }
  0x93   :  { %2400 = vst [vmem:[#allocation0 + $0x152] sm:$0x2] %v2396_v58   ;;  %2404 = vst [vmem:[#allocation0 + $0x5b] sm:$0x1] %v2402_v59   ;;  %v2438_v1 = vld [vmem:[#allocation1 + $0x208] sm:$0x3]  }
  0x94   :  { %2406 = vst [vmem:[#allocation0 + $0x15a] sm:$0x2] %v2402_v59   ;;  %2410 = vst [vmem:[#allocation0 + $0x63] sm:$0x1] %v2408_v60   ;;  %v2444_v2 = vld [vmem:[#allocation1 + $0x210] sm:$0x3]  }
  0x95   :  { %2412 = vst [vmem:[#allocation0 + $0x162] sm:$0x2] %v2408_v60   ;;  %2416 = vst [vmem:[#allocation0 + $0x6b] sm:$0x1] %v2414_v61   ;;  %v2450_v3 = vld [vmem:[#allocation1 + $0x218] sm:$0x3]  }
  0x96   :  { %2418 = vst [vmem:[#allocation0 + $0x16a] sm:$0x2] %v2414_v61   ;;  %2422 = vst [vmem:[#allocation0 + $0x73] sm:$0x1] %v2420_v62   ;;  %v2456_v4 = vld [vmem:[#allocation1 + $0x220] sm:$0x3]  }
  0x97   :  { %2424 = vst [vmem:[#allocation0 + $0x172] sm:$0x2] %v2420_v62   ;;  %2428 = vst [vmem:[#allocation0 + $0x7b] sm:$0x1] %v2426_v63   ;;  %v2462_v5 = vld [vmem:[#allocation1 + $0x228] sm:$0x3]  }
  0x98   :  { %2430 = vst [vmem:[#allocation0 + $0x17a] sm:$0x2] %v2426_v63   ;;  %2434 = vst [vmem:[#allocation0 + $0x80] sm:$0x1] %v2432_v0   ;;  %v2468_v6 = vld [vmem:[#allocation1 + $0x230] sm:$0x3]  }
  0x99   :  { %2436 = vst [vmem:[#allocation0 + $0x17f] sm:$0x2] %v2432_v0   ;;  %2440 = vst [vmem:[#allocation0 + $0x88] sm:$0x1] %v2438_v1   ;;  %v2474_v7 = vld [vmem:[#allocation1 + $0x238] sm:$0x3]  }
  0x9a   :  { %2442 = vst [vmem:[#allocation0 + $0x187] sm:$0x2] %v2438_v1   ;;  %2446 = vst [vmem:[#allocation0 + $0x90] sm:$0x1] %v2444_v2   ;;  %v2480_v8 = vld [vmem:[#allocation1 + $0x240] sm:$0x3]  }
  0x9b   :  { %2448 = vst [vmem:[#allocation0 + $0x18f] sm:$0x2] %v2444_v2   ;;  %2452 = vst [vmem:[#allocation0 + $0x98] sm:$0x1] %v2450_v3   ;;  %v2486_v9 = vld [vmem:[#allocation1 + $0x248] sm:$0x3]  }
  0x9c   :  { %2454 = vst [vmem:[#allocation0 + $0x197] sm:$0x2] %v2450_v3   ;;  %2458 = vst [vmem:[#allocation0 + $0xa0] sm:$0x1] %v2456_v4   ;;  %v2492_v10 = vld [vmem:[#allocation1 + $0x250] sm:$0x3]  }
  0x9d   :  { %2460 = vst [vmem:[#allocation0 + $0x19f] sm:$0x2] %v2456_v4   ;;  %2464 = vst [vmem:[#allocation0 + $0xa8] sm:$0x1] %v2462_v5   ;;  %v2498_v11 = vld [vmem:[#allocation1 + $0x258] sm:$0x3]  }
  0x9e   :  { %2466 = vst [vmem:[#allocation0 + $0x1a7] sm:$0x2] %v2462_v5   ;;  %2470 = vst [vmem:[#allocation0 + $0xb0] sm:$0x1] %v2468_v6   ;;  %v2504_v12 = vld [vmem:[#allocation1 + $0x260] sm:$0x3]  }
  0x9f   :  { %2472 = vst [vmem:[#allocation0 + $0x1af] sm:$0x2] %v2468_v6   ;;  %2476 = vst [vmem:[#allocation0 + $0xb8] sm:$0x1] %v2474_v7   ;;  %v2510_v13 = vld [vmem:[#allocation1 + $0x268] sm:$0x3]  }
  0xa0   :  { %2478 = vst [vmem:[#allocation0 + $0x1b7] sm:$0x2] %v2474_v7   ;;  %2482 = vst [vmem:[#allocation0 + $0x81] sm:$0x1] %v2480_v8   ;;  %v2516_v14 = vld [vmem:[#allocation1 + $0x270] sm:$0x3]  }
  0xa1   :  { %2484 = vst [vmem:[#allocation0 + $0x180] sm:$0x2] %v2480_v8   ;;  %2488 = vst [vmem:[#allocation0 + $0x89] sm:$0x1] %v2486_v9   ;;  %v2522_v15 = vld [vmem:[#allocation1 + $0x278] sm:$0x3]  }
  0xa2   :  { %2490 = vst [vmem:[#allocation0 + $0x188] sm:$0x2] %v2486_v9   ;;  %2494 = vst [vmem:[#allocation0 + $0x91] sm:$0x1] %v2492_v10   ;;  %v2528_v16 = vld [vmem:[#allocation1 + $0x280] sm:$0x3]  }
  0xa3   :  { %2496 = vst [vmem:[#allocation0 + $0x190] sm:$0x2] %v2492_v10   ;;  %2500 = vst [vmem:[#allocation0 + $0x99] sm:$0x1] %v2498_v11   ;;  %v2534_v17 = vld [vmem:[#allocation1 + $0x288] sm:$0x3]  }
  0xa4   :  { %2502 = vst [vmem:[#allocation0 + $0x198] sm:$0x2] %v2498_v11   ;;  %2506 = vst [vmem:[#allocation0 + $0xa1] sm:$0x1] %v2504_v12   ;;  %v2540_v18 = vld [vmem:[#allocation1 + $0x290] sm:$0x3]  }
  0xa5   :  { %2508 = vst [vmem:[#allocation0 + $0x1a0] sm:$0x2] %v2504_v12   ;;  %2512 = vst [vmem:[#allocation0 + $0xa9] sm:$0x1] %v2510_v13   ;;  %v2546_v19 = vld [vmem:[#allocation1 + $0x298] sm:$0x3]  }
  0xa6   :  { %2514 = vst [vmem:[#allocation0 + $0x1a8] sm:$0x2] %v2510_v13   ;;  %2518 = vst [vmem:[#allocation0 + $0xb1] sm:$0x1] %v2516_v14   ;;  %v2552_v20 = vld [vmem:[#allocation1 + $0x2a0] sm:$0x3]  }
  0xa7   :  { %2520 = vst [vmem:[#allocation0 + $0x1b0] sm:$0x2] %v2516_v14   ;;  %2524 = vst [vmem:[#allocation0 + $0xb9] sm:$0x1] %v2522_v15   ;;  %v2558_v21 = vld [vmem:[#allocation1 + $0x2a8] sm:$0x3]  }
  0xa8   :  { %2526 = vst [vmem:[#allocation0 + $0x1b8] sm:$0x2] %v2522_v15   ;;  %2530 = vst [vmem:[#allocation0 + $0x82] sm:$0x1] %v2528_v16   ;;  %v2564_v22 = vld [vmem:[#allocation1 + $0x2b0] sm:$0x3]  }
  0xa9   :  { %2532 = vst [vmem:[#allocation0 + $0x181] sm:$0x2] %v2528_v16   ;;  %2536 = vst [vmem:[#allocation0 + $0x8a] sm:$0x1] %v2534_v17   ;;  %v2570_v23 = vld [vmem:[#allocation1 + $0x2b8] sm:$0x3]  }
  0xaa   :  { %2538 = vst [vmem:[#allocation0 + $0x189] sm:$0x2] %v2534_v17   ;;  %2542 = vst [vmem:[#allocation0 + $0x92] sm:$0x1] %v2540_v18   ;;  %v2576_v24 = vld [vmem:[#allocation1 + $0x2c0] sm:$0x3]  }
  0xab   :  { %2544 = vst [vmem:[#allocation0 + $0x191] sm:$0x2] %v2540_v18   ;;  %2548 = vst [vmem:[#allocation0 + $0x9a] sm:$0x1] %v2546_v19   ;;  %v2582_v25 = vld [vmem:[#allocation1 + $0x2c8] sm:$0x3]  }
  0xac   :  { %2550 = vst [vmem:[#allocation0 + $0x199] sm:$0x2] %v2546_v19   ;;  %2554 = vst [vmem:[#allocation0 + $0xa2] sm:$0x1] %v2552_v20   ;;  %v2588_v26 = vld [vmem:[#allocation1 + $0x2d0] sm:$0x3]  }
  0xad   :  { %2556 = vst [vmem:[#allocation0 + $0x1a1] sm:$0x2] %v2552_v20   ;;  %2560 = vst [vmem:[#allocation0 + $0xaa] sm:$0x1] %v2558_v21   ;;  %v2594_v27 = vld [vmem:[#allocation1 + $0x2d8] sm:$0x3]  }
  0xae   :  { %2562 = vst [vmem:[#allocation0 + $0x1a9] sm:$0x2] %v2558_v21   ;;  %2566 = vst [vmem:[#allocation0 + $0xb2] sm:$0x1] %v2564_v22   ;;  %v2600_v28 = vld [vmem:[#allocation1 + $0x2e0] sm:$0x3]  }
  0xaf   :  { %2568 = vst [vmem:[#allocation0 + $0x1b1] sm:$0x2] %v2564_v22   ;;  %2572 = vst [vmem:[#allocation0 + $0xba] sm:$0x1] %v2570_v23   ;;  %v2606_v29 = vld [vmem:[#allocation1 + $0x2e8] sm:$0x3]  }
  0xb0   :  { %2574 = vst [vmem:[#allocation0 + $0x1b9] sm:$0x2] %v2570_v23   ;;  %2578 = vst [vmem:[#allocation0 + $0x83] sm:$0x1] %v2576_v24   ;;  %v2612_v30 = vld [vmem:[#allocation1 + $0x2f0] sm:$0x3]  }
  0xb1   :  { %2580 = vst [vmem:[#allocation0 + $0x182] sm:$0x2] %v2576_v24   ;;  %2584 = vst [vmem:[#allocation0 + $0x8b] sm:$0x1] %v2582_v25   ;;  %v2618_v31 = vld [vmem:[#allocation1 + $0x2f8] sm:$0x3]  }
  0xb2   :  { %2586 = vst [vmem:[#allocation0 + $0x18a] sm:$0x2] %v2582_v25   ;;  %2590 = vst [vmem:[#allocation0 + $0x93] sm:$0x1] %v2588_v26   ;;  %v2624_v32 = vld [vmem:[#allocation1 + $0x300] sm:$0x3]  }
  0xb3   :  { %2592 = vst [vmem:[#allocation0 + $0x192] sm:$0x2] %v2588_v26   ;;  %2596 = vst [vmem:[#allocation0 + $0x9b] sm:$0x1] %v2594_v27   ;;  %v2630_v33 = vld [vmem:[#allocation1 + $0x308] sm:$0x3]  }
  0xb4   :  { %2598 = vst [vmem:[#allocation0 + $0x19a] sm:$0x2] %v2594_v27   ;;  %2602 = vst [vmem:[#allocation0 + $0xa3] sm:$0x1] %v2600_v28   ;;  %v2636_v34 = vld [vmem:[#allocation1 + $0x310] sm:$0x3]  }
  0xb5   :  { %2604 = vst [vmem:[#allocation0 + $0x1a2] sm:$0x2] %v2600_v28   ;;  %2608 = vst [vmem:[#allocation0 + $0xab] sm:$0x1] %v2606_v29   ;;  %v2642_v35 = vld [vmem:[#allocation1 + $0x318] sm:$0x3]  }
  0xb6   :  { %2610 = vst [vmem:[#allocation0 + $0x1aa] sm:$0x2] %v2606_v29   ;;  %2614 = vst [vmem:[#allocation0 + $0xb3] sm:$0x1] %v2612_v30   ;;  %v2648_v36 = vld [vmem:[#allocation1 + $0x320] sm:$0x3]  }
  0xb7   :  { %2616 = vst [vmem:[#allocation0 + $0x1b2] sm:$0x2] %v2612_v30   ;;  %2620 = vst [vmem:[#allocation0 + $0xbb] sm:$0x1] %v2618_v31   ;;  %v2654_v37 = vld [vmem:[#allocation1 + $0x328] sm:$0x3]  }
  0xb8   :  { %2622 = vst [vmem:[#allocation0 + $0x1ba] sm:$0x2] %v2618_v31   ;;  %2626 = vst [vmem:[#allocation0 + $0xc0] sm:$0x1] %v2624_v32   ;;  %v2660_v38 = vld [vmem:[#allocation1 + $0x330] sm:$0x3]  }
  0xb9   :  { %2628 = vst [vmem:[#allocation0 + $0x1bf] sm:$0x2] %v2624_v32   ;;  %2632 = vst [vmem:[#allocation0 + $0xc8] sm:$0x1] %v2630_v33   ;;  %v2666_v39 = vld [vmem:[#allocation1 + $0x338] sm:$0x3]  }
  0xba   :  { %2634 = vst [vmem:[#allocation0 + $0x1c7] sm:$0x2] %v2630_v33   ;;  %2638 = vst [vmem:[#allocation0 + $0xd0] sm:$0x1] %v2636_v34   ;;  %v2672_v40 = vld [vmem:[#allocation1 + $0x340] sm:$0x3]  }
  0xbb   :  { %2640 = vst [vmem:[#allocation0 + $0x1cf] sm:$0x2] %v2636_v34   ;;  %2644 = vst [vmem:[#allocation0 + $0xd8] sm:$0x1] %v2642_v35   ;;  %v2678_v41 = vld [vmem:[#allocation1 + $0x348] sm:$0x3]  }
  0xbc   :  { %2646 = vst [vmem:[#allocation0 + $0x1d7] sm:$0x2] %v2642_v35   ;;  %2650 = vst [vmem:[#allocation0 + $0xe0] sm:$0x1] %v2648_v36   ;;  %v2684_v42 = vld [vmem:[#allocation1 + $0x350] sm:$0x3]  }
  0xbd   :  { %2652 = vst [vmem:[#allocation0 + $0x1df] sm:$0x2] %v2648_v36   ;;  %2656 = vst [vmem:[#allocation0 + $0xe8] sm:$0x1] %v2654_v37   ;;  %v2690_v43 = vld [vmem:[#allocation1 + $0x358] sm:$0x3]  }
  0xbe   :  { %2658 = vst [vmem:[#allocation0 + $0x1e7] sm:$0x2] %v2654_v37   ;;  %2662 = vst [vmem:[#allocation0 + $0xf0] sm:$0x1] %v2660_v38   ;;  %v2696_v44 = vld [vmem:[#allocation1 + $0x360] sm:$0x3]  }
  0xbf   :  { %2664 = vst [vmem:[#allocation0 + $0x1ef] sm:$0x2] %v2660_v38   ;;  %2668 = vst [vmem:[#allocation0 + $0xf8] sm:$0x1] %v2666_v39   ;;  %v2702_v45 = vld [vmem:[#allocation1 + $0x368] sm:$0x3]  }
  0xc0   :  { %2670 = vst [vmem:[#allocation0 + $0x1f7] sm:$0x2] %v2666_v39   ;;  %2674 = vst [vmem:[#allocation0 + $0xc1] sm:$0x1] %v2672_v40   ;;  %v2708_v46 = vld [vmem:[#allocation1 + $0x370] sm:$0x3]  }
  0xc1   :  { %2676 = vst [vmem:[#allocation0 + $0x1c0] sm:$0x2] %v2672_v40   ;;  %2680 = vst [vmem:[#allocation0 + $0xc9] sm:$0x1] %v2678_v41   ;;  %v2714_v47 = vld [vmem:[#allocation1 + $0x378] sm:$0x3]  }
  0xc2   :  { %2682 = vst [vmem:[#allocation0 + $0x1c8] sm:$0x2] %v2678_v41   ;;  %2686 = vst [vmem:[#allocation0 + $0xd1] sm:$0x1] %v2684_v42   ;;  %v2720_v48 = vld [vmem:[#allocation1 + $0x380] sm:$0x3]  }
  0xc3   :  { %2688 = vst [vmem:[#allocation0 + $0x1d0] sm:$0x2] %v2684_v42   ;;  %2692 = vst [vmem:[#allocation0 + $0xd9] sm:$0x1] %v2690_v43   ;;  %v2726_v49 = vld [vmem:[#allocation1 + $0x388] sm:$0x3]  }
  0xc4   :  { %2694 = vst [vmem:[#allocation0 + $0x1d8] sm:$0x2] %v2690_v43   ;;  %2698 = vst [vmem:[#allocation0 + $0xe1] sm:$0x1] %v2696_v44   ;;  %v2732_v50 = vld [vmem:[#allocation1 + $0x390] sm:$0x3]  }
  0xc5   :  { %2700 = vst [vmem:[#allocation0 + $0x1e0] sm:$0x2] %v2696_v44   ;;  %2704 = vst [vmem:[#allocation0 + $0xe9] sm:$0x1] %v2702_v45   ;;  %v2738_v51 = vld [vmem:[#allocation1 + $0x398] sm:$0x3]  }
  0xc6   :  { %2706 = vst [vmem:[#allocation0 + $0x1e8] sm:$0x2] %v2702_v45   ;;  %2710 = vst [vmem:[#allocation0 + $0xf1] sm:$0x1] %v2708_v46   ;;  %v2744_v52 = vld [vmem:[#allocation1 + $0x3a0] sm:$0x3]  }
  0xc7   :  { %2712 = vst [vmem:[#allocation0 + $0x1f0] sm:$0x2] %v2708_v46   ;;  %2716 = vst [vmem:[#allocation0 + $0xf9] sm:$0x1] %v2714_v47   ;;  %v2750_v53 = vld [vmem:[#allocation1 + $0x3a8] sm:$0x3]  }
  0xc8   :  { %2718 = vst [vmem:[#allocation0 + $0x1f8] sm:$0x2] %v2714_v47   ;;  %2722 = vst [vmem:[#allocation0 + $0xc2] sm:$0x1] %v2720_v48   ;;  %v2756_v54 = vld [vmem:[#allocation1 + $0x3b0] sm:$0x3]  }
  0xc9   :  { %2724 = vst [vmem:[#allocation0 + $0x1c1] sm:$0x2] %v2720_v48   ;;  %2728 = vst [vmem:[#allocation0 + $0xca] sm:$0x1] %v2726_v49   ;;  %v2762_v55 = vld [vmem:[#allocation1 + $0x3b8] sm:$0x3]  }
  0xca   :  { %2730 = vst [vmem:[#allocation0 + $0x1c9] sm:$0x2] %v2726_v49   ;;  %2734 = vst [vmem:[#allocation0 + $0xd2] sm:$0x1] %v2732_v50   ;;  %v2768_v56 = vld [vmem:[#allocation1 + $0x3c0] sm:$0x3]  }
  0xcb   :  { %2736 = vst [vmem:[#allocation0 + $0x1d1] sm:$0x2] %v2732_v50   ;;  %2740 = vst [vmem:[#allocation0 + $0xda] sm:$0x1] %v2738_v51   ;;  %v2774_v57 = vld [vmem:[#allocation1 + $0x3c8] sm:$0x3]  }
  0xcc   :  { %2742 = vst [vmem:[#allocation0 + $0x1d9] sm:$0x2] %v2738_v51   ;;  %2746 = vst [vmem:[#allocation0 + $0xe2] sm:$0x1] %v2744_v52   ;;  %v2780_v58 = vld [vmem:[#allocation1 + $0x3d0] sm:$0x3]  }
  0xcd   :  { %2748 = vst [vmem:[#allocation0 + $0x1e1] sm:$0x2] %v2744_v52   ;;  %2752 = vst [vmem:[#allocation0 + $0xea] sm:$0x1] %v2750_v53   ;;  %v2786_v59 = vld [vmem:[#allocation1 + $0x3d8] sm:$0x3]  }
  0xce   :  { %2754 = vst [vmem:[#allocation0 + $0x1e9] sm:$0x2] %v2750_v53   ;;  %2758 = vst [vmem:[#allocation0 + $0xf2] sm:$0x1] %v2756_v54   ;;  %v2792_v60 = vld [vmem:[#allocation1 + $0x3e0] sm:$0x3]  }
  0xcf   :  { %2760 = vst [vmem:[#allocation0 + $0x1f1] sm:$0x2] %v2756_v54   ;;  %2764 = vst [vmem:[#allocation0 + $0xfa] sm:$0x1] %v2762_v55   ;;  %v2798_v61 = vld [vmem:[#allocation1 + $0x3e8] sm:$0x3]  }
  0xd0   :  { %2766 = vst [vmem:[#allocation0 + $0x1f9] sm:$0x2] %v2762_v55   ;;  %2770 = vst [vmem:[#allocation0 + $0xc3] sm:$0x1] %v2768_v56   ;;  %v2804_v62 = vld [vmem:[#allocation1 + $0x3f0] sm:$0x3]  }
  0xd1   :  { %2772 = vst [vmem:[#allocation0 + $0x1c2] sm:$0x2] %v2768_v56   ;;  %2776 = vst [vmem:[#allocation0 + $0xcb] sm:$0x1] %v2774_v57   ;;  %v2810_v63 = vld [vmem:[#allocation1 + $0x3f8] sm:$0x3]  }
  0xd2   :  { %2778 = vst [vmem:[#allocation0 + $0x1ca] sm:$0x2] %v2774_v57   ;;  %2782 = vst [vmem:[#allocation0 + $0xd3] sm:$0x1] %v2780_v58   ;;  %v2819_v0 = vld [vmem:[#allocation0] sm:$0xf] }
  0xd3   :  { %2784 = vst [vmem:[#allocation0 + $0x1d2] sm:$0x2] %v2780_v58   ;;  %2788 = vst [vmem:[#allocation0 + $0xdb] sm:$0x1] %v2786_v59   ;;  %v3642_v1 = vmov 0.0  }
  0xd4   :  { %2790 = vst [vmem:[#allocation0 + $0x1da] sm:$0x2] %v2786_v59   ;;  %2794 = vst [vmem:[#allocation0 + $0xe3] sm:$0x1] %v2792_v60   ;;  %v2820_v2 = vpack.c.bf16 %v3642_v1, %v2819_v0  ;;  %v2824_v3 = vld [vmem:[#allocation0 + $0x8] sm:$0xf] }
  0xd5   :  { %2796 = vst [vmem:[#allocation0 + $0x1e2] sm:$0x2] %v2792_v60   ;;  %2800 = vst [vmem:[#allocation0 + $0xeb] sm:$0x1] %v2798_v61   ;;  %v2830_v4 = vld [vmem:[#allocation0 + $0x10] sm:$0xf]  ;;  %v2825_v6 = vpack.c.bf16 %v3642_v1, %v2824_v3 }
  0xd6   :  { %2802 = vst [vmem:[#allocation0 + $0x1ea] sm:$0x2] %v2798_v61   ;;  %2806 = vst [vmem:[#allocation0 + $0xf3] sm:$0x1] %v2804_v62   ;;  %v2837_v5 = vld [vmem:[#allocation0 + $0x18] sm:$0xf]  ;;  %v2831_v7 = vpack.c.bf16 %v3642_v1, %v2830_v4 }
  0xd7   :  { %2808 = vst [vmem:[#allocation0 + $0x1f2] sm:$0x2] %v2804_v62   ;;  %2812 = vst [vmem:[#allocation0 + $0xfb] sm:$0x1] %v2810_v63   ;;  %v2838_v8 = vpack.c.bf16 %v3642_v1, %v2837_v5  ;;  %v2844_v9 = vld [vmem:[#allocation0 + $0x20] sm:$0xf] }
  0xd8   :  { %2814 = vst [vmem:[#allocation0 + $0x1fa] sm:$0x2] %v2810_v63   ;;  %v2851_v10 = vld [vmem:[#allocation0 + $0x28] sm:$0xf]  ;;  %v2858_v11 = vld [vmem:[#allocation0 + $0x30] sm:$0xf]  ;;  %v2845_v12 = vpack.c.bf16 %v3642_v1, %v2844_v9 }
  0xd9   :  { %2822 = vst [vmem:[%s4294_s1] sm:$0x3] %v2820_v2  ;;  %v2852_v13 = vpack.c.bf16 %v3642_v1, %v2851_v10  ;;  %v2859_v14 = vpack.c.bf16 %v3642_v1, %v2858_v11  ;;  %v2865_v15 = vld [vmem:[#allocation0 + $0x38] sm:$0xf]  ;;  %v2872_v16 = vld [vmem:[#allocation0 + $0x40] sm:$0xf] }
  0xda   :  { %v2879_v17 = vld [vmem:[#allocation0 + $0x48] sm:$0xf]  ;;  %3578 = vst [vmem:[%s4294_s1 + $0x2] sm:$0x3] %v2825_v6  ;;  %3579 = vst [vmem:[%s4294_s1 + $0x4] sm:$0x3] %v2831_v7  ;;  %v2866_v18 = vpack.c.bf16 %v3642_v1, %v2865_v15  ;;  %v2873_v19 = vpack.c.bf16 %v3642_v1, %v2872_v16 }
  0xdb   :  { %3580 = vst [vmem:[%s4294_s1 + $0x6] sm:$0x3] %v2838_v8  ;;  %v2880_v20 = vpack.c.bf16 %v3642_v1, %v2879_v17  ;;  %v2886_v21 = vld [vmem:[#allocation0 + $0x50] sm:$0xf]  ;;  %v2893_v22 = vld [vmem:[#allocation0 + $0x58] sm:$0xf] }
  0xdc   :  { %v2900_v23 = vld [vmem:[#allocation0 + $0x60] sm:$0xf]  ;;  %3581 = vst [vmem:[%s4294_s1 + $0x8] sm:$0x3] %v2845_v12  ;;  %3582 = vst [vmem:[%s4294_s1 + $0xa] sm:$0x3] %v2852_v13  ;;  %v2887_v24 = vpack.c.bf16 %v3642_v1, %v2886_v21  ;;  %v2894_v25 = vpack.c.bf16 %v3642_v1, %v2893_v22 }
  0xdd   :  { %3583 = vst [vmem:[%s4294_s1 + $0xc] sm:$0x3] %v2859_v14  ;;  %v2901_v26 = vpack.c.bf16 %v3642_v1, %v2900_v23  ;;  %v2907_v27 = vld [vmem:[#allocation0 + $0x68] sm:$0xf]  ;;  %v2914_v28 = vld [vmem:[#allocation0 + $0x70] sm:$0xf] }
  0xde   :  { %v2921_v29 = vld [vmem:[#allocation0 + $0x78] sm:$0xf]  ;;  %3584 = vst [vmem:[%s4294_s1 + $0xe] sm:$0x3] %v2866_v18  ;;  %3585 = vst [vmem:[%s4294_s1 + $0x10] sm:$0x3] %v2873_v19  ;;  %v2908_v30 = vpack.c.bf16 %v3642_v1, %v2907_v27  ;;  %v2915_v31 = vpack.c.bf16 %v3642_v1, %v2914_v28 }
  0xdf   :  { %3586 = vst [vmem:[%s4294_s1 + $0x12] sm:$0x3] %v2880_v20  ;;  %v2922_v32 = vpack.c.bf16 %v3642_v1, %v2921_v29  ;;  %v2928_v33 = vld [vmem:[#allocation0 + $0x80] sm:$0xf]  ;;  %v2935_v34 = vld [vmem:[#allocation0 + $0x88] sm:$0xf] }
  0xe0   :  { %v2942_v35 = vld [vmem:[#allocation0 + $0x90] sm:$0xf]  ;;  %3587 = vst [vmem:[%s4294_s1 + $0x14] sm:$0x3] %v2887_v24  ;;  %3588 = vst [vmem:[%s4294_s1 + $0x16] sm:$0x3] %v2894_v25  ;;  %v2929_v36 = vpack.c.bf16 %v3642_v1, %v2928_v33  ;;  %v2936_v37 = vpack.c.bf16 %v3642_v1, %v2935_v34 }
  0xe1   :  { %3589 = vst [vmem:[%s4294_s1 + $0x18] sm:$0x3] %v2901_v26  ;;  %v2943_v38 = vpack.c.bf16 %v3642_v1, %v2942_v35  ;;  %v2949_v39 = vld [vmem:[#allocation0 + $0x98] sm:$0xf]  ;;  %v2956_v40 = vld [vmem:[#allocation0 + $0xa0] sm:$0xf] }
  0xe2   :  { %v2963_v41 = vld [vmem:[#allocation0 + $0xa8] sm:$0xf]  ;;  %3590 = vst [vmem:[%s4294_s1 + $0x1a] sm:$0x3] %v2908_v30  ;;  %3591 = vst [vmem:[%s4294_s1 + $0x1c] sm:$0x3] %v2915_v31  ;;  %v2950_v42 = vpack.c.bf16 %v3642_v1, %v2949_v39  ;;  %v2957_v43 = vpack.c.bf16 %v3642_v1, %v2956_v40 }
  0xe3   :  { %3592 = vst [vmem:[%s4294_s1 + $0x1e] sm:$0x3] %v2922_v32  ;;  %v2964_v44 = vpack.c.bf16 %v3642_v1, %v2963_v41  ;;  %v2970_v45 = vld [vmem:[#allocation0 + $0xb0] sm:$0xf]  ;;  %v2977_v46 = vld [vmem:[#allocation0 + $0xb8] sm:$0xf] }
  0xe4   :  { %v2984_v47 = vld [vmem:[#allocation0 + $0xc0] sm:$0xf]  ;;  %3593 = vst [vmem:[%s4294_s1 + $0x20] sm:$0x3] %v2929_v36  ;;  %3594 = vst [vmem:[%s4294_s1 + $0x22] sm:$0x3] %v2936_v37  ;;  %v2971_v48 = vpack.c.bf16 %v3642_v1, %v2970_v45  ;;  %v2978_v49 = vpack.c.bf16 %v3642_v1, %v2977_v46 }
  0xe5   :  { %3595 = vst [vmem:[%s4294_s1 + $0x24] sm:$0x3] %v2943_v38  ;;  %v2985_v50 = vpack.c.bf16 %v3642_v1, %v2984_v47  ;;  %v2991_v51 = vld [vmem:[#allocation0 + $0xc8] sm:$0xf]  ;;  %v2998_v52 = vld [vmem:[#allocation0 + $0xd0] sm:$0xf] }
  0xe6   :  { %v3005_v53 = vld [vmem:[#allocation0 + $0xd8] sm:$0xf]  ;;  %3596 = vst [vmem:[%s4294_s1 + $0x26] sm:$0x3] %v2950_v42  ;;  %3597 = vst [vmem:[%s4294_s1 + $0x28] sm:$0x3] %v2957_v43  ;;  %v2992_v54 = vpack.c.bf16 %v3642_v1, %v2991_v51  ;;  %v2999_v55 = vpack.c.bf16 %v3642_v1, %v2998_v52 }
  0xe7   :  { %3598 = vst [vmem:[%s4294_s1 + $0x2a] sm:$0x3] %v2964_v44  ;;  %v3006_v56 = vpack.c.bf16 %v3642_v1, %v3005_v53  ;;  %v3012_v57 = vld [vmem:[#allocation0 + $0xe0] sm:$0xf]  ;;  %v3019_v58 = vld [vmem:[#allocation0 + $0xe8] sm:$0xf] }
  0xe8   :  { %v3026_v59 = vld [vmem:[#allocation0 + $0xf0] sm:$0xf]  ;;  %3599 = vst [vmem:[%s4294_s1 + $0x2c] sm:$0x3] %v2971_v48  ;;  %3600 = vst [vmem:[%s4294_s1 + $0x2e] sm:$0x3] %v2978_v49  ;;  %v3013_v60 = vpack.c.bf16 %v3642_v1, %v3012_v57  ;;  %v3020_v61 = vpack.c.bf16 %v3642_v1, %v3019_v58 }
  0xe9   :  { %3601 = vst [vmem:[%s4294_s1 + $0x30] sm:$0x3] %v2985_v50  ;;  %v3027_v62 = vpack.c.bf16 %v3642_v1, %v3026_v59  ;;  %v3033_v63 = vld [vmem:[#allocation0 + $0xf8] sm:$0xf]  ;;  %v3040_v0 = vld [vmem:[#allocation0 + $0x100] sm:$0xf] }
  0xea   :  { %v3047_v2 = vld [vmem:[#allocation0 + $0x108] sm:$0xf]  ;;  %3602 = vst [vmem:[%s4294_s1 + $0x32] sm:$0x3] %v2992_v54  ;;  %3603 = vst [vmem:[%s4294_s1 + $0x34] sm:$0x3] %v2999_v55  ;;  %v3034_v3 = vpack.c.bf16 %v3642_v1, %v3033_v63  ;;  %v3041_v4 = vpack.c.bf16 %v3642_v1, %v3040_v0 }
  0xeb   :  { %3604 = vst [vmem:[%s4294_s1 + $0x36] sm:$0x3] %v3006_v56  ;;  %v3048_v5 = vpack.c.bf16 %v3642_v1, %v3047_v2  ;;  %v3054_v6 = vld [vmem:[#allocation0 + $0x110] sm:$0xf]  ;;  %v3061_v7 = vld [vmem:[#allocation0 + $0x118] sm:$0xf] }
  0xec   :  { %v3068_v8 = vld [vmem:[#allocation0 + $0x120] sm:$0xf]  ;;  %3605 = vst [vmem:[%s4294_s1 + $0x38] sm:$0x3] %v3013_v60  ;;  %3606 = vst [vmem:[%s4294_s1 + $0x3a] sm:$0x3] %v3020_v61  ;;  %v3055_v9 = vpack.c.bf16 %v3642_v1, %v3054_v6  ;;  %v3062_v10 = vpack.c.bf16 %v3642_v1, %v3061_v7 }
  0xed   :  { %3607 = vst [vmem:[%s4294_s1 + $0x3c] sm:$0x3] %v3027_v62  ;;  %v3069_v11 = vpack.c.bf16 %v3642_v1, %v3068_v8  ;;  %v3075_v12 = vld [vmem:[#allocation0 + $0x128] sm:$0xf]  ;;  %v3082_v13 = vld [vmem:[#allocation0 + $0x130] sm:$0xf] }
  0xee   :  { %v3089_v14 = vld [vmem:[#allocation0 + $0x138] sm:$0xf]  ;;  %3608 = vst [vmem:[%s4294_s1 + $0x3e] sm:$0x3] %v3034_v3  ;;  %3609 = vst [vmem:[%s4294_s1 + $0x40] sm:$0x3] %v3041_v4  ;;  %v3076_v15 = vpack.c.bf16 %v3642_v1, %v3075_v12  ;;  %v3083_v16 = vpack.c.bf16 %v3642_v1, %v3082_v13 }
  0xef   :  { %3610 = vst [vmem:[%s4294_s1 + $0x42] sm:$0x3] %v3048_v5  ;;  %v3090_v17 = vpack.c.bf16 %v3642_v1, %v3089_v14  ;;  %v3096_v18 = vld [vmem:[#allocation0 + $0x140] sm:$0xf]  ;;  %v3103_v19 = vld [vmem:[#allocation0 + $0x148] sm:$0xf] }
  0xf0   :  { %v3110_v20 = vld [vmem:[#allocation0 + $0x150] sm:$0xf]  ;;  %3611 = vst [vmem:[%s4294_s1 + $0x44] sm:$0x3] %v3055_v9  ;;  %3612 = vst [vmem:[%s4294_s1 + $0x46] sm:$0x3] %v3062_v10  ;;  %v3097_v21 = vpack.c.bf16 %v3642_v1, %v3096_v18  ;;  %v3104_v22 = vpack.c.bf16 %v3642_v1, %v3103_v19 }
  0xf1   :  { %3613 = vst [vmem:[%s4294_s1 + $0x48] sm:$0x3] %v3069_v11  ;;  %v3111_v23 = vpack.c.bf16 %v3642_v1, %v3110_v20  ;;  %v3117_v24 = vld [vmem:[#allocation0 + $0x158] sm:$0xf]  ;;  %v3124_v25 = vld [vmem:[#allocation0 + $0x160] sm:$0xf] }
  0xf2   :  { %v3131_v26 = vld [vmem:[#allocation0 + $0x168] sm:$0xf]  ;;  %3614 = vst [vmem:[%s4294_s1 + $0x4a] sm:$0x3] %v3076_v15  ;;  %3615 = vst [vmem:[%s4294_s1 + $0x4c] sm:$0x3] %v3083_v16  ;;  %v3118_v27 = vpack.c.bf16 %v3642_v1, %v3117_v24  ;;  %v3125_v28 = vpack.c.bf16 %v3642_v1, %v3124_v25 }
  0xf3   :  { %3616 = vst [vmem:[%s4294_s1 + $0x4e] sm:$0x3] %v3090_v17  ;;  %v3132_v29 = vpack.c.bf16 %v3642_v1, %v3131_v26  ;;  %v3138_v30 = vld [vmem:[#allocation0 + $0x170] sm:$0xf]  ;;  %v3145_v31 = vld [vmem:[#allocation0 + $0x178] sm:$0xf] }
  0xf4   :  { %v3152_v32 = vld [vmem:[#allocation0 + $0x180] sm:$0xf]  ;;  %3617 = vst [vmem:[%s4294_s1 + $0x50] sm:$0x3] %v3097_v21  ;;  %3618 = vst [vmem:[%s4294_s1 + $0x52] sm:$0x3] %v3104_v22  ;;  %v3139_v33 = vpack.c.bf16 %v3642_v1, %v3138_v30  ;;  %v3146_v34 = vpack.c.bf16 %v3642_v1, %v3145_v31 }
  0xf5   :  { %3619 = vst [vmem:[%s4294_s1 + $0x54] sm:$0x3] %v3111_v23  ;;  %v3153_v35 = vpack.c.bf16 %v3642_v1, %v3152_v32  ;;  %v3159_v36 = vld [vmem:[#allocation0 + $0x188] sm:$0xf]  ;;  %v3166_v37 = vld [vmem:[#allocation0 + $0x190] sm:$0xf] }
  0xf6   :  { %v3173_v38 = vld [vmem:[#allocation0 + $0x198] sm:$0xf]  ;;  %3620 = vst [vmem:[%s4294_s1 + $0x56] sm:$0x3] %v3118_v27  ;;  %3621 = vst [vmem:[%s4294_s1 + $0x58] sm:$0x3] %v3125_v28  ;;  %v3160_v39 = vpack.c.bf16 %v3642_v1, %v3159_v36  ;;  %v3167_v40 = vpack.c.bf16 %v3642_v1, %v3166_v37 }
  0xf7   :  { %3622 = vst [vmem:[%s4294_s1 + $0x5a] sm:$0x3] %v3132_v29  ;;  %v3174_v41 = vpack.c.bf16 %v3642_v1, %v3173_v38  ;;  %v3180_v42 = vld [vmem:[#allocation0 + $0x1a0] sm:$0xf]  ;;  %v3187_v43 = vld [vmem:[#allocation0 + $0x1a8] sm:$0xf] }
  0xf8   :  { %v3194_v44 = vld [vmem:[#allocation0 + $0x1b0] sm:$0xf]  ;;  %3623 = vst [vmem:[%s4294_s1 + $0x5c] sm:$0x3] %v3139_v33  ;;  %3624 = vst [vmem:[%s4294_s1 + $0x5e] sm:$0x3] %v3146_v34  ;;  %v3181_v45 = vpack.c.bf16 %v3642_v1, %v3180_v42  ;;  %v3188_v46 = vpack.c.bf16 %v3642_v1, %v3187_v43 }
  0xf9   :  { %3625 = vst [vmem:[%s4294_s1 + $0x60] sm:$0x3] %v3153_v35  ;;  %v3195_v47 = vpack.c.bf16 %v3642_v1, %v3194_v44  ;;  %v3201_v48 = vld [vmem:[#allocation0 + $0x1b8] sm:$0xf]  ;;  %v3208_v49 = vld [vmem:[#allocation0 + $0x1c0] sm:$0xf] }
  0xfa   :  { %v3215_v50 = vld [vmem:[#allocation0 + $0x1c8] sm:$0xf]  ;;  %3626 = vst [vmem:[%s4294_s1 + $0x62] sm:$0x3] %v3160_v39  ;;  %3627 = vst [vmem:[%s4294_s1 + $0x64] sm:$0x3] %v3167_v40  ;;  %v3202_v51 = vpack.c.bf16 %v3642_v1, %v3201_v48  ;;  %v3209_v52 = vpack.c.bf16 %v3642_v1, %v3208_v49 }
  0xfb   :  { %3628 = vst [vmem:[%s4294_s1 + $0x66] sm:$0x3] %v3174_v41  ;;  %v3216_v53 = vpack.c.bf16 %v3642_v1, %v3215_v50  ;;  %v3222_v54 = vld [vmem:[#allocation0 + $0x1d0] sm:$0xf]  ;;  %v3229_v55 = vld [vmem:[#allocation0 + $0x1d8] sm:$0xf] }
  0xfc   :  { %v3236_v56 = vld [vmem:[#allocation0 + $0x1e0] sm:$0xf]  ;;  %3629 = vst [vmem:[%s4294_s1 + $0x68] sm:$0x3] %v3181_v45  ;;  %3630 = vst [vmem:[%s4294_s1 + $0x6a] sm:$0x3] %v3188_v46  ;;  %v3223_v57 = vpack.c.bf16 %v3642_v1, %v3222_v54  ;;  %v3230_v58 = vpack.c.bf16 %v3642_v1, %v3229_v55 }
  0xfd   :  { %3631 = vst [vmem:[%s4294_s1 + $0x6c] sm:$0x3] %v3195_v47  ;;  %v3237_v59 = vpack.c.bf16 %v3642_v1, %v3236_v56  ;;  %v3243_v60 = vld [vmem:[#allocation0 + $0x1e8] sm:$0xf]  ;;  %v3250_v61 = vld [vmem:[#allocation0 + $0x1f0] sm:$0xf] }
  0xfe   :  { %v3257_v62 = vld [vmem:[#allocation0 + $0x1f8] sm:$0xf]  ;;  %3632 = vst [vmem:[%s4294_s1 + $0x6e] sm:$0x3] %v3202_v51  ;;  %3633 = vst [vmem:[%s4294_s1 + $0x70] sm:$0x3] %v3209_v52  ;;  %v3244_v63 = vpack.c.bf16 %v3642_v1, %v3243_v60  ;;  %v3251_v0 = vpack.c.bf16 %v3642_v1, %v3250_v61 }
  0xff   :  { %3634 = vst [vmem:[%s4294_s1 + $0x72] sm:$0x3] %v3216_v53  ;;  %v3258_v1 = vpack.c.bf16 %v3642_v1, %v3257_v62  ;;  %3635 = vst [vmem:[%s4294_s1 + $0x74] sm:$0x3] %v3223_v57 }
 0x100   :  { %3636 = vst [vmem:[%s4294_s1 + $0x76] sm:$0x3] %v3230_v58  ;;  %3637 = vst [vmem:[%s4294_s1 + $0x78] sm:$0x3] %v3237_v59 }
 0x101   :  { %3638 = vst [vmem:[%s4294_s1 + $0x7a] sm:$0x3] %v3244_v63  ;;  %3639 = vst [vmem:[%s4294_s1 + $0x7c] sm:$0x3] %v3251_v0 }
 0x102   :  { %3640 = vst [vmem:[%s4294_s1 + $0x7e] sm:$0x3] %v3258_v1 }

// kernel: generator_forward.6
= control target key start
LH: loop header
LB: loop body
LE: loop exit
PB: predicated region body
PF: predicated region fallthrough
CT: control target
= control target key end

     0   :  { %s10662_s15 = smov 0   ;;  %s10664_s16 = smov 0   ;;  %s12498_s0 = inlined_call_operand.vmem [shape: bf16[4,32,4096], index: 0, kind: input, shape index: {}]   ;;  %s12499_s1 = inlined_call_operand.vmem [shape: bf16[4,4096,512], index: 1, kind: input, shape index: {}]   ;;  %s12500_s2 = inlined_call_operand.vmem [shape: f32[1,512], index: 2, kind: input, shape index: {}]   ;;  %s12501_s3 = inlined_call_operand.vmem [shape: f32[1,512], index: 3, kind: input, shape index: {}]   ;;  %s12502_s4 = inlined_call_operand.vmem [shape: bf16[4,32,512], index: 4, kind: output, shape index: {}]  }
   0x1   :  { %s10666_s17 = smov 0   ;;  %s10668_s18 = smov 0  }
   0x2   :  { %s10670_s19 = smov 0   ;;  %s10672_s20 = smov 0  }
   0x3   :  { %s10674_s21 = smov 0  }
   0x4 LB: > { %s26_s22 = sadd.s32 1, %s10627_s19  ;;  %s33_s23 = sadd.s32 1, %s10631_s20  ;;  %s10635_s21 = sphi %s10674_s21, %s14_s21   ;;  %s10631_s20 = sphi %s10672_s20, %s12509_s20   ;;  %s10627_s19 = sphi %s10670_s19, %s12508_s19   ;;  %s10623_s18 = sphi %s10668_s18, %s12507_s18   ;;  %s10619_s17 = sphi %s10666_s17, %s12506_s17   ;;  %s10615_s16 = sphi %s10664_s16, %s12505_s16   ;;  %s10611_s15 = sphi %s10662_s15, %s12504_s15  }
   0x5   : > { %p27_p0 = scmp.ge.s32.totalorder %s26_s22, 2  ;;  %s9031_s24 = sadd.s32 4294967295, %s10635_s21  }
   0x6   : > { %p77_p1 = scmp.ne.s32.totalorder %s10615_s16, %s10611_s15  ;;  %p78_p2 = scmp.eq.s32.totalorder %s10635_s21, 0 }
   0x7   : > { %s12511_s22 = smov (%p27_p0, %s26_s22), 0  ;;  %s12513_s23 = smov (!%p27_p0, %s33_s23), %s10631_s20 }
   0x8   : > { %p35_p3 = scmp.ge.s32.totalorder %s12513_s23, 4  ;;  %p163_p4 = scmp.eq.s32.totalorder %s9031_s24, 7 }
   0x9   : > { %s66_s25 = ssub.s32 %s10627_s19, %s12511_s22  ;;  %p79_p5 = por %p78_p2, %p77_p1 }
   0xa   : > { %s12515_s23 = smov (%p35_p3, %s12513_s23), 0  ;;  %p10710_p6 = por %p163_p4, %p77_p1 }
   0xb   : > { %s65_s27 = ssub.s32 %s10631_s20, %s12515_s23  ;;  %s70_s29 = sadd.s32 1, %s10615_s16 }
   0xc   : > { %s67_s28 = sor.u32 %s66_s25, %s65_s27  ;;  %p9034_p8 = scmp.ge.s32.totalorder %s10635_s21, 8 }
   0xd   : > { %p68_p7 = scmp.eq.s32.totalorder %s67_s28, 0 }
   0xe   : > { %185 = sbr.rel (%p9034_p8) target bundleno = 284 (0x11c), region = 16 }
   0xf   : > { %s10718_s30 = scalar_select %p68_p7, %s10615_s16, %s70_s29  }
  0x15   : > { %202 = sbr.rel (!%p79_p5) target bundleno = 284 (0x11c), region = 24  ;;  %s204_s5 = sand.u32 (%p79_p5), 1, %s10615_s16  }
  0x16   : > { %s9036_s6 = sshll.u32 (%p79_p5), %s10627_s19, 1  ;;  %s9035_s7 = sshll.u32 (%p79_p5), %s204_s5, 12 }
  0x17   : > { %s9037_s8 = sshll.u32 (%p79_p5), %s10631_s20, 11  ;;  %s10732_s14 = scalar_lea.vmem (%p79_p5), [#allocation2], %s9035_s7 }
  0x18   : > { %s209_s9 = sadd.s32 (%p79_p5), %s9037_s8, %s9036_s6 }
  0x19   : > { %s9038_s10 = sshll.u32 (%p79_p5), %s209_s9, 2 }
  0x1a   : > { %s10727_s13 = scalar_lea.vmem (%p79_p5), %s12499_s1, %s9038_s10 }
  0x1b   : > { %v1264_v0 = vld [vmem:[%s10727_s13] sm:$0xff] (%p79_p5)  ;;  %v1266_v1 = vld [vmem:[%s10727_s13 + $0x10] sm:$0xff] (%p79_p5) }
  0x1c   : > { %v1268_v2 = vld [vmem:[%s10727_s13 + $0x20] sm:$0xff]  ;;  %1265 = vst [vmem:[%s10732_s14] sm:$0xff] %v1264_v0  ;;  %1267 = vst [vmem:[%s10732_s14 + $0x8] sm:$0xff] %v1266_v1  ;;  %v1270_v3 = vld [vmem:[%s10727_s13 + $0x30] sm:$0xff] }
  0x1d   : > { %1269 = vst [vmem:[%s10732_s14 + $0x10] sm:$0xff] %v1268_v2  ;;  %v1272_v4 = vld [vmem:[%s10727_s13 + $0x40] sm:$0xff]  ;;  %v1274_v5 = vld [vmem:[%s10727_s13 + $0x50] sm:$0xff]  ;;  %1271 = vst [vmem:[%s10732_s14 + $0x18] sm:$0xff] %v1270_v3 }
  0x1e   : > { %1273 = vst [vmem:[%s10732_s14 + $0x20] sm:$0xff] %v1272_v4  ;;  %1275 = vst [vmem:[%s10732_s14 + $0x28] sm:$0xff] %v1274_v5  ;;  %v1276_v6 = vld [vmem:[%s10727_s13 + $0x60] sm:$0xff]  ;;  %v1278_v7 = vld [vmem:[%s10727_s13 + $0x70] sm:$0xff] }
  0x1f   : > { %v1280_v8 = vld [vmem:[%s10727_s13 + $0x80] sm:$0xff]  ;;  %1277 = vst [vmem:[%s10732_s14 + $0x30] sm:$0xff] %v1276_v6  ;;  %1279 = vst [vmem:[%s10732_s14 + $0x38] sm:$0xff] %v1278_v7  ;;  %v1282_v9 = vld [vmem:[%s10727_s13 + $0x90] sm:$0xff] }
  0x20   : > { %1281 = vst [vmem:[%s10732_s14 + $0x40] sm:$0xff] %v1280_v8  ;;  %v1284_v10 = vld [vmem:[%s10727_s13 + $0xa0] sm:$0xff]  ;;  %v1286_v11 = vld [vmem:[%s10727_s13 + $0xb0] sm:$0xff]  ;;  %1283 = vst [vmem:[%s10732_s14 + $0x48] sm:$0xff] %v1282_v9 }
  0x21   : > { %1285 = vst [vmem:[%s10732_s14 + $0x50] sm:$0xff] %v1284_v10  ;;  %1287 = vst [vmem:[%s10732_s14 + $0x58] sm:$0xff] %v1286_v11  ;;  %v1288_v12 = vld [vmem:[%s10727_s13 + $0xc0] sm:$0xff]  ;;  %v1290_v13 = vld [vmem:[%s10727_s13 + $0xd0] sm:$0xff] }
  0x22   : > { %v1292_v14 = vld [vmem:[%s10727_s13 + $0xe0] sm:$0xff]  ;;  %1289 = vst [vmem:[%s10732_s14 + $0x60] sm:$0xff] %v1288_v12  ;;  %1291 = vst [vmem:[%s10732_s14 + $0x68] sm:$0xff] %v1290_v13  ;;  %v1294_v15 = vld [vmem:[%s10727_s13 + $0xf0] sm:$0xff] }
  0x23   : > { %1293 = vst [vmem:[%s10732_s14 + $0x70] sm:$0xff] %v1292_v14  ;;  %v1296_v16 = vld [vmem:[%s10727_s13 + $0x100] sm:$0xff]  ;;  %v1298_v17 = vld [vmem:[%s10727_s13 + $0x110] sm:$0xff]  ;;  %1295 = vst [vmem:[%s10732_s14 + $0x78] sm:$0xff] %v1294_v15 }
  0x24   : > { %1297 = vst [vmem:[%s10732_s14 + $0x80] sm:$0xff] %v1296_v16  ;;  %1299 = vst [vmem:[%s10732_s14 + $0x88] sm:$0xff] %v1298_v17  ;;  %v1300_v18 = vld [vmem:[%s10727_s13 + $0x120] sm:$0xff]  ;;  %v1302_v19 = vld [vmem:[%s10727_s13 + $0x130] sm:$0xff] }
  0x25   : > { %v1304_v20 = vld [vmem:[%s10727_s13 + $0x140] sm:$0xff]  ;;  %1301 = vst [vmem:[%s10732_s14 + $0x90] sm:$0xff] %v1300_v18  ;;  %1303 = vst [vmem:[%s10732_s14 + $0x98] sm:$0xff] %v1302_v19  ;;  %v1306_v21 = vld [vmem:[%s10727_s13 + $0x150] sm:$0xff] }
  0x26   : > { %1305 = vst [vmem:[%s10732_s14 + $0xa0] sm:$0xff] %v1304_v20  ;;  %v1308_v22 = vld [vmem:[%s10727_s13 + $0x160] sm:$0xff]  ;;  %v1310_v23 = vld [vmem:[%s10727_s13 + $0x170] sm:$0xff]  ;;  %1307 = vst [vmem:[%s10732_s14 + $0xa8] sm:$0xff] %v1306_v21 }
  0x27   : > { %1309 = vst [vmem:[%s10732_s14 + $0xb0] sm:$0xff] %v1308_v22  ;;  %1311 = vst [vmem:[%s10732_s14 + $0xb8] sm:$0xff] %v1310_v23  ;;  %v1312_v24 = vld [vmem:[%s10727_s13 + $0x180] sm:$0xff]  ;;  %v1314_v25 = vld [vmem:[%s10727_s13 + $0x190] sm:$0xff] }
  0x28   : > { %v1316_v26 = vld [vmem:[%s10727_s13 + $0x1a0] sm:$0xff]  ;;  %1313 = vst [vmem:[%s10732_s14 + $0xc0] sm:$0xff] %v1312_v24  ;;  %1315 = vst [vmem:[%s10732_s14 + $0xc8] sm:$0xff] %v1314_v25  ;;  %v1318_v27 = vld [vmem:[%s10727_s13 + $0x1b0] sm:$0xff] }
  0x29   : > { %1317 = vst [vmem:[%s10732_s14 + $0xd0] sm:$0xff] %v1316_v26  ;;  %v1320_v28 = vld [vmem:[%s10727_s13 + $0x1c0] sm:$0xff]  ;;  %v1322_v29 = vld [vmem:[%s10727_s13 + $0x1d0] sm:$0xff]  ;;  %1319 = vst [vmem:[%s10732_s14 + $0xd8] sm:$0xff] %v1318_v27 }
  0x2a   : > { %1321 = vst [vmem:[%s10732_s14 + $0xe0] sm:$0xff] %v1320_v28  ;;  %1323 = vst [vmem:[%s10732_s14 + $0xe8] sm:$0xff] %v1322_v29  ;;  %v1324_v30 = vld [vmem:[%s10727_s13 + $0x1e0] sm:$0xff]  ;;  %v1326_v31 = vld [vmem:[%s10727_s13 + $0x1f0] sm:$0xff] }
  0x2b   : > { %v1328_v32 = vld [vmem:[%s10727_s13 + $0x200] sm:$0xff]  ;;  %1325 = vst [vmem:[%s10732_s14 + $0xf0] sm:$0xff] %v1324_v30  ;;  %1327 = vst [vmem:[%s10732_s14 + $0xf8] sm:$0xff] %v1326_v31  ;;  %v1330_v33 = vld [vmem:[%s10727_s13 + $0x210] sm:$0xff] }
  0x2c   : > { %1329 = vst [vmem:[%s10732_s14 + $0x100] sm:$0xff] %v1328_v32  ;;  %v1332_v34 = vld [vmem:[%s10727_s13 + $0x220] sm:$0xff]  ;;  %v1334_v35 = vld [vmem:[%s10727_s13 + $0x230] sm:$0xff]  ;;  %1331 = vst [vmem:[%s10732_s14 + $0x108] sm:$0xff] %v1330_v33 }
  0x2d   : > { %1333 = vst [vmem:[%s10732_s14 + $0x110] sm:$0xff] %v1332_v34  ;;  %1335 = vst [vmem:[%s10732_s14 + $0x118] sm:$0xff] %v1334_v35  ;;  %v1336_v36 = vld [vmem:[%s10727_s13 + $0x240] sm:$0xff]  ;;  %v1338_v37 = vld [vmem:[%s10727_s13 + $0x250] sm:$0xff] }
  0x2e   : > { %v1340_v38 = vld [vmem:[%s10727_s13 + $0x260] sm:$0xff]  ;;  %1337 = vst [vmem:[%s10732_s14 + $0x120] sm:$0xff] %v1336_v36  ;;  %1339 = vst [vmem:[%s10732_s14 + $0x128] sm:$0xff] %v1338_v37  ;;  %v1342_v39 = vld [vmem:[%s10727_s13 + $0x270] sm:$0xff] }
  0x2f   : > { %1341 = vst [vmem:[%s10732_s14 + $0x130] sm:$0xff] %v1340_v38  ;;  %v1344_v40 = vld [vmem:[%s10727_s13 + $0x280] sm:$0xff]  ;;  %v1346_v41 = vld [vmem:[%s10727_s13 + $0x290] sm:$0xff]  ;;  %1343 = vst [vmem:[%s10732_s14 + $0x138] sm:$0xff] %v1342_v39 }
  0x30   : > { %1345 = vst [vmem:[%s10732_s14 + $0x140] sm:$0xff] %v1344_v40  ;;  %1347 = vst [vmem:[%s10732_s14 + $0x148] sm:$0xff] %v1346_v41  ;;  %v1348_v42 = vld [vmem:[%s10727_s13 + $0x2a0] sm:$0xff]  ;;  %v1350_v43 = vld [vmem:[%s10727_s13 + $0x2b0] sm:$0xff] }
  0x31   : > { %v1352_v44 = vld [vmem:[%s10727_s13 + $0x2c0] sm:$0xff]  ;;  %1349 = vst [vmem:[%s10732_s14 + $0x150] sm:$0xff] %v1348_v42  ;;  %1351 = vst [vmem:[%s10732_s14 + $0x158] sm:$0xff] %v1350_v43  ;;  %v1354_v45 = vld [vmem:[%s10727_s13 + $0x2d0] sm:$0xff] }
  0x32   : > { %1353 = vst [vmem:[%s10732_s14 + $0x160] sm:$0xff] %v1352_v44  ;;  %v1356_v46 = vld [vmem:[%s10727_s13 + $0x2e0] sm:$0xff]  ;;  %v1358_v47 = vld [vmem:[%s10727_s13 + $0x2f0] sm:$0xff]  ;;  %1355 = vst [vmem:[%s10732_s14 + $0x168] sm:$0xff] %v1354_v45 }
  0x33   : > { %1357 = vst [vmem:[%s10732_s14 + $0x170] sm:$0xff] %v1356_v46  ;;  %1359 = vst [vmem:[%s10732_s14 + $0x178] sm:$0xff] %v1358_v47  ;;  %v1360_v48 = vld [vmem:[%s10727_s13 + $0x300] sm:$0xff]  ;;  %v1362_v49 = vld [vmem:[%s10727_s13 + $0x310] sm:$0xff] }
  0x34   : > { %v1364_v50 = vld [vmem:[%s10727_s13 + $0x320] sm:$0xff]  ;;  %1361 = vst [vmem:[%s10732_s14 + $0x180] sm:$0xff] %v1360_v48  ;;  %1363 = vst [vmem:[%s10732_s14 + $0x188] sm:$0xff] %v1362_v49  ;;  %v1366_v51 = vld [vmem:[%s10727_s13 + $0x330] sm:$0xff] }
  0x35   : > { %1365 = vst [vmem:[%s10732_s14 + $0x190] sm:$0xff] %v1364_v50  ;;  %v1368_v52 = vld [vmem:[%s10727_s13 + $0x340] sm:$0xff]  ;;  %v1370_v53 = vld [vmem:[%s10727_s13 + $0x350] sm:$0xff]  ;;  %1367 = vst [vmem:[%s10732_s14 + $0x198] sm:$0xff] %v1366_v51 }
  0x36   : > { %1369 = vst [vmem:[%s10732_s14 + $0x1a0] sm:$0xff] %v1368_v52  ;;  %1371 = vst [vmem:[%s10732_s14 + $0x1a8] sm:$0xff] %v1370_v53  ;;  %v1372_v54 = vld [vmem:[%s10727_s13 + $0x360] sm:$0xff]  ;;  %v1374_v55 = vld [vmem:[%s10727_s13 + $0x370] sm:$0xff] }
  0x37   : > { %v1376_v56 = vld [vmem:[%s10727_s13 + $0x380] sm:$0xff]  ;;  %1373 = vst [vmem:[%s10732_s14 + $0x1b0] sm:$0xff] %v1372_v54  ;;  %1375 = vst [vmem:[%s10732_s14 + $0x1b8] sm:$0xff] %v1374_v55  ;;  %v1378_v57 = vld [vmem:[%s10727_s13 + $0x390] sm:$0xff] }
  0x38   : > { %1377 = vst [vmem:[%s10732_s14 + $0x1c0] sm:$0xff] %v1376_v56  ;;  %v1380_v58 = vld [vmem:[%s10727_s13 + $0x3a0] sm:$0xff]  ;;  %v1382_v59 = vld [vmem:[%s10727_s13 + $0x3b0] sm:$0xff]  ;;  %1379 = vst [vmem:[%s10732_s14 + $0x1c8] sm:$0xff] %v1378_v57 }
  0x39   : > { %1381 = vst [vmem:[%s10732_s14 + $0x1d0] sm:$0xff] %v1380_v58  ;;  %1383 = vst [vmem:[%s10732_s14 + $0x1d8] sm:$0xff] %v1382_v59  ;;  %v1384_v60 = vld [vmem:[%s10727_s13 + $0x3c0] sm:$0xff]  ;;  %v1386_v61 = vld [vmem:[%s10727_s13 + $0x3d0] sm:$0xff] }
  0x3a   : > { %v1388_v62 = vld [vmem:[%s10727_s13 + $0x3e0] sm:$0xff]  ;;  %1385 = vst [vmem:[%s10732_s14 + $0x1e0] sm:$0xff] %v1384_v60  ;;  %1387 = vst [vmem:[%s10732_s14 + $0x1e8] sm:$0xff] %v1386_v61  ;;  %v1390_v63 = vld [vmem:[%s10727_s13 + $0x3f0] sm:$0xff] }
  0x3b   : > { %1389 = vst [vmem:[%s10732_s14 + $0x1f0] sm:$0xff] %v1388_v62  ;;  %v1392_v0 = vld [vmem:[%s10727_s13 + $0x400] sm:$0xff]  ;;  %v1394_v1 = vld [vmem:[%s10727_s13 + $0x410] sm:$0xff]  ;;  %1391 = vst [vmem:[%s10732_s14 + $0x1f8] sm:$0xff] %v1390_v63 }
  0x3c   : > { %1393 = vst [vmem:[%s10732_s14 + $0x200] sm:$0xff] %v1392_v0  ;;  %1395 = vst [vmem:[%s10732_s14 + $0x208] sm:$0xff] %v1394_v1  ;;  %v1396_v2 = vld [vmem:[%s10727_s13 + $0x420] sm:$0xff]  ;;  %v1398_v3 = vld [vmem:[%s10727_s13 + $0x430] sm:$0xff] }
  0x3d   : > { %v1400_v4 = vld [vmem:[%s10727_s13 + $0x440] sm:$0xff]  ;;  %1397 = vst [vmem:[%s10732_s14 + $0x210] sm:$0xff] %v1396_v2  ;;  %1399 = vst [vmem:[%s10732_s14 + $0x218] sm:$0xff] %v1398_v3  ;;  %v1402_v5 = vld [vmem:[%s10727_s13 + $0x450] sm:$0xff] }
  0x3e   : > { %1401 = vst [vmem:[%s10732_s14 + $0x220] sm:$0xff] %v1400_v4  ;;  %v1404_v6 = vld [vmem:[%s10727_s13 + $0x460] sm:$0xff]  ;;  %v1406_v7 = vld [vmem:[%s10727_s13 + $0x470] sm:$0xff]  ;;  %1403 = vst [vmem:[%s10732_s14 + $0x228] sm:$0xff] %v1402_v5 }
  0x3f   : > { %1405 = vst [vmem:[%s10732_s14 + $0x230] sm:$0xff] %v1404_v6  ;;  %1407 = vst [vmem:[%s10732_s14 + $0x238] sm:$0xff] %v1406_v7  ;;  %v1408_v8 = vld [vmem:[%s10727_s13 + $0x480] sm:$0xff]  ;;  %v1410_v9 = vld [vmem:[%s10727_s13 + $0x490] sm:$0xff] }
  0x40   : > { %v1412_v10 = vld [vmem:[%s10727_s13 + $0x4a0] sm:$0xff]  ;;  %1409 = vst [vmem:[%s10732_s14 + $0x240] sm:$0xff] %v1408_v8  ;;  %1411 = vst [vmem:[%s10732_s14 + $0x248] sm:$0xff] %v1410_v9  ;;  %v1414_v11 = vld [vmem:[%s10727_s13 + $0x4b0] sm:$0xff] }
  0x41   : > { %1413 = vst [vmem:[%s10732_s14 + $0x250] sm:$0xff] %v1412_v10  ;;  %v1416_v12 = vld [vmem:[%s10727_s13 + $0x4c0] sm:$0xff]  ;;  %v1418_v13 = vld [vmem:[%s10727_s13 + $0x4d0] sm:$0xff]  ;;  %1415 = vst [vmem:[%s10732_s14 + $0x258] sm:$0xff] %v1414_v11 }
  0x42   : > { %1417 = vst [vmem:[%s10732_s14 + $0x260] sm:$0xff] %v1416_v12  ;;  %1419 = vst [vmem:[%s10732_s14 + $0x268] sm:$0xff] %v1418_v13  ;;  %v1420_v14 = vld [vmem:[%s10727_s13 + $0x4e0] sm:$0xff]  ;;  %v1422_v15 = vld [vmem:[%s10727_s13 + $0x4f0] sm:$0xff] }
  0x43   : > { %v1424_v16 = vld [vmem:[%s10727_s13 + $0x500] sm:$0xff]  ;;  %1421 = vst [vmem:[%s10732_s14 + $0x270] sm:$0xff] %v1420_v14  ;;  %1423 = vst [vmem:[%s10732_s14 + $0x278] sm:$0xff] %v1422_v15  ;;  %v1426_v17 = vld [vmem:[%s10727_s13 + $0x510] sm:$0xff] }
  0x44   : > { %1425 = vst [vmem:[%s10732_s14 + $0x280] sm:$0xff] %v1424_v16  ;;  %v1428_v18 = vld [vmem:[%s10727_s13 + $0x520] sm:$0xff]  ;;  %v1430_v19 = vld [vmem:[%s10727_s13 + $0x530] sm:$0xff]  ;;  %1427 = vst [vmem:[%s10732_s14 + $0x288] sm:$0xff] %v1426_v17 }
  0x45   : > { %1429 = vst [vmem:[%s10732_s14 + $0x290] sm:$0xff] %v1428_v18  ;;  %1431 = vst [vmem:[%s10732_s14 + $0x298] sm:$0xff] %v1430_v19  ;;  %v1432_v20 = vld [vmem:[%s10727_s13 + $0x540] sm:$0xff]  ;;  %v1434_v21 = vld [vmem:[%s10727_s13 + $0x550] sm:$0xff] }
  0x46   : > { %v1436_v22 = vld [vmem:[%s10727_s13 + $0x560] sm:$0xff]  ;;  %1433 = vst [vmem:[%s10732_s14 + $0x2a0] sm:$0xff] %v1432_v20  ;;  %1435 = vst [vmem:[%s10732_s14 + $0x2a8] sm:$0xff] %v1434_v21  ;;  %v1438_v23 = vld [vmem:[%s10727_s13 + $0x570] sm:$0xff] }
  0x47   : > { %1437 = vst [vmem:[%s10732_s14 + $0x2b0] sm:$0xff] %v1436_v22  ;;  %v1440_v24 = vld [vmem:[%s10727_s13 + $0x580] sm:$0xff]  ;;  %v1442_v25 = vld [vmem:[%s10727_s13 + $0x590] sm:$0xff]  ;;  %1439 = vst [vmem:[%s10732_s14 + $0x2b8] sm:$0xff] %v1438_v23 }
  0x48   : > { %1441 = vst [vmem:[%s10732_s14 + $0x2c0] sm:$0xff] %v1440_v24  ;;  %1443 = vst [vmem:[%s10732_s14 + $0x2c8] sm:$0xff] %v1442_v25  ;;  %v1444_v26 = vld [vmem:[%s10727_s13 + $0x5a0] sm:$0xff]  ;;  %v1446_v27 = vld [vmem:[%s10727_s13 + $0x5b0] sm:$0xff] }
  0x49   : > { %v1448_v28 = vld [vmem:[%s10727_s13 + $0x5c0] sm:$0xff]  ;;  %1445 = vst [vmem:[%s10732_s14 + $0x2d0] sm:$0xff] %v1444_v26  ;;  %1447 = vst [vmem:[%s10732_s14 + $0x2d8] sm:$0xff] %v1446_v27  ;;  %v1450_v29 = vld [vmem:[%s10727_s13 + $0x5d0] sm:$0xff] }
  0x4a   : > { %1449 = vst [vmem:[%s10732_s14 + $0x2e0] sm:$0xff] %v1448_v28  ;;  %v1452_v30 = vld [vmem:[%s10727_s13 + $0x5e0] sm:$0xff]  ;;  %v1454_v31 = vld [vmem:[%s10727_s13 + $0x5f0] sm:$0xff]  ;;  %1451 = vst [vmem:[%s10732_s14 + $0x2e8] sm:$0xff] %v1450_v29 }
  0x4b   : > { %1453 = vst [vmem:[%s10732_s14 + $0x2f0] sm:$0xff] %v1452_v30  ;;  %1455 = vst [vmem:[%s10732_s14 + $0x2f8] sm:$0xff] %v1454_v31  ;;  %v1456_v32 = vld [vmem:[%s10727_s13 + $0x600] sm:$0xff]  ;;  %v1458_v33 = vld [vmem:[%s10727_s13 + $0x610] sm:$0xff] }
  0x4c   : > { %v1460_v34 = vld [vmem:[%s10727_s13 + $0x620] sm:$0xff]  ;;  %1457 = vst [vmem:[%s10732_s14 + $0x300] sm:$0xff] %v1456_v32  ;;  %1459 = vst [vmem:[%s10732_s14 + $0x308] sm:$0xff] %v1458_v33  ;;  %v1462_v35 = vld [vmem:[%s10727_s13 + $0x630] sm:$0xff] }
  0x4d   : > { %1461 = vst [vmem:[%s10732_s14 + $0x310] sm:$0xff] %v1460_v34  ;;  %v1464_v36 = vld [vmem:[%s10727_s13 + $0x640] sm:$0xff]  ;;  %v1466_v37 = vld [vmem:[%s10727_s13 + $0x650] sm:$0xff]  ;;  %1463 = vst [vmem:[%s10732_s14 + $0x318] sm:$0xff] %v1462_v35 }
  0x4e   : > { %1465 = vst [vmem:[%s10732_s14 + $0x320] sm:$0xff] %v1464_v36  ;;  %1467 = vst [vmem:[%s10732_s14 + $0x328] sm:$0xff] %v1466_v37  ;;  %v1468_v38 = vld [vmem:[%s10727_s13 + $0x660] sm:$0xff]  ;;  %v1470_v39 = vld [vmem:[%s10727_s13 + $0x670] sm:$0xff] }
  0x4f   : > { %v1472_v40 = vld [vmem:[%s10727_s13 + $0x680] sm:$0xff]  ;;  %1469 = vst [vmem:[%s10732_s14 + $0x330] sm:$0xff] %v1468_v38  ;;  %1471 = vst [vmem:[%s10732_s14 + $0x338] sm:$0xff] %v1470_v39  ;;  %v1474_v41 = vld [vmem:[%s10727_s13 + $0x690] sm:$0xff] }
  0x50   : > { %1473 = vst [vmem:[%s10732_s14 + $0x340] sm:$0xff] %v1472_v40  ;;  %v1476_v42 = vld [vmem:[%s10727_s13 + $0x6a0] sm:$0xff]  ;;  %v1478_v43 = vld [vmem:[%s10727_s13 + $0x6b0] sm:$0xff]  ;;  %1475 = vst [vmem:[%s10732_s14 + $0x348] sm:$0xff] %v1474_v41 }
  0x51   : > { %1477 = vst [vmem:[%s10732_s14 + $0x350] sm:$0xff] %v1476_v42  ;;  %1479 = vst [vmem:[%s10732_s14 + $0x358] sm:$0xff] %v1478_v43  ;;  %v1480_v44 = vld [vmem:[%s10727_s13 + $0x6c0] sm:$0xff]  ;;  %v1482_v45 = vld [vmem:[%s10727_s13 + $0x6d0] sm:$0xff] }
  0x52   : > { %v1484_v46 = vld [vmem:[%s10727_s13 + $0x6e0] sm:$0xff]  ;;  %1481 = vst [vmem:[%s10732_s14 + $0x360] sm:$0xff] %v1480_v44  ;;  %1483 = vst [vmem:[%s10732_s14 + $0x368] sm:$0xff] %v1482_v45  ;;  %v1486_v47 = vld [vmem:[%s10727_s13 + $0x6f0] sm:$0xff] }
  0x53   : > { %1485 = vst [vmem:[%s10732_s14 + $0x370] sm:$0xff] %v1484_v46  ;;  %v1488_v48 = vld [vmem:[%s10727_s13 + $0x700] sm:$0xff]  ;;  %v1490_v49 = vld [vmem:[%s10727_s13 + $0x710] sm:$0xff]  ;;  %1487 = vst [vmem:[%s10732_s14 + $0x378] sm:$0xff] %v1486_v47 }
  0x54   : > { %1489 = vst [vmem:[%s10732_s14 + $0x380] sm:$0xff] %v1488_v48  ;;  %1491 = vst [vmem:[%s10732_s14 + $0x388] sm:$0xff] %v1490_v49  ;;  %v1492_v50 = vld [vmem:[%s10727_s13 + $0x720] sm:$0xff]  ;;  %v1494_v51 = vld [vmem:[%s10727_s13 + $0x730] sm:$0xff] }
  0x55   : > { %v1496_v52 = vld [vmem:[%s10727_s13 + $0x740] sm:$0xff]  ;;  %1493 = vst [vmem:[%s10732_s14 + $0x390] sm:$0xff] %v1492_v50  ;;  %1495 = vst [vmem:[%s10732_s14 + $0x398] sm:$0xff] %v1494_v51  ;;  %v1498_v53 = vld [vmem:[%s10727_s13 + $0x750] sm:$0xff] }
  0x56   : > { %1497 = vst [vmem:[%s10732_s14 + $0x3a0] sm:$0xff] %v1496_v52  ;;  %v1500_v54 = vld [vmem:[%s10727_s13 + $0x760] sm:$0xff]  ;;  %v1502_v55 = vld [vmem:[%s10727_s13 + $0x770] sm:$0xff]  ;;  %1499 = vst [vmem:[%s10732_s14 + $0x3a8] sm:$0xff] %v1498_v53 }
  0x57   : > { %1501 = vst [vmem:[%s10732_s14 + $0x3b0] sm:$0xff] %v1500_v54  ;;  %1503 = vst [vmem:[%s10732_s14 + $0x3b8] sm:$0xff] %v1502_v55  ;;  %v1504_v56 = vld [vmem:[%s10727_s13 + $0x780] sm:$0xff]  ;;  %v1506_v57 = vld [vmem:[%s10727_s13 + $0x790] sm:$0xff] }
  0x58   : > { %v1508_v58 = vld [vmem:[%s10727_s13 + $0x7a0] sm:$0xff]  ;;  %1505 = vst [vmem:[%s10732_s14 + $0x3c0] sm:$0xff] %v1504_v56  ;;  %1507 = vst [vmem:[%s10732_s14 + $0x3c8] sm:$0xff] %v1506_v57  ;;  %v1510_v59 = vld [vmem:[%s10727_s13 + $0x7b0] sm:$0xff] }
  0x59   : > { %1509 = vst [vmem:[%s10732_s14 + $0x3d0] sm:$0xff] %v1508_v58  ;;  %v1512_v60 = vld [vmem:[%s10727_s13 + $0x7c0] sm:$0xff]  ;;  %v1514_v61 = vld [vmem:[%s10727_s13 + $0x7d0] sm:$0xff]  ;;  %1511 = vst [vmem:[%s10732_s14 + $0x3d8] sm:$0xff] %v1510_v59 }
  0x5a   : > { %1513 = vst [vmem:[%s10732_s14 + $0x3e0] sm:$0xff] %v1512_v60  ;;  %1515 = vst [vmem:[%s10732_s14 + $0x3e8] sm:$0xff] %v1514_v61  ;;  %v1516_v62 = vld [vmem:[%s10727_s13 + $0x7e0] sm:$0xff]  ;;  %v1518_v63 = vld [vmem:[%s10727_s13 + $0x7f0] sm:$0xff] }
  0x5b   : > { %v1520_v0 = vld [vmem:[%s10727_s13 + $0x800] sm:$0xff]  ;;  %1517 = vst [vmem:[%s10732_s14 + $0x3f0] sm:$0xff] %v1516_v62  ;;  %1519 = vst [vmem:[%s10732_s14 + $0x3f8] sm:$0xff] %v1518_v63  ;;  %v1522_v1 = vld [vmem:[%s10727_s13 + $0x810] sm:$0xff] }
  0x5c   : > { %1521 = vst [vmem:[%s10732_s14 + $0x400] sm:$0xff] %v1520_v0  ;;  %v1524_v2 = vld [vmem:[%s10727_s13 + $0x820] sm:$0xff]  ;;  %v1526_v3 = vld [vmem:[%s10727_s13 + $0x830] sm:$0xff]  ;;  %1523 = vst [vmem:[%s10732_s14 + $0x408] sm:$0xff] %v1522_v1 }
  0x5d   : > { %1525 = vst [vmem:[%s10732_s14 + $0x410] sm:$0xff] %v1524_v2  ;;  %1527 = vst [vmem:[%s10732_s14 + $0x418] sm:$0xff] %v1526_v3  ;;  %v1528_v4 = vld [vmem:[%s10727_s13 + $0x840] sm:$0xff]  ;;  %v1530_v5 = vld [vmem:[%s10727_s13 + $0x850] sm:$0xff] }
  0x5e   : > { %v1532_v6 = vld [vmem:[%s10727_s13 + $0x860] sm:$0xff]  ;;  %1529 = vst [vmem:[%s10732_s14 + $0x420] sm:$0xff] %v1528_v4  ;;  %1531 = vst [vmem:[%s10732_s14 + $0x428] sm:$0xff] %v1530_v5  ;;  %v1534_v7 = vld [vmem:[%s10727_s13 + $0x870] sm:$0xff] }
  0x5f   : > { %1533 = vst [vmem:[%s10732_s14 + $0x430] sm:$0xff] %v1532_v6  ;;  %v1536_v8 = vld [vmem:[%s10727_s13 + $0x880] sm:$0xff]  ;;  %v1538_v9 = vld [vmem:[%s10727_s13 + $0x890] sm:$0xff]  ;;  %1535 = vst [vmem:[%s10732_s14 + $0x438] sm:$0xff] %v1534_v7 }
  0x60   : > { %1537 = vst [vmem:[%s10732_s14 + $0x440] sm:$0xff] %v1536_v8  ;;  %1539 = vst [vmem:[%s10732_s14 + $0x448] sm:$0xff] %v1538_v9  ;;  %v1540_v10 = vld [vmem:[%s10727_s13 + $0x8a0] sm:$0xff]  ;;  %v1542_v11 = vld [vmem:[%s10727_s13 + $0x8b0] sm:$0xff] }
  0x61   : > { %v1544_v12 = vld [vmem:[%s10727_s13 + $0x8c0] sm:$0xff]  ;;  %1541 = vst [vmem:[%s10732_s14 + $0x450] sm:$0xff] %v1540_v10  ;;  %1543 = vst [vmem:[%s10732_s14 + $0x458] sm:$0xff] %v1542_v11  ;;  %v1546_v13 = vld [vmem:[%s10727_s13 + $0x8d0] sm:$0xff] }
  0x62   : > { %1545 = vst [vmem:[%s10732_s14 + $0x460] sm:$0xff] %v1544_v12  ;;  %v1548_v14 = vld [vmem:[%s10727_s13 + $0x8e0] sm:$0xff]  ;;  %v1550_v15 = vld [vmem:[%s10727_s13 + $0x8f0] sm:$0xff]  ;;  %1547 = vst [vmem:[%s10732_s14 + $0x468] sm:$0xff] %v1546_v13 }
  0x63   : > { %1549 = vst [vmem:[%s10732_s14 + $0x470] sm:$0xff] %v1548_v14  ;;  %1551 = vst [vmem:[%s10732_s14 + $0x478] sm:$0xff] %v1550_v15  ;;  %v1552_v16 = vld [vmem:[%s10727_s13 + $0x900] sm:$0xff]  ;;  %v1554_v17 = vld [vmem:[%s10727_s13 + $0x910] sm:$0xff] }
  0x64   : > { %v1556_v18 = vld [vmem:[%s10727_s13 + $0x920] sm:$0xff]  ;;  %1553 = vst [vmem:[%s10732_s14 + $0x480] sm:$0xff] %v1552_v16  ;;  %1555 = vst [vmem:[%s10732_s14 + $0x488] sm:$0xff] %v1554_v17  ;;  %v1558_v19 = vld [vmem:[%s10727_s13 + $0x930] sm:$0xff] }
  0x65   : > { %1557 = vst [vmem:[%s10732_s14 + $0x490] sm:$0xff] %v1556_v18  ;;  %v1560_v20 = vld [vmem:[%s10727_s13 + $0x940] sm:$0xff]  ;;  %v1562_v21 = vld [vmem:[%s10727_s13 + $0x950] sm:$0xff]  ;;  %1559 = vst [vmem:[%s10732_s14 + $0x498] sm:$0xff] %v1558_v19 }
  0x66   : > { %1561 = vst [vmem:[%s10732_s14 + $0x4a0] sm:$0xff] %v1560_v20  ;;  %1563 = vst [vmem:[%s10732_s14 + $0x4a8] sm:$0xff] %v1562_v21  ;;  %v1564_v22 = vld [vmem:[%s10727_s13 + $0x960] sm:$0xff]  ;;  %v1566_v23 = vld [vmem:[%s10727_s13 + $0x970] sm:$0xff] }
  0x67   : > { %v1568_v24 = vld [vmem:[%s10727_s13 + $0x980] sm:$0xff]  ;;  %1565 = vst [vmem:[%s10732_s14 + $0x4b0] sm:$0xff] %v1564_v22  ;;  %1567 = vst [vmem:[%s10732_s14 + $0x4b8] sm:$0xff] %v1566_v23  ;;  %v1570_v25 = vld [vmem:[%s10727_s13 + $0x990] sm:$0xff] }
  0x68   : > { %1569 = vst [vmem:[%s10732_s14 + $0x4c0] sm:$0xff] %v1568_v24  ;;  %v1572_v26 = vld [vmem:[%s10727_s13 + $0x9a0] sm:$0xff]  ;;  %v1574_v27 = vld [vmem:[%s10727_s13 + $0x9b0] sm:$0xff]  ;;  %1571 = vst [vmem:[%s10732_s14 + $0x4c8] sm:$0xff] %v1570_v25 }
  0x69   : > { %1573 = vst [vmem:[%s10732_s14 + $0x4d0] sm:$0xff] %v1572_v26  ;;  %1575 = vst [vmem:[%s10732_s14 + $0x4d8] sm:$0xff] %v1574_v27  ;;  %v1576_v28 = vld [vmem:[%s10727_s13 + $0x9c0] sm:$0xff]  ;;  %v1578_v29 = vld [vmem:[%s10727_s13 + $0x9d0] sm:$0xff] }
  0x6a   : > { %v1580_v30 = vld [vmem:[%s10727_s13 + $0x9e0] sm:$0xff]  ;;  %1577 = vst [vmem:[%s10732_s14 + $0x4e0] sm:$0xff] %v1576_v28  ;;  %1579 = vst [vmem:[%s10732_s14 + $0x4e8] sm:$0xff] %v1578_v29  ;;  %v1582_v31 = vld [vmem:[%s10727_s13 + $0x9f0] sm:$0xff] }
  0x6b   : > { %1581 = vst [vmem:[%s10732_s14 + $0x4f0] sm:$0xff] %v1580_v30  ;;  %v1584_v32 = vld [vmem:[%s10727_s13 + $0xa00] sm:$0xff]  ;;  %v1586_v33 = vld [vmem:[%s10727_s13 + $0xa10] sm:$0xff]  ;;  %1583 = vst [vmem:[%s10732_s14 + $0x4f8] sm:$0xff] %v1582_v31 }
  0x6c   : > { %1585 = vst [vmem:[%s10732_s14 + $0x500] sm:$0xff] %v1584_v32  ;;  %1587 = vst [vmem:[%s10732_s14 + $0x508] sm:$0xff] %v1586_v33  ;;  %v1588_v34 = vld [vmem:[%s10727_s13 + $0xa20] sm:$0xff]  ;;  %v1590_v35 = vld [vmem:[%s10727_s13 + $0xa30] sm:$0xff] }
  0x6d   : > { %v1592_v36 = vld [vmem:[%s10727_s13 + $0xa40] sm:$0xff]  ;;  %1589 = vst [vmem:[%s10732_s14 + $0x510] sm:$0xff] %v1588_v34  ;;  %1591 = vst [vmem:[%s10732_s14 + $0x518] sm:$0xff] %v1590_v35  ;;  %v1594_v37 = vld [vmem:[%s10727_s13 + $0xa50] sm:$0xff] }
  0x6e   : > { %1593 = vst [vmem:[%s10732_s14 + $0x520] sm:$0xff] %v1592_v36  ;;  %v1596_v38 = vld [vmem:[%s10727_s13 + $0xa60] sm:$0xff]  ;;  %v1598_v39 = vld [vmem:[%s10727_s13 + $0xa70] sm:$0xff]  ;;  %1595 = vst [vmem:[%s10732_s14 + $0x528] sm:$0xff] %v1594_v37 }
  0x6f   : > { %1597 = vst [vmem:[%s10732_s14 + $0x530] sm:$0xff] %v1596_v38  ;;  %1599 = vst [vmem:[%s10732_s14 + $0x538] sm:$0xff] %v1598_v39  ;;  %v1600_v40 = vld [vmem:[%s10727_s13 + $0xa80] sm:$0xff]  ;;  %v1602_v41 = vld [vmem:[%s10727_s13 + $0xa90] sm:$0xff] }
  0x70   : > { %v1604_v42 = vld [vmem:[%s10727_s13 + $0xaa0] sm:$0xff]  ;;  %1601 = vst [vmem:[%s10732_s14 + $0x540] sm:$0xff] %v1600_v40  ;;  %1603 = vst [vmem:[%s10732_s14 + $0x548] sm:$0xff] %v1602_v41  ;;  %v1606_v43 = vld [vmem:[%s10727_s13 + $0xab0] sm:$0xff] }
  0x71   : > { %1605 = vst [vmem:[%s10732_s14 + $0x550] sm:$0xff] %v1604_v42  ;;  %v1608_v44 = vld [vmem:[%s10727_s13 + $0xac0] sm:$0xff]  ;;  %v1610_v45 = vld [vmem:[%s10727_s13 + $0xad0] sm:$0xff]  ;;  %1607 = vst [vmem:[%s10732_s14 + $0x558] sm:$0xff] %v1606_v43 }
  0x72   : > { %1609 = vst [vmem:[%s10732_s14 + $0x560] sm:$0xff] %v1608_v44  ;;  %1611 = vst [vmem:[%s10732_s14 + $0x568] sm:$0xff] %v1610_v45  ;;  %v1612_v46 = vld [vmem:[%s10727_s13 + $0xae0] sm:$0xff]  ;;  %v1614_v47 = vld [vmem:[%s10727_s13 + $0xaf0] sm:$0xff] }
  0x73   : > { %v1616_v48 = vld [vmem:[%s10727_s13 + $0xb00] sm:$0xff]  ;;  %1613 = vst [vmem:[%s10732_s14 + $0x570] sm:$0xff] %v1612_v46  ;;  %1615 = vst [vmem:[%s10732_s14 + $0x578] sm:$0xff] %v1614_v47  ;;  %v1618_v49 = vld [vmem:[%s10727_s13 + $0xb10] sm:$0xff] }
  0x74   : > { %1617 = vst [vmem:[%s10732_s14 + $0x580] sm:$0xff] %v1616_v48  ;;  %v1620_v50 = vld [vmem:[%s10727_s13 + $0xb20] sm:$0xff]  ;;  %v1622_v51 = vld [vmem:[%s10727_s13 + $0xb30] sm:$0xff]  ;;  %1619 = vst [vmem:[%s10732_s14 + $0x588] sm:$0xff] %v1618_v49 }
  0x75   : > { %1621 = vst [vmem:[%s10732_s14 + $0x590] sm:$0xff] %v1620_v50  ;;  %1623 = vst [vmem:[%s10732_s14 + $0x598] sm:$0xff] %v1622_v51  ;;  %v1624_v52 = vld [vmem:[%s10727_s13 + $0xb40] sm:$0xff]  ;;  %v1626_v53 = vld [vmem:[%s10727_s13 + $0xb50] sm:$0xff] }
  0x76   : > { %v1628_v54 = vld [vmem:[%s10727_s13 + $0xb60] sm:$0xff]  ;;  %1625 = vst [vmem:[%s10732_s14 + $0x5a0] sm:$0xff] %v1624_v52  ;;  %1627 = vst [vmem:[%s10732_s14 + $0x5a8] sm:$0xff] %v1626_v53  ;;  %v1630_v55 = vld [vmem:[%s10727_s13 + $0xb70] sm:$0xff] }
  0x77   : > { %1629 = vst [vmem:[%s10732_s14 + $0x5b0] sm:$0xff] %v1628_v54  ;;  %v1632_v56 = vld [vmem:[%s10727_s13 + $0xb80] sm:$0xff]  ;;  %v1634_v57 = vld [vmem:[%s10727_s13 + $0xb90] sm:$0xff]  ;;  %1631 = vst [vmem:[%s10732_s14 + $0x5b8] sm:$0xff] %v1630_v55 }
  0x78   : > { %1633 = vst [vmem:[%s10732_s14 + $0x5c0] sm:$0xff] %v1632_v56  ;;  %1635 = vst [vmem:[%s10732_s14 + $0x5c8] sm:$0xff] %v1634_v57  ;;  %v1636_v58 = vld [vmem:[%s10727_s13 + $0xba0] sm:$0xff]  ;;  %v1638_v59 = vld [vmem:[%s10727_s13 + $0xbb0] sm:$0xff] }
  0x79   : > { %v1640_v60 = vld [vmem:[%s10727_s13 + $0xbc0] sm:$0xff]  ;;  %1637 = vst [vmem:[%s10732_s14 + $0x5d0] sm:$0xff] %v1636_v58  ;;  %1639 = vst [vmem:[%s10732_s14 + $0x5d8] sm:$0xff] %v1638_v59  ;;  %v1642_v61 = vld [vmem:[%s10727_s13 + $0xbd0] sm:$0xff] }
  0x7a   : > { %1641 = vst [vmem:[%s10732_s14 + $0x5e0] sm:$0xff] %v1640_v60  ;;  %v1644_v62 = vld [vmem:[%s10727_s13 + $0xbe0] sm:$0xff]  ;;  %v1646_v63 = vld [vmem:[%s10727_s13 + $0xbf0] sm:$0xff]  ;;  %1643 = vst [vmem:[%s10732_s14 + $0x5e8] sm:$0xff] %v1642_v61 }
  0x7b   : > { %1645 = vst [vmem:[%s10732_s14 + $0x5f0] sm:$0xff] %v1644_v62  ;;  %1647 = vst [vmem:[%s10732_s14 + $0x5f8] sm:$0xff] %v1646_v63  ;;  %v1648_v0 = vld [vmem:[%s10727_s13 + $0xc00] sm:$0xff]  ;;  %v1650_v1 = vld [vmem:[%s10727_s13 + $0xc10] sm:$0xff] }
  0x7c   : > { %v1652_v2 = vld [vmem:[%s10727_s13 + $0xc20] sm:$0xff]  ;;  %1649 = vst [vmem:[%s10732_s14 + $0x600] sm:$0xff] %v1648_v0  ;;  %1651 = vst [vmem:[%s10732_s14 + $0x608] sm:$0xff] %v1650_v1  ;;  %v1654_v3 = vld [vmem:[%s10727_s13 + $0xc30] sm:$0xff] }
  0x7d   : > { %1653 = vst [vmem:[%s10732_s14 + $0x610] sm:$0xff] %v1652_v2  ;;  %v1656_v4 = vld [vmem:[%s10727_s13 + $0xc40] sm:$0xff]  ;;  %v1658_v5 = vld [vmem:[%s10727_s13 + $0xc50] sm:$0xff]  ;;  %1655 = vst [vmem:[%s10732_s14 + $0x618] sm:$0xff] %v1654_v3 }
  0x7e   : > { %1657 = vst [vmem:[%s10732_s14 + $0x620] sm:$0xff] %v1656_v4  ;;  %1659 = vst [vmem:[%s10732_s14 + $0x628] sm:$0xff] %v1658_v5  ;;  %v1660_v6 = vld [vmem:[%s10727_s13 + $0xc60] sm:$0xff]  ;;  %v1662_v7 = vld [vmem:[%s10727_s13 + $0xc70] sm:$0xff] }
  0x7f   : > { %v1664_v8 = vld [vmem:[%s10727_s13 + $0xc80] sm:$0xff]  ;;  %1661 = vst [vmem:[%s10732_s14 + $0x630] sm:$0xff] %v1660_v6  ;;  %1663 = vst [vmem:[%s10732_s14 + $0x638] sm:$0xff] %v1662_v7  ;;  %v1666_v9 = vld [vmem:[%s10727_s13 + $0xc90] sm:$0xff] }
  0x80   : > { %1665 = vst [vmem:[%s10732_s14 + $0x640] sm:$0xff] %v1664_v8  ;;  %v1668_v10 = vld [vmem:[%s10727_s13 + $0xca0] sm:$0xff]  ;;  %v1670_v11 = vld [vmem:[%s10727_s13 + $0xcb0] sm:$0xff]  ;;  %1667 = vst [vmem:[%s10732_s14 + $0x648] sm:$0xff] %v1666_v9 }
  0x81   : > { %1669 = vst [vmem:[%s10732_s14 + $0x650] sm:$0xff] %v1668_v10  ;;  %1671 = vst [vmem:[%s10732_s14 + $0x658] sm:$0xff] %v1670_v11  ;;  %v1672_v12 = vld [vmem:[%s10727_s13 + $0xcc0] sm:$0xff]  ;;  %v1674_v13 = vld [vmem:[%s10727_s13 + $0xcd0] sm:$0xff] }
  0x82   : > { %v1676_v14 = vld [vmem:[%s10727_s13 + $0xce0] sm:$0xff]  ;;  %1673 = vst [vmem:[%s10732_s14 + $0x660] sm:$0xff] %v1672_v12  ;;  %1675 = vst [vmem:[%s10732_s14 + $0x668] sm:$0xff] %v1674_v13  ;;  %v1678_v15 = vld [vmem:[%s10727_s13 + $0xcf0] sm:$0xff] }
  0x83   : > { %1677 = vst [vmem:[%s10732_s14 + $0x670] sm:$0xff] %v1676_v14  ;;  %v1680_v16 = vld [vmem:[%s10727_s13 + $0xd00] sm:$0xff]  ;;  %v1682_v17 = vld [vmem:[%s10727_s13 + $0xd10] sm:$0xff]  ;;  %1679 = vst [vmem:[%s10732_s14 + $0x678] sm:$0xff] %v1678_v15 }
  0x84   : > { %1681 = vst [vmem:[%s10732_s14 + $0x680] sm:$0xff] %v1680_v16  ;;  %1683 = vst [vmem:[%s10732_s14 + $0x688] sm:$0xff] %v1682_v17  ;;  %v1684_v18 = vld [vmem:[%s10727_s13 + $0xd20] sm:$0xff]  ;;  %v1686_v19 = vld [vmem:[%s10727_s13 + $0xd30] sm:$0xff] }
  0x85   : > { %v1688_v20 = vld [vmem:[%s10727_s13 + $0xd40] sm:$0xff]  ;;  %1685 = vst [vmem:[%s10732_s14 + $0x690] sm:$0xff] %v1684_v18  ;;  %1687 = vst [vmem:[%s10732_s14 + $0x698] sm:$0xff] %v1686_v19  ;;  %v1690_v21 = vld [vmem:[%s10727_s13 + $0xd50] sm:$0xff] }
  0x86   : > { %1689 = vst [vmem:[%s10732_s14 + $0x6a0] sm:$0xff] %v1688_v20  ;;  %v1692_v22 = vld [vmem:[%s10727_s13 + $0xd60] sm:$0xff]  ;;  %v1694_v23 = vld [vmem:[%s10727_s13 + $0xd70] sm:$0xff]  ;;  %1691 = vst [vmem:[%s10732_s14 + $0x6a8] sm:$0xff] %v1690_v21 }
  0x87   : > { %1693 = vst [vmem:[%s10732_s14 + $0x6b0] sm:$0xff] %v1692_v22  ;;  %1695 = vst [vmem:[%s10732_s14 + $0x6b8] sm:$0xff] %v1694_v23  ;;  %v1696_v24 = vld [vmem:[%s10727_s13 + $0xd80] sm:$0xff]  ;;  %v1698_v25 = vld [vmem:[%s10727_s13 + $0xd90] sm:$0xff] }
  0x88   : > { %v1700_v26 = vld [vmem:[%s10727_s13 + $0xda0] sm:$0xff]  ;;  %1697 = vst [vmem:[%s10732_s14 + $0x6c0] sm:$0xff] %v1696_v24  ;;  %1699 = vst [vmem:[%s10732_s14 + $0x6c8] sm:$0xff] %v1698_v25  ;;  %v1702_v27 = vld [vmem:[%s10727_s13 + $0xdb0] sm:$0xff] }
  0x89   : > { %1701 = vst [vmem:[%s10732_s14 + $0x6d0] sm:$0xff] %v1700_v26  ;;  %v1704_v28 = vld [vmem:[%s10727_s13 + $0xdc0] sm:$0xff]  ;;  %v1706_v29 = vld [vmem:[%s10727_s13 + $0xdd0] sm:$0xff]  ;;  %1703 = vst [vmem:[%s10732_s14 + $0x6d8] sm:$0xff] %v1702_v27 }
  0x8a   : > { %1705 = vst [vmem:[%s10732_s14 + $0x6e0] sm:$0xff] %v1704_v28  ;;  %1707 = vst [vmem:[%s10732_s14 + $0x6e8] sm:$0xff] %v1706_v29  ;;  %v1708_v30 = vld [vmem:[%s10727_s13 + $0xde0] sm:$0xff]  ;;  %v1710_v31 = vld [vmem:[%s10727_s13 + $0xdf0] sm:$0xff] }
  0x8b   : > { %v1712_v32 = vld [vmem:[%s10727_s13 + $0xe00] sm:$0xff]  ;;  %1709 = vst [vmem:[%s10732_s14 + $0x6f0] sm:$0xff] %v1708_v30  ;;  %1711 = vst [vmem:[%s10732_s14 + $0x6f8] sm:$0xff] %v1710_v31  ;;  %v1714_v33 = vld [vmem:[%s10727_s13 + $0xe10] sm:$0xff] }
  0x8c   : > { %1713 = vst [vmem:[%s10732_s14 + $0x700] sm:$0xff] %v1712_v32  ;;  %v1716_v34 = vld [vmem:[%s10727_s13 + $0xe20] sm:$0xff]  ;;  %v1718_v35 = vld [vmem:[%s10727_s13 + $0xe30] sm:$0xff]  ;;  %1715 = vst [vmem:[%s10732_s14 + $0x708] sm:$0xff] %v1714_v33 }
  0x8d   : > { %1717 = vst [vmem:[%s10732_s14 + $0x710] sm:$0xff] %v1716_v34  ;;  %1719 = vst [vmem:[%s10732_s14 + $0x718] sm:$0xff] %v1718_v35  ;;  %v1720_v36 = vld [vmem:[%s10727_s13 + $0xe40] sm:$0xff]  ;;  %v1722_v37 = vld [vmem:[%s10727_s13 + $0xe50] sm:$0xff] }
  0x8e   : > { %v1724_v38 = vld [vmem:[%s10727_s13 + $0xe60] sm:$0xff]  ;;  %1721 = vst [vmem:[%s10732_s14 + $0x720] sm:$0xff] %v1720_v36  ;;  %1723 = vst [vmem:[%s10732_s14 + $0x728] sm:$0xff] %v1722_v37  ;;  %v1726_v39 = vld [vmem:[%s10727_s13 + $0xe70] sm:$0xff] }
  0x8f   : > { %1725 = vst [vmem:[%s10732_s14 + $0x730] sm:$0xff] %v1724_v38  ;;  %v1728_v40 = vld [vmem:[%s10727_s13 + $0xe80] sm:$0xff]  ;;  %v1730_v41 = vld [vmem:[%s10727_s13 + $0xe90] sm:$0xff]  ;;  %1727 = vst [vmem:[%s10732_s14 + $0x738] sm:$0xff] %v1726_v39 }
  0x90   : > { %1729 = vst [vmem:[%s10732_s14 + $0x740] sm:$0xff] %v1728_v40  ;;  %1731 = vst [vmem:[%s10732_s14 + $0x748] sm:$0xff] %v1730_v41  ;;  %v1732_v42 = vld [vmem:[%s10727_s13 + $0xea0] sm:$0xff]  ;;  %v1734_v43 = vld [vmem:[%s10727_s13 + $0xeb0] sm:$0xff] }
  0x91   : > { %v1736_v44 = vld [vmem:[%s10727_s13 + $0xec0] sm:$0xff]  ;;  %1733 = vst [vmem:[%s10732_s14 + $0x750] sm:$0xff] %v1732_v42  ;;  %1735 = vst [vmem:[%s10732_s14 + $0x758] sm:$0xff] %v1734_v43  ;;  %v1738_v45 = vld [vmem:[%s10727_s13 + $0xed0] sm:$0xff] }
  0x92   : > { %1737 = vst [vmem:[%s10732_s14 + $0x760] sm:$0xff] %v1736_v44  ;;  %v1740_v46 = vld [vmem:[%s10727_s13 + $0xee0] sm:$0xff]  ;;  %v1742_v47 = vld [vmem:[%s10727_s13 + $0xef0] sm:$0xff]  ;;  %1739 = vst [vmem:[%s10732_s14 + $0x768] sm:$0xff] %v1738_v45 }
  0x93   : > { %1741 = vst [vmem:[%s10732_s14 + $0x770] sm:$0xff] %v1740_v46  ;;  %1743 = vst [vmem:[%s10732_s14 + $0x778] sm:$0xff] %v1742_v47  ;;  %v1744_v48 = vld [vmem:[%s10727_s13 + $0xf00] sm:$0xff]  ;;  %v1746_v49 = vld [vmem:[%s10727_s13 + $0xf10] sm:$0xff] }
  0x94   : > { %v1748_v50 = vld [vmem:[%s10727_s13 + $0xf20] sm:$0xff]  ;;  %1745 = vst [vmem:[%s10732_s14 + $0x780] sm:$0xff] %v1744_v48  ;;  %1747 = vst [vmem:[%s10732_s14 + $0x788] sm:$0xff] %v1746_v49  ;;  %v1750_v51 = vld [vmem:[%s10727_s13 + $0xf30] sm:$0xff] }
  0x95   : > { %1749 = vst [vmem:[%s10732_s14 + $0x790] sm:$0xff] %v1748_v50  ;;  %v1752_v52 = vld [vmem:[%s10727_s13 + $0xf40] sm:$0xff]  ;;  %v1754_v53 = vld [vmem:[%s10727_s13 + $0xf50] sm:$0xff]  ;;  %1751 = vst [vmem:[%s10732_s14 + $0x798] sm:$0xff] %v1750_v51 }
  0x96   : > { %1753 = vst [vmem:[%s10732_s14 + $0x7a0] sm:$0xff] %v1752_v52  ;;  %1755 = vst [vmem:[%s10732_s14 + $0x7a8] sm:$0xff] %v1754_v53  ;;  %v1756_v54 = vld [vmem:[%s10727_s13 + $0xf60] sm:$0xff]  ;;  %v1758_v55 = vld [vmem:[%s10727_s13 + $0xf70] sm:$0xff] }
  0x97   : > { %v1760_v56 = vld [vmem:[%s10727_s13 + $0xf80] sm:$0xff]  ;;  %1757 = vst [vmem:[%s10732_s14 + $0x7b0] sm:$0xff] %v1756_v54  ;;  %1759 = vst [vmem:[%s10732_s14 + $0x7b8] sm:$0xff] %v1758_v55  ;;  %v1762_v57 = vld [vmem:[%s10727_s13 + $0xf90] sm:$0xff] }
  0x98   : > { %1761 = vst [vmem:[%s10732_s14 + $0x7c0] sm:$0xff] %v1760_v56  ;;  %v1764_v58 = vld [vmem:[%s10727_s13 + $0xfa0] sm:$0xff]  ;;  %v1766_v59 = vld [vmem:[%s10727_s13 + $0xfb0] sm:$0xff]  ;;  %1763 = vst [vmem:[%s10732_s14 + $0x7c8] sm:$0xff] %v1762_v57 }
  0x99   : > { %1765 = vst [vmem:[%s10732_s14 + $0x7d0] sm:$0xff] %v1764_v58  ;;  %1767 = vst [vmem:[%s10732_s14 + $0x7d8] sm:$0xff] %v1766_v59  ;;  %v1768_v60 = vld [vmem:[%s10727_s13 + $0xfc0] sm:$0xff]  ;;  %v1770_v61 = vld [vmem:[%s10727_s13 + $0xfd0] sm:$0xff] }
  0x9a   : > { %v1772_v62 = vld [vmem:[%s10727_s13 + $0xfe0] sm:$0xff]  ;;  %1769 = vst [vmem:[%s10732_s14 + $0x7e0] sm:$0xff] %v1768_v60  ;;  %1771 = vst [vmem:[%s10732_s14 + $0x7e8] sm:$0xff] %v1770_v61  ;;  %v1774_v63 = vld [vmem:[%s10727_s13 + $0xff0] sm:$0xff] }
  0x9b   : > { %1773 = vst [vmem:[%s10732_s14 + $0x7f0] sm:$0xff] %v1772_v62  ;;  %v1776_v0 = vld [vmem:[%s10727_s13 + $0x1000] sm:$0xff]  ;;  %v1778_v1 = vld [vmem:[%s10727_s13 + $0x1010] sm:$0xff]  ;;  %1775 = vst [vmem:[%s10732_s14 + $0x7f8] sm:$0xff] %v1774_v63 }
  0x9c   : > { %1777 = vst [vmem:[%s10732_s14 + $0x800] sm:$0xff] %v1776_v0  ;;  %1779 = vst [vmem:[%s10732_s14 + $0x808] sm:$0xff] %v1778_v1  ;;  %v1780_v2 = vld [vmem:[%s10727_s13 + $0x1020] sm:$0xff]  ;;  %v1782_v3 = vld [vmem:[%s10727_s13 + $0x1030] sm:$0xff] }
  0x9d   : > { %v1784_v4 = vld [vmem:[%s10727_s13 + $0x1040] sm:$0xff]  ;;  %1781 = vst [vmem:[%s10732_s14 + $0x810] sm:$0xff] %v1780_v2  ;;  %1783 = vst [vmem:[%s10732_s14 + $0x818] sm:$0xff] %v1782_v3  ;;  %v1786_v5 = vld [vmem:[%s10727_s13 + $0x1050] sm:$0xff] }
  0x9e   : > { %1785 = vst [vmem:[%s10732_s14 + $0x820] sm:$0xff] %v1784_v4  ;;  %v1788_v6 = vld [vmem:[%s10727_s13 + $0x1060] sm:$0xff]  ;;  %v1790_v7 = vld [vmem:[%s10727_s13 + $0x1070] sm:$0xff]  ;;  %1787 = vst [vmem:[%s10732_s14 + $0x828] sm:$0xff] %v1786_v5 }
  0x9f   : > { %1789 = vst [vmem:[%s10732_s14 + $0x830] sm:$0xff] %v1788_v6  ;;  %1791 = vst [vmem:[%s10732_s14 + $0x838] sm:$0xff] %v1790_v7  ;;  %v1792_v8 = vld [vmem:[%s10727_s13 + $0x1080] sm:$0xff]  ;;  %v1794_v9 = vld [vmem:[%s10727_s13 + $0x1090] sm:$0xff] }
  0xa0   : > { %v1796_v10 = vld [vmem:[%s10727_s13 + $0x10a0] sm:$0xff]  ;;  %1793 = vst [vmem:[%s10732_s14 + $0x840] sm:$0xff] %v1792_v8  ;;  %1795 = vst [vmem:[%s10732_s14 + $0x848] sm:$0xff] %v1794_v9  ;;  %v1798_v11 = vld [vmem:[%s10727_s13 + $0x10b0] sm:$0xff] }
  0xa1   : > { %1797 = vst [vmem:[%s10732_s14 + $0x850] sm:$0xff] %v1796_v10  ;;  %v1800_v12 = vld [vmem:[%s10727_s13 + $0x10c0] sm:$0xff]  ;;  %v1802_v13 = vld [vmem:[%s10727_s13 + $0x10d0] sm:$0xff]  ;;  %1799 = vst [vmem:[%s10732_s14 + $0x858] sm:$0xff] %v1798_v11 }
  0xa2   : > { %1801 = vst [vmem:[%s10732_s14 + $0x860] sm:$0xff] %v1800_v12  ;;  %1803 = vst [vmem:[%s10732_s14 + $0x868] sm:$0xff] %v1802_v13  ;;  %v1804_v14 = vld [vmem:[%s10727_s13 + $0x10e0] sm:$0xff]  ;;  %v1806_v15 = vld [vmem:[%s10727_s13 + $0x10f0] sm:$0xff] }
  0xa3   : > { %v1808_v16 = vld [vmem:[%s10727_s13 + $0x1100] sm:$0xff]  ;;  %1805 = vst [vmem:[%s10732_s14 + $0x870] sm:$0xff] %v1804_v14  ;;  %1807 = vst [vmem:[%s10732_s14 + $0x878] sm:$0xff] %v1806_v15  ;;  %v1810_v17 = vld [vmem:[%s10727_s13 + $0x1110] sm:$0xff] }
  0xa4   : > { %1809 = vst [vmem:[%s10732_s14 + $0x880] sm:$0xff] %v1808_v16  ;;  %v1812_v18 = vld [vmem:[%s10727_s13 + $0x1120] sm:$0xff]  ;;  %v1814_v19 = vld [vmem:[%s10727_s13 + $0x1130] sm:$0xff]  ;;  %1811 = vst [vmem:[%s10732_s14 + $0x888] sm:$0xff] %v1810_v17 }
  0xa5   : > { %1813 = vst [vmem:[%s10732_s14 + $0x890] sm:$0xff] %v1812_v18  ;;  %1815 = vst [vmem:[%s10732_s14 + $0x898] sm:$0xff] %v1814_v19  ;;  %v1816_v20 = vld [vmem:[%s10727_s13 + $0x1140] sm:$0xff]  ;;  %v1818_v21 = vld [vmem:[%s10727_s13 + $0x1150] sm:$0xff] }
  0xa6   : > { %v1820_v22 = vld [vmem:[%s10727_s13 + $0x1160] sm:$0xff]  ;;  %1817 = vst [vmem:[%s10732_s14 + $0x8a0] sm:$0xff] %v1816_v20  ;;  %1819 = vst [vmem:[%s10732_s14 + $0x8a8] sm:$0xff] %v1818_v21  ;;  %v1822_v23 = vld [vmem:[%s10727_s13 + $0x1170] sm:$0xff] }
  0xa7   : > { %1821 = vst [vmem:[%s10732_s14 + $0x8b0] sm:$0xff] %v1820_v22  ;;  %v1824_v24 = vld [vmem:[%s10727_s13 + $0x1180] sm:$0xff]  ;;  %v1826_v25 = vld [vmem:[%s10727_s13 + $0x1190] sm:$0xff]  ;;  %1823 = vst [vmem:[%s10732_s14 + $0x8b8] sm:$0xff] %v1822_v23 }
  0xa8   : > { %1825 = vst [vmem:[%s10732_s14 + $0x8c0] sm:$0xff] %v1824_v24  ;;  %1827 = vst [vmem:[%s10732_s14 + $0x8c8] sm:$0xff] %v1826_v25  ;;  %v1828_v26 = vld [vmem:[%s10727_s13 + $0x11a0] sm:$0xff]  ;;  %v1830_v27 = vld [vmem:[%s10727_s13 + $0x11b0] sm:$0xff] }
  0xa9   : > { %v1832_v28 = vld [vmem:[%s10727_s13 + $0x11c0] sm:$0xff]  ;;  %1829 = vst [vmem:[%s10732_s14 + $0x8d0] sm:$0xff] %v1828_v26  ;;  %1831 = vst [vmem:[%s10732_s14 + $0x8d8] sm:$0xff] %v1830_v27  ;;  %v1834_v29 = vld [vmem:[%s10727_s13 + $0x11d0] sm:$0xff] }
  0xaa   : > { %1833 = vst [vmem:[%s10732_s14 + $0x8e0] sm:$0xff] %v1832_v28  ;;  %v1836_v30 = vld [vmem:[%s10727_s13 + $0x11e0] sm:$0xff]  ;;  %v1838_v31 = vld [vmem:[%s10727_s13 + $0x11f0] sm:$0xff]  ;;  %1835 = vst [vmem:[%s10732_s14 + $0x8e8] sm:$0xff] %v1834_v29 }
  0xab   : > { %1837 = vst [vmem:[%s10732_s14 + $0x8f0] sm:$0xff] %v1836_v30  ;;  %1839 = vst [vmem:[%s10732_s14 + $0x8f8] sm:$0xff] %v1838_v31  ;;  %v1840_v32 = vld [vmem:[%s10727_s13 + $0x1200] sm:$0xff]  ;;  %v1842_v33 = vld [vmem:[%s10727_s13 + $0x1210] sm:$0xff] }
  0xac   : > { %v1844_v34 = vld [vmem:[%s10727_s13 + $0x1220] sm:$0xff]  ;;  %1841 = vst [vmem:[%s10732_s14 + $0x900] sm:$0xff] %v1840_v32  ;;  %1843 = vst [vmem:[%s10732_s14 + $0x908] sm:$0xff] %v1842_v33  ;;  %v1846_v35 = vld [vmem:[%s10727_s13 + $0x1230] sm:$0xff] }
  0xad   : > { %1845 = vst [vmem:[%s10732_s14 + $0x910] sm:$0xff] %v1844_v34  ;;  %v1848_v36 = vld [vmem:[%s10727_s13 + $0x1240] sm:$0xff]  ;;  %v1850_v37 = vld [vmem:[%s10727_s13 + $0x1250] sm:$0xff]  ;;  %1847 = vst [vmem:[%s10732_s14 + $0x918] sm:$0xff] %v1846_v35 }
  0xae   : > { %1849 = vst [vmem:[%s10732_s14 + $0x920] sm:$0xff] %v1848_v36  ;;  %1851 = vst [vmem:[%s10732_s14 + $0x928] sm:$0xff] %v1850_v37  ;;  %v1852_v38 = vld [vmem:[%s10727_s13 + $0x1260] sm:$0xff]  ;;  %v1854_v39 = vld [vmem:[%s10727_s13 + $0x1270] sm:$0xff] }
  0xaf   : > { %v1856_v40 = vld [vmem:[%s10727_s13 + $0x1280] sm:$0xff]  ;;  %1853 = vst [vmem:[%s10732_s14 + $0x930] sm:$0xff] %v1852_v38  ;;  %1855 = vst [vmem:[%s10732_s14 + $0x938] sm:$0xff] %v1854_v39  ;;  %v1858_v41 = vld [vmem:[%s10727_s13 + $0x1290] sm:$0xff] }
  0xb0   : > { %1857 = vst [vmem:[%s10732_s14 + $0x940] sm:$0xff] %v1856_v40  ;;  %v1860_v42 = vld [vmem:[%s10727_s13 + $0x12a0] sm:$0xff]  ;;  %v1862_v43 = vld [vmem:[%s10727_s13 + $0x12b0] sm:$0xff]  ;;  %1859 = vst [vmem:[%s10732_s14 + $0x948] sm:$0xff] %v1858_v41 }
  0xb1   : > { %1861 = vst [vmem:[%s10732_s14 + $0x950] sm:$0xff] %v1860_v42  ;;  %1863 = vst [vmem:[%s10732_s14 + $0x958] sm:$0xff] %v1862_v43  ;;  %v1864_v44 = vld [vmem:[%s10727_s13 + $0x12c0] sm:$0xff]  ;;  %v1866_v45 = vld [vmem:[%s10727_s13 + $0x12d0] sm:$0xff] }
  0xb2   : > { %v1868_v46 = vld [vmem:[%s10727_s13 + $0x12e0] sm:$0xff]  ;;  %1865 = vst [vmem:[%s10732_s14 + $0x960] sm:$0xff] %v1864_v44  ;;  %1867 = vst [vmem:[%s10732_s14 + $0x968] sm:$0xff] %v1866_v45  ;;  %v1870_v47 = vld [vmem:[%s10727_s13 + $0x12f0] sm:$0xff] }
  0xb3   : > { %1869 = vst [vmem:[%s10732_s14 + $0x970] sm:$0xff] %v1868_v46  ;;  %v1872_v48 = vld [vmem:[%s10727_s13 + $0x1300] sm:$0xff]  ;;  %v1874_v49 = vld [vmem:[%s10727_s13 + $0x1310] sm:$0xff]  ;;  %1871 = vst [vmem:[%s10732_s14 + $0x978] sm:$0xff] %v1870_v47 }
  0xb4   : > { %1873 = vst [vmem:[%s10732_s14 + $0x980] sm:$0xff] %v1872_v48  ;;  %1875 = vst [vmem:[%s10732_s14 + $0x988] sm:$0xff] %v1874_v49  ;;  %v1876_v50 = vld [vmem:[%s10727_s13 + $0x1320] sm:$0xff]  ;;  %v1878_v51 = vld [vmem:[%s10727_s13 + $0x1330] sm:$0xff] }
  0xb5   : > { %v1880_v52 = vld [vmem:[%s10727_s13 + $0x1340] sm:$0xff]  ;;  %1877 = vst [vmem:[%s10732_s14 + $0x990] sm:$0xff] %v1876_v50  ;;  %1879 = vst [vmem:[%s10732_s14 + $0x998] sm:$0xff] %v1878_v51  ;;  %v1882_v53 = vld [vmem:[%s10727_s13 + $0x1350] sm:$0xff] }
  0xb6   : > { %1881 = vst [vmem:[%s10732_s14 + $0x9a0] sm:$0xff] %v1880_v52  ;;  %v1884_v54 = vld [vmem:[%s10727_s13 + $0x1360] sm:$0xff]  ;;  %v1886_v55 = vld [vmem:[%s10727_s13 + $0x1370] sm:$0xff]  ;;  %1883 = vst [vmem:[%s10732_s14 + $0x9a8] sm:$0xff] %v1882_v53 }
  0xb7   : > { %1885 = vst [vmem:[%s10732_s14 + $0x9b0] sm:$0xff] %v1884_v54  ;;  %1887 = vst [vmem:[%s10732_s14 + $0x9b8] sm:$0xff] %v1886_v55  ;;  %v1888_v56 = vld [vmem:[%s10727_s13 + $0x1380] sm:$0xff]  ;;  %v1890_v57 = vld [vmem:[%s10727_s13 + $0x1390] sm:$0xff] }
  0xb8   : > { %v1892_v58 = vld [vmem:[%s10727_s13 + $0x13a0] sm:$0xff]  ;;  %1889 = vst [vmem:[%s10732_s14 + $0x9c0] sm:$0xff] %v1888_v56  ;;  %1891 = vst [vmem:[%s10732_s14 + $0x9c8] sm:$0xff] %v1890_v57  ;;  %v1894_v59 = vld [vmem:[%s10727_s13 + $0x13b0] sm:$0xff] }
  0xb9   : > { %1893 = vst [vmem:[%s10732_s14 + $0x9d0] sm:$0xff] %v1892_v58  ;;  %v1896_v60 = vld [vmem:[%s10727_s13 + $0x13c0] sm:$0xff]  ;;  %v1898_v61 = vld [vmem:[%s10727_s13 + $0x13d0] sm:$0xff]  ;;  %1895 = vst [vmem:[%s10732_s14 + $0x9d8] sm:$0xff] %v1894_v59 }
  0xba   : > { %1897 = vst [vmem:[%s10732_s14 + $0x9e0] sm:$0xff] %v1896_v60  ;;  %1899 = vst [vmem:[%s10732_s14 + $0x9e8] sm:$0xff] %v1898_v61  ;;  %v1900_v62 = vld [vmem:[%s10727_s13 + $0x13e0] sm:$0xff]  ;;  %v1902_v63 = vld [vmem:[%s10727_s13 + $0x13f0] sm:$0xff] }
  0xbb   : > { %v1904_v0 = vld [vmem:[%s10727_s13 + $0x1400] sm:$0xff]  ;;  %1901 = vst [vmem:[%s10732_s14 + $0x9f0] sm:$0xff] %v1900_v62  ;;  %1903 = vst [vmem:[%s10732_s14 + $0x9f8] sm:$0xff] %v1902_v63  ;;  %v1906_v1 = vld [vmem:[%s10727_s13 + $0x1410] sm:$0xff] }
  0xbc   : > { %1905 = vst [vmem:[%s10732_s14 + $0xa00] sm:$0xff] %v1904_v0  ;;  %v1908_v2 = vld [vmem:[%s10727_s13 + $0x1420] sm:$0xff]  ;;  %v1910_v3 = vld [vmem:[%s10727_s13 + $0x1430] sm:$0xff]  ;;  %1907 = vst [vmem:[%s10732_s14 + $0xa08] sm:$0xff] %v1906_v1 }
  0xbd   : > { %1909 = vst [vmem:[%s10732_s14 + $0xa10] sm:$0xff] %v1908_v2  ;;  %1911 = vst [vmem:[%s10732_s14 + $0xa18] sm:$0xff] %v1910_v3  ;;  %v1912_v4 = vld [vmem:[%s10727_s13 + $0x1440] sm:$0xff]  ;;  %v1914_v5 = vld [vmem:[%s10727_s13 + $0x1450] sm:$0xff] }
  0xbe   : > { %v1916_v6 = vld [vmem:[%s10727_s13 + $0x1460] sm:$0xff]  ;;  %1913 = vst [vmem:[%s10732_s14 + $0xa20] sm:$0xff] %v1912_v4  ;;  %1915 = vst [vmem:[%s10732_s14 + $0xa28] sm:$0xff] %v1914_v5  ;;  %v1918_v7 = vld [vmem:[%s10727_s13 + $0x1470] sm:$0xff] }
  0xbf   : > { %1917 = vst [vmem:[%s10732_s14 + $0xa30] sm:$0xff] %v1916_v6  ;;  %v1920_v8 = vld [vmem:[%s10727_s13 + $0x1480] sm:$0xff]  ;;  %v1922_v9 = vld [vmem:[%s10727_s13 + $0x1490] sm:$0xff]  ;;  %1919 = vst [vmem:[%s10732_s14 + $0xa38] sm:$0xff] %v1918_v7 }
  0xc0   : > { %1921 = vst [vmem:[%s10732_s14 + $0xa40] sm:$0xff] %v1920_v8  ;;  %1923 = vst [vmem:[%s10732_s14 + $0xa48] sm:$0xff] %v1922_v9  ;;  %v1924_v10 = vld [vmem:[%s10727_s13 + $0x14a0] sm:$0xff]  ;;  %v1926_v11 = vld [vmem:[%s10727_s13 + $0x14b0] sm:$0xff] }
  0xc1   : > { %v1928_v12 = vld [vmem:[%s10727_s13 + $0x14c0] sm:$0xff]  ;;  %1925 = vst [vmem:[%s10732_s14 + $0xa50] sm:$0xff] %v1924_v10  ;;  %1927 = vst [vmem:[%s10732_s14 + $0xa58] sm:$0xff] %v1926_v11  ;;  %v1930_v13 = vld [vmem:[%s10727_s13 + $0x14d0] sm:$0xff] }
  0xc2   : > { %1929 = vst [vmem:[%s10732_s14 + $0xa60] sm:$0xff] %v1928_v12  ;;  %v1932_v14 = vld [vmem:[%s10727_s13 + $0x14e0] sm:$0xff]  ;;  %v1934_v15 = vld [vmem:[%s10727_s13 + $0x14f0] sm:$0xff]  ;;  %1931 = vst [vmem:[%s10732_s14 + $0xa68] sm:$0xff] %v1930_v13 }
  0xc3   : > { %1933 = vst [vmem:[%s10732_s14 + $0xa70] sm:$0xff] %v1932_v14  ;;  %1935 = vst [vmem:[%s10732_s14 + $0xa78] sm:$0xff] %v1934_v15  ;;  %v1936_v16 = vld [vmem:[%s10727_s13 + $0x1500] sm:$0xff]  ;;  %v1938_v17 = vld [vmem:[%s10727_s13 + $0x1510] sm:$0xff] }
  0xc4   : > { %v1940_v18 = vld [vmem:[%s10727_s13 + $0x1520] sm:$0xff]  ;;  %1937 = vst [vmem:[%s10732_s14 + $0xa80] sm:$0xff] %v1936_v16  ;;  %1939 = vst [vmem:[%s10732_s14 + $0xa88] sm:$0xff] %v1938_v17  ;;  %v1942_v19 = vld [vmem:[%s10727_s13 + $0x1530] sm:$0xff] }
  0xc5   : > { %1941 = vst [vmem:[%s10732_s14 + $0xa90] sm:$0xff] %v1940_v18  ;;  %v1944_v20 = vld [vmem:[%s10727_s13 + $0x1540] sm:$0xff]  ;;  %v1946_v21 = vld [vmem:[%s10727_s13 + $0x1550] sm:$0xff]  ;;  %1943 = vst [vmem:[%s10732_s14 + $0xa98] sm:$0xff] %v1942_v19 }
  0xc6   : > { %1945 = vst [vmem:[%s10732_s14 + $0xaa0] sm:$0xff] %v1944_v20  ;;  %1947 = vst [vmem:[%s10732_s14 + $0xaa8] sm:$0xff] %v1946_v21  ;;  %v1948_v22 = vld [vmem:[%s10727_s13 + $0x1560] sm:$0xff]  ;;  %v1950_v23 = vld [vmem:[%s10727_s13 + $0x1570] sm:$0xff] }
  0xc7   : > { %v1952_v24 = vld [vmem:[%s10727_s13 + $0x1580] sm:$0xff]  ;;  %1949 = vst [vmem:[%s10732_s14 + $0xab0] sm:$0xff] %v1948_v22  ;;  %1951 = vst [vmem:[%s10732_s14 + $0xab8] sm:$0xff] %v1950_v23  ;;  %v1954_v25 = vld [vmem:[%s10727_s13 + $0x1590] sm:$0xff] }
  0xc8   : > { %1953 = vst [vmem:[%s10732_s14 + $0xac0] sm:$0xff] %v1952_v24  ;;  %v1956_v26 = vld [vmem:[%s10727_s13 + $0x15a0] sm:$0xff]  ;;  %v1958_v27 = vld [vmem:[%s10727_s13 + $0x15b0] sm:$0xff]  ;;  %1955 = vst [vmem:[%s10732_s14 + $0xac8] sm:$0xff] %v1954_v25 }
  0xc9   : > { %1957 = vst [vmem:[%s10732_s14 + $0xad0] sm:$0xff] %v1956_v26  ;;  %1959 = vst [vmem:[%s10732_s14 + $0xad8] sm:$0xff] %v1958_v27  ;;  %v1960_v28 = vld [vmem:[%s10727_s13 + $0x15c0] sm:$0xff]  ;;  %v1962_v29 = vld [vmem:[%s10727_s13 + $0x15d0] sm:$0xff] }
  0xca   : > { %v1964_v30 = vld [vmem:[%s10727_s13 + $0x15e0] sm:$0xff]  ;;  %1961 = vst [vmem:[%s10732_s14 + $0xae0] sm:$0xff] %v1960_v28  ;;  %1963 = vst [vmem:[%s10732_s14 + $0xae8] sm:$0xff] %v1962_v29  ;;  %v1966_v31 = vld [vmem:[%s10727_s13 + $0x15f0] sm:$0xff] }
  0xcb   : > { %1965 = vst [vmem:[%s10732_s14 + $0xaf0] sm:$0xff] %v1964_v30  ;;  %v1968_v32 = vld [vmem:[%s10727_s13 + $0x1600] sm:$0xff]  ;;  %v1970_v33 = vld [vmem:[%s10727_s13 + $0x1610] sm:$0xff]  ;;  %1967 = vst [vmem:[%s10732_s14 + $0xaf8] sm:$0xff] %v1966_v31 }
  0xcc   : > { %1969 = vst [vmem:[%s10732_s14 + $0xb00] sm:$0xff] %v1968_v32  ;;  %1971 = vst [vmem:[%s10732_s14 + $0xb08] sm:$0xff] %v1970_v33  ;;  %v1972_v34 = vld [vmem:[%s10727_s13 + $0x1620] sm:$0xff]  ;;  %v1974_v35 = vld [vmem:[%s10727_s13 + $0x1630] sm:$0xff] }
  0xcd   : > { %v1976_v36 = vld [vmem:[%s10727_s13 + $0x1640] sm:$0xff]  ;;  %1973 = vst [vmem:[%s10732_s14 + $0xb10] sm:$0xff] %v1972_v34  ;;  %1975 = vst [vmem:[%s10732_s14 + $0xb18] sm:$0xff] %v1974_v35  ;;  %v1978_v37 = vld [vmem:[%s10727_s13 + $0x1650] sm:$0xff] }
  0xce   : > { %1977 = vst [vmem:[%s10732_s14 + $0xb20] sm:$0xff] %v1976_v36  ;;  %v1980_v38 = vld [vmem:[%s10727_s13 + $0x1660] sm:$0xff]  ;;  %v1982_v39 = vld [vmem:[%s10727_s13 + $0x1670] sm:$0xff]  ;;  %1979 = vst [vmem:[%s10732_s14 + $0xb28] sm:$0xff] %v1978_v37 }
  0xcf   : > { %1981 = vst [vmem:[%s10732_s14 + $0xb30] sm:$0xff] %v1980_v38  ;;  %1983 = vst [vmem:[%s10732_s14 + $0xb38] sm:$0xff] %v1982_v39  ;;  %v1984_v40 = vld [vmem:[%s10727_s13 + $0x1680] sm:$0xff]  ;;  %v1986_v41 = vld [vmem:[%s10727_s13 + $0x1690] sm:$0xff] }
  0xd0   : > { %v1988_v42 = vld [vmem:[%s10727_s13 + $0x16a0] sm:$0xff]  ;;  %1985 = vst [vmem:[%s10732_s14 + $0xb40] sm:$0xff] %v1984_v40  ;;  %1987 = vst [vmem:[%s10732_s14 + $0xb48] sm:$0xff] %v1986_v41  ;;  %v1990_v43 = vld [vmem:[%s10727_s13 + $0x16b0] sm:$0xff] }
  0xd1   : > { %1989 = vst [vmem:[%s10732_s14 + $0xb50] sm:$0xff] %v1988_v42  ;;  %v1992_v44 = vld [vmem:[%s10727_s13 + $0x16c0] sm:$0xff]  ;;  %v1994_v45 = vld [vmem:[%s10727_s13 + $0x16d0] sm:$0xff]  ;;  %1991 = vst [vmem:[%s10732_s14 + $0xb58] sm:$0xff] %v1990_v43 }
  0xd2   : > { %1993 = vst [vmem:[%s10732_s14 + $0xb60] sm:$0xff] %v1992_v44  ;;  %1995 = vst [vmem:[%s10732_s14 + $0xb68] sm:$0xff] %v1994_v45  ;;  %v1996_v46 = vld [vmem:[%s10727_s13 + $0x16e0] sm:$0xff]  ;;  %v1998_v47 = vld [vmem:[%s10727_s13 + $0x16f0] sm:$0xff] }
  0xd3   : > { %v2000_v48 = vld [vmem:[%s10727_s13 + $0x1700] sm:$0xff]  ;;  %1997 = vst [vmem:[%s10732_s14 + $0xb70] sm:$0xff] %v1996_v46  ;;  %1999 = vst [vmem:[%s10732_s14 + $0xb78] sm:$0xff] %v1998_v47  ;;  %v2002_v49 = vld [vmem:[%s10727_s13 + $0x1710] sm:$0xff] }
  0xd4   : > { %2001 = vst [vmem:[%s10732_s14 + $0xb80] sm:$0xff] %v2000_v48  ;;  %v2004_v50 = vld [vmem:[%s10727_s13 + $0x1720] sm:$0xff]  ;;  %v2006_v51 = vld [vmem:[%s10727_s13 + $0x1730] sm:$0xff]  ;;  %2003 = vst [vmem:[%s10732_s14 + $0xb88] sm:$0xff] %v2002_v49 }
  0xd5   : > { %2005 = vst [vmem:[%s10732_s14 + $0xb90] sm:$0xff] %v2004_v50  ;;  %2007 = vst [vmem:[%s10732_s14 + $0xb98] sm:$0xff] %v2006_v51  ;;  %v2008_v52 = vld [vmem:[%s10727_s13 + $0x1740] sm:$0xff]  ;;  %v2010_v53 = vld [vmem:[%s10727_s13 + $0x1750] sm:$0xff] }
  0xd6   : > { %v2012_v54 = vld [vmem:[%s10727_s13 + $0x1760] sm:$0xff]  ;;  %2009 = vst [vmem:[%s10732_s14 + $0xba0] sm:$0xff] %v2008_v52  ;;  %2011 = vst [vmem:[%s10732_s14 + $0xba8] sm:$0xff] %v2010_v53  ;;  %v2014_v55 = vld [vmem:[%s10727_s13 + $0x1770] sm:$0xff] }
  0xd7   : > { %2013 = vst [vmem:[%s10732_s14 + $0xbb0] sm:$0xff] %v2012_v54  ;;  %v2016_v56 = vld [vmem:[%s10727_s13 + $0x1780] sm:$0xff]  ;;  %v2018_v57 = vld [vmem:[%s10727_s13 + $0x1790] sm:$0xff]  ;;  %2015 = vst [vmem:[%s10732_s14 + $0xbb8] sm:$0xff] %v2014_v55 }
  0xd8   : > { %2017 = vst [vmem:[%s10732_s14 + $0xbc0] sm:$0xff] %v2016_v56  ;;  %2019 = vst [vmem:[%s10732_s14 + $0xbc8] sm:$0xff] %v2018_v57  ;;  %v2020_v58 = vld [vmem:[%s10727_s13 + $0x17a0] sm:$0xff]  ;;  %v2022_v59 = vld [vmem:[%s10727_s13 + $0x17b0] sm:$0xff] }
  0xd9   : > { %v2024_v60 = vld [vmem:[%s10727_s13 + $0x17c0] sm:$0xff]  ;;  %2021 = vst [vmem:[%s10732_s14 + $0xbd0] sm:$0xff] %v2020_v58  ;;  %2023 = vst [vmem:[%s10732_s14 + $0xbd8] sm:$0xff] %v2022_v59  ;;  %v2026_v61 = vld [vmem:[%s10727_s13 + $0x17d0] sm:$0xff] }
  0xda   : > { %2025 = vst [vmem:[%s10732_s14 + $0xbe0] sm:$0xff] %v2024_v60  ;;  %v2028_v62 = vld [vmem:[%s10727_s13 + $0x17e0] sm:$0xff]  ;;  %v2030_v63 = vld [vmem:[%s10727_s13 + $0x17f0] sm:$0xff]  ;;  %2027 = vst [vmem:[%s10732_s14 + $0xbe8] sm:$0xff] %v2026_v61 }
  0xdb   : > { %2029 = vst [vmem:[%s10732_s14 + $0xbf0] sm:$0xff] %v2028_v62  ;;  %2031 = vst [vmem:[%s10732_s14 + $0xbf8] sm:$0xff] %v2030_v63  ;;  %v2032_v0 = vld [vmem:[%s10727_s13 + $0x1800] sm:$0xff]  ;;  %v2034_v1 = vld [vmem:[%s10727_s13 + $0x1810] sm:$0xff] }
  0xdc   : > { %v2036_v2 = vld [vmem:[%s10727_s13 + $0x1820] sm:$0xff]  ;;  %2033 = vst [vmem:[%s10732_s14 + $0xc00] sm:$0xff] %v2032_v0  ;;  %2035 = vst [vmem:[%s10732_s14 + $0xc08] sm:$0xff] %v2034_v1  ;;  %v2038_v3 = vld [vmem:[%s10727_s13 + $0x1830] sm:$0xff] }
  0xdd   : > { %2037 = vst [vmem:[%s10732_s14 + $0xc10] sm:$0xff] %v2036_v2  ;;  %v2040_v4 = vld [vmem:[%s10727_s13 + $0x1840] sm:$0xff]  ;;  %v2042_v5 = vld [vmem:[%s10727_s13 + $0x1850] sm:$0xff]  ;;  %2039 = vst [vmem:[%s10732_s14 + $0xc18] sm:$0xff] %v2038_v3 }
  0xde   : > { %2041 = vst [vmem:[%s10732_s14 + $0xc20] sm:$0xff] %v2040_v4  ;;  %2043 = vst [vmem:[%s10732_s14 + $0xc28] sm:$0xff] %v2042_v5  ;;  %v2044_v6 = vld [vmem:[%s10727_s13 + $0x1860] sm:$0xff]  ;;  %v2046_v7 = vld [vmem:[%s10727_s13 + $0x1870] sm:$0xff] }
  0xdf   : > { %v2048_v8 = vld [vmem:[%s10727_s13 + $0x1880] sm:$0xff]  ;;  %2045 = vst [vmem:[%s10732_s14 + $0xc30] sm:$0xff] %v2044_v6  ;;  %2047 = vst [vmem:[%s10732_s14 + $0xc38] sm:$0xff] %v2046_v7  ;;  %v2050_v9 = vld [vmem:[%s10727_s13 + $0x1890] sm:$0xff] }
  0xe0   : > { %2049 = vst [vmem:[%s10732_s14 + $0xc40] sm:$0xff] %v2048_v8  ;;  %v2052_v10 = vld [vmem:[%s10727_s13 + $0x18a0] sm:$0xff]  ;;  %v2054_v11 = vld [vmem:[%s10727_s13 + $0x18b0] sm:$0xff]  ;;  %2051 = vst [vmem:[%s10732_s14 + $0xc48] sm:$0xff] %v2050_v9 }
  0xe1   : > { %2053 = vst [vmem:[%s10732_s14 + $0xc50] sm:$0xff] %v2052_v10  ;;  %2055 = vst [vmem:[%s10732_s14 + $0xc58] sm:$0xff] %v2054_v11  ;;  %v2056_v12 = vld [vmem:[%s10727_s13 + $0x18c0] sm:$0xff]  ;;  %v2058_v13 = vld [vmem:[%s10727_s13 + $0x18d0] sm:$0xff] }
  0xe2   : > { %v2060_v14 = vld [vmem:[%s10727_s13 + $0x18e0] sm:$0xff]  ;;  %2057 = vst [vmem:[%s10732_s14 + $0xc60] sm:$0xff] %v2056_v12  ;;  %2059 = vst [vmem:[%s10732_s14 + $0xc68] sm:$0xff] %v2058_v13  ;;  %v2062_v15 = vld [vmem:[%s10727_s13 + $0x18f0] sm:$0xff] }
  0xe3   : > { %2061 = vst [vmem:[%s10732_s14 + $0xc70] sm:$0xff] %v2060_v14  ;;  %v2064_v16 = vld [vmem:[%s10727_s13 + $0x1900] sm:$0xff]  ;;  %v2066_v17 = vld [vmem:[%s10727_s13 + $0x1910] sm:$0xff]  ;;  %2063 = vst [vmem:[%s10732_s14 + $0xc78] sm:$0xff] %v2062_v15 }
  0xe4   : > { %2065 = vst [vmem:[%s10732_s14 + $0xc80] sm:$0xff] %v2064_v16  ;;  %2067 = vst [vmem:[%s10732_s14 + $0xc88] sm:$0xff] %v2066_v17  ;;  %v2068_v18 = vld [vmem:[%s10727_s13 + $0x1920] sm:$0xff]  ;;  %v2070_v19 = vld [vmem:[%s10727_s13 + $0x1930] sm:$0xff] }
  0xe5   : > { %v2072_v20 = vld [vmem:[%s10727_s13 + $0x1940] sm:$0xff]  ;;  %2069 = vst [vmem:[%s10732_s14 + $0xc90] sm:$0xff] %v2068_v18  ;;  %2071 = vst [vmem:[%s10732_s14 + $0xc98] sm:$0xff] %v2070_v19  ;;  %v2074_v21 = vld [vmem:[%s10727_s13 + $0x1950] sm:$0xff] }
  0xe6   : > { %2073 = vst [vmem:[%s10732_s14 + $0xca0] sm:$0xff] %v2072_v20  ;;  %v2076_v22 = vld [vmem:[%s10727_s13 + $0x1960] sm:$0xff]  ;;  %v2078_v23 = vld [vmem:[%s10727_s13 + $0x1970] sm:$0xff]  ;;  %2075 = vst [vmem:[%s10732_s14 + $0xca8] sm:$0xff] %v2074_v21 }
  0xe7   : > { %2077 = vst [vmem:[%s10732_s14 + $0xcb0] sm:$0xff] %v2076_v22  ;;  %2079 = vst [vmem:[%s10732_s14 + $0xcb8] sm:$0xff] %v2078_v23  ;;  %v2080_v24 = vld [vmem:[%s10727_s13 + $0x1980] sm:$0xff]  ;;  %v2082_v25 = vld [vmem:[%s10727_s13 + $0x1990] sm:$0xff] }
  0xe8   : > { %v2084_v26 = vld [vmem:[%s10727_s13 + $0x19a0] sm:$0xff]  ;;  %2081 = vst [vmem:[%s10732_s14 + $0xcc0] sm:$0xff] %v2080_v24  ;;  %2083 = vst [vmem:[%s10732_s14 + $0xcc8] sm:$0xff] %v2082_v25  ;;  %v2086_v27 = vld [vmem:[%s10727_s13 + $0x19b0] sm:$0xff] }
  0xe9   : > { %2085 = vst [vmem:[%s10732_s14 + $0xcd0] sm:$0xff] %v2084_v26  ;;  %v2088_v28 = vld [vmem:[%s10727_s13 + $0x19c0] sm:$0xff]  ;;  %v2090_v29 = vld [vmem:[%s10727_s13 + $0x19d0] sm:$0xff]  ;;  %2087 = vst [vmem:[%s10732_s14 + $0xcd8] sm:$0xff] %v2086_v27 }
  0xea   : > { %2089 = vst [vmem:[%s10732_s14 + $0xce0] sm:$0xff] %v2088_v28  ;;  %2091 = vst [vmem:[%s10732_s14 + $0xce8] sm:$0xff] %v2090_v29  ;;  %v2092_v30 = vld [vmem:[%s10727_s13 + $0x19e0] sm:$0xff]  ;;  %v2094_v31 = vld [vmem:[%s10727_s13 + $0x19f0] sm:$0xff] }
  0xeb   : > { %v2096_v32 = vld [vmem:[%s10727_s13 + $0x1a00] sm:$0xff]  ;;  %2093 = vst [vmem:[%s10732_s14 + $0xcf0] sm:$0xff] %v2092_v30  ;;  %2095 = vst [vmem:[%s10732_s14 + $0xcf8] sm:$0xff] %v2094_v31  ;;  %v2098_v33 = vld [vmem:[%s10727_s13 + $0x1a10] sm:$0xff] }
  0xec   : > { %2097 = vst [vmem:[%s10732_s14 + $0xd00] sm:$0xff] %v2096_v32  ;;  %v2100_v34 = vld [vmem:[%s10727_s13 + $0x1a20] sm:$0xff]  ;;  %v2102_v35 = vld [vmem:[%s10727_s13 + $0x1a30] sm:$0xff]  ;;  %2099 = vst [vmem:[%s10732_s14 + $0xd08] sm:$0xff] %v2098_v33 }
  0xed   : > { %2101 = vst [vmem:[%s10732_s14 + $0xd10] sm:$0xff] %v2100_v34  ;;  %2103 = vst [vmem:[%s10732_s14 + $0xd18] sm:$0xff] %v2102_v35  ;;  %v2104_v36 = vld [vmem:[%s10727_s13 + $0x1a40] sm:$0xff]  ;;  %v2106_v37 = vld [vmem:[%s10727_s13 + $0x1a50] sm:$0xff] }
  0xee   : > { %v2108_v38 = vld [vmem:[%s10727_s13 + $0x1a60] sm:$0xff]  ;;  %2105 = vst [vmem:[%s10732_s14 + $0xd20] sm:$0xff] %v2104_v36  ;;  %2107 = vst [vmem:[%s10732_s14 + $0xd28] sm:$0xff] %v2106_v37  ;;  %v2110_v39 = vld [vmem:[%s10727_s13 + $0x1a70] sm:$0xff] }
  0xef   : > { %2109 = vst [vmem:[%s10732_s14 + $0xd30] sm:$0xff] %v2108_v38  ;;  %v2112_v40 = vld [vmem:[%s10727_s13 + $0x1a80] sm:$0xff]  ;;  %v2114_v41 = vld [vmem:[%s10727_s13 + $0x1a90] sm:$0xff]  ;;  %2111 = vst [vmem:[%s10732_s14 + $0xd38] sm:$0xff] %v2110_v39 }
  0xf0   : > { %2113 = vst [vmem:[%s10732_s14 + $0xd40] sm:$0xff] %v2112_v40  ;;  %2115 = vst [vmem:[%s10732_s14 + $0xd48] sm:$0xff] %v2114_v41  ;;  %v2116_v42 = vld [vmem:[%s10727_s13 + $0x1aa0] sm:$0xff]  ;;  %v2118_v43 = vld [vmem:[%s10727_s13 + $0x1ab0] sm:$0xff] }
  0xf1   : > { %v2120_v44 = vld [vmem:[%s10727_s13 + $0x1ac0] sm:$0xff]  ;;  %2117 = vst [vmem:[%s10732_s14 + $0xd50] sm:$0xff] %v2116_v42  ;;  %2119 = vst [vmem:[%s10732_s14 + $0xd58] sm:$0xff] %v2118_v43  ;;  %v2122_v45 = vld [vmem:[%s10727_s13 + $0x1ad0] sm:$0xff] }
  0xf2   : > { %2121 = vst [vmem:[%s10732_s14 + $0xd60] sm:$0xff] %v2120_v44  ;;  %v2124_v46 = vld [vmem:[%s10727_s13 + $0x1ae0] sm:$0xff]  ;;  %v2126_v47 = vld [vmem:[%s10727_s13 + $0x1af0] sm:$0xff]  ;;  %2123 = vst [vmem:[%s10732_s14 + $0xd68] sm:$0xff] %v2122_v45 }
  0xf3   : > { %2125 = vst [vmem:[%s10732_s14 + $0xd70] sm:$0xff] %v2124_v46  ;;  %2127 = vst [vmem:[%s10732_s14 + $0xd78] sm:$0xff] %v2126_v47  ;;  %v2128_v48 = vld [vmem:[%s10727_s13 + $0x1b00] sm:$0xff]  ;;  %v2130_v49 = vld [vmem:[%s10727_s13 + $0x1b10] sm:$0xff] }
  0xf4   : > { %v2132_v50 = vld [vmem:[%s10727_s13 + $0x1b20] sm:$0xff]  ;;  %2129 = vst [vmem:[%s10732_s14 + $0xd80] sm:$0xff] %v2128_v48  ;;  %2131 = vst [vmem:[%s10732_s14 + $0xd88] sm:$0xff] %v2130_v49  ;;  %v2134_v51 = vld [vmem:[%s10727_s13 + $0x1b30] sm:$0xff] }
  0xf5   : > { %2133 = vst [vmem:[%s10732_s14 + $0xd90] sm:$0xff] %v2132_v50  ;;  %v2136_v52 = vld [vmem:[%s10727_s13 + $0x1b40] sm:$0xff]  ;;  %v2138_v53 = vld [vmem:[%s10727_s13 + $0x1b50] sm:$0xff]  ;;  %2135 = vst [vmem:[%s10732_s14 + $0xd98] sm:$0xff] %v2134_v51 }
  0xf6   : > { %2137 = vst [vmem:[%s10732_s14 + $0xda0] sm:$0xff] %v2136_v52  ;;  %2139 = vst [vmem:[%s10732_s14 + $0xda8] sm:$0xff] %v2138_v53  ;;  %v2140_v54 = vld [vmem:[%s10727_s13 + $0x1b60] sm:$0xff]  ;;  %v2142_v55 = vld [vmem:[%s10727_s13 + $0x1b70] sm:$0xff] }
  0xf7   : > { %v2144_v56 = vld [vmem:[%s10727_s13 + $0x1b80] sm:$0xff]  ;;  %2141 = vst [vmem:[%s10732_s14 + $0xdb0] sm:$0xff] %v2140_v54  ;;  %2143 = vst [vmem:[%s10732_s14 + $0xdb8] sm:$0xff] %v2142_v55  ;;  %v2146_v57 = vld [vmem:[%s10727_s13 + $0x1b90] sm:$0xff] }
  0xf8   : > { %2145 = vst [vmem:[%s10732_s14 + $0xdc0] sm:$0xff] %v2144_v56  ;;  %v2148_v58 = vld [vmem:[%s10727_s13 + $0x1ba0] sm:$0xff]  ;;  %v2150_v59 = vld [vmem:[%s10727_s13 + $0x1bb0] sm:$0xff]  ;;  %2147 = vst [vmem:[%s10732_s14 + $0xdc8] sm:$0xff] %v2146_v57 }
  0xf9   : > { %2149 = vst [vmem:[%s10732_s14 + $0xdd0] sm:$0xff] %v2148_v58  ;;  %2151 = vst [vmem:[%s10732_s14 + $0xdd8] sm:$0xff] %v2150_v59  ;;  %v2152_v60 = vld [vmem:[%s10727_s13 + $0x1bc0] sm:$0xff]  ;;  %v2154_v61 = vld [vmem:[%s10727_s13 + $0x1bd0] sm:$0xff] }
  0xfa   : > { %v2156_v62 = vld [vmem:[%s10727_s13 + $0x1be0] sm:$0xff]  ;;  %2153 = vst [vmem:[%s10732_s14 + $0xde0] sm:$0xff] %v2152_v60  ;;  %2155 = vst [vmem:[%s10732_s14 + $0xde8] sm:$0xff] %v2154_v61  ;;  %v2158_v63 = vld [vmem:[%s10727_s13 + $0x1bf0] sm:$0xff] }
  0xfb   : > { %2157 = vst [vmem:[%s10732_s14 + $0xdf0] sm:$0xff] %v2156_v62  ;;  %v2160_v0 = vld [vmem:[%s10727_s13 + $0x1c00] sm:$0xff]  ;;  %v2162_v1 = vld [vmem:[%s10727_s13 + $0x1c10] sm:$0xff]  ;;  %2159 = vst [vmem:[%s10732_s14 + $0xdf8] sm:$0xff] %v2158_v63 }
  0xfc   : > { %2161 = vst [vmem:[%s10732_s14 + $0xe00] sm:$0xff] %v2160_v0  ;;  %2163 = vst [vmem:[%s10732_s14 + $0xe08] sm:$0xff] %v2162_v1  ;;  %v2164_v2 = vld [vmem:[%s10727_s13 + $0x1c20] sm:$0xff]  ;;  %v2166_v3 = vld [vmem:[%s10727_s13 + $0x1c30] sm:$0xff] }
  0xfd   : > { %v2168_v4 = vld [vmem:[%s10727_s13 + $0x1c40] sm:$0xff]  ;;  %2165 = vst [vmem:[%s10732_s14 + $0xe10] sm:$0xff] %v2164_v2  ;;  %2167 = vst [vmem:[%s10732_s14 + $0xe18] sm:$0xff] %v2166_v3  ;;  %v2170_v5 = vld [vmem:[%s10727_s13 + $0x1c50] sm:$0xff] }
  0xfe   : > { %2169 = vst [vmem:[%s10732_s14 + $0xe20] sm:$0xff] %v2168_v4  ;;  %v2172_v6 = vld [vmem:[%s10727_s13 + $0x1c60] sm:$0xff]  ;;  %v2174_v7 = vld [vmem:[%s10727_s13 + $0x1c70] sm:$0xff]  ;;  %2171 = vst [vmem:[%s10732_s14 + $0xe28] sm:$0xff] %v2170_v5 }
  0xff   : > { %2173 = vst [vmem:[%s10732_s14 + $0xe30] sm:$0xff] %v2172_v6  ;;  %2175 = vst [vmem:[%s10732_s14 + $0xe38] sm:$0xff] %v2174_v7  ;;  %v2176_v8 = vld [vmem:[%s10727_s13 + $0x1c80] sm:$0xff]  ;;  %v2178_v9 = vld [vmem:[%s10727_s13 + $0x1c90] sm:$0xff] }
 0x100   : > { %v2180_v10 = vld [vmem:[%s10727_s13 + $0x1ca0] sm:$0xff]  ;;  %2177 = vst [vmem:[%s10732_s14 + $0xe40] sm:$0xff] %v2176_v8  ;;  %2179 = vst [vmem:[%s10732_s14 + $0xe48] sm:$0xff] %v2178_v9  ;;  %v2182_v11 = vld [vmem:[%s10727_s13 + $0x1cb0] sm:$0xff] }
 0x101   : > { %2181 = vst [vmem:[%s10732_s14 + $0xe50] sm:$0xff] %v2180_v10  ;;  %v2184_v12 = vld [vmem:[%s10727_s13 + $0x1cc0] sm:$0xff]  ;;  %v2186_v13 = vld [vmem:[%s10727_s13 + $0x1cd0] sm:$0xff]  ;;  %2183 = vst [vmem:[%s10732_s14 + $0xe58] sm:$0xff] %v2182_v11 }
 0x102   : > { %2185 = vst [vmem:[%s10732_s14 + $0xe60] sm:$0xff] %v2184_v12  ;;  %2187 = vst [vmem:[%s10732_s14 + $0xe68] sm:$0xff] %v2186_v13  ;;  %v2188_v14 = vld [vmem:[%s10727_s13 + $0x1ce0] sm:$0xff]  ;;  %v2190_v15 = vld [vmem:[%s10727_s13 + $0x1cf0] sm:$0xff] }
 0x103   : > { %v2192_v16 = vld [vmem:[%s10727_s13 + $0x1d00] sm:$0xff]  ;;  %2189 = vst [vmem:[%s10732_s14 + $0xe70] sm:$0xff] %v2188_v14  ;;  %2191 = vst [vmem:[%s10732_s14 + $0xe78] sm:$0xff] %v2190_v15  ;;  %v2194_v17 = vld [vmem:[%s10727_s13 + $0x1d10] sm:$0xff] }
 0x104   : > { %2193 = vst [vmem:[%s10732_s14 + $0xe80] sm:$0xff] %v2192_v16  ;;  %v2196_v18 = vld [vmem:[%s10727_s13 + $0x1d20] sm:$0xff]  ;;  %v2198_v19 = vld [vmem:[%s10727_s13 + $0x1d30] sm:$0xff]  ;;  %2195 = vst [vmem:[%s10732_s14 + $0xe88] sm:$0xff] %v2194_v17 }
 0x105   : > { %2197 = vst [vmem:[%s10732_s14 + $0xe90] sm:$0xff] %v2196_v18  ;;  %2199 = vst [vmem:[%s10732_s14 + $0xe98] sm:$0xff] %v2198_v19  ;;  %v2200_v20 = vld [vmem:[%s10727_s13 + $0x1d40] sm:$0xff]  ;;  %v2202_v21 = vld [vmem:[%s10727_s13 + $0x1d50] sm:$0xff] }
 0x106   : > { %v2204_v22 = vld [vmem:[%s10727_s13 + $0x1d60] sm:$0xff]  ;;  %2201 = vst [vmem:[%s10732_s14 + $0xea0] sm:$0xff] %v2200_v20  ;;  %2203 = vst [vmem:[%s10732_s14 + $0xea8] sm:$0xff] %v2202_v21  ;;  %v2206_v23 = vld [vmem:[%s10727_s13 + $0x1d70] sm:$0xff] }
 0x107   : > { %2205 = vst [vmem:[%s10732_s14 + $0xeb0] sm:$0xff] %v2204_v22  ;;  %v2208_v24 = vld [vmem:[%s10727_s13 + $0x1d80] sm:$0xff]  ;;  %v2210_v25 = vld [vmem:[%s10727_s13 + $0x1d90] sm:$0xff]  ;;  %2207 = vst [vmem:[%s10732_s14 + $0xeb8] sm:$0xff] %v2206_v23 }
 0x108   : > { %2209 = vst [vmem:[%s10732_s14 + $0xec0] sm:$0xff] %v2208_v24  ;;  %2211 = vst [vmem:[%s10732_s14 + $0xec8] sm:$0xff] %v2210_v25  ;;  %v2212_v26 = vld [vmem:[%s10727_s13 + $0x1da0] sm:$0xff]  ;;  %v2214_v27 = vld [vmem:[%s10727_s13 + $0x1db0] sm:$0xff] }
 0x109   : > { %v2216_v28 = vld [vmem:[%s10727_s13 + $0x1dc0] sm:$0xff]  ;;  %2213 = vst [vmem:[%s10732_s14 + $0xed0] sm:$0xff] %v2212_v26  ;;  %2215 = vst [vmem:[%s10732_s14 + $0xed8] sm:$0xff] %v2214_v27  ;;  %v2218_v29 = vld [vmem:[%s10727_s13 + $0x1dd0] sm:$0xff] }
 0x10a   : > { %2217 = vst [vmem:[%s10732_s14 + $0xee0] sm:$0xff] %v2216_v28  ;;  %v2220_v30 = vld [vmem:[%s10727_s13 + $0x1de0] sm:$0xff]  ;;  %v2222_v31 = vld [vmem:[%s10727_s13 + $0x1df0] sm:$0xff]  ;;  %2219 = vst [vmem:[%s10732_s14 + $0xee8] sm:$0xff] %v2218_v29 }
 0x10b   : > { %2221 = vst [vmem:[%s10732_s14 + $0xef0] sm:$0xff] %v2220_v30  ;;  %2223 = vst [vmem:[%s10732_s14 + $0xef8] sm:$0xff] %v2222_v31  ;;  %v2224_v32 = vld [vmem:[%s10727_s13 + $0x1e00] sm:$0xff]  ;;  %v2226_v33 = vld [vmem:[%s10727_s13 + $0x1e10] sm:$0xff] }
 0x10c   : > { %v2228_v34 = vld [vmem:[%s10727_s13 + $0x1e20] sm:$0xff]  ;;  %2225 = vst [vmem:[%s10732_s14 + $0xf00] sm:$0xff] %v2224_v32  ;;  %2227 = vst [vmem:[%s10732_s14 + $0xf08] sm:$0xff] %v2226_v33  ;;  %v2230_v35 = vld [vmem:[%s10727_s13 + $0x1e30] sm:$0xff] }
 0x10d   : > { %2229 = vst [vmem:[%s10732_s14 + $0xf10] sm:$0xff] %v2228_v34  ;;  %v2232_v36 = vld [vmem:[%s10727_s13 + $0x1e40] sm:$0xff]  ;;  %v2234_v37 = vld [vmem:[%s10727_s13 + $0x1e50] sm:$0xff]  ;;  %2231 = vst [vmem:[%s10732_s14 + $0xf18] sm:$0xff] %v2230_v35 }
 0x10e   : > { %2233 = vst [vmem:[%s10732_s14 + $0xf20] sm:$0xff] %v2232_v36  ;;  %2235 = vst [vmem:[%s10732_s14 + $0xf28] sm:$0xff] %v2234_v37  ;;  %v2236_v38 = vld [vmem:[%s10727_s13 + $0x1e60] sm:$0xff]  ;;  %v2238_v39 = vld [vmem:[%s10727_s13 + $0x1e70] sm:$0xff] }
 0x10f   : > { %v2240_v40 = vld [vmem:[%s10727_s13 + $0x1e80] sm:$0xff]  ;;  %2237 = vst [vmem:[%s10732_s14 + $0xf30] sm:$0xff] %v2236_v38  ;;  %2239 = vst [vmem:[%s10732_s14 + $0xf38] sm:$0xff] %v2238_v39  ;;  %v2242_v41 = vld [vmem:[%s10727_s13 + $0x1e90] sm:$0xff] }
 0x110   : > { %2241 = vst [vmem:[%s10732_s14 + $0xf40] sm:$0xff] %v2240_v40  ;;  %v2244_v42 = vld [vmem:[%s10727_s13 + $0x1ea0] sm:$0xff]  ;;  %v2246_v43 = vld [vmem:[%s10727_s13 + $0x1eb0] sm:$0xff]  ;;  %2243 = vst [vmem:[%s10732_s14 + $0xf48] sm:$0xff] %v2242_v41 }
 0x111   : > { %2245 = vst [vmem:[%s10732_s14 + $0xf50] sm:$0xff] %v2244_v42  ;;  %2247 = vst [vmem:[%s10732_s14 + $0xf58] sm:$0xff] %v2246_v43  ;;  %v2248_v44 = vld [vmem:[%s10727_s13 + $0x1ec0] sm:$0xff]  ;;  %v2250_v45 = vld [vmem:[%s10727_s13 + $0x1ed0] sm:$0xff] }
 0x112   : > { %v2252_v46 = vld [vmem:[%s10727_s13 + $0x1ee0] sm:$0xff]  ;;  %2249 = vst [vmem:[%s10732_s14 + $0xf60] sm:$0xff] %v2248_v44  ;;  %2251 = vst [vmem:[%s10732_s14 + $0xf68] sm:$0xff] %v2250_v45  ;;  %v2254_v47 = vld [vmem:[%s10727_s13 + $0x1ef0] sm:$0xff] }
 0x113   : > { %2253 = vst [vmem:[%s10732_s14 + $0xf70] sm:$0xff] %v2252_v46  ;;  %v2256_v48 = vld [vmem:[%s10727_s13 + $0x1f00] sm:$0xff]  ;;  %v2258_v49 = vld [vmem:[%s10727_s13 + $0x1f10] sm:$0xff]  ;;  %2255 = vst [vmem:[%s10732_s14 + $0xf78] sm:$0xff] %v2254_v47 }
 0x114   : > { %2257 = vst [vmem:[%s10732_s14 + $0xf80] sm:$0xff] %v2256_v48  ;;  %2259 = vst [vmem:[%s10732_s14 + $0xf88] sm:$0xff] %v2258_v49  ;;  %v2260_v50 = vld [vmem:[%s10727_s13 + $0x1f20] sm:$0xff]  ;;  %v2262_v51 = vld [vmem:[%s10727_s13 + $0x1f30] sm:$0xff] }
 0x115   : > { %v2264_v52 = vld [vmem:[%s10727_s13 + $0x1f40] sm:$0xff]  ;;  %2261 = vst [vmem:[%s10732_s14 + $0xf90] sm:$0xff] %v2260_v50  ;;  %2263 = vst [vmem:[%s10732_s14 + $0xf98] sm:$0xff] %v2262_v51  ;;  %v2266_v53 = vld [vmem:[%s10727_s13 + $0x1f50] sm:$0xff] }
 0x116   : > { %2265 = vst [vmem:[%s10732_s14 + $0xfa0] sm:$0xff] %v2264_v52  ;;  %v2268_v54 = vld [vmem:[%s10727_s13 + $0x1f60] sm:$0xff]  ;;  %v2270_v55 = vld [vmem:[%s10727_s13 + $0x1f70] sm:$0xff]  ;;  %2267 = vst [vmem:[%s10732_s14 + $0xfa8] sm:$0xff] %v2266_v53 }
 0x117   : > { %2269 = vst [vmem:[%s10732_s14 + $0xfb0] sm:$0xff] %v2268_v54  ;;  %2271 = vst [vmem:[%s10732_s14 + $0xfb8] sm:$0xff] %v2270_v55  ;;  %v2272_v56 = vld [vmem:[%s10727_s13 + $0x1f80] sm:$0xff]  ;;  %v2274_v57 = vld [vmem:[%s10727_s13 + $0x1f90] sm:$0xff] }
 0x118   : > { %v2276_v58 = vld [vmem:[%s10727_s13 + $0x1fa0] sm:$0xff]  ;;  %2273 = vst [vmem:[%s10732_s14 + $0xfc0] sm:$0xff] %v2272_v56  ;;  %2275 = vst [vmem:[%s10732_s14 + $0xfc8] sm:$0xff] %v2274_v57  ;;  %v2278_v59 = vld [vmem:[%s10727_s13 + $0x1fb0] sm:$0xff] }
 0x119   : > { %2277 = vst [vmem:[%s10732_s14 + $0xfd0] sm:$0xff] %v2276_v58  ;;  %v2280_v60 = vld [vmem:[%s10727_s13 + $0x1fc0] sm:$0xff]  ;;  %v2282_v61 = vld [vmem:[%s10727_s13 + $0x1fd0] sm:$0xff]  ;;  %2279 = vst [vmem:[%s10732_s14 + $0xfd8] sm:$0xff] %v2278_v59 }
 0x11a   : > { %2281 = vst [vmem:[%s10732_s14 + $0xfe0] sm:$0xff] %v2280_v60  ;;  %2283 = vst [vmem:[%s10732_s14 + $0xfe8] sm:$0xff] %v2282_v61  ;;  %v2284_v62 = vld [vmem:[%s10727_s13 + $0x1fe0] sm:$0xff]  ;;  %v2286_v63 = vld [vmem:[%s10727_s13 + $0x1ff0] sm:$0xff] }
 0x11b   : > { %2285 = vst [vmem:[%s10732_s14 + $0xff0] sm:$0xff] %v2284_v62  ;;  %2287 = vst [vmem:[%s10732_s14 + $0xff8] sm:$0xff] %v2286_v63 }
 0x11c PF: > { %p9039_p9 = scmp.ge.s32.totalorder %s10635_s21, 1  ;;  %p4392_p10 = scmp.lt.s32.totalorder %s10635_s21, 9 }
 0x11e   : > { %p4393_p11 = pnand %p9039_p9, %p4392_p10 }
 0x11f   : > { %s4399_s24 = sand.u32 (!%p4393_p11), 1, %s10611_s15   ;;  %p4442_p12 = scmp.lt.s32.totalorder (!%p4393_p11), %s10623_s18, 3 }
 0x120   : > { %4396 = sbr.rel (%p4393_p11) target bundleno = 1046 (0x416), region = 84  ;;  %s9040_s25 = sshll.u32 (!%p4393_p11), %s4399_s24, 12 }
 0x121   : > { %s11760_s27 = scalar_lea.vmem (!%p4393_p11), [#allocation2], %s9040_s25  ;;  %s12458_s8 = sshll.u32 (!%p4393_p11), %s10619_s17, 1 }
 0x122   : > { %v9813_v0 = vld [vmem:[%s11760_s27 + $0x4] ss:$8 sps:$4 sm:$0xff] (!%p4393_p11)   ;;  %v9817_v2 = vld [vmem:[%s11760_s27] ss:$8 sps:$4 sm:$0xff] (!%p4393_p11)   ;;  %v9819_v4 = vld [vmem:[%s11760_s27 + $0x14] ss:$8 sps:$4 sm:$0xff] (!%p4393_p11)  }
 0x123   : > { %v9815_v1 = vld [vmem:[%s11760_s27 + $0x804] ss:$8 sps:$4 sm:$0xff] (!%p4393_p11)   ;;  %7921 = vmatprep.subr.bf16.mxu1 (!%p4393_p11), %v9813_v0  ;;  %v9818_v3 = vld [vmem:[%s11760_s27 + $0x800] ss:$8 sps:$4 sm:$0xff] (!%p4393_p11)   ;;  %v9821_v5 = vld [vmem:[%s11760_s27 + $0x814] ss:$8 sps:$4 sm:$0xff] (!%p4393_p11)  }
 0x124   : > { %8345 = vmatprep.subr.bf16.mxu0 (!%p4393_p11), %v9815_v1  ;;  %7922 = vmatpush1.bf16.msra.mxu1 (!%p4393_p11), %v9817_v2  ;;  %v9823_v6 = vld [vmem:[%s11760_s27 + $0x10] ss:$8 sps:$4 sm:$0xff] (!%p4393_p11)   ;;  %v9825_v8 = vld [vmem:[%s11760_s27 + $0x24] ss:$8 sps:$4 sm:$0xff] (!%p4393_p11)   ;;  %v9829_v10 = vld [vmem:[%s11760_s27 + $0x20] ss:$8 sps:$4 sm:$0xff] (!%p4393_p11)  }
 0x125   : > { %8346 = vmatpush1.bf16.msra.mxu0 (!%p4393_p11), %v9818_v3  ;;  %7923 = vmatprep.subr.bf16.mxu1 (!%p4393_p11), %v9819_v4  ;;  %v9824_v7 = vld [vmem:[%s11760_s27 + $0x810] ss:$8 sps:$4 sm:$0xff] (!%p4393_p11)   ;;  %v9827_v9 = vld [vmem:[%s11760_s27 + $0x824] ss:$8 sps:$4 sm:$0xff] (!%p4393_p11)   ;;  %v9830_v11 = vld [vmem:[%s11760_s27 + $0x820] ss:$8 sps:$4 sm:$0xff] (!%p4393_p11)  }
 0x126   : > { %8347 = vmatprep.subr.bf16.mxu0 (!%p4393_p11), %v9821_v5  ;;  %v9831_v12 = vld [vmem:[%s11760_s27 + $0x34] ss:$8 sps:$4 sm:$0xff] (!%p4393_p11)   ;;  %v9835_v14 = vld [vmem:[%s11760_s27 + $0x30] ss:$8 sps:$4 sm:$0xff] (!%p4393_p11)   ;;  %v9837_v16 = vld [vmem:[%s11760_s27 + $0x44] ss:$8 sps:$4 sm:$0xff] (!%p4393_p11)  }
 0x127   : > { %v9833_v13 = vld [vmem:[%s11760_s27 + $0x834] ss:$8 sps:$4 sm:$0xff]   ;;  %v9836_v15 = vld [vmem:[%s11760_s27 + $0x830] ss:$8 sps:$4 sm:$0xff]   ;;  %v9839_v17 = vld [vmem:[%s11760_s27 + $0x844] ss:$8 sps:$4 sm:$0xff]  }
 0x128   : > { %7924 = vmatpush1.bf16.msra.mxu1 %v9823_v6  ;;  %v9841_v18 = vld [vmem:[%s11760_s27 + $0x40] ss:$8 sps:$4 sm:$0xff]   ;;  %v9843_v20 = vld [vmem:[%s11760_s27 + $0x54] ss:$8 sps:$4 sm:$0xff]   ;;  %v9847_v22 = vld [vmem:[%s11760_s27 + $0x50] ss:$8 sps:$4 sm:$0xff]  }
 0x129   : > { %8348 = vmatpush1.bf16.msra.mxu0 %v9824_v7  ;;  %7925 = vmatprep.subr.bf16.mxu1 %v9825_v8  ;;  %v9842_v19 = vld [vmem:[%s11760_s27 + $0x840] ss:$8 sps:$4 sm:$0xff]   ;;  %v9845_v21 = vld [vmem:[%s11760_s27 + $0x854] ss:$8 sps:$4 sm:$0xff]   ;;  %v9848_v23 = vld [vmem:[%s11760_s27 + $0x850] ss:$8 sps:$4 sm:$0xff]  }
 0x12a   : > { %8349 = vmatprep.subr.bf16.mxu0 %v9827_v9  ;;  %v9849_v24 = vld [vmem:[%s11760_s27 + $0x64] ss:$8 sps:$4 sm:$0xff]   ;;  %v9853_v26 = vld [vmem:[%s11760_s27 + $0x60] ss:$8 sps:$4 sm:$0xff]   ;;  %v9855_v28 = vld [vmem:[%s11760_s27 + $0x74] ss:$8 sps:$4 sm:$0xff]  }
 0x12b   : > { %v9851_v25 = vld [vmem:[%s11760_s27 + $0x864] ss:$8 sps:$4 sm:$0xff]   ;;  %v9854_v27 = vld [vmem:[%s11760_s27 + $0x860] ss:$8 sps:$4 sm:$0xff]   ;;  %v9857_v29 = vld [vmem:[%s11760_s27 + $0x874] ss:$8 sps:$4 sm:$0xff]  }
 0x12c   : > { %7926 = vmatpush1.bf16.msra.mxu1 %v9829_v10  ;;  %v9859_v30 = vld [vmem:[%s11760_s27 + $0x70] ss:$8 sps:$4 sm:$0xff]   ;;  %v9861_v32 = vld [vmem:[%s11760_s27 + $0x84] ss:$8 sps:$4 sm:$0xff]   ;;  %v9865_v34 = vld [vmem:[%s11760_s27 + $0x80] ss:$8 sps:$4 sm:$0xff]  }
 0x12d   : > { %8350 = vmatpush1.bf16.msra.mxu0 %v9830_v11  ;;  %7927 = vmatprep.subr.bf16.mxu1 %v9831_v12  ;;  %v9860_v31 = vld [vmem:[%s11760_s27 + $0x870] ss:$8 sps:$4 sm:$0xff]   ;;  %v9863_v33 = vld [vmem:[%s11760_s27 + $0x884] ss:$8 sps:$4 sm:$0xff]   ;;  %v9866_v35 = vld [vmem:[%s11760_s27 + $0x880] ss:$8 sps:$4 sm:$0xff]  }
 0x12e   : > { %8351 = vmatprep.subr.bf16.mxu0 %v9833_v13  ;;  %v9867_v36 = vld [vmem:[%s11760_s27 + $0x94] ss:$8 sps:$4 sm:$0xff]   ;;  %s4443_s28 = scalar_select %p4442_p12, %s10623_s18, 3  ;;  %v9871_v38 = vld [vmem:[%s11760_s27 + $0x90] ss:$8 sps:$4 sm:$0xff]  }
 0x12f   : > { %v9869_v37 = vld [vmem:[%s11760_s27 + $0x894] ss:$8 sps:$4 sm:$0xff]   ;;  %v9872_v39 = vld [vmem:[%s11760_s27 + $0x890] ss:$8 sps:$4 sm:$0xff]   ;;  %v9873_v40 = vld [vmem:[%s11760_s27 + $0xa4] ss:$8 sps:$4 sm:$0xff]  }
 0x130   : > { %7928 = vmatpush1.bf16.msra.mxu1 %v9835_v14  ;;  %s9632_s29 = sshll.u32 %s4443_s28, 9  ;;  %v9875_v41 = vld [vmem:[%s11760_s27 + $0x8a4] ss:$8 sps:$4 sm:$0xff]   ;;  %v9877_v42 = vld [vmem:[%s11760_s27 + $0xa0] ss:$8 sps:$4 sm:$0xff]   ;;  %p4454_p13 = scmp.lt.s32.totalorder %s12458_s8, 3 }
 0x131   : > { %8352 = vmatpush1.bf16.msra.mxu0 %v9836_v15  ;;  %7929 = vmatprep.subr.bf16.mxu1 %v9837_v16  ;;  %v9878_v43 = vld [vmem:[%s11760_s27 + $0x8a0] ss:$8 sps:$4 sm:$0xff]   ;;  %s11811_s7 = scalar_lea.vmem %s12498_s0, %s9632_s29  ;;  %v9879_v44 = vld [vmem:[%s11760_s27 + $0xb4] ss:$8 sps:$4 sm:$0xff]   ;;  %v9883_v46 = vld [vmem:[%s11760_s27 + $0xb0] ss:$8 sps:$4 sm:$0xff]  }
 0x132   : > { %8353 = vmatprep.subr.bf16.mxu0 %v9839_v17  ;;  %v9881_v45 = vld [vmem:[%s11760_s27 + $0x8b4] ss:$8 sps:$4 sm:$0xff]   ;;  %v9884_v47 = vld [vmem:[%s11760_s27 + $0x8b0] ss:$8 sps:$4 sm:$0xff]   ;;  %v4465_v48 = vld [vmem:[%s11811_s7] sm:$0xff]  ;;  %s4455_s9 = scalar_select %p4454_p13, %s12458_s8, 3 }
 0x133   : > { %v4481_v49 = vld [vmem:[%s11811_s7 + $0x80] sm:$0xff]  ;;  %v9891_v58 = vld [vmem:[%s11760_s27 + $0xd4] ss:$8 sps:$4 sm:$0xff]   ;;  %v9895_v60 = vld [vmem:[%s11760_s27 + $0xd0] ss:$8 sps:$4 sm:$0xff]   ;;  %s9041_s17 = sshll.u32 %s4399_s24, 5 }
 0x134   : > { %7930 = vmatpush1.bf16.msra.mxu1 %v9841_v18  ;;  %v9885_v50 = vld [vmem:[%s11760_s27 + $0xc4] ss:$8 sps:$4 sm:$0xff]   ;;  %v9047_v52 = vcombine.high %v4465_v48, %v4481_v49  ;;  %v9889_v56 = vld [vmem:[%s11760_s27 + $0xc0] ss:$8 sps:$4 sm:$0xff]   ;;  %v9893_v59 = vld [vmem:[%s11760_s27 + $0x8d4] ss:$8 sps:$4 sm:$0xff]   ;;  %v9046_v8 = vcombine.low %v4465_v48, %v4481_v49  ;;  %s4456_s12 = scalar_lea.vmem %s12500_s2, %s4455_s9  ;;  %s4461_s25 = scalar_lea.vmem %s12501_s3, %s4455_s9 }
 0x135   : > { %8354 = vmatpush1.bf16.msra.mxu0 %v9842_v19  ;;  %7931 = vmatprep.subr.bf16.mxu1 %v9843_v20  ;;  %v9887_v51 = vld [vmem:[%s11760_s27 + $0x8c4] ss:$8 sps:$4 sm:$0xff]   ;;  %v9890_v57 = vld [vmem:[%s11760_s27 + $0x8c0] ss:$8 sps:$4 sm:$0xff]   ;;  %v9896_v61 = vld [vmem:[%s11760_s27 + $0x8d0] ss:$8 sps:$4 sm:$0xff]  }
 0x136   : > { %8355 = vmatprep.subr.bf16.mxu0 %v9845_v21  ;;  %v4473_v53 = vld [vmem:[%s11811_s7 + $0x40] sm:$0xff]  ;;  %7953 = vmatprep.mubr.bf16.mxu1 %v9047_v52  ;;  %v9903_v2 = vld [vmem:[%s11760_s27 + $0xf4] ss:$8 sps:$4 sm:$0xff]   ;;  %v9907_v4 = vld [vmem:[%s11760_s27 + $0xf0] ss:$8 sps:$4 sm:$0xff]   ;;  %s4440_s15 = scalar_lea.vmem [#allocation3], %s9041_s17 }
 0x137   : > { %v4489_v54 = vld [vmem:[%s11811_s7 + $0xc0] sm:$0xff]  ;;  %v9905_v3 = vld [vmem:[%s11760_s27 + $0x8f4] ss:$8 sps:$4 sm:$0xff]   ;;  %v9908_v5 = vld [vmem:[%s11760_s27 + $0x8f0] ss:$8 sps:$4 sm:$0xff]   ;;  %s9628_s24 = sshll.u32 (%p10710_p6), %s10623_s18, 4 }
 0x138   : > { %7932 = vmatpush1.bf16.msra.mxu1 %v9847_v22  ;;  %v9063_v55 = vcombine.high %v4473_v53, %v4489_v54  ;;  %v9897_v62 = vld [vmem:[%s11760_s27 + $0xe4] ss:$8 sps:$4 sm:$0xff]   ;;  %v9901_v0 = vld [vmem:[%s11760_s27 + $0xe0] ss:$8 sps:$4 sm:$0xff]   ;;  %v9062_v10 = vcombine.low %v4473_v53, %v4489_v54  ;;  %v9917_v12 = vld [vmem:[%s11760_s27 + $0x114] ss:$8 sps:$4 sm:$0xff]  }
 0x139   : > { %8356 = vmatpush1.bf16.msra.mxu0 %v9848_v23  ;;  %7933 = vmatprep.subr.bf16.mxu1 %v9849_v24  ;;  %v9899_v63 = vld [vmem:[%s11760_s27 + $0x8e4] ss:$8 sps:$4 sm:$0xff]   ;;  %v9902_v1 = vld [vmem:[%s11760_s27 + $0x8e0] ss:$8 sps:$4 sm:$0xff]   ;;  %v9920_v13 = vld [vmem:[%s11760_s27 + $0x914] ss:$8 sps:$4 sm:$0xff]  }
 0x13a   : > { %8357 = vmatprep.subr.bf16.mxu0 %v9851_v25  ;;  %8377 = vmatprep.mubr.bf16.mxu0 %v9063_v55  ;;  %v9911_v6 = vld [vmem:[%s11760_s27 + $0x104] ss:$8 sps:$4 sm:$0xff]   ;;  %v9909_v9 = vld [vmem:[%s11760_s27 + $0x100] ss:$8 sps:$4 sm:$0xff]   ;;  %v9915_v14 = vld [vmem:[%s11760_s27 + $0x110] ss:$8 sps:$4 sm:$0xff]  }
 0x13b   : > { %v9914_v7 = vld [vmem:[%s11760_s27 + $0x904] ss:$8 sps:$4 sm:$0xff]   ;;  %v9912_v11 = vld [vmem:[%s11760_s27 + $0x900] ss:$8 sps:$4 sm:$0xff]   ;;  %v9918_v15 = vld [vmem:[%s11760_s27 + $0x910] ss:$8 sps:$4 sm:$0xff]  }
 0x13c   : > { %7934 = vmatpush1.bf16.msra.mxu1 %v9853_v26  ;;  %v9923_v16 = vld [vmem:[%s11760_s27 + $0x124] ss:$8 sps:$4 sm:$0xff]   ;;  %v9921_v18 = vld [vmem:[%s11760_s27 + $0x120] ss:$8 sps:$4 sm:$0xff]   ;;  %v9929_v20 = vld [vmem:[%s11760_s27 + $0x134] ss:$8 sps:$4 sm:$0xff]  }
 0x13d   : > { %8358 = vmatpush1.bf16.msra.mxu0 %v9854_v27  ;;  %7935 = vmatprep.subr.bf16.mxu1 %v9855_v28  ;;  %v9926_v17 = vld [vmem:[%s11760_s27 + $0x924] ss:$8 sps:$4 sm:$0xff]   ;;  %v9924_v19 = vld [vmem:[%s11760_s27 + $0x920] ss:$8 sps:$4 sm:$0xff]   ;;  %v9932_v21 = vld [vmem:[%s11760_s27 + $0x934] ss:$8 sps:$4 sm:$0xff]  }
 0x13e   : > { %8359 = vmatprep.subr.bf16.mxu0 %v9857_v29  ;;  %v9927_v22 = vld [vmem:[%s11760_s27 + $0x130] ss:$8 sps:$4 sm:$0xff]   ;;  %v9935_v24 = vld [vmem:[%s11760_s27 + $0x144] ss:$8 sps:$4 sm:$0xff]   ;;  %v9933_v26 = vld [vmem:[%s11760_s27 + $0x140] ss:$8 sps:$4 sm:$0xff]  }
 0x13f   : > { %v9930_v23 = vld [vmem:[%s11760_s27 + $0x930] ss:$8 sps:$4 sm:$0xff]   ;;  %v9938_v25 = vld [vmem:[%s11760_s27 + $0x944] ss:$8 sps:$4 sm:$0xff]   ;;  %v9936_v27 = vld [vmem:[%s11760_s27 + $0x940] ss:$8 sps:$4 sm:$0xff]  }
 0x140   : > { %7936 = vmatpush1.bf16.msra.mxu1 %v9859_v30  ;;  %v9941_v28 = vld [vmem:[%s11760_s27 + $0x154] ss:$8 sps:$4 sm:$0xff]   ;;  %v4497_v30 = vld [vmem:[%s11811_s7 + $0x100] sm:$0xff]  ;;  %v11880_v49 = vld [vmem:[%s11811_s7 + $0x48] sm:$0xff] }
 0x141   : > { %8360 = vmatpush1.bf16.msra.mxu0 %v9860_v31  ;;  %7937 = vmatprep.subr.bf16.mxu1 %v9861_v32  ;;  %v9944_v29 = vld [vmem:[%s11760_s27 + $0x954] ss:$8 sps:$4 sm:$0xff]   ;;  %v4513_v31 = vld [vmem:[%s11811_s7 + $0x180] sm:$0xff]  ;;  %v9939_v32 = vld [vmem:[%s11760_s27 + $0x150] ss:$8 sps:$4 sm:$0xff]  }
 0x142   : > { %8361 = vmatprep.subr.bf16.mxu0 %v9863_v33  ;;  %v9079_v33 = vcombine.high %v4497_v30, %v4513_v31  ;;  %v9954_v52 = vld [vmem:[%s11760_s27 + $0x970] ss:$8 sps:$4 sm:$0xff]   ;;  %v9959_v54 = vld [vmem:[%s11760_s27 + $0x184] ss:$8 sps:$4 sm:$0xff]  }
 0x143   : > { %v9962_v55 = vld [vmem:[%s11760_s27 + $0x984] ss:$8 sps:$4 sm:$0xff]  }
 0x144   : > { %7938 = vmatpush1.bf16.msra.mxu1 %v9865_v34  ;;  %v9942_v34 = vld [vmem:[%s11760_s27 + $0x950] ss:$8 sps:$4 sm:$0xff]  }
 0x145   : > { %8362 = vmatpush1.bf16.msra.mxu0 %v9866_v35  ;;  %7939 = vmatprep.subr.bf16.mxu1 %v9867_v36  ;;  %v4505_v35 = vld [vmem:[%s11811_s7 + $0x140] sm:$0xff] }
 0x146   : > { %8363 = vmatprep.subr.bf16.mxu0 %v9869_v37  ;;  %v4521_v36 = vld [vmem:[%s11811_s7 + $0x1c0] sm:$0xff]  ;;  %v9078_v37 = vcombine.low %v4497_v30, %v4513_v31  ;;  %v10013_v30 = vld [vmem:[%s11760_s27 + $0x214] ss:$8 sps:$4 sm:$0xff]  }
 0x147   : > { %v10016_v31 = vld [vmem:[%s11760_s27 + $0xa14] ss:$8 sps:$4 sm:$0xff]  }
 0x148   : > { %7940 = vmatpush1.bf16.msra.mxu1 %v9871_v38  ;;  %v9947_v38 = vld [vmem:[%s11760_s27 + $0x164] ss:$8 sps:$4 sm:$0xff]  }
 0x149   : > { %8364 = vmatpush1.bf16.msra.mxu0 %v9872_v39  ;;  %7941 = vmatprep.subr.bf16.mxu1 %v9873_v40  ;;  %v9095_v39 = vcombine.high %v4505_v35, %v4521_v36  ;;  %v9094_v40 = vcombine.low %v4505_v35, %v4521_v36  ;;  %v10011_v36 = vld [vmem:[%s11760_s27 + $0x210] ss:$8 sps:$4 sm:$0xff]  }
 0x14a   : > { %8365 = vmatprep.subr.bf16.mxu0 %v9875_v41  ;;  %v9950_v41 = vld [vmem:[%s11760_s27 + $0x964] ss:$8 sps:$4 sm:$0xff]  }
 0x14c   : > { %7942 = vmatpush1.bf16.msra.mxu1 %v9877_v42  ;;  %v9945_v42 = vld [vmem:[%s11760_s27 + $0x160] ss:$8 sps:$4 sm:$0xff]  }
 0x14d   : > { %8366 = vmatpush1.bf16.msra.mxu0 %v9878_v43  ;;  %7943 = vmatprep.subr.bf16.mxu1 %v9879_v44  ;;  %v9948_v43 = vld [vmem:[%s11760_s27 + $0x960] ss:$8 sps:$4 sm:$0xff]  }
 0x14e   : > { %8367 = vmatprep.subr.bf16.mxu0 %v9881_v45  ;;  %v11870_v44 = vld [vmem:[%s11811_s7 + $0x8] sm:$0xff] }
 0x14f   : > { %v11873_v45 = vld [vmem:[%s11811_s7 + $0x88] sm:$0xff] }
 0x150   : > { %7944 = vmatpush1.bf16.msra.mxu1 %v9883_v46  ;;  %v9953_v46 = vld [vmem:[%s11760_s27 + $0x174] ss:$8 sps:$4 sm:$0xff]   ;;  %v9049_v48 = vcombine.high %v11870_v44, %v11873_v45 }
 0x151   : > { %8368 = vmatpush1.bf16.msra.mxu0 %v9884_v47  ;;  %7945 = vmatprep.subr.bf16.mxu1 %v9885_v50  ;;  %v9956_v47 = vld [vmem:[%s11760_s27 + $0x974] ss:$8 sps:$4 sm:$0xff]   ;;  %v11883_v50 = vld [vmem:[%s11811_s7 + $0xc8] sm:$0xff] }
 0x152   : > { %8369 = vmatprep.subr.bf16.mxu0 %v9887_v51  ;;  %v9951_v51 = vld [vmem:[%s11760_s27 + $0x170] ss:$8 sps:$4 sm:$0xff]   ;;  %v9065_v53 = vcombine.high %v11880_v49, %v11883_v50 }
 0x154   : > { %7946 = vmatpush1.bf16.msra.mxu1 %v9889_v56  ;;  %v9957_v56 = vld [vmem:[%s11760_s27 + $0x180] ss:$8 sps:$4 sm:$0xff]  }
 0x155   : > { %8370 = vmatpush1.bf16.msra.mxu0 %v9890_v57  ;;  %7947 = vmatprep.subr.bf16.mxu1 %v9891_v58  ;;  %v9960_v57 = vld [vmem:[%s11760_s27 + $0x980] ss:$8 sps:$4 sm:$0xff]   ;;  %v9965_v58 = vld [vmem:[%s11760_s27 + $0x194] ss:$8 sps:$4 sm:$0xff]  }
 0x156   : > { %8371 = vmatprep.subr.bf16.mxu0 %v9893_v59  ;;  %v9968_v59 = vld [vmem:[%s11760_s27 + $0x994] ss:$8 sps:$4 sm:$0xff]  }
 0x158   : > { %7948 = vmatpush1.bf16.msra.mxu1 %v9895_v60  ;;  %v9963_v60 = vld [vmem:[%s11760_s27 + $0x190] ss:$8 sps:$4 sm:$0xff]  }
 0x159   : > { %8372 = vmatpush1.bf16.msra.mxu0 %v9896_v61  ;;  %7949 = vmatprep.subr.bf16.mxu1 %v9897_v62  ;;  %v9966_v61 = vld [vmem:[%s11760_s27 + $0x990] ss:$8 sps:$4 sm:$0xff]   ;;  %v9971_v62 = vld [vmem:[%s11760_s27 + $0x1a4] ss:$8 sps:$4 sm:$0xff]  }
 0x15a   : > { %8373 = vmatprep.subr.bf16.mxu0 %v9899_v63  ;;  %v9974_v63 = vld [vmem:[%s11760_s27 + $0x9a4] ss:$8 sps:$4 sm:$0xff]  }
 0x15c   : > { %7950 = vmatpush1.bf16.msra.mxu1 %v9901_v0  ;;  %v9969_v0 = vld [vmem:[%s11760_s27 + $0x1a0] ss:$8 sps:$4 sm:$0xff]  }
 0x15d   : > { %8374 = vmatpush1.bf16.msra.mxu0 %v9902_v1  ;;  %7951 = vmatprep.subr.bf16.mxu1 %v9903_v2  ;;  %v9972_v1 = vld [vmem:[%s11760_s27 + $0x9a0] ss:$8 sps:$4 sm:$0xff]   ;;  %v9977_v2 = vld [vmem:[%s11760_s27 + $0x1b4] ss:$8 sps:$4 sm:$0xff]  }
 0x15e   : > { %8375 = vmatprep.subr.bf16.mxu0 %v9905_v3  ;;  %v9980_v3 = vld [vmem:[%s11760_s27 + $0x9b4] ss:$8 sps:$4 sm:$0xff]  }
 0x160   : > { %7952 = vmatpush1.bf16.msra.mxu1 %v9907_v4  ;;  %v9975_v4 = vld [vmem:[%s11760_s27 + $0x1b0] ss:$8 sps:$4 sm:$0xff]  }
 0x161   : > { %8376 = vmatpush1.bf16.msra.mxu0 %v9908_v5  ;;  %7974 = vmatprep.subr.bf16.mxu1 %v9911_v6  ;;  %v9978_v5 = vld [vmem:[%s11760_s27 + $0x9b0] ss:$8 sps:$4 sm:$0xff]   ;;  %v9983_v6 = vld [vmem:[%s11760_s27 + $0x1c4] ss:$8 sps:$4 sm:$0xff]  }
 0x162   : > { %8398 = vmatprep.subr.bf16.mxu0 %v9914_v7  ;;  %v9986_v7 = vld [vmem:[%s11760_s27 + $0x9c4] ss:$8 sps:$4 sm:$0xff]  }
 0x163   : > { %7954 = vmatmul.mubr.bf16.vlgmr.msra.gmra.mrb[0].mxu1 %v9046_v8  ;;  %v9981_v8 = vld [vmem:[%s11760_s27 + $0x1c0] ss:$8 sps:$4 sm:$0xff]  }
 0x164   : > { %8378 = vmatmul.mubr.bf16.vlgmr.msra.gmra.mrb[0].mxu0 %v9062_v10  ;;  %7975 = vmatpush1.bf16.msra.mxu1 %v9909_v9  ;;  %v9984_v9 = vld [vmem:[%s11760_s27 + $0x9c0] ss:$8 sps:$4 sm:$0xff]   ;;  %v9989_v10 = vld [vmem:[%s11760_s27 + $0x1d4] ss:$8 sps:$4 sm:$0xff]  }
 0x165   : > { %8399 = vmatpush1.bf16.msra.mxu0 %v9912_v11  ;;  %7976 = vmatprep.subr.bf16.mxu1 %v9917_v12  ;;  %v9992_v11 = vld [vmem:[%s11760_s27 + $0x9d4] ss:$8 sps:$4 sm:$0xff]   ;;  %v9987_v12 = vld [vmem:[%s11760_s27 + $0x1d0] ss:$8 sps:$4 sm:$0xff]  }
 0x166   : > { %8400 = vmatprep.subr.bf16.mxu0 %v9920_v13  ;;  %7963 = vmatprep.mubr.bf16.mxu1 %v9079_v33  ;;  %v9990_v13 = vld [vmem:[%s11760_s27 + $0x9d0] ss:$8 sps:$4 sm:$0xff]   ;;  %v4522_v33 = vld [vmem:[%s11811_s7 + $0x1c8] sm:$0xff] }
 0x167   : > { %8387 = vmatprep.mubr.bf16.mxu0 %v9095_v39  ;;  %v10022_v39 = vld [vmem:[%s11760_s27 + $0xa24] ss:$8 sps:$4 sm:$0xff]  }
 0x168   : > { %7977 = vmatpush1.bf16.msra.mxu1 %v9915_v14  ;;  %v9995_v14 = vld [vmem:[%s11760_s27 + $0x1e4] ss:$8 sps:$4 sm:$0xff]  }
 0x169   : > { %8401 = vmatpush1.bf16.msra.mxu0 %v9918_v15  ;;  %7978 = vmatprep.subr.bf16.mxu1 %v9923_v16  ;;  %v9998_v15 = vld [vmem:[%s11760_s27 + $0x9e4] ss:$8 sps:$4 sm:$0xff]   ;;  %v9993_v16 = vld [vmem:[%s11760_s27 + $0x1e0] ss:$8 sps:$4 sm:$0xff]  }
 0x16a   : > { %8402 = vmatprep.subr.bf16.mxu0 %v9926_v17  ;;  %v9996_v17 = vld [vmem:[%s11760_s27 + $0x9e0] ss:$8 sps:$4 sm:$0xff]  }
 0x16b   : > { %7964 = vmatmul.mubr.bf16.gmra.mrb[4].mxu1 %v9078_v37  ;;  %v10014_v37 = vld [vmem:[%s11760_s27 + $0xa10] ss:$8 sps:$4 sm:$0xff]  }
 0x16c   : > { %7979 = vmatpush1.bf16.msra.mxu1 %v9921_v18  ;;  %8388 = vmatmul.mubr.bf16.gmra.mrb[4].mxu0 %v9094_v40  ;;  %v10001_v18 = vld [vmem:[%s11760_s27 + $0x1f4] ss:$8 sps:$4 sm:$0xff]   ;;  %v10017_v40 = vld [vmem:[%s11760_s27 + $0x220] ss:$8 sps:$4 sm:$0xff]  }
 0x16d   : > { %8403 = vmatpush1.bf16.msra.mxu0 %v9924_v19  ;;  %7980 = vmatprep.subr.bf16.mxu1 %v9929_v20  ;;  %v10004_v19 = vld [vmem:[%s11760_s27 + $0x9f4] ss:$8 sps:$4 sm:$0xff]   ;;  %v9999_v20 = vld [vmem:[%s11760_s27 + $0x1f0] ss:$8 sps:$4 sm:$0xff]  }
 0x16e   : > { %8404 = vmatprep.subr.bf16.mxu0 %v9932_v21  ;;  %8006 = vmatprep.mubr.bf16.mxu1 %v9049_v48  ;;  %v10002_v21 = vld [vmem:[%s11760_s27 + $0x9f0] ss:$8 sps:$4 sm:$0xff]   ;;  %v10025_v48 = vld [vmem:[%s11760_s27 + $0x234] ss:$8 sps:$4 sm:$0xff]  }
 0x16f   : > { %8430 = vmatprep.mubr.bf16.mxu0 %v9065_v53  ;;  %v10026_v53 = vld [vmem:[%s11760_s27 + $0xa30] ss:$8 sps:$4 sm:$0xff]  }
 0x170   : > { %7981 = vmatpush1.bf16.msra.mxu1 %v9927_v22  ;;  %v10007_v22 = vld [vmem:[%s11760_s27 + $0x204] ss:$8 sps:$4 sm:$0xff]  }
 0x171   : > { %8405 = vmatpush1.bf16.msra.mxu0 %v9930_v23  ;;  %7982 = vmatprep.subr.bf16.mxu1 %v9935_v24  ;;  %v10010_v23 = vld [vmem:[%s11760_s27 + $0xa04] ss:$8 sps:$4 sm:$0xff]   ;;  %v10005_v24 = vld [vmem:[%s11760_s27 + $0x200] ss:$8 sps:$4 sm:$0xff]  }
 0x172   : > { %8406 = vmatprep.subr.bf16.mxu0 %v9938_v25  ;;  %v10008_v25 = vld [vmem:[%s11760_s27 + $0xa00] ss:$8 sps:$4 sm:$0xff]  }
 0x174   : > { %7983 = vmatpush1.bf16.msra.mxu1 %v9933_v26  ;;  %v4498_v26 = vld [vmem:[%s11811_s7 + $0x108] sm:$0xff] }
 0x175   : > { %8407 = vmatpush1.bf16.msra.mxu0 %v9936_v27  ;;  %7984 = vmatprep.subr.bf16.mxu1 %v9941_v28  ;;  %v9048_v27 = vcombine.low %v11870_v44, %v11873_v45  ;;  %v9064_v28 = vcombine.low %v11880_v49, %v11883_v50  ;;  %v11945_v45 = vld [vmem:[%s11811_s7 + $0x90] sm:$0xff] }
 0x176   : > { %8408 = vmatprep.subr.bf16.mxu0 %v9944_v29  ;;  %v4514_v29 = vld [vmem:[%s11811_s7 + $0x188] sm:$0xff]  ;;  %v10028_v49 = vld [vmem:[%s11760_s27 + $0xa34] ss:$8 sps:$4 sm:$0xff]  }
 0x178   : > { %7985 = vmatpush1.bf16.msra.mxu1 %v9939_v32  ;;  %v4506_v32 = vld [vmem:[%s11811_s7 + $0x148] sm:$0xff] }
 0x179   : > { %8409 = vmatpush1.bf16.msra.mxu0 %v9942_v34  ;;  %7986 = vmatprep.subr.bf16.mxu1 %v9947_v38  ;;  %v9081_v34 = vcombine.high %v4498_v26, %v4514_v29  ;;  %v9097_v35 = vcombine.high %v4506_v32, %v4522_v33  ;;  %v10019_v38 = vld [vmem:[%s11760_s27 + $0x224] ss:$8 sps:$4 sm:$0xff]   ;;  %v9096_v44 = vcombine.low %v4506_v32, %v4522_v33  ;;  %v10089_v32 = vld [vmem:[%s11760_s27 + $0x2e0] ss:$8 sps:$4 sm:$0xff]  }
 0x17a   : > { %8410 = vmatprep.subr.bf16.mxu0 %v9950_v41  ;;  %v10020_v41 = vld [vmem:[%s11760_s27 + $0xa20] ss:$8 sps:$4 sm:$0xff]  }
 0x17b   : > { %v10092_v33 = vld [vmem:[%s11760_s27 + $0xae0] ss:$8 sps:$4 sm:$0xff]  }
 0x17c   : > { %7987 = vmatpush1.bf16.msra.mxu1 %v9945_v42  ;;  %v11942_v42 = vld [vmem:[%s11811_s7 + $0x10] sm:$0xff] }
 0x17d   : > { %8411 = vmatpush1.bf16.msra.mxu0 %v9948_v43  ;;  %7988 = vmatprep.subr.bf16.mxu1 %v9953_v46  ;;  %v9080_v43 = vcombine.low %v4498_v26, %v4514_v29  ;;  %v11948_v46 = vld [vmem:[%s11811_s7 + $0x50] sm:$0xff]  ;;  %v9051_v50 = vcombine.high %v11942_v42, %v11945_v45 }
 0x17e   : > { %8412 = vmatprep.subr.bf16.mxu0 %v9956_v47  ;;  %v11951_v47 = vld [vmem:[%s11811_s7 + $0xd0] sm:$0xff] }
 0x17f   : > { %v10085_v26 = vld [vmem:[%s11760_s27 + $0x2d4] ss:$8 sps:$4 sm:$0xff]   ;;  %v10086_v29 = vld [vmem:[%s11760_s27 + $0xad0] ss:$8 sps:$4 sm:$0xff]  }
 0x180   : > { %7989 = vmatpush1.bf16.msra.mxu1 %v9951_v51  ;;  %v9067_v51 = vcombine.high %v11948_v46, %v11951_v47 }
 0x181   : > { %8413 = vmatpush1.bf16.msra.mxu0 %v9954_v52  ;;  %7990 = vmatprep.subr.bf16.mxu1 %v9959_v54  ;;  %v10023_v52 = vld [vmem:[%s11760_s27 + $0x230] ss:$8 sps:$4 sm:$0xff]   ;;  %v10031_v54 = vld [vmem:[%s11760_s27 + $0x244] ss:$8 sps:$4 sm:$0xff]  }
 0x182   : > { %8414 = vmatprep.subr.bf16.mxu0 %v9962_v55  ;;  %v10034_v55 = vld [vmem:[%s11760_s27 + $0xa44] ss:$8 sps:$4 sm:$0xff]  }
 0x184   : > { %7991 = vmatpush1.bf16.msra.mxu1 %v9957_v56  ;;  %v10029_v56 = vld [vmem:[%s11760_s27 + $0x240] ss:$8 sps:$4 sm:$0xff]  }
 0x185   : > { %8415 = vmatpush1.bf16.msra.mxu0 %v9960_v57  ;;  %7992 = vmatprep.subr.bf16.mxu1 %v9965_v58  ;;  %v10032_v57 = vld [vmem:[%s11760_s27 + $0xa40] ss:$8 sps:$4 sm:$0xff]   ;;  %v10037_v58 = vld [vmem:[%s11760_s27 + $0x254] ss:$8 sps:$4 sm:$0xff]  }
 0x186   : > { %8416 = vmatprep.subr.bf16.mxu0 %v9968_v59  ;;  %v10040_v59 = vld [vmem:[%s11760_s27 + $0xa54] ss:$8 sps:$4 sm:$0xff]  }
 0x188   : > { %7993 = vmatpush1.bf16.msra.mxu1 %v9963_v60  ;;  %v10035_v60 = vld [vmem:[%s11760_s27 + $0x250] ss:$8 sps:$4 sm:$0xff]  }
 0x189   : > { %8417 = vmatpush1.bf16.msra.mxu0 %v9966_v61  ;;  %7994 = vmatprep.subr.bf16.mxu1 %v9971_v62  ;;  %v10038_v61 = vld [vmem:[%s11760_s27 + $0xa50] ss:$8 sps:$4 sm:$0xff]   ;;  %v10043_v62 = vld [vmem:[%s11760_s27 + $0x264] ss:$8 sps:$4 sm:$0xff]  }
 0x18a   : > { %8418 = vmatprep.subr.bf16.mxu0 %v9974_v63  ;;  %v10046_v63 = vld [vmem:[%s11760_s27 + $0xa64] ss:$8 sps:$4 sm:$0xff]  }
 0x18c   : > { %7995 = vmatpush1.bf16.msra.mxu1 %v9969_v0  ;;  %v10041_v0 = vld [vmem:[%s11760_s27 + $0x260] ss:$8 sps:$4 sm:$0xff]  }
 0x18d   : > { %8419 = vmatpush1.bf16.msra.mxu0 %v9972_v1  ;;  %7996 = vmatprep.subr.bf16.mxu1 %v9977_v2  ;;  %v10044_v1 = vld [vmem:[%s11760_s27 + $0xa60] ss:$8 sps:$4 sm:$0xff]   ;;  %v10049_v2 = vld [vmem:[%s11760_s27 + $0x274] ss:$8 sps:$4 sm:$0xff]  }
 0x18e   : > { %8420 = vmatprep.subr.bf16.mxu0 %v9980_v3  ;;  %v10052_v3 = vld [vmem:[%s11760_s27 + $0xa74] ss:$8 sps:$4 sm:$0xff]  }
 0x190   : > { %7997 = vmatpush1.bf16.msra.mxu1 %v9975_v4  ;;  %v10047_v4 = vld [vmem:[%s11760_s27 + $0x270] ss:$8 sps:$4 sm:$0xff]  }
 0x191   : > { %8421 = vmatpush1.bf16.msra.mxu0 %v9978_v5  ;;  %7998 = vmatprep.subr.bf16.mxu1 %v9983_v6  ;;  %v10050_v5 = vld [vmem:[%s11760_s27 + $0xa70] ss:$8 sps:$4 sm:$0xff]   ;;  %v10055_v6 = vld [vmem:[%s11760_s27 + $0x284] ss:$8 sps:$4 sm:$0xff]  }
 0x192   : > { %8422 = vmatprep.subr.bf16.mxu0 %v9986_v7  ;;  %v10058_v7 = vld [vmem:[%s11760_s27 + $0xa84] ss:$8 sps:$4 sm:$0xff]  }
 0x194   : > { %7999 = vmatpush1.bf16.msra.mxu1 %v9981_v8  ;;  %v10053_v8 = vld [vmem:[%s11760_s27 + $0x280] ss:$8 sps:$4 sm:$0xff]  }
 0x195   : > { %8423 = vmatpush1.bf16.msra.mxu0 %v9984_v9  ;;  %8000 = vmatprep.subr.bf16.mxu1 %v9989_v10  ;;  %v10056_v9 = vld [vmem:[%s11760_s27 + $0xa80] ss:$8 sps:$4 sm:$0xff]   ;;  %v10061_v10 = vld [vmem:[%s11760_s27 + $0x294] ss:$8 sps:$4 sm:$0xff]  }
 0x196   : > { %8424 = vmatprep.subr.bf16.mxu0 %v9992_v11  ;;  %v10064_v11 = vld [vmem:[%s11760_s27 + $0xa94] ss:$8 sps:$4 sm:$0xff]  }
 0x198   : > { %8001 = vmatpush1.bf16.msra.mxu1 %v9987_v12  ;;  %v10059_v12 = vld [vmem:[%s11760_s27 + $0x290] ss:$8 sps:$4 sm:$0xff]  }
 0x199   : > { %8425 = vmatpush1.bf16.msra.mxu0 %v9990_v13  ;;  %8002 = vmatprep.subr.bf16.mxu1 %v9995_v14  ;;  %v10062_v13 = vld [vmem:[%s11760_s27 + $0xa90] ss:$8 sps:$4 sm:$0xff]   ;;  %v10067_v14 = vld [vmem:[%s11760_s27 + $0x2a4] ss:$8 sps:$4 sm:$0xff]  }
 0x19a   : > { %8426 = vmatprep.subr.bf16.mxu0 %v9998_v15  ;;  %v10070_v15 = vld [vmem:[%s11760_s27 + $0xaa4] ss:$8 sps:$4 sm:$0xff]  }
 0x19c   : > { %8003 = vmatpush1.bf16.msra.mxu1 %v9993_v16  ;;  %v10065_v16 = vld [vmem:[%s11760_s27 + $0x2a0] ss:$8 sps:$4 sm:$0xff]  }
 0x19d   : > { %8427 = vmatpush1.bf16.msra.mxu0 %v9996_v17  ;;  %8004 = vmatprep.subr.bf16.mxu1 %v10001_v18  ;;  %v10068_v17 = vld [vmem:[%s11760_s27 + $0xaa0] ss:$8 sps:$4 sm:$0xff]   ;;  %v10073_v18 = vld [vmem:[%s11760_s27 + $0x2b4] ss:$8 sps:$4 sm:$0xff]  }
 0x19e   : > { %8428 = vmatprep.subr.bf16.mxu0 %v10004_v19  ;;  %v10076_v19 = vld [vmem:[%s11760_s27 + $0xab4] ss:$8 sps:$4 sm:$0xff]  }
 0x1a0   : > { %8005 = vmatpush1.bf16.msra.mxu1 %v9999_v20  ;;  %v10071_v20 = vld [vmem:[%s11760_s27 + $0x2b0] ss:$8 sps:$4 sm:$0xff]  }
 0x1a1   : > { %8429 = vmatpush1.bf16.msra.mxu0 %v10002_v21  ;;  %8027 = vmatprep.subr.bf16.mxu1 %v10007_v22  ;;  %v10074_v21 = vld [vmem:[%s11760_s27 + $0xab0] ss:$8 sps:$4 sm:$0xff]   ;;  %v10079_v22 = vld [vmem:[%s11760_s27 + $0x2c4] ss:$8 sps:$4 sm:$0xff]  }
 0x1a2   : > { %8451 = vmatprep.subr.bf16.mxu0 %v10010_v23  ;;  %v10082_v23 = vld [vmem:[%s11760_s27 + $0xac4] ss:$8 sps:$4 sm:$0xff]  }
 0x1a3   : > { %8007 = vmatmul.mubr.bf16.vlgmr.msra.gmra.mrb[0].mxu1 %v9048_v27  ;;  %v10088_v27 = vld [vmem:[%s11760_s27 + $0xad4] ss:$8 sps:$4 sm:$0xff]  }
 0x1a4   : > { %8431 = vmatmul.mubr.bf16.vlgmr.msra.gmra.mrb[0].mxu0 %v9064_v28  ;;  %8028 = vmatpush1.bf16.msra.mxu1 %v10005_v24  ;;  %v10077_v24 = vld [vmem:[%s11760_s27 + $0x2c0] ss:$8 sps:$4 sm:$0xff]   ;;  %v10083_v28 = vld [vmem:[%s11760_s27 + $0x2d0] ss:$8 sps:$4 sm:$0xff]  }
 0x1a5   : > { %8452 = vmatpush1.bf16.msra.mxu0 %v10008_v25  ;;  %8029 = vmatprep.subr.bf16.mxu1 %v10013_v30  ;;  %v10080_v25 = vld [vmem:[%s11760_s27 + $0xac0] ss:$8 sps:$4 sm:$0xff]   ;;  %v10091_v30 = vld [vmem:[%s11760_s27 + $0x2e4] ss:$8 sps:$4 sm:$0xff]  }
 0x1a6   : > { %8453 = vmatprep.subr.bf16.mxu0 %v10016_v31  ;;  %8016 = vmatprep.mubr.bf16.mxu1 %v9081_v34  ;;  %v10094_v31 = vld [vmem:[%s11760_s27 + $0xae4] ss:$8 sps:$4 sm:$0xff]   ;;  %v10097_v34 = vld [vmem:[%s11760_s27 + $0x2f4] ss:$8 sps:$4 sm:$0xff]  }
 0x1a7   : > { %8440 = vmatprep.mubr.bf16.mxu0 %v9097_v35  ;;  %v10100_v35 = vld [vmem:[%s11760_s27 + $0xaf4] ss:$8 sps:$4 sm:$0xff]  }
 0x1a8   : > { %8030 = vmatpush1.bf16.msra.mxu1 %v10011_v36  ;;  %v10095_v36 = vld [vmem:[%s11760_s27 + $0x2f0] ss:$8 sps:$4 sm:$0xff]  }
 0x1a9   : > { %8454 = vmatpush1.bf16.msra.mxu0 %v10014_v37  ;;  %8031 = vmatprep.subr.bf16.mxu1 %v10019_v38  ;;  %v10098_v37 = vld [vmem:[%s11760_s27 + $0xaf0] ss:$8 sps:$4 sm:$0xff]   ;;  %v10103_v38 = vld [vmem:[%s11760_s27 + $0x304] ss:$8 sps:$4 sm:$0xff]  }
 0x1aa   : > { %8455 = vmatprep.subr.bf16.mxu0 %v10022_v39  ;;  %v10106_v39 = vld [vmem:[%s11760_s27 + $0xb04] ss:$8 sps:$4 sm:$0xff]  }
 0x1ab   : > { %8017 = vmatmul.mubr.bf16.gmra.mrb[4].mxu1 %v9080_v43  ;;  %v4499_v43 = vld [vmem:[%s11811_s7 + $0x110] sm:$0xff] }
 0x1ac   : > { %8441 = vmatmul.mubr.bf16.gmra.mrb[4].mxu0 %v9096_v44  ;;  %8032 = vmatpush1.bf16.msra.mxu1 %v10017_v40  ;;  %v10101_v40 = vld [vmem:[%s11760_s27 + $0x300] ss:$8 sps:$4 sm:$0xff]   ;;  %v4515_v44 = vld [vmem:[%s11811_s7 + $0x190] sm:$0xff] }
 0x1ad   : > { %8456 = vmatpush1.bf16.msra.mxu0 %v10020_v41  ;;  %8033 = vmatprep.subr.bf16.mxu1 %v10025_v48  ;;  %v10104_v41 = vld [vmem:[%s11760_s27 + $0xb00] ss:$8 sps:$4 sm:$0xff]   ;;  %v9050_v48 = vcombine.low %v11942_v42, %v11945_v45  ;;  %v10107_v42 = vld [vmem:[%s11760_s27 + $0x310] ss:$8 sps:$4 sm:$0xff]  }
 0x1ae   : > { %8457 = vmatprep.subr.bf16.mxu0 %v10028_v49  ;;  %8059 = vmatprep.mubr.bf16.mxu1 %v9051_v50  ;;  %v9066_v49 = vcombine.low %v11948_v46, %v11951_v47  ;;  %v4507_v50 = vld [vmem:[%s11811_s7 + $0x150] sm:$0xff]  ;;  %v10115_v46 = vld [vmem:[%s11760_s27 + $0x324] ss:$8 sps:$4 sm:$0xff]  }
 0x1af   : > { %8483 = vmatprep.mubr.bf16.mxu0 %v9067_v51  ;;  %v4523_v51 = vld [vmem:[%s11811_s7 + $0x1d0] sm:$0xff]  ;;  %v10118_v47 = vld [vmem:[%s11760_s27 + $0xb24] ss:$8 sps:$4 sm:$0xff]  }
 0x1b0   : > { %8034 = vmatpush1.bf16.msra.mxu1 %v10023_v52  ;;  %v10109_v52 = vld [vmem:[%s11760_s27 + $0x314] ss:$8 sps:$4 sm:$0xff]   ;;  %v10110_v45 = vld [vmem:[%s11760_s27 + $0xb10] ss:$8 sps:$4 sm:$0xff]  }
 0x1b1   : > { %8458 = vmatpush1.bf16.msra.mxu0 %v10026_v53  ;;  %8035 = vmatprep.subr.bf16.mxu1 %v10031_v54  ;;  %v10112_v53 = vld [vmem:[%s11760_s27 + $0xb14] ss:$8 sps:$4 sm:$0xff]   ;;  %v9083_v54 = vcombine.high %v4499_v43, %v4515_v44 }
 0x1b2   : > { %8459 = vmatprep.subr.bf16.mxu0 %v10034_v55  ;;  %v9099_v55 = vcombine.high %v4507_v50, %v4523_v51 }
 0x1b4   : > { %8036 = vmatpush1.bf16.msra.mxu1 %v10029_v56  ;;  %v10113_v56 = vld [vmem:[%s11760_s27 + $0x320] ss:$8 sps:$4 sm:$0xff]  }
 0x1b5   : > { %8460 = vmatpush1.bf16.msra.mxu0 %v10032_v57  ;;  %8037 = vmatprep.subr.bf16.mxu1 %v10037_v58  ;;  %v10116_v57 = vld [vmem:[%s11760_s27 + $0xb20] ss:$8 sps:$4 sm:$0xff]   ;;  %v12030_v58 = vld [vmem:[%s11811_s7 + $0x18] sm:$0xff] }
 0x1b6   : > { %8461 = vmatprep.subr.bf16.mxu0 %v10040_v59  ;;  %v12033_v59 = vld [vmem:[%s11811_s7 + $0x98] sm:$0xff] }
 0x1b8   : > { %8038 = vmatpush1.bf16.msra.mxu1 %v10035_v60  ;;  %v9082_v60 = vcombine.low %v4499_v43, %v4515_v44  ;;  %v10181_v43 = vld [vmem:[%s11760_s27 + $0x3d4] ss:$8 sps:$4 sm:$0xff]  }
 0x1b9   : > { %8462 = vmatpush1.bf16.msra.mxu0 %v10038_v61  ;;  %8039 = vmatprep.subr.bf16.mxu1 %v10043_v62  ;;  %v9098_v61 = vcombine.low %v4507_v50, %v4523_v51  ;;  %v12036_v62 = vld [vmem:[%s11811_s7 + $0x58] sm:$0xff]  ;;  %v10187_v50 = vld [vmem:[%s11760_s27 + $0x3e4] ss:$8 sps:$4 sm:$0xff]  }
 0x1ba   : > { %8463 = vmatprep.subr.bf16.mxu0 %v10046_v63  ;;  %v12039_v63 = vld [vmem:[%s11811_s7 + $0xd8] sm:$0xff]  ;;  %v10190_v51 = vld [vmem:[%s11760_s27 + $0xbe4] ss:$8 sps:$4 sm:$0xff]  }
 0x1bb   : > { %v10184_v44 = vld [vmem:[%s11760_s27 + $0xbd4] ss:$8 sps:$4 sm:$0xff]  }
 0x1bc   : > { %8040 = vmatpush1.bf16.msra.mxu1 %v10041_v0  ;;  %v10121_v0 = vld [vmem:[%s11760_s27 + $0x334] ss:$8 sps:$4 sm:$0xff]  }
 0x1bd   : > { %8464 = vmatpush1.bf16.msra.mxu0 %v10044_v1  ;;  %8041 = vmatprep.subr.bf16.mxu1 %v10049_v2  ;;  %v10124_v1 = vld [vmem:[%s11760_s27 + $0xb34] ss:$8 sps:$4 sm:$0xff]   ;;  %v9053_v2 = vcombine.high %v12030_v58, %v12033_v59 }
 0x1be   : > { %8465 = vmatprep.subr.bf16.mxu0 %v10052_v3  ;;  %v9069_v3 = vcombine.high %v12036_v62, %v12039_v63 }
 0x1c0   : > { %8042 = vmatpush1.bf16.msra.mxu1 %v10047_v4  ;;  %v10119_v4 = vld [vmem:[%s11760_s27 + $0x330] ss:$8 sps:$4 sm:$0xff]  }
 0x1c1   : > { %8466 = vmatpush1.bf16.msra.mxu0 %v10050_v5  ;;  %8043 = vmatprep.subr.bf16.mxu1 %v10055_v6  ;;  %v10122_v5 = vld [vmem:[%s11760_s27 + $0xb30] ss:$8 sps:$4 sm:$0xff]   ;;  %v10127_v6 = vld [vmem:[%s11760_s27 + $0x344] ss:$8 sps:$4 sm:$0xff]  }
 0x1c2   : > { %8467 = vmatprep.subr.bf16.mxu0 %v10058_v7  ;;  %v10130_v7 = vld [vmem:[%s11760_s27 + $0xb44] ss:$8 sps:$4 sm:$0xff]  }
 0x1c4   : > { %8044 = vmatpush1.bf16.msra.mxu1 %v10053_v8  ;;  %v10125_v8 = vld [vmem:[%s11760_s27 + $0x340] ss:$8 sps:$4 sm:$0xff]  }
 0x1c5   : > { %8468 = vmatpush1.bf16.msra.mxu0 %v10056_v9  ;;  %8045 = vmatprep.subr.bf16.mxu1 %v10061_v10  ;;  %v10128_v9 = vld [vmem:[%s11760_s27 + $0xb40] ss:$8 sps:$4 sm:$0xff]   ;;  %v10133_v10 = vld [vmem:[%s11760_s27 + $0x354] ss:$8 sps:$4 sm:$0xff]  }
 0x1c6   : > { %8469 = vmatprep.subr.bf16.mxu0 %v10064_v11  ;;  %v10136_v11 = vld [vmem:[%s11760_s27 + $0xb54] ss:$8 sps:$4 sm:$0xff]  }
 0x1c8   : > { %8046 = vmatpush1.bf16.msra.mxu1 %v10059_v12  ;;  %v10131_v12 = vld [vmem:[%s11760_s27 + $0x350] ss:$8 sps:$4 sm:$0xff]  }
 0x1c9   : > { %8470 = vmatpush1.bf16.msra.mxu0 %v10062_v13  ;;  %8047 = vmatprep.subr.bf16.mxu1 %v10067_v14  ;;  %v10134_v13 = vld [vmem:[%s11760_s27 + $0xb50] ss:$8 sps:$4 sm:$0xff]   ;;  %v10139_v14 = vld [vmem:[%s11760_s27 + $0x364] ss:$8 sps:$4 sm:$0xff]  }
 0x1ca   : > { %8471 = vmatprep.subr.bf16.mxu0 %v10070_v15  ;;  %v10142_v15 = vld [vmem:[%s11760_s27 + $0xb64] ss:$8 sps:$4 sm:$0xff]  }
 0x1cc   : > { %8048 = vmatpush1.bf16.msra.mxu1 %v10065_v16  ;;  %v10137_v16 = vld [vmem:[%s11760_s27 + $0x360] ss:$8 sps:$4 sm:$0xff]  }
 0x1cd   : > { %8472 = vmatpush1.bf16.msra.mxu0 %v10068_v17  ;;  %8049 = vmatprep.subr.bf16.mxu1 %v10073_v18  ;;  %v10140_v17 = vld [vmem:[%s11760_s27 + $0xb60] ss:$8 sps:$4 sm:$0xff]   ;;  %v10145_v18 = vld [vmem:[%s11760_s27 + $0x374] ss:$8 sps:$4 sm:$0xff]  }
 0x1ce   : > { %8473 = vmatprep.subr.bf16.mxu0 %v10076_v19  ;;  %v10148_v19 = vld [vmem:[%s11760_s27 + $0xb74] ss:$8 sps:$4 sm:$0xff]  }
 0x1d0   : > { %8050 = vmatpush1.bf16.msra.mxu1 %v10071_v20  ;;  %v10143_v20 = vld [vmem:[%s11760_s27 + $0x370] ss:$8 sps:$4 sm:$0xff]  }
 0x1d1   : > { %8474 = vmatpush1.bf16.msra.mxu0 %v10074_v21  ;;  %8051 = vmatprep.subr.bf16.mxu1 %v10079_v22  ;;  %v10146_v21 = vld [vmem:[%s11760_s27 + $0xb70] ss:$8 sps:$4 sm:$0xff]   ;;  %v10151_v22 = vld [vmem:[%s11760_s27 + $0x384] ss:$8 sps:$4 sm:$0xff]  }
 0x1d2   : > { %8475 = vmatprep.subr.bf16.mxu0 %v10082_v23  ;;  %v10154_v23 = vld [vmem:[%s11760_s27 + $0xb84] ss:$8 sps:$4 sm:$0xff]  }
 0x1d4   : > { %8052 = vmatpush1.bf16.msra.mxu1 %v10077_v24  ;;  %v10149_v24 = vld [vmem:[%s11760_s27 + $0x380] ss:$8 sps:$4 sm:$0xff]  }
 0x1d5   : > { %8476 = vmatpush1.bf16.msra.mxu0 %v10080_v25  ;;  %8053 = vmatprep.subr.bf16.mxu1 %v10085_v26  ;;  %v10152_v25 = vld [vmem:[%s11760_s27 + $0xb80] ss:$8 sps:$4 sm:$0xff]   ;;  %v10157_v26 = vld [vmem:[%s11760_s27 + $0x394] ss:$8 sps:$4 sm:$0xff]  }
 0x1d6   : > { %8477 = vmatprep.subr.bf16.mxu0 %v10088_v27  ;;  %v10160_v27 = vld [vmem:[%s11760_s27 + $0xb94] ss:$8 sps:$4 sm:$0xff]  }
 0x1d8   : > { %8054 = vmatpush1.bf16.msra.mxu1 %v10083_v28  ;;  %v10155_v28 = vld [vmem:[%s11760_s27 + $0x390] ss:$8 sps:$4 sm:$0xff]  }
 0x1d9   : > { %8478 = vmatpush1.bf16.msra.mxu0 %v10086_v29  ;;  %8055 = vmatprep.subr.bf16.mxu1 %v10091_v30  ;;  %v10158_v29 = vld [vmem:[%s11760_s27 + $0xb90] ss:$8 sps:$4 sm:$0xff]   ;;  %v10163_v30 = vld [vmem:[%s11760_s27 + $0x3a4] ss:$8 sps:$4 sm:$0xff]  }
 0x1da   : > { %8479 = vmatprep.subr.bf16.mxu0 %v10094_v31  ;;  %v10166_v31 = vld [vmem:[%s11760_s27 + $0xba4] ss:$8 sps:$4 sm:$0xff]  }
 0x1dc   : > { %8056 = vmatpush1.bf16.msra.mxu1 %v10089_v32  ;;  %v10161_v32 = vld [vmem:[%s11760_s27 + $0x3a0] ss:$8 sps:$4 sm:$0xff]  }
 0x1dd   : > { %8480 = vmatpush1.bf16.msra.mxu0 %v10092_v33  ;;  %8057 = vmatprep.subr.bf16.mxu1 %v10097_v34  ;;  %v10164_v33 = vld [vmem:[%s11760_s27 + $0xba0] ss:$8 sps:$4 sm:$0xff]   ;;  %v10169_v34 = vld [vmem:[%s11760_s27 + $0x3b4] ss:$8 sps:$4 sm:$0xff]  }
 0x1de   : > { %8481 = vmatprep.subr.bf16.mxu0 %v10100_v35  ;;  %v10172_v35 = vld [vmem:[%s11760_s27 + $0xbb4] ss:$8 sps:$4 sm:$0xff]  }
 0x1e0   : > { %8058 = vmatpush1.bf16.msra.mxu1 %v10095_v36  ;;  %v10167_v36 = vld [vmem:[%s11760_s27 + $0x3b0] ss:$8 sps:$4 sm:$0xff]  }
 0x1e1   : > { %8482 = vmatpush1.bf16.msra.mxu0 %v10098_v37  ;;  %8080 = vmatprep.subr.bf16.mxu1 %v10103_v38  ;;  %v10170_v37 = vld [vmem:[%s11760_s27 + $0xbb0] ss:$8 sps:$4 sm:$0xff]   ;;  %v10175_v38 = vld [vmem:[%s11760_s27 + $0x3c4] ss:$8 sps:$4 sm:$0xff]  }
 0x1e2   : > { %8504 = vmatprep.subr.bf16.mxu0 %v10106_v39  ;;  %v10178_v39 = vld [vmem:[%s11760_s27 + $0xbc4] ss:$8 sps:$4 sm:$0xff]  }
 0x1e3   : > { %8060 = vmatmul.mubr.bf16.vlgmr.msra.gmra.mrb[0].mxu1 %v9050_v48  ;;  %v10179_v48 = vld [vmem:[%s11760_s27 + $0x3d0] ss:$8 sps:$4 sm:$0xff]  }
 0x1e4   : > { %8484 = vmatmul.mubr.bf16.vlgmr.msra.gmra.mrb[0].mxu0 %v9066_v49  ;;  %8081 = vmatpush1.bf16.msra.mxu1 %v10101_v40  ;;  %v10173_v40 = vld [vmem:[%s11760_s27 + $0x3c0] ss:$8 sps:$4 sm:$0xff]   ;;  %v10182_v49 = vld [vmem:[%s11760_s27 + $0xbd0] ss:$8 sps:$4 sm:$0xff]  }
 0x1e5   : > { %8505 = vmatpush1.bf16.msra.mxu0 %v10104_v41  ;;  %8082 = vmatprep.subr.bf16.mxu1 %v10109_v52  ;;  %v10176_v41 = vld [vmem:[%s11760_s27 + $0xbc0] ss:$8 sps:$4 sm:$0xff]  }
 0x1e6   : > { %8506 = vmatprep.subr.bf16.mxu0 %v10112_v53  ;;  %8069 = vmatprep.mubr.bf16.mxu1 %v9083_v54  ;;  %v10185_v52 = vld [vmem:[%s11760_s27 + $0x3e0] ss:$8 sps:$4 sm:$0xff]   ;;  %v10193_v54 = vld [vmem:[%s11760_s27 + $0x3f4] ss:$8 sps:$4 sm:$0xff]  }
 0x1e7   : > { %8493 = vmatprep.mubr.bf16.mxu0 %v9099_v55  ;;  %v10188_v53 = vld [vmem:[%s11760_s27 + $0xbe0] ss:$8 sps:$4 sm:$0xff]   ;;  %v10196_v55 = vld [vmem:[%s11760_s27 + $0xbf4] ss:$8 sps:$4 sm:$0xff]  }
 0x1e8   : > { %8083 = vmatpush1.bf16.msra.mxu1 %v10107_v42  ;;  %v10191_v42 = vld [vmem:[%s11760_s27 + $0x3f0] ss:$8 sps:$4 sm:$0xff]  }
 0x1e9   : > { %8507 = vmatpush1.bf16.msra.mxu0 %v10110_v45  ;;  %8084 = vmatprep.subr.bf16.mxu1 %v10115_v46  ;;  %v10194_v45 = vld [vmem:[%s11760_s27 + $0xbf0] ss:$8 sps:$4 sm:$0xff]   ;;  %v10199_v46 = vld [vmem:[%s11760_s27 + $0x404] ss:$8 sps:$4 sm:$0xff]  }
 0x1ea   : > { %8508 = vmatprep.subr.bf16.mxu0 %v10118_v47  ;;  %v10202_v47 = vld [vmem:[%s11760_s27 + $0xc04] ss:$8 sps:$4 sm:$0xff]  }
 0x1eb   : > { %8070 = vmatmul.mubr.bf16.gmra.mrb[4].mxu1 %v9082_v60  ;;  %v4500_v60 = vld [vmem:[%s11811_s7 + $0x118] sm:$0xff] }
 0x1ec   : > { %8494 = vmatmul.mubr.bf16.gmra.mrb[4].mxu0 %v9098_v61  ;;  %8085 = vmatpush1.bf16.msra.mxu1 %v10113_v56  ;;  %v10197_v56 = vld [vmem:[%s11760_s27 + $0x400] ss:$8 sps:$4 sm:$0xff]   ;;  %v4516_v61 = vld [vmem:[%s11811_s7 + $0x198] sm:$0xff] }
 0x1ed   : > { %8509 = vmatpush1.bf16.msra.mxu0 %v10116_v57  ;;  %8086 = vmatprep.subr.bf16.mxu1 %v10121_v0  ;;  %v10200_v57 = vld [vmem:[%s11760_s27 + $0xc00] ss:$8 sps:$4 sm:$0xff]   ;;  %v9052_v0 = vcombine.low %v12030_v58, %v12033_v59  ;;  %v10203_v58 = vld [vmem:[%s11760_s27 + $0x410] ss:$8 sps:$4 sm:$0xff]  }
 0x1ee   : > { %8510 = vmatprep.subr.bf16.mxu0 %v10124_v1  ;;  %8112 = vmatprep.mubr.bf16.mxu1 %v9053_v2  ;;  %v9068_v1 = vcombine.low %v12036_v62, %v12039_v63  ;;  %v4508_v2 = vld [vmem:[%s11811_s7 + $0x158] sm:$0xff]  ;;  %v10211_v62 = vld [vmem:[%s11760_s27 + $0x424] ss:$8 sps:$4 sm:$0xff]  }
 0x1ef   : > { %8536 = vmatprep.mubr.bf16.mxu0 %v9069_v3  ;;  %v4524_v3 = vld [vmem:[%s11811_s7 + $0x1d8] sm:$0xff]  ;;  %v10214_v63 = vld [vmem:[%s11760_s27 + $0xc24] ss:$8 sps:$4 sm:$0xff]  }
 0x1f0   : > { %8087 = vmatpush1.bf16.msra.mxu1 %v10119_v4  ;;  %v10205_v4 = vld [vmem:[%s11760_s27 + $0x414] ss:$8 sps:$4 sm:$0xff]   ;;  %v10206_v59 = vld [vmem:[%s11760_s27 + $0xc10] ss:$8 sps:$4 sm:$0xff]  }
 0x1f1   : > { %8511 = vmatpush1.bf16.msra.mxu0 %v10122_v5  ;;  %8088 = vmatprep.subr.bf16.mxu1 %v10127_v6  ;;  %v10208_v5 = vld [vmem:[%s11760_s27 + $0xc14] ss:$8 sps:$4 sm:$0xff]   ;;  %v9085_v6 = vcombine.high %v4500_v60, %v4516_v61 }
 0x1f2   : > { %8512 = vmatprep.subr.bf16.mxu0 %v10130_v7  ;;  %v9101_v7 = vcombine.high %v4508_v2, %v4524_v3 }
 0x1f4   : > { %8089 = vmatpush1.bf16.msra.mxu1 %v10125_v8  ;;  %v12116_v8 = vld [vmem:[%s11811_s7 + $0x20] sm:$0xff] }
 0x1f5   : > { %8513 = vmatpush1.bf16.msra.mxu0 %v10128_v9  ;;  %8090 = vmatprep.subr.bf16.mxu1 %v10133_v10  ;;  %v12119_v9 = vld [vmem:[%s11811_s7 + $0xa0] sm:$0xff] }
 0x1f6   : > { %8514 = vmatprep.subr.bf16.mxu0 %v10136_v11  ;;  %v12122_v10 = vld [vmem:[%s11811_s7 + $0x60] sm:$0xff]  ;;  %v9084_v11 = vcombine.low %v4500_v60, %v4516_v61  ;;  %v10277_v60 = vld [vmem:[%s11760_s27 + $0x4d4] ss:$8 sps:$4 sm:$0xff]  }
 0x1f7   : > { %v10280_v61 = vld [vmem:[%s11760_s27 + $0xcd4] ss:$8 sps:$4 sm:$0xff]  }
 0x1f8   : > { %8091 = vmatpush1.bf16.msra.mxu1 %v10131_v12  ;;  %v9100_v12 = vcombine.low %v4508_v2, %v4524_v3  ;;  %v10283_v2 = vld [vmem:[%s11760_s27 + $0x4e4] ss:$8 sps:$4 sm:$0xff]  }
 0x1f9   : > { %8515 = vmatpush1.bf16.msra.mxu0 %v10134_v13  ;;  %8092 = vmatprep.subr.bf16.mxu1 %v10139_v14  ;;  %v12125_v13 = vld [vmem:[%s11811_s7 + $0xe0] sm:$0xff] }
 0x1fa   : > { %8516 = vmatprep.subr.bf16.mxu0 %v10142_v15  ;;  %v10209_v14 = vld [vmem:[%s11760_s27 + $0x420] ss:$8 sps:$4 sm:$0xff]   ;;  %v10286_v3 = vld [vmem:[%s11760_s27 + $0xce4] ss:$8 sps:$4 sm:$0xff]  }
 0x1fb   : > { %v10212_v15 = vld [vmem:[%s11760_s27 + $0xc20] ss:$8 sps:$4 sm:$0xff]  }
 0x1fc   : > { %8093 = vmatpush1.bf16.msra.mxu1 %v10137_v16  ;;  %v10217_v16 = vld [vmem:[%s11760_s27 + $0x434] ss:$8 sps:$4 sm:$0xff]  }
 0x1fd   : > { %8517 = vmatpush1.bf16.msra.mxu0 %v10140_v17  ;;  %8094 = vmatprep.subr.bf16.mxu1 %v10145_v18  ;;  %v10220_v17 = vld [vmem:[%s11760_s27 + $0xc34] ss:$8 sps:$4 sm:$0xff]   ;;  %v9055_v18 = vcombine.high %v12116_v8, %v12119_v9 }
 0x1fe   : > { %8518 = vmatprep.subr.bf16.mxu0 %v10148_v19  ;;  %v9071_v19 = vcombine.high %v12122_v10, %v12125_v13 }
 0x200   : > { %8095 = vmatpush1.bf16.msra.mxu1 %v10143_v20  ;;  %v10215_v20 = vld [vmem:[%s11760_s27 + $0x430] ss:$8 sps:$4 sm:$0xff]  }
 0x201   : > { %8519 = vmatpush1.bf16.msra.mxu0 %v10146_v21  ;;  %8096 = vmatprep.subr.bf16.mxu1 %v10151_v22  ;;  %v10218_v21 = vld [vmem:[%s11760_s27 + $0xc30] ss:$8 sps:$4 sm:$0xff]   ;;  %v10223_v22 = vld [vmem:[%s11760_s27 + $0x444] ss:$8 sps:$4 sm:$0xff]  }
 0x202   : > { %8520 = vmatprep.subr.bf16.mxu0 %v10154_v23  ;;  %v10226_v23 = vld [vmem:[%s11760_s27 + $0xc44] ss:$8 sps:$4 sm:$0xff]  }
 0x204   : > { %8097 = vmatpush1.bf16.msra.mxu1 %v10149_v24  ;;  %v10221_v24 = vld [vmem:[%s11760_s27 + $0x440] ss:$8 sps:$4 sm:$0xff]  }
 0x205   : > { %8521 = vmatpush1.bf16.msra.mxu0 %v10152_v25  ;;  %8098 = vmatprep.subr.bf16.mxu1 %v10157_v26  ;;  %v10224_v25 = vld [vmem:[%s11760_s27 + $0xc40] ss:$8 sps:$4 sm:$0xff]   ;;  %v10229_v26 = vld [vmem:[%s11760_s27 + $0x454] ss:$8 sps:$4 sm:$0xff]  }
 0x206   : > { %8522 = vmatprep.subr.bf16.mxu0 %v10160_v27  ;;  %v10232_v27 = vld [vmem:[%s11760_s27 + $0xc54] ss:$8 sps:$4 sm:$0xff]  }
 0x208   : > { %8099 = vmatpush1.bf16.msra.mxu1 %v10155_v28  ;;  %v10227_v28 = vld [vmem:[%s11760_s27 + $0x450] ss:$8 sps:$4 sm:$0xff]  }
 0x209   : > { %8523 = vmatpush1.bf16.msra.mxu0 %v10158_v29  ;;  %8100 = vmatprep.subr.bf16.mxu1 %v10163_v30  ;;  %v10230_v29 = vld [vmem:[%s11760_s27 + $0xc50] ss:$8 sps:$4 sm:$0xff]   ;;  %v10235_v30 = vld [vmem:[%s11760_s27 + $0x464] ss:$8 sps:$4 sm:$0xff]  }
 0x20a   : > { %8524 = vmatprep.subr.bf16.mxu0 %v10166_v31  ;;  %v10238_v31 = vld [vmem:[%s11760_s27 + $0xc64] ss:$8 sps:$4 sm:$0xff]  }
 0x20c   : > { %8101 = vmatpush1.bf16.msra.mxu1 %v10161_v32  ;;  %v10233_v32 = vld [vmem:[%s11760_s27 + $0x460] ss:$8 sps:$4 sm:$0xff]  }
 0x20d   : > { %8525 = vmatpush1.bf16.msra.mxu0 %v10164_v33  ;;  %8102 = vmatprep.subr.bf16.mxu1 %v10169_v34  ;;  %v10236_v33 = vld [vmem:[%s11760_s27 + $0xc60] ss:$8 sps:$4 sm:$0xff]   ;;  %v10241_v34 = vld [vmem:[%s11760_s27 + $0x474] ss:$8 sps:$4 sm:$0xff]  }
 0x20e   : > { %8526 = vmatprep.subr.bf16.mxu0 %v10172_v35  ;;  %v10244_v35 = vld [vmem:[%s11760_s27 + $0xc74] ss:$8 sps:$4 sm:$0xff]  }
 0x210   : > { %8103 = vmatpush1.bf16.msra.mxu1 %v10167_v36  ;;  %v10239_v36 = vld [vmem:[%s11760_s27 + $0x470] ss:$8 sps:$4 sm:$0xff]  }
 0x211   : > { %8527 = vmatpush1.bf16.msra.mxu0 %v10170_v37  ;;  %8104 = vmatprep.subr.bf16.mxu1 %v10175_v38  ;;  %v10242_v37 = vld [vmem:[%s11760_s27 + $0xc70] ss:$8 sps:$4 sm:$0xff]   ;;  %v10247_v38 = vld [vmem:[%s11760_s27 + $0x484] ss:$8 sps:$4 sm:$0xff]  }
 0x212   : > { %8528 = vmatprep.subr.bf16.mxu0 %v10178_v39  ;;  %v10250_v39 = vld [vmem:[%s11760_s27 + $0xc84] ss:$8 sps:$4 sm:$0xff]  }
 0x214   : > { %8105 = vmatpush1.bf16.msra.mxu1 %v10173_v40  ;;  %v10245_v40 = vld [vmem:[%s11760_s27 + $0x480] ss:$8 sps:$4 sm:$0xff]  }
 0x215   : > { %8529 = vmatpush1.bf16.msra.mxu0 %v10176_v41  ;;  %8106 = vmatprep.subr.bf16.mxu1 %v10181_v43  ;;  %v10248_v41 = vld [vmem:[%s11760_s27 + $0xc80] ss:$8 sps:$4 sm:$0xff]   ;;  %v10253_v43 = vld [vmem:[%s11760_s27 + $0x494] ss:$8 sps:$4 sm:$0xff]  }
 0x216   : > { %8530 = vmatprep.subr.bf16.mxu0 %v10184_v44  ;;  %v10256_v44 = vld [vmem:[%s11760_s27 + $0xc94] ss:$8 sps:$4 sm:$0xff]  }
 0x218   : > { %8107 = vmatpush1.bf16.msra.mxu1 %v10179_v48  ;;  %v10251_v48 = vld [vmem:[%s11760_s27 + $0x490] ss:$8 sps:$4 sm:$0xff]  }
 0x219   : > { %8531 = vmatpush1.bf16.msra.mxu0 %v10182_v49  ;;  %8108 = vmatprep.subr.bf16.mxu1 %v10187_v50  ;;  %v10254_v49 = vld [vmem:[%s11760_s27 + $0xc90] ss:$8 sps:$4 sm:$0xff]   ;;  %v10259_v50 = vld [vmem:[%s11760_s27 + $0x4a4] ss:$8 sps:$4 sm:$0xff]  }
 0x21a   : > { %8532 = vmatprep.subr.bf16.mxu0 %v10190_v51  ;;  %v10262_v51 = vld [vmem:[%s11760_s27 + $0xca4] ss:$8 sps:$4 sm:$0xff]  }
 0x21c   : > { %8109 = vmatpush1.bf16.msra.mxu1 %v10185_v52  ;;  %v10257_v52 = vld [vmem:[%s11760_s27 + $0x4a0] ss:$8 sps:$4 sm:$0xff]  }
 0x21d   : > { %8533 = vmatpush1.bf16.msra.mxu0 %v10188_v53  ;;  %8110 = vmatprep.subr.bf16.mxu1 %v10193_v54  ;;  %v10260_v53 = vld [vmem:[%s11760_s27 + $0xca0] ss:$8 sps:$4 sm:$0xff]   ;;  %v10265_v54 = vld [vmem:[%s11760_s27 + $0x4b4] ss:$8 sps:$4 sm:$0xff]  }
 0x21e   : > { %8534 = vmatprep.subr.bf16.mxu0 %v10196_v55  ;;  %v10268_v55 = vld [vmem:[%s11760_s27 + $0xcb4] ss:$8 sps:$4 sm:$0xff]  }
 0x220   : > { %8111 = vmatpush1.bf16.msra.mxu1 %v10191_v42  ;;  %v10263_v42 = vld [vmem:[%s11760_s27 + $0x4b0] ss:$8 sps:$4 sm:$0xff]  }
 0x221   : > { %8535 = vmatpush1.bf16.msra.mxu0 %v10194_v45  ;;  %8133 = vmatprep.subr.bf16.mxu1 %v10199_v46  ;;  %v10266_v45 = vld [vmem:[%s11760_s27 + $0xcb0] ss:$8 sps:$4 sm:$0xff]   ;;  %v10271_v46 = vld [vmem:[%s11760_s27 + $0x4c4] ss:$8 sps:$4 sm:$0xff]  }
 0x222   : > { %8557 = vmatprep.subr.bf16.mxu0 %v10202_v47  ;;  %v10274_v47 = vld [vmem:[%s11760_s27 + $0xcc4] ss:$8 sps:$4 sm:$0xff]  }
 0x223   : > { %8113 = vmatmul.mubr.bf16.vlgmr.msra.gmra.mrb[0].mxu1 %v9052_v0  ;;  %v10275_v0 = vld [vmem:[%s11760_s27 + $0x4d0] ss:$8 sps:$4 sm:$0xff]  }
 0x224   : > { %8537 = vmatmul.mubr.bf16.vlgmr.msra.gmra.mrb[0].mxu0 %v9068_v1  ;;  %8134 = vmatpush1.bf16.msra.mxu1 %v10197_v56  ;;  %v10269_v56 = vld [vmem:[%s11760_s27 + $0x4c0] ss:$8 sps:$4 sm:$0xff]   ;;  %v10278_v1 = vld [vmem:[%s11760_s27 + $0xcd0] ss:$8 sps:$4 sm:$0xff]  }
 0x225   : > { %8558 = vmatpush1.bf16.msra.mxu0 %v10200_v57  ;;  %8135 = vmatprep.subr.bf16.mxu1 %v10205_v4  ;;  %v10272_v57 = vld [vmem:[%s11760_s27 + $0xcc0] ss:$8 sps:$4 sm:$0xff]  }
 0x226   : > { %8559 = vmatprep.subr.bf16.mxu0 %v10208_v5  ;;  %8122 = vmatprep.mubr.bf16.mxu1 %v9085_v6  ;;  %v10281_v4 = vld [vmem:[%s11760_s27 + $0x4e0] ss:$8 sps:$4 sm:$0xff]   ;;  %v10289_v6 = vld [vmem:[%s11760_s27 + $0x4f4] ss:$8 sps:$4 sm:$0xff]  }
 0x227   : > { %8546 = vmatprep.mubr.bf16.mxu0 %v9101_v7  ;;  %v10284_v5 = vld [vmem:[%s11760_s27 + $0xce0] ss:$8 sps:$4 sm:$0xff]   ;;  %v10292_v7 = vld [vmem:[%s11760_s27 + $0xcf4] ss:$8 sps:$4 sm:$0xff]  }
 0x228   : > { %8136 = vmatpush1.bf16.msra.mxu1 %v10203_v58  ;;  %v10287_v58 = vld [vmem:[%s11760_s27 + $0x4f0] ss:$8 sps:$4 sm:$0xff]  }
 0x229   : > { %8560 = vmatpush1.bf16.msra.mxu0 %v10206_v59  ;;  %8137 = vmatprep.subr.bf16.mxu1 %v10211_v62  ;;  %v10290_v59 = vld [vmem:[%s11760_s27 + $0xcf0] ss:$8 sps:$4 sm:$0xff]   ;;  %v10295_v62 = vld [vmem:[%s11760_s27 + $0x504] ss:$8 sps:$4 sm:$0xff]  }
 0x22a   : > { %8561 = vmatprep.subr.bf16.mxu0 %v10214_v63  ;;  %v10298_v63 = vld [vmem:[%s11760_s27 + $0xd04] ss:$8 sps:$4 sm:$0xff]  }
 0x22b   : > { %8123 = vmatmul.mubr.bf16.gmra.mrb[4].mxu1 %v9084_v11  ;;  %v4501_v11 = vld [vmem:[%s11811_s7 + $0x120] sm:$0xff] }
 0x22c   : > { %8547 = vmatmul.mubr.bf16.gmra.mrb[4].mxu0 %v9100_v12  ;;  %8138 = vmatpush1.bf16.msra.mxu1 %v10209_v14  ;;  %v4517_v12 = vld [vmem:[%s11811_s7 + $0x1a0] sm:$0xff] }
 0x22d   : > { %8562 = vmatpush1.bf16.msra.mxu0 %v10212_v15  ;;  %8139 = vmatprep.subr.bf16.mxu1 %v10217_v16  ;;  %v4509_v14 = vld [vmem:[%s11811_s7 + $0x160] sm:$0xff]  ;;  %v9054_v16 = vcombine.low %v12116_v8, %v12119_v9  ;;  %v9087_v8 = vcombine.high %v4501_v11, %v4517_v12 }
 0x22e   : > { %8563 = vmatprep.subr.bf16.mxu0 %v10220_v17  ;;  %8165 = vmatprep.mubr.bf16.mxu1 %v9055_v18  ;;  %v4525_v15 = vld [vmem:[%s11811_s7 + $0x1e0] sm:$0xff]  ;;  %v9070_v17 = vcombine.low %v12122_v10, %v12125_v13 }
 0x22f   : > { %8589 = vmatprep.mubr.bf16.mxu0 %v9071_v19  ;;  %v10293_v18 = vld [vmem:[%s11760_s27 + $0x500] ss:$8 sps:$4 sm:$0xff]   ;;  %v9103_v9 = vcombine.high %v4509_v14, %v4525_v15  ;;  %v10307_v10 = vld [vmem:[%s11760_s27 + $0x524] ss:$8 sps:$4 sm:$0xff]  }
 0x230   : > { %8140 = vmatpush1.bf16.msra.mxu1 %v10215_v20  ;;  %v10296_v19 = vld [vmem:[%s11760_s27 + $0xd00] ss:$8 sps:$4 sm:$0xff]   ;;  %v10301_v20 = vld [vmem:[%s11760_s27 + $0x514] ss:$8 sps:$4 sm:$0xff]   ;;  %v10310_v13 = vld [vmem:[%s11760_s27 + $0xd24] ss:$8 sps:$4 sm:$0xff]  }
 0x231   : > { %8564 = vmatpush1.bf16.msra.mxu0 %v10218_v21  ;;  %8141 = vmatprep.subr.bf16.mxu1 %v10223_v22  ;;  %v10304_v21 = vld [vmem:[%s11760_s27 + $0xd14] ss:$8 sps:$4 sm:$0xff]   ;;  %v10299_v22 = vld [vmem:[%s11760_s27 + $0x510] ss:$8 sps:$4 sm:$0xff]  }
 0x232   : > { %8565 = vmatprep.subr.bf16.mxu0 %v10226_v23  ;;  %v10302_v23 = vld [vmem:[%s11760_s27 + $0xd10] ss:$8 sps:$4 sm:$0xff]  }
 0x234   : > { %8142 = vmatpush1.bf16.msra.mxu1 %v10221_v24  ;;  %v12204_v24 = vld [vmem:[%s11811_s7 + $0x28] sm:$0xff] }
 0x235   : > { %8566 = vmatpush1.bf16.msra.mxu0 %v10224_v25  ;;  %8143 = vmatprep.subr.bf16.mxu1 %v10229_v26  ;;  %v12207_v25 = vld [vmem:[%s11811_s7 + $0xa8] sm:$0xff] }
 0x236   : > { %8567 = vmatprep.subr.bf16.mxu0 %v10232_v27  ;;  %v12210_v26 = vld [vmem:[%s11811_s7 + $0x68] sm:$0xff] }
 0x237   : > { %v12213_v27 = vld [vmem:[%s11811_s7 + $0xe8] sm:$0xff] }
 0x238   : > { %8144 = vmatpush1.bf16.msra.mxu1 %v10227_v28  ;;  %v9086_v28 = vcombine.low %v4501_v11, %v4517_v12  ;;  %v10365_v11 = vld [vmem:[%s11760_s27 + $0x5c0] ss:$8 sps:$4 sm:$0xff]  }
 0x239   : > { %8568 = vmatpush1.bf16.msra.mxu0 %v10230_v29  ;;  %8145 = vmatprep.subr.bf16.mxu1 %v10235_v30  ;;  %v9102_v29 = vcombine.low %v4509_v14, %v4525_v15  ;;  %v10305_v30 = vld [vmem:[%s11760_s27 + $0x520] ss:$8 sps:$4 sm:$0xff]   ;;  %v10373_v14 = vld [vmem:[%s11760_s27 + $0x5d4] ss:$8 sps:$4 sm:$0xff]  }
 0x23a   : > { %8569 = vmatprep.subr.bf16.mxu0 %v10238_v31  ;;  %v10308_v31 = vld [vmem:[%s11760_s27 + $0xd20] ss:$8 sps:$4 sm:$0xff]   ;;  %v10376_v15 = vld [vmem:[%s11760_s27 + $0xdd4] ss:$8 sps:$4 sm:$0xff]  }
 0x23b   : > { %v10368_v12 = vld [vmem:[%s11760_s27 + $0xdc0] ss:$8 sps:$4 sm:$0xff]  }
 0x23c   : > { %8146 = vmatpush1.bf16.msra.mxu1 %v10233_v32  ;;  %v10313_v32 = vld [vmem:[%s11760_s27 + $0x534] ss:$8 sps:$4 sm:$0xff]  }
 0x23d   : > { %8570 = vmatpush1.bf16.msra.mxu0 %v10236_v33  ;;  %8147 = vmatprep.subr.bf16.mxu1 %v10241_v34  ;;  %v10316_v33 = vld [vmem:[%s11760_s27 + $0xd34] ss:$8 sps:$4 sm:$0xff]   ;;  %v9057_v34 = vcombine.high %v12204_v24, %v12207_v25 }
 0x23e   : > { %8571 = vmatprep.subr.bf16.mxu0 %v10244_v35  ;;  %v9073_v35 = vcombine.high %v12210_v26, %v12213_v27 }
 0x240   : > { %8148 = vmatpush1.bf16.msra.mxu1 %v10239_v36  ;;  %v10311_v36 = vld [vmem:[%s11760_s27 + $0x530] ss:$8 sps:$4 sm:$0xff]  }
 0x241   : > { %8572 = vmatpush1.bf16.msra.mxu0 %v10242_v37  ;;  %8149 = vmatprep.subr.bf16.mxu1 %v10247_v38  ;;  %v10314_v37 = vld [vmem:[%s11760_s27 + $0xd30] ss:$8 sps:$4 sm:$0xff]   ;;  %v10319_v38 = vld [vmem:[%s11760_s27 + $0x544] ss:$8 sps:$4 sm:$0xff]  }
 0x242   : > { %8573 = vmatprep.subr.bf16.mxu0 %v10250_v39  ;;  %v10322_v39 = vld [vmem:[%s11760_s27 + $0xd44] ss:$8 sps:$4 sm:$0xff]  }
 0x244   : > { %8150 = vmatpush1.bf16.msra.mxu1 %v10245_v40  ;;  %v10317_v40 = vld [vmem:[%s11760_s27 + $0x540] ss:$8 sps:$4 sm:$0xff]  }
 0x245   : > { %8574 = vmatpush1.bf16.msra.mxu0 %v10248_v41  ;;  %8151 = vmatprep.subr.bf16.mxu1 %v10253_v43  ;;  %v10320_v41 = vld [vmem:[%s11760_s27 + $0xd40] ss:$8 sps:$4 sm:$0xff]   ;;  %v10325_v43 = vld [vmem:[%s11760_s27 + $0x554] ss:$8 sps:$4 sm:$0xff]  }
 0x246   : > { %8575 = vmatprep.subr.bf16.mxu0 %v10256_v44  ;;  %v10328_v44 = vld [vmem:[%s11760_s27 + $0xd54] ss:$8 sps:$4 sm:$0xff]  }
 0x248   : > { %8152 = vmatpush1.bf16.msra.mxu1 %v10251_v48  ;;  %v10323_v48 = vld [vmem:[%s11760_s27 + $0x550] ss:$8 sps:$4 sm:$0xff]  }
 0x249   : > { %8576 = vmatpush1.bf16.msra.mxu0 %v10254_v49  ;;  %8153 = vmatprep.subr.bf16.mxu1 %v10259_v50  ;;  %v10326_v49 = vld [vmem:[%s11760_s27 + $0xd50] ss:$8 sps:$4 sm:$0xff]   ;;  %v10331_v50 = vld [vmem:[%s11760_s27 + $0x564] ss:$8 sps:$4 sm:$0xff]  }
 0x24a   : > { %8577 = vmatprep.subr.bf16.mxu0 %v10262_v51  ;;  %v10334_v51 = vld [vmem:[%s11760_s27 + $0xd64] ss:$8 sps:$4 sm:$0xff]  }
 0x24c   : > { %8154 = vmatpush1.bf16.msra.mxu1 %v10257_v52  ;;  %v10329_v52 = vld [vmem:[%s11760_s27 + $0x560] ss:$8 sps:$4 sm:$0xff]  }
 0x24d   : > { %8578 = vmatpush1.bf16.msra.mxu0 %v10260_v53  ;;  %8155 = vmatprep.subr.bf16.mxu1 %v10265_v54  ;;  %v10332_v53 = vld [vmem:[%s11760_s27 + $0xd60] ss:$8 sps:$4 sm:$0xff]   ;;  %v10337_v54 = vld [vmem:[%s11760_s27 + $0x574] ss:$8 sps:$4 sm:$0xff]  }
 0x24e   : > { %8579 = vmatprep.subr.bf16.mxu0 %v10268_v55  ;;  %v10340_v55 = vld [vmem:[%s11760_s27 + $0xd74] ss:$8 sps:$4 sm:$0xff]  }
 0x250   : > { %8156 = vmatpush1.bf16.msra.mxu1 %v10263_v42  ;;  %v10335_v42 = vld [vmem:[%s11760_s27 + $0x570] ss:$8 sps:$4 sm:$0xff]  }
 0x251   : > { %8580 = vmatpush1.bf16.msra.mxu0 %v10266_v45  ;;  %8157 = vmatprep.subr.bf16.mxu1 %v10271_v46  ;;  %v10338_v45 = vld [vmem:[%s11760_s27 + $0xd70] ss:$8 sps:$4 sm:$0xff]   ;;  %v10343_v46 = vld [vmem:[%s11760_s27 + $0x584] ss:$8 sps:$4 sm:$0xff]  }
 0x252   : > { %8581 = vmatprep.subr.bf16.mxu0 %v10274_v47  ;;  %v10346_v47 = vld [vmem:[%s11760_s27 + $0xd84] ss:$8 sps:$4 sm:$0xff]  }
 0x254   : > { %8158 = vmatpush1.bf16.msra.mxu1 %v10269_v56  ;;  %v10341_v56 = vld [vmem:[%s11760_s27 + $0x580] ss:$8 sps:$4 sm:$0xff]  }
 0x255   : > { %8582 = vmatpush1.bf16.msra.mxu0 %v10272_v57  ;;  %8159 = vmatprep.subr.bf16.mxu1 %v10277_v60  ;;  %v10344_v57 = vld [vmem:[%s11760_s27 + $0xd80] ss:$8 sps:$4 sm:$0xff]   ;;  %v10349_v60 = vld [vmem:[%s11760_s27 + $0x594] ss:$8 sps:$4 sm:$0xff]  }
 0x256   : > { %8583 = vmatprep.subr.bf16.mxu0 %v10280_v61  ;;  %v10352_v61 = vld [vmem:[%s11760_s27 + $0xd94] ss:$8 sps:$4 sm:$0xff]  }
 0x258   : > { %8160 = vmatpush1.bf16.msra.mxu1 %v10275_v0  ;;  %v10347_v0 = vld [vmem:[%s11760_s27 + $0x590] ss:$8 sps:$4 sm:$0xff]  }
 0x259   : > { %8584 = vmatpush1.bf16.msra.mxu0 %v10278_v1  ;;  %8161 = vmatprep.subr.bf16.mxu1 %v10283_v2  ;;  %v10350_v1 = vld [vmem:[%s11760_s27 + $0xd90] ss:$8 sps:$4 sm:$0xff]   ;;  %v10355_v2 = vld [vmem:[%s11760_s27 + $0x5a4] ss:$8 sps:$4 sm:$0xff]  }
 0x25a   : > { %8585 = vmatprep.subr.bf16.mxu0 %v10286_v3  ;;  %v10358_v3 = vld [vmem:[%s11760_s27 + $0xda4] ss:$8 sps:$4 sm:$0xff]  }
 0x25c   : > { %8162 = vmatpush1.bf16.msra.mxu1 %v10281_v4  ;;  %v10353_v4 = vld [vmem:[%s11760_s27 + $0x5a0] ss:$8 sps:$4 sm:$0xff]  }
 0x25d   : > { %8586 = vmatpush1.bf16.msra.mxu0 %v10284_v5  ;;  %8163 = vmatprep.subr.bf16.mxu1 %v10289_v6  ;;  %v10356_v5 = vld [vmem:[%s11760_s27 + $0xda0] ss:$8 sps:$4 sm:$0xff]   ;;  %v10361_v6 = vld [vmem:[%s11760_s27 + $0x5b4] ss:$8 sps:$4 sm:$0xff]  }
 0x25e   : > { %8587 = vmatprep.subr.bf16.mxu0 %v10292_v7  ;;  %v10364_v7 = vld [vmem:[%s11760_s27 + $0xdb4] ss:$8 sps:$4 sm:$0xff]  }
 0x260   : > { %8164 = vmatpush1.bf16.msra.mxu1 %v10287_v58  ;;  %v10359_v58 = vld [vmem:[%s11760_s27 + $0x5b0] ss:$8 sps:$4 sm:$0xff]  }
 0x261   : > { %8588 = vmatpush1.bf16.msra.mxu0 %v10290_v59  ;;  %8186 = vmatprep.subr.bf16.mxu1 %v10295_v62  ;;  %v10362_v59 = vld [vmem:[%s11760_s27 + $0xdb0] ss:$8 sps:$4 sm:$0xff]   ;;  %v10367_v62 = vld [vmem:[%s11760_s27 + $0x5c4] ss:$8 sps:$4 sm:$0xff]  }
 0x262   : > { %8610 = vmatprep.subr.bf16.mxu0 %v10298_v63  ;;  %v10370_v63 = vld [vmem:[%s11760_s27 + $0xdc4] ss:$8 sps:$4 sm:$0xff]  }
 0x263   : > { %8166 = vmatmul.mubr.bf16.vlgmr.msra.gmra.mrb[0].mxu1 %v9054_v16  ;;  %v10371_v16 = vld [vmem:[%s11760_s27 + $0x5d0] ss:$8 sps:$4 sm:$0xff]  }
 0x264   : > { %8590 = vmatmul.mubr.bf16.vlgmr.msra.gmra.mrb[0].mxu0 %v9070_v17  ;;  %8187 = vmatpush1.bf16.msra.mxu1 %v10293_v18  ;;  %v10374_v17 = vld [vmem:[%s11760_s27 + $0xdd0] ss:$8 sps:$4 sm:$0xff]   ;;  %v10379_v18 = vld [vmem:[%s11760_s27 + $0x5e4] ss:$8 sps:$4 sm:$0xff]  }
 0x265   : > { %8611 = vmatpush1.bf16.msra.mxu0 %v10296_v19  ;;  %8188 = vmatprep.subr.bf16.mxu1 %v10301_v20  ;;  %v10382_v19 = vld [vmem:[%s11760_s27 + $0xde4] ss:$8 sps:$4 sm:$0xff]   ;;  %v10377_v20 = vld [vmem:[%s11760_s27 + $0x5e0] ss:$8 sps:$4 sm:$0xff]  }
 0x266   : > { %8612 = vmatprep.subr.bf16.mxu0 %v10304_v21  ;;  %8175 = vmatprep.mubr.bf16.mxu1 %v9087_v8  ;;  %v10380_v21 = vld [vmem:[%s11760_s27 + $0xde0] ss:$8 sps:$4 sm:$0xff]   ;;  %v10383_v8 = vld [vmem:[%s11760_s27 + $0x5f0] ss:$8 sps:$4 sm:$0xff]  }
 0x267   : > { %8599 = vmatprep.mubr.bf16.mxu0 %v9103_v9  ;;  %v10386_v9 = vld [vmem:[%s11760_s27 + $0xdf0] ss:$8 sps:$4 sm:$0xff]  }
 0x268   : > { %8189 = vmatpush1.bf16.msra.mxu1 %v10299_v22  ;;  %v10385_v22 = vld [vmem:[%s11760_s27 + $0x5f4] ss:$8 sps:$4 sm:$0xff]  }
 0x269   : > { %8613 = vmatpush1.bf16.msra.mxu0 %v10302_v23  ;;  %8190 = vmatprep.subr.bf16.mxu1 %v10307_v10  ;;  %v10388_v23 = vld [vmem:[%s11760_s27 + $0xdf4] ss:$8 sps:$4 sm:$0xff]   ;;  %v10391_v10 = vld [vmem:[%s11760_s27 + $0x604] ss:$8 sps:$4 sm:$0xff]  }
 0x26a   : > { %8614 = vmatprep.subr.bf16.mxu0 %v10310_v13  ;;  %v10394_v13 = vld [vmem:[%s11760_s27 + $0xe04] ss:$8 sps:$4 sm:$0xff]  }
 0x26b   : > { %8176 = vmatmul.mubr.bf16.gmra.mrb[4].mxu1 %v9086_v28  ;;  %v4502_v28 = vld [vmem:[%s11811_s7 + $0x128] sm:$0xff] }
 0x26c   : > { %8600 = vmatmul.mubr.bf16.gmra.mrb[4].mxu0 %v9102_v29  ;;  %8191 = vmatpush1.bf16.msra.mxu1 %v10305_v30  ;;  %v9056_v29 = vcombine.low %v12204_v24, %v12207_v25  ;;  %v9072_v30 = vcombine.low %v12210_v26, %v12213_v27  ;;  %v10395_v26 = vld [vmem:[%s11760_s27 + $0x610] ss:$8 sps:$4 sm:$0xff]  }
 0x26d   : > { %8615 = vmatpush1.bf16.msra.mxu0 %v10308_v31  ;;  %8192 = vmatprep.subr.bf16.mxu1 %v10313_v32  ;;  %v4518_v31 = vld [vmem:[%s11811_s7 + $0x1a8] sm:$0xff]  ;;  %v10398_v27 = vld [vmem:[%s11760_s27 + $0xe10] ss:$8 sps:$4 sm:$0xff]  }
 0x26e   : > { %8616 = vmatprep.subr.bf16.mxu0 %v10316_v33  ;;  %8218 = vmatprep.mubr.bf16.mxu1 %v9057_v34  ;;  %v4510_v32 = vld [vmem:[%s11811_s7 + $0x168] sm:$0xff]  ;;  %v9089_v24 = vcombine.high %v4502_v28, %v4518_v31 }
 0x26f   : > { %8642 = vmatprep.mubr.bf16.mxu0 %v9073_v35  ;;  %v4526_v33 = vld [vmem:[%s11811_s7 + $0x1e8] sm:$0xff] }
 0x270   : > { %8193 = vmatpush1.bf16.msra.mxu1 %v10311_v36  ;;  %v10389_v34 = vld [vmem:[%s11760_s27 + $0x600] ss:$8 sps:$4 sm:$0xff]   ;;  %v10397_v36 = vld [vmem:[%s11760_s27 + $0x614] ss:$8 sps:$4 sm:$0xff]   ;;  %v9105_v25 = vcombine.high %v4510_v32, %v4526_v33 }
 0x271   : > { %8617 = vmatpush1.bf16.msra.mxu0 %v10314_v37  ;;  %8194 = vmatprep.subr.bf16.mxu1 %v10319_v38  ;;  %v10392_v35 = vld [vmem:[%s11760_s27 + $0xe00] ss:$8 sps:$4 sm:$0xff]   ;;  %v10400_v37 = vld [vmem:[%s11760_s27 + $0xe14] ss:$8 sps:$4 sm:$0xff]   ;;  %v10403_v38 = vld [vmem:[%s11760_s27 + $0x624] ss:$8 sps:$4 sm:$0xff]  }
 0x272   : > { %8618 = vmatprep.subr.bf16.mxu0 %v10322_v39  ;;  %v10406_v39 = vld [vmem:[%s11760_s27 + $0xe24] ss:$8 sps:$4 sm:$0xff]  }
 0x274   : > { %8195 = vmatpush1.bf16.msra.mxu1 %v10317_v40  ;;  %v12292_v40 = vld [vmem:[%s11811_s7 + $0x30] sm:$0xff] }
 0x275   : > { %8619 = vmatpush1.bf16.msra.mxu0 %v10320_v41  ;;  %8196 = vmatprep.subr.bf16.mxu1 %v10325_v43  ;;  %v9088_v41 = vcombine.low %v4502_v28, %v4518_v31  ;;  %v9104_v43 = vcombine.low %v4510_v32, %v4526_v33  ;;  %v10461_v28 = vld [vmem:[%s11760_s27 + $0x6c0] ss:$8 sps:$4 sm:$0xff]   ;;  %v10472_v31 = vld [vmem:[%s11760_s27 + $0xed4] ss:$8 sps:$4 sm:$0xff]   ;;  %v10467_v32 = vld [vmem:[%s11760_s27 + $0x6d0] ss:$8 sps:$4 sm:$0xff]  }
 0x276   : > { %8620 = vmatprep.subr.bf16.mxu0 %v10328_v44  ;;  %v12295_v44 = vld [vmem:[%s11811_s7 + $0xb0] sm:$0xff] }
 0x277   : > { %v10470_v33 = vld [vmem:[%s11760_s27 + $0xed0] ss:$8 sps:$4 sm:$0xff]  }
 0x278   : > { %8197 = vmatpush1.bf16.msra.mxu1 %v10323_v48  ;;  %v12298_v48 = vld [vmem:[%s11811_s7 + $0x70] sm:$0xff] }
 0x279   : > { %8621 = vmatpush1.bf16.msra.mxu0 %v10326_v49  ;;  %8198 = vmatprep.subr.bf16.mxu1 %v10331_v50  ;;  %v12301_v49 = vld [vmem:[%s11811_s7 + $0xf0] sm:$0xff]  ;;  %v10401_v50 = vld [vmem:[%s11760_s27 + $0x620] ss:$8 sps:$4 sm:$0xff]  }
 0x27a   : > { %8622 = vmatprep.subr.bf16.mxu0 %v10334_v51  ;;  %v10404_v51 = vld [vmem:[%s11760_s27 + $0xe20] ss:$8 sps:$4 sm:$0xff]  }
 0x27c   : > { %8199 = vmatpush1.bf16.msra.mxu1 %v10329_v52  ;;  %v10409_v52 = vld [vmem:[%s11760_s27 + $0x634] ss:$8 sps:$4 sm:$0xff]  }
 0x27d   : > { %8623 = vmatpush1.bf16.msra.mxu0 %v10332_v53  ;;  %8200 = vmatprep.subr.bf16.mxu1 %v10337_v54  ;;  %v10412_v53 = vld [vmem:[%s11760_s27 + $0xe34] ss:$8 sps:$4 sm:$0xff]   ;;  %v9059_v54 = vcombine.high %v12292_v40, %v12295_v44 }
 0x27e   : > { %8624 = vmatprep.subr.bf16.mxu0 %v10340_v55  ;;  %v9075_v55 = vcombine.high %v12298_v48, %v12301_v49 }
 0x280   : > { %8201 = vmatpush1.bf16.msra.mxu1 %v10335_v42  ;;  %v10407_v42 = vld [vmem:[%s11760_s27 + $0x630] ss:$8 sps:$4 sm:$0xff]  }
 0x281   : > { %8625 = vmatpush1.bf16.msra.mxu0 %v10338_v45  ;;  %8202 = vmatprep.subr.bf16.mxu1 %v10343_v46  ;;  %v10410_v45 = vld [vmem:[%s11760_s27 + $0xe30] ss:$8 sps:$4 sm:$0xff]   ;;  %v10415_v46 = vld [vmem:[%s11760_s27 + $0x644] ss:$8 sps:$4 sm:$0xff]  }
 0x282   : > { %8626 = vmatprep.subr.bf16.mxu0 %v10346_v47  ;;  %v10418_v47 = vld [vmem:[%s11760_s27 + $0xe44] ss:$8 sps:$4 sm:$0xff]  }
 0x284   : > { %8203 = vmatpush1.bf16.msra.mxu1 %v10341_v56  ;;  %v10413_v56 = vld [vmem:[%s11760_s27 + $0x640] ss:$8 sps:$4 sm:$0xff]  }
 0x285   : > { %8627 = vmatpush1.bf16.msra.mxu0 %v10344_v57  ;;  %8204 = vmatprep.subr.bf16.mxu1 %v10349_v60  ;;  %v10416_v57 = vld [vmem:[%s11760_s27 + $0xe40] ss:$8 sps:$4 sm:$0xff]   ;;  %v10421_v60 = vld [vmem:[%s11760_s27 + $0x654] ss:$8 sps:$4 sm:$0xff]  }
 0x286   : > { %8628 = vmatprep.subr.bf16.mxu0 %v10352_v61  ;;  %v10424_v61 = vld [vmem:[%s11760_s27 + $0xe54] ss:$8 sps:$4 sm:$0xff]  }
 0x288   : > { %8205 = vmatpush1.bf16.msra.mxu1 %v10347_v0  ;;  %v10419_v0 = vld [vmem:[%s11760_s27 + $0x650] ss:$8 sps:$4 sm:$0xff]  }
 0x289   : > { %8629 = vmatpush1.bf16.msra.mxu0 %v10350_v1  ;;  %8206 = vmatprep.subr.bf16.mxu1 %v10355_v2  ;;  %v10422_v1 = vld [vmem:[%s11760_s27 + $0xe50] ss:$8 sps:$4 sm:$0xff]   ;;  %v10427_v2 = vld [vmem:[%s11760_s27 + $0x664] ss:$8 sps:$4 sm:$0xff]  }
 0x28a   : > { %8630 = vmatprep.subr.bf16.mxu0 %v10358_v3  ;;  %v10430_v3 = vld [vmem:[%s11760_s27 + $0xe64] ss:$8 sps:$4 sm:$0xff]  }
 0x28c   : > { %8207 = vmatpush1.bf16.msra.mxu1 %v10353_v4  ;;  %v10425_v4 = vld [vmem:[%s11760_s27 + $0x660] ss:$8 sps:$4 sm:$0xff]  }
 0x28d   : > { %8631 = vmatpush1.bf16.msra.mxu0 %v10356_v5  ;;  %8208 = vmatprep.subr.bf16.mxu1 %v10361_v6  ;;  %v10428_v5 = vld [vmem:[%s11760_s27 + $0xe60] ss:$8 sps:$4 sm:$0xff]   ;;  %v10433_v6 = vld [vmem:[%s11760_s27 + $0x674] ss:$8 sps:$4 sm:$0xff]  }
 0x28e   : > { %8632 = vmatprep.subr.bf16.mxu0 %v10364_v7  ;;  %v10436_v7 = vld [vmem:[%s11760_s27 + $0xe74] ss:$8 sps:$4 sm:$0xff]  }
 0x290   : > { %8209 = vmatpush1.bf16.msra.mxu1 %v10359_v58  ;;  %v10431_v58 = vld [vmem:[%s11760_s27 + $0x670] ss:$8 sps:$4 sm:$0xff]  }
 0x291   : > { %8633 = vmatpush1.bf16.msra.mxu0 %v10362_v59  ;;  %8210 = vmatprep.subr.bf16.mxu1 %v10367_v62  ;;  %v10434_v59 = vld [vmem:[%s11760_s27 + $0xe70] ss:$8 sps:$4 sm:$0xff]   ;;  %v10439_v62 = vld [vmem:[%s11760_s27 + $0x684] ss:$8 sps:$4 sm:$0xff]  }
 0x292   : > { %8634 = vmatprep.subr.bf16.mxu0 %v10370_v63  ;;  %v10442_v63 = vld [vmem:[%s11760_s27 + $0xe84] ss:$8 sps:$4 sm:$0xff]  }
 0x294   : > { %8211 = vmatpush1.bf16.msra.mxu1 %v10365_v11  ;;  %v10437_v11 = vld [vmem:[%s11760_s27 + $0x680] ss:$8 sps:$4 sm:$0xff]  }
 0x295   : > { %8635 = vmatpush1.bf16.msra.mxu0 %v10368_v12  ;;  %8212 = vmatprep.subr.bf16.mxu1 %v10373_v14  ;;  %v10440_v12 = vld [vmem:[%s11760_s27 + $0xe80] ss:$8 sps:$4 sm:$0xff]   ;;  %v10445_v14 = vld [vmem:[%s11760_s27 + $0x694] ss:$8 sps:$4 sm:$0xff]  }
 0x296   : > { %8636 = vmatprep.subr.bf16.mxu0 %v10376_v15  ;;  %v10448_v15 = vld [vmem:[%s11760_s27 + $0xe94] ss:$8 sps:$4 sm:$0xff]  }
 0x298   : > { %8213 = vmatpush1.bf16.msra.mxu1 %v10371_v16  ;;  %v10443_v16 = vld [vmem:[%s11760_s27 + $0x690] ss:$8 sps:$4 sm:$0xff]  }
 0x299   : > { %8637 = vmatpush1.bf16.msra.mxu0 %v10374_v17  ;;  %8214 = vmatprep.subr.bf16.mxu1 %v10379_v18  ;;  %v10446_v17 = vld [vmem:[%s11760_s27 + $0xe90] ss:$8 sps:$4 sm:$0xff]   ;;  %v10451_v18 = vld [vmem:[%s11760_s27 + $0x6a4] ss:$8 sps:$4 sm:$0xff]  }
 0x29a   : > { %8638 = vmatprep.subr.bf16.mxu0 %v10382_v19  ;;  %v10454_v19 = vld [vmem:[%s11760_s27 + $0xea4] ss:$8 sps:$4 sm:$0xff]  }
 0x29c   : > { %8215 = vmatpush1.bf16.msra.mxu1 %v10377_v20  ;;  %v10449_v20 = vld [vmem:[%s11760_s27 + $0x6a0] ss:$8 sps:$4 sm:$0xff]  }
 0x29d   : > { %8639 = vmatpush1.bf16.msra.mxu0 %v10380_v21  ;;  %8216 = vmatprep.subr.bf16.mxu1 %v10385_v22  ;;  %v10452_v21 = vld [vmem:[%s11760_s27 + $0xea0] ss:$8 sps:$4 sm:$0xff]   ;;  %v10457_v22 = vld [vmem:[%s11760_s27 + $0x6b4] ss:$8 sps:$4 sm:$0xff]  }
 0x29e   : > { %8640 = vmatprep.subr.bf16.mxu0 %v10388_v23  ;;  %v10460_v23 = vld [vmem:[%s11760_s27 + $0xeb4] ss:$8 sps:$4 sm:$0xff]  }
 0x2a0   : > { %8217 = vmatpush1.bf16.msra.mxu1 %v10383_v8  ;;  %v10455_v8 = vld [vmem:[%s11760_s27 + $0x6b0] ss:$8 sps:$4 sm:$0xff]  }
 0x2a1   : > { %8641 = vmatpush1.bf16.msra.mxu0 %v10386_v9  ;;  %8239 = vmatprep.subr.bf16.mxu1 %v10391_v10  ;;  %v10458_v9 = vld [vmem:[%s11760_s27 + $0xeb0] ss:$8 sps:$4 sm:$0xff]   ;;  %v10463_v10 = vld [vmem:[%s11760_s27 + $0x6c4] ss:$8 sps:$4 sm:$0xff]  }
 0x2a2   : > { %8663 = vmatprep.subr.bf16.mxu0 %v10394_v13  ;;  %v10466_v13 = vld [vmem:[%s11760_s27 + $0xec4] ss:$8 sps:$4 sm:$0xff]  }
 0x2a3   : > { %8219 = vmatmul.mubr.bf16.vlgmr.msra.gmra.mrb[0].mxu1 %v9056_v29  ;;  %v10464_v29 = vld [vmem:[%s11760_s27 + $0xec0] ss:$8 sps:$4 sm:$0xff]  }
 0x2a4   : > { %8643 = vmatmul.mubr.bf16.vlgmr.msra.gmra.mrb[0].mxu0 %v9072_v30  ;;  %8240 = vmatpush1.bf16.msra.mxu1 %v10389_v34  ;;  %v10469_v30 = vld [vmem:[%s11760_s27 + $0x6d4] ss:$8 sps:$4 sm:$0xff]   ;;  %v10475_v34 = vld [vmem:[%s11760_s27 + $0x6e4] ss:$8 sps:$4 sm:$0xff]  }
 0x2a5   : > { %8664 = vmatpush1.bf16.msra.mxu0 %v10392_v35  ;;  %8241 = vmatprep.subr.bf16.mxu1 %v10397_v36  ;;  %v10478_v35 = vld [vmem:[%s11760_s27 + $0xee4] ss:$8 sps:$4 sm:$0xff]   ;;  %v10473_v36 = vld [vmem:[%s11760_s27 + $0x6e0] ss:$8 sps:$4 sm:$0xff]  }
 0x2a6   : > { %8665 = vmatprep.subr.bf16.mxu0 %v10400_v37  ;;  %8228 = vmatprep.mubr.bf16.mxu1 %v9089_v24  ;;  %v10476_v37 = vld [vmem:[%s11760_s27 + $0xee0] ss:$8 sps:$4 sm:$0xff]   ;;  %v10481_v24 = vld [vmem:[%s11760_s27 + $0x6f4] ss:$8 sps:$4 sm:$0xff]  }
 0x2a7   : > { %8652 = vmatprep.mubr.bf16.mxu0 %v9105_v25  ;;  %v10484_v25 = vld [vmem:[%s11760_s27 + $0xef4] ss:$8 sps:$4 sm:$0xff]  }
 0x2a8   : > { %8242 = vmatpush1.bf16.msra.mxu1 %v10395_v26  ;;  %v10479_v26 = vld [vmem:[%s11760_s27 + $0x6f0] ss:$8 sps:$4 sm:$0xff]  }
 0x2a9   : > { %8666 = vmatpush1.bf16.msra.mxu0 %v10398_v27  ;;  %8243 = vmatprep.subr.bf16.mxu1 %v10403_v38  ;;  %v10482_v27 = vld [vmem:[%s11760_s27 + $0xef0] ss:$8 sps:$4 sm:$0xff]   ;;  %v10487_v38 = vld [vmem:[%s11760_s27 + $0x704] ss:$8 sps:$4 sm:$0xff]  }
 0x2aa   : > { %8667 = vmatprep.subr.bf16.mxu0 %v10406_v39  ;;  %v10490_v39 = vld [vmem:[%s11760_s27 + $0xf04] ss:$8 sps:$4 sm:$0xff]  }
 0x2ab   : > { %8229 = vmatmul.mubr.bf16.gmra.mrb[4].mxu1 %v9088_v41  ;;  %v4503_v41 = vld [vmem:[%s11811_s7 + $0x130] sm:$0xff] }
 0x2ac   : > { %8653 = vmatmul.mubr.bf16.gmra.mrb[4].mxu0 %v9104_v43  ;;  %8244 = vmatpush1.bf16.msra.mxu1 %v10401_v50  ;;  %v9058_v43 = vcombine.low %v12292_v40, %v12295_v44  ;;  %v9074_v50 = vcombine.low %v12298_v48, %v12301_v49  ;;  %v10491_v48 = vld [vmem:[%s11760_s27 + $0x710] ss:$8 sps:$4 sm:$0xff]  }
 0x2ad   : > { %8668 = vmatpush1.bf16.msra.mxu0 %v10404_v51  ;;  %8245 = vmatprep.subr.bf16.mxu1 %v10409_v52  ;;  %v4519_v51 = vld [vmem:[%s11811_s7 + $0x1b0] sm:$0xff] }
 0x2ae   : > { %8669 = vmatprep.subr.bf16.mxu0 %v10412_v53  ;;  %8271 = vmatprep.mubr.bf16.mxu1 %v9059_v54  ;;  %v4511_v52 = vld [vmem:[%s11811_s7 + $0x170] sm:$0xff]  ;;  %v10485_v54 = vld [vmem:[%s11760_s27 + $0x700] ss:$8 sps:$4 sm:$0xff]   ;;  %v9091_v40 = vcombine.high %v4503_v41, %v4519_v51 }
 0x2af   : > { %8695 = vmatprep.mubr.bf16.mxu0 %v9075_v55  ;;  %v4527_v53 = vld [vmem:[%s11811_s7 + $0x1f0] sm:$0xff]  ;;  %v10488_v55 = vld [vmem:[%s11760_s27 + $0xf00] ss:$8 sps:$4 sm:$0xff]  }
 0x2b0   : > { %8246 = vmatpush1.bf16.msra.mxu1 %v10407_v42  ;;  %v10493_v42 = vld [vmem:[%s11760_s27 + $0x714] ss:$8 sps:$4 sm:$0xff]   ;;  %v9107_v44 = vcombine.high %v4511_v52, %v4527_v53  ;;  %v10494_v49 = vld [vmem:[%s11760_s27 + $0xf10] ss:$8 sps:$4 sm:$0xff]  }
 0x2b1   : > { %8670 = vmatpush1.bf16.msra.mxu0 %v10410_v45  ;;  %8247 = vmatprep.subr.bf16.mxu1 %v10415_v46  ;;  %v10496_v45 = vld [vmem:[%s11760_s27 + $0xf14] ss:$8 sps:$4 sm:$0xff]   ;;  %v10499_v46 = vld [vmem:[%s11760_s27 + $0x724] ss:$8 sps:$4 sm:$0xff]  }
 0x2b2   : > { %8671 = vmatprep.subr.bf16.mxu0 %v10418_v47  ;;  %v10502_v47 = vld [vmem:[%s11760_s27 + $0xf24] ss:$8 sps:$4 sm:$0xff]  }
 0x2b4   : > { %8248 = vmatpush1.bf16.msra.mxu1 %v10413_v56  ;;  %v12380_v56 = vld [vmem:[%s11811_s7 + $0x38] sm:$0xff] }
 0x2b5   : > { %8672 = vmatpush1.bf16.msra.mxu0 %v10416_v57  ;;  %8249 = vmatprep.subr.bf16.mxu1 %v10421_v60  ;;  %v9090_v57 = vcombine.low %v4503_v41, %v4519_v51  ;;  %v9106_v60 = vcombine.low %v4511_v52, %v4527_v53  ;;  %v10557_v41 = vld [vmem:[%s11760_s27 + $0x7c0] ss:$8 sps:$4 sm:$0xff]   ;;  %v10568_v51 = vld [vmem:[%s11760_s27 + $0xfd4] ss:$8 sps:$4 sm:$0xff]   ;;  %v10563_v52 = vld [vmem:[%s11760_s27 + $0x7d0] ss:$8 sps:$4 sm:$0xff]  }
 0x2b6   : > { %8673 = vmatprep.subr.bf16.mxu0 %v10424_v61  ;;  %v12383_v61 = vld [vmem:[%s11811_s7 + $0xb8] sm:$0xff] }
 0x2b7   : > { %v10566_v53 = vld [vmem:[%s11760_s27 + $0xfd0] ss:$8 sps:$4 sm:$0xff]  }
 0x2b8   : > { %8250 = vmatpush1.bf16.msra.mxu1 %v10419_v0  ;;  %v12386_v0 = vld [vmem:[%s11811_s7 + $0x78] sm:$0xff] }
 0x2b9   : > { %8674 = vmatpush1.bf16.msra.mxu0 %v10422_v1  ;;  %8251 = vmatprep.subr.bf16.mxu1 %v10427_v2  ;;  %v12389_v1 = vld [vmem:[%s11811_s7 + $0xf8] sm:$0xff]  ;;  %v10497_v2 = vld [vmem:[%s11760_s27 + $0x720] ss:$8 sps:$4 sm:$0xff]  }
 0x2ba   : > { %8675 = vmatprep.subr.bf16.mxu0 %v10430_v3  ;;  %v10500_v3 = vld [vmem:[%s11760_s27 + $0xf20] ss:$8 sps:$4 sm:$0xff]  }
 0x2bc   : > { %8252 = vmatpush1.bf16.msra.mxu1 %v10425_v4  ;;  %v10505_v4 = vld [vmem:[%s11760_s27 + $0x734] ss:$8 sps:$4 sm:$0xff]  }
 0x2bd   : > { %8676 = vmatpush1.bf16.msra.mxu0 %v10428_v5  ;;  %8253 = vmatprep.subr.bf16.mxu1 %v10433_v6  ;;  %v10508_v5 = vld [vmem:[%s11760_s27 + $0xf34] ss:$8 sps:$4 sm:$0xff]   ;;  %v9061_v6 = vcombine.high %v12380_v56, %v12383_v61 }
 0x2be   : > { %8677 = vmatprep.subr.bf16.mxu0 %v10436_v7  ;;  %v9077_v7 = vcombine.high %v12386_v0, %v12389_v1 }
 0x2c0   : > { %8254 = vmatpush1.bf16.msra.mxu1 %v10431_v58  ;;  %v10503_v58 = vld [vmem:[%s11760_s27 + $0x730] ss:$8 sps:$4 sm:$0xff]  }
 0x2c1   : > { %8678 = vmatpush1.bf16.msra.mxu0 %v10434_v59  ;;  %8255 = vmatprep.subr.bf16.mxu1 %v10439_v62  ;;  %v10506_v59 = vld [vmem:[%s11760_s27 + $0xf30] ss:$8 sps:$4 sm:$0xff]   ;;  %v10511_v62 = vld [vmem:[%s11760_s27 + $0x744] ss:$8 sps:$4 sm:$0xff]  }
 0x2c2   : > { %8679 = vmatprep.subr.bf16.mxu0 %v10442_v63  ;;  %v10514_v63 = vld [vmem:[%s11760_s27 + $0xf44] ss:$8 sps:$4 sm:$0xff]  }
 0x2c4   : > { %8256 = vmatpush1.bf16.msra.mxu1 %v10437_v11  ;;  %v10509_v11 = vld [vmem:[%s11760_s27 + $0x740] ss:$8 sps:$4 sm:$0xff]  }
 0x2c5   : > { %8680 = vmatpush1.bf16.msra.mxu0 %v10440_v12  ;;  %8257 = vmatprep.subr.bf16.mxu1 %v10445_v14  ;;  %v10512_v12 = vld [vmem:[%s11760_s27 + $0xf40] ss:$8 sps:$4 sm:$0xff]   ;;  %v10517_v14 = vld [vmem:[%s11760_s27 + $0x754] ss:$8 sps:$4 sm:$0xff]  }
 0x2c6   : > { %8681 = vmatprep.subr.bf16.mxu0 %v10448_v15  ;;  %v10520_v15 = vld [vmem:[%s11760_s27 + $0xf54] ss:$8 sps:$4 sm:$0xff]  }
 0x2c8   : > { %8258 = vmatpush1.bf16.msra.mxu1 %v10443_v16  ;;  %v10515_v16 = vld [vmem:[%s11760_s27 + $0x750] ss:$8 sps:$4 sm:$0xff]  }
 0x2c9   : > { %8682 = vmatpush1.bf16.msra.mxu0 %v10446_v17  ;;  %8259 = vmatprep.subr.bf16.mxu1 %v10451_v18  ;;  %v10518_v17 = vld [vmem:[%s11760_s27 + $0xf50] ss:$8 sps:$4 sm:$0xff]   ;;  %v10523_v18 = vld [vmem:[%s11760_s27 + $0x764] ss:$8 sps:$4 sm:$0xff]  }
 0x2ca   : > { %8683 = vmatprep.subr.bf16.mxu0 %v10454_v19  ;;  %v10526_v19 = vld [vmem:[%s11760_s27 + $0xf64] ss:$8 sps:$4 sm:$0xff]  }
 0x2cc   : > { %8260 = vmatpush1.bf16.msra.mxu1 %v10449_v20  ;;  %v10521_v20 = vld [vmem:[%s11760_s27 + $0x760] ss:$8 sps:$4 sm:$0xff]  }
 0x2cd   : > { %8684 = vmatpush1.bf16.msra.mxu0 %v10452_v21  ;;  %8261 = vmatprep.subr.bf16.mxu1 %v10457_v22  ;;  %v10524_v21 = vld [vmem:[%s11760_s27 + $0xf60] ss:$8 sps:$4 sm:$0xff]   ;;  %v10529_v22 = vld [vmem:[%s11760_s27 + $0x774] ss:$8 sps:$4 sm:$0xff]  }
 0x2ce   : > { %8685 = vmatprep.subr.bf16.mxu0 %v10460_v23  ;;  %v10532_v23 = vld [vmem:[%s11760_s27 + $0xf74] ss:$8 sps:$4 sm:$0xff]  }
 0x2d0   : > { %8262 = vmatpush1.bf16.msra.mxu1 %v10455_v8  ;;  %v10527_v8 = vld [vmem:[%s11760_s27 + $0x770] ss:$8 sps:$4 sm:$0xff]  }
 0x2d1   : > { %8686 = vmatpush1.bf16.msra.mxu0 %v10458_v9  ;;  %8263 = vmatprep.subr.bf16.mxu1 %v10463_v10  ;;  %v10530_v9 = vld [vmem:[%s11760_s27 + $0xf70] ss:$8 sps:$4 sm:$0xff]   ;;  %v10535_v10 = vld [vmem:[%s11760_s27 + $0x784] ss:$8 sps:$4 sm:$0xff]  }
 0x2d2   : > { %8687 = vmatprep.subr.bf16.mxu0 %v10466_v13  ;;  %v10538_v13 = vld [vmem:[%s11760_s27 + $0xf84] ss:$8 sps:$4 sm:$0xff]  }
 0x2d4   : > { %8264 = vmatpush1.bf16.msra.mxu1 %v10461_v28  ;;  %v10533_v28 = vld [vmem:[%s11760_s27 + $0x780] ss:$8 sps:$4 sm:$0xff]  }
 0x2d5   : > { %8688 = vmatpush1.bf16.msra.mxu0 %v10464_v29  ;;  %8265 = vmatprep.subr.bf16.mxu1 %v10469_v30  ;;  %v10536_v29 = vld [vmem:[%s11760_s27 + $0xf80] ss:$8 sps:$4 sm:$0xff]   ;;  %v10541_v30 = vld [vmem:[%s11760_s27 + $0x794] ss:$8 sps:$4 sm:$0xff]  }
 0x2d6   : > { %8689 = vmatprep.subr.bf16.mxu0 %v10472_v31  ;;  %v10544_v31 = vld [vmem:[%s11760_s27 + $0xf94] ss:$8 sps:$4 sm:$0xff]  }
 0x2d8   : > { %8266 = vmatpush1.bf16.msra.mxu1 %v10467_v32  ;;  %v10539_v32 = vld [vmem:[%s11760_s27 + $0x790] ss:$8 sps:$4 sm:$0xff]  }
 0x2d9   : > { %8690 = vmatpush1.bf16.msra.mxu0 %v10470_v33  ;;  %8267 = vmatprep.subr.bf16.mxu1 %v10475_v34  ;;  %v10542_v33 = vld [vmem:[%s11760_s27 + $0xf90] ss:$8 sps:$4 sm:$0xff]   ;;  %v10547_v34 = vld [vmem:[%s11760_s27 + $0x7a4] ss:$8 sps:$4 sm:$0xff]  }
 0x2da   : > { %8691 = vmatprep.subr.bf16.mxu0 %v10478_v35  ;;  %v10550_v35 = vld [vmem:[%s11760_s27 + $0xfa4] ss:$8 sps:$4 sm:$0xff]  }
 0x2dc   : > { %8268 = vmatpush1.bf16.msra.mxu1 %v10473_v36  ;;  %v10545_v36 = vld [vmem:[%s11760_s27 + $0x7a0] ss:$8 sps:$4 sm:$0xff]  }
 0x2dd   : > { %8692 = vmatpush1.bf16.msra.mxu0 %v10476_v37  ;;  %8269 = vmatprep.subr.bf16.mxu1 %v10481_v24  ;;  %v10548_v37 = vld [vmem:[%s11760_s27 + $0xfa0] ss:$8 sps:$4 sm:$0xff]   ;;  %v10553_v24 = vld [vmem:[%s11760_s27 + $0x7b4] ss:$8 sps:$4 sm:$0xff]  }
 0x2de   : > { %8693 = vmatprep.subr.bf16.mxu0 %v10484_v25  ;;  %v10556_v25 = vld [vmem:[%s11760_s27 + $0xfb4] ss:$8 sps:$4 sm:$0xff]  }
 0x2e0   : > { %8270 = vmatpush1.bf16.msra.mxu1 %v10479_v26  ;;  %v10551_v26 = vld [vmem:[%s11760_s27 + $0x7b0] ss:$8 sps:$4 sm:$0xff]  }
 0x2e1   : > { %8694 = vmatpush1.bf16.msra.mxu0 %v10482_v27  ;;  %8292 = vmatprep.subr.bf16.mxu1 %v10487_v38  ;;  %v10554_v27 = vld [vmem:[%s11760_s27 + $0xfb0] ss:$8 sps:$4 sm:$0xff]   ;;  %v10559_v38 = vld [vmem:[%s11760_s27 + $0x7c4] ss:$8 sps:$4 sm:$0xff]  }
 0x2e2   : > { %8716 = vmatprep.subr.bf16.mxu0 %v10490_v39  ;;  %v10562_v39 = vld [vmem:[%s11760_s27 + $0xfc4] ss:$8 sps:$4 sm:$0xff]  }
 0x2e3   : > { %8272 = vmatmul.mubr.bf16.vlgmr.msra.gmra.mrb[0].mxu1 %v9058_v43  ;;  %v10560_v43 = vld [vmem:[%s11760_s27 + $0xfc0] ss:$8 sps:$4 sm:$0xff]  }
 0x2e4   : > { %8696 = vmatmul.mubr.bf16.vlgmr.msra.gmra.mrb[0].mxu0 %v9074_v50  ;;  %8293 = vmatpush1.bf16.msra.mxu1 %v10485_v54  ;;  %v10565_v50 = vld [vmem:[%s11760_s27 + $0x7d4] ss:$8 sps:$4 sm:$0xff]   ;;  %v10571_v54 = vld [vmem:[%s11760_s27 + $0x7e4] ss:$8 sps:$4 sm:$0xff]  }
 0x2e5   : > { %8717 = vmatpush1.bf16.msra.mxu0 %v10488_v55  ;;  %8294 = vmatprep.subr.bf16.mxu1 %v10493_v42  ;;  %v10574_v55 = vld [vmem:[%s11760_s27 + $0xfe4] ss:$8 sps:$4 sm:$0xff]   ;;  %v10569_v42 = vld [vmem:[%s11760_s27 + $0x7e0] ss:$8 sps:$4 sm:$0xff]  }
 0x2e6   : > { %8718 = vmatprep.subr.bf16.mxu0 %v10496_v45  ;;  %8281 = vmatprep.mubr.bf16.mxu1 %v9091_v40  ;;  %v10572_v45 = vld [vmem:[%s11760_s27 + $0xfe0] ss:$8 sps:$4 sm:$0xff]   ;;  %v10577_v40 = vld [vmem:[%s11760_s27 + $0x7f4] ss:$8 sps:$4 sm:$0xff]  }
 0x2e7   : > { %8705 = vmatprep.mubr.bf16.mxu0 %v9107_v44  ;;  %v10580_v44 = vld [vmem:[%s11760_s27 + $0xff4] ss:$8 sps:$4 sm:$0xff]  }
 0x2e8   : > { %8295 = vmatpush1.bf16.msra.mxu1 %v10491_v48  ;;  %v10575_v48 = vld [vmem:[%s11760_s27 + $0x7f0] ss:$8 sps:$4 sm:$0xff]  }
 0x2e9   : > { %8719 = vmatpush1.bf16.msra.mxu0 %v10494_v49  ;;  %8296 = vmatprep.subr.bf16.mxu1 %v10499_v46  ;;  %v10578_v49 = vld [vmem:[%s11760_s27 + $0xff0] ss:$8 sps:$4 sm:$0xff]   ;;  %s8857_s27 = sadd.s32 (%p10710_p6), %s9628_s24, %s12458_s8 }
 0x2ea   : > { %8720 = vmatprep.subr.bf16.mxu0 %v10502_v47  ;;  %v4504_v46 = vld [vmem:[%s11811_s7 + $0x138] sm:$0xff]  ;;  %s9629_s28 = sshll.u32 (%p10710_p6), %s8857_s27, 2 }
 0x2eb   : > { %8282 = vmatmul.mubr.bf16.gmra.mrb[4].mxu1 %v9090_v57  ;;  %v4520_v47 = vld [vmem:[%s11811_s7 + $0x1b8] sm:$0xff]  ;;  %s8859_s6 = scalar_lea.vmem (%p10710_p6), %s12502_s4, %s9629_s28 }
 0x2ec   : > { %8706 = vmatmul.mubr.bf16.gmra.mrb[4].mxu0 %v9106_v60  ;;  %8297 = vmatpush1.bf16.msra.mxu1 %v10497_v2  ;;  %v4512_v57 = vld [vmem:[%s11811_s7 + $0x178] sm:$0xff]  ;;  %v9060_v2 = vcombine.low %v12380_v56, %v12383_v61  ;;  %v8771_v56 = vlaneseq }
 0x2ed   : > { %8721 = vmatpush1.bf16.msra.mxu0 %v10500_v3  ;;  %8298 = vmatprep.subr.bf16.mxu1 %v10505_v4  ;;  %v4528_v60 = vld [vmem:[%s11811_s7 + $0x1f8] sm:$0xff]  ;;  %v9076_v3 = vcombine.low %v12386_v0, %v12389_v1  ;;  %v9093_v4 = vcombine.high %v4504_v46, %v4520_v47  ;;  %v8769_v1 = vld [vmem:[%s4456_s12] sm:$0x3] }
 0x2ee   : > { %8722 = vmatprep.subr.bf16.mxu0 %v10508_v5  ;;  %8324 = vmatprep.mubr.bf16.mxu1 %v9061_v6  ;;  %v9109_v5 = vcombine.high %v4512_v57, %v4528_v60  ;;  %v9092_v6 = vcombine.low %v4504_v46, %v4520_v47  ;;  %v8772_v61 = vshrl.u32 %v8771_v56, 7 }
 0x2ef   : > { %8748 = vmatprep.mubr.bf16.mxu0 %v9077_v7  ;;  %v9108_v7 = vcombine.low %v4512_v57, %v4528_v60 }
 0x2f0   : > { %8299 = vmatpush1.bf16.msra.mxu1 %v10503_v58  ;;  %v8773_v0 = vsub.s32 0, %v8772_v61  ;;  %v8777_v58 = vsub.s32 1, %v8772_v61 }
 0x2f1   : > { %8723 = vmatpush1.bf16.msra.mxu0 %v10506_v59  ;;  %8300 = vmatprep.subr.bf16.mxu1 %v10511_v62  ;;  %v8789_v59 = vld [vmem:[%s4461_s25] sm:$0x3] }
 0x2f2   : > { %8724 = vmatprep.subr.bf16.mxu0 %v10514_v63  ;;  %v8774_v62 = vrot.slane %v8769_v1, %v8773_v0 }
 0x2f4   : > { %8301 = vmatpush1.bf16.msra.mxu1 %v10509_v11 }
 0x2f5   : > { %8725 = vmatpush1.bf16.msra.mxu0 %v10512_v12  ;;  %8302 = vmatprep.subr.bf16.mxu1 %v10517_v14  ;;  %v8778_v12 = vrot.slane %v8769_v1, %v8777_v58 }
 0x2f6   : > { %8726 = vmatprep.subr.bf16.mxu0 %v10520_v15  ;;  %v8794_v15 = vrot.slane %v8789_v59, %v8773_v0 }
 0x2f8   : > { %8303 = vmatpush1.bf16.msra.mxu1 %v10515_v16 }
 0x2f9   : > { %8727 = vmatpush1.bf16.msra.mxu0 %v10518_v17  ;;  %8304 = vmatprep.subr.bf16.mxu1 %v10523_v18 }
 0x2fa   : > { %8728 = vmatprep.subr.bf16.mxu0 %v10526_v19  ;;  %v8798_v19 = vrot.slane %v8789_v59, %v8777_v58 }
 0x2fc   : > { %8305 = vmatpush1.bf16.msra.mxu1 %v10521_v20 }
 0x2fd   : > { %8729 = vmatpush1.bf16.msra.mxu0 %v10524_v21  ;;  %8306 = vmatprep.subr.bf16.mxu1 %v10529_v22 }
 0x2fe   : > { %8730 = vmatprep.subr.bf16.mxu0 %v10532_v23 }
 0x300   : > { %8307 = vmatpush1.bf16.msra.mxu1 %v10527_v8 }
 0x301   : > { %8731 = vmatpush1.bf16.msra.mxu0 %v10530_v9  ;;  %8308 = vmatprep.subr.bf16.mxu1 %v10535_v10 }
 0x302   : > { %8732 = vmatprep.subr.bf16.mxu0 %v10538_v13 }
 0x304   : > { %8309 = vmatpush1.bf16.msra.mxu1 %v10533_v28 }
 0x305   : > { %8733 = vmatpush1.bf16.msra.mxu0 %v10536_v29  ;;  %8310 = vmatprep.subr.bf16.mxu1 %v10541_v30 }
 0x306   : > { %8734 = vmatprep.subr.bf16.mxu0 %v10544_v31 }
 0x308   : > { %8311 = vmatpush1.bf16.msra.mxu1 %v10539_v32 }
 0x309   : > { %8735 = vmatpush1.bf16.msra.mxu0 %v10542_v33  ;;  %8312 = vmatprep.subr.bf16.mxu1 %v10547_v34 }
 0x30a   : > { %8736 = vmatprep.subr.bf16.mxu0 %v10550_v35 }
 0x30c   : > { %8313 = vmatpush1.bf16.msra.mxu1 %v10545_v36 }
 0x30d   : > { %8737 = vmatpush1.bf16.msra.mxu0 %v10548_v37  ;;  %8314 = vmatprep.subr.bf16.mxu1 %v10553_v24 }
 0x30e   : > { %8738 = vmatprep.subr.bf16.mxu0 %v10556_v25 }
 0x310   : > { %8315 = vmatpush1.bf16.msra.mxu1 %v10551_v26 }
 0x311   : > { %8739 = vmatpush1.bf16.msra.mxu0 %v10554_v27  ;;  %8316 = vmatprep.subr.bf16.mxu1 %v10559_v38 }
 0x312   : > { %8740 = vmatprep.subr.bf16.mxu0 %v10562_v39 }
 0x314   : > { %8317 = vmatpush1.bf16.msra.mxu1 %v10557_v41 }
 0x315   : > { %8741 = vmatpush1.bf16.msra.mxu0 %v10560_v43  ;;  %8318 = vmatprep.subr.bf16.mxu1 %v10565_v50 }
 0x316   : > { %8742 = vmatprep.subr.bf16.mxu0 %v10568_v51 }
 0x318   : > { %8319 = vmatpush1.bf16.msra.mxu1 %v10563_v52 }
 0x319   : > { %8743 = vmatpush1.bf16.msra.mxu0 %v10566_v53  ;;  %8320 = vmatprep.subr.bf16.mxu1 %v10571_v54 }
 0x31a   : > { %8744 = vmatprep.subr.bf16.mxu0 %v10574_v55 }
 0x31c   : > { %8321 = vmatpush1.bf16.msra.mxu1 %v10569_v42 }
 0x31d   : > { %8745 = vmatpush1.bf16.msra.mxu0 %v10572_v45  ;;  %8322 = vmatprep.subr.bf16.mxu1 %v10577_v40 }
 0x31e   : > { %8746 = vmatprep.subr.bf16.mxu0 %v10580_v44 }
 0x320   : > { %8323 = vmatpush1.bf16.msra.mxu1 %v10575_v48 }
 0x321   : > { %8747 = vmatpush1.bf16.msra.mxu0 %v10578_v49 }
 0x323   : > { %8325 = vmatmul.mubr.bf16.vlgmr.msra.gmra.mrb[0].mxu1 %v9060_v2 }
 0x324   : > { %8749 = vmatmul.mubr.bf16.vlgmr.msra.gmra.mrb[0].mxu0 %v9076_v3  ;;  %8334 = vmatprep.mubr.bf16.mxu1 %v9093_v4 }
 0x325   : > { %8758 = vmatprep.mubr.bf16.mxu0 %v9109_v5 }
 0x32b   : > { %8335 = vmatmul.mubr.bf16.gmra.mrb[4].mxu1 %v9092_v6 }
 0x32c   : > { %8759 = vmatmul.mubr.bf16.gmra.mrb[4].mxu0 %v9108_v7 }
 0x3f6   : > { %v8326_v63 = vpop.f32.mrb[0].mxu1 }
 0x3f7   : > { %v8750_v11 = vpop.f32.mrb[0].mxu0  ;;  %v8328_v16 = vpop.f32.mrb[1].mxu1 }
 0x3f8   : > { %v9637_v14 = vadd.f32 %v8750_v11, %v8326_v63  ;;  %v8752_v17 = vpop.f32.mrb[1].mxu0  ;;  %v8330_v20 = vpop.f32.mrb[2].mxu1 }
 0x3f9   : > { %v9638_v18 = vadd.f32 %v8752_v17, %v8328_v16  ;;  %v8754_v21 = vpop.f32.mrb[2].mxu0  ;;  %v8332_v8 = vpop.f32.mrb[3].mxu1 }
 0x3fa   : > { %v8781_v22 = vmul.f32 %v9637_v14, %v8774_v62  ;;  %v9639_v23 = vadd.f32 %v8754_v21, %v8330_v20  ;;  %v8756_v9 = vpop.f32.mrb[3].mxu0 }
 0x3fb   : > { %v8782_v10 = vmul.f32 %v9638_v18, %v8778_v12  ;;  %v9640_v13 = vadd.f32 %v8756_v9, %v8332_v8 }
 0x3fc   : > { %v8801_v28 = vadd.f32 %v8794_v15, %v8781_v22  ;;  %v8783_v29 = vmul.f32 %v9639_v23, %v8774_v62 }
 0x3fd   : > { %v8802_v30 = vadd.f32 %v8798_v19, %v8782_v10  ;;  %v8784_v31 = vmul.f32 %v9640_v13, %v8778_v12 }
 0x3fe   : > { %v8809_v32 = vmax.f32 %v8801_v28, 0.0  ;;  %v8803_v33 = vadd.f32 %v8794_v15, %v8783_v29  ;;  %v8336_v36 = vpop.f32.mrb[4].mxu1 }
 0x3ff   : > { %v8810_v34 = vmax.f32 %v8802_v30, 0.0  ;;  %v8804_v35 = vadd.f32 %v8798_v19, %v8784_v31  ;;  %v8760_v37 = vpop.f32.mrb[4].mxu0  ;;  %v8338_v26 = vpop.f32.mrb[5].mxu1 }
 0x400   : > { %v8811_v24 = vmax.f32 %v8803_v33, 0.0  ;;  %v9641_v25 = vadd.f32 %v8760_v37, %v8336_v36  ;;  %v8762_v27 = vpop.f32.mrb[5].mxu0  ;;  %v8340_v43 = vpop.f32.mrb[6].mxu1 }
 0x401   : > { %v9633_v38 = vpack.c.bf16 %v8810_v34, %v8809_v32  ;;  %v8812_v39 = vmax.f32 %v8804_v35, 0.0  ;;  %v9642_v41 = vadd.f32 %v8762_v27, %v8338_v26  ;;  %v8764_v50 = vpop.f32.mrb[6].mxu0  ;;  %v8342_v53 = vpop.f32.mrb[7].mxu1 }
 0x402   : > { %v8785_v51 = vmul.f32 %v9641_v25, %v8774_v62  ;;  %v9643_v52 = vadd.f32 %v8764_v50, %v8340_v43  ;;  %v8766_v54 = vpop.f32.mrb[7].mxu0 }
 0x403   : > { %8841 = vst [vmem:[%s4440_s15] sm:$0xff] %v9633_v38  ;;  %v9634_v55 = vpack.c.bf16 %v8812_v39, %v8811_v24  ;;  %v8786_v42 = vmul.f32 %v9642_v41, %v8778_v12  ;;  %v9644_v45 = vadd.f32 %v8766_v54, %v8342_v53 }
 0x404   : > { %v8805_v40 = vadd.f32 %v8794_v15, %v8785_v51  ;;  %v8787_v44 = vmul.f32 %v9643_v52, %v8774_v62 }
 0x405   : > { %8842 = vst [vmem:[%s4440_s15 + $0x8] sm:$0xff] %v9634_v55  ;;  %v8806_v48 = vadd.f32 %v8798_v19, %v8786_v42  ;;  %v8788_v49 = vmul.f32 %v9644_v45, %v8778_v12 }
 0x406   : > { %v8813_v46 = vmax.f32 %v8805_v40, 0.0  ;;  %v8807_v47 = vadd.f32 %v8794_v15, %v8787_v44 }
 0x407   : > { %v8814_v57 = vmax.f32 %v8806_v48, 0.0  ;;  %v8808_v60 = vadd.f32 %v8798_v19, %v8788_v49  ;;  %8851 = sbr.rel (!%p10710_p6) target bundleno = 1046 (0x416), region = 92 }
 0x408   : > { %v8815_v2 = vmax.f32 %v8807_v47, 0.0 }
 0x409   : > { %v9635_v3 = vpack.c.bf16 %v8814_v57, %v8813_v46  ;;  %v8816_v4 = vmax.f32 %v8808_v60, 0.0 }
 0x40a   : > { %v8893_v6 = vld [vmem:[%s4440_s15] sm:$0xff] (%p10710_p6) }
 0x40b   : > { %8843 = vst [vmem:[%s4440_s15 + $0x10] sm:$0xff] %v9635_v3  ;;  %v9636_v5 = vpack.c.bf16 %v8816_v4, %v8815_v2  ;;  %8894 = vst [vmem:[%s8859_s6] sm:$0xff] (%p10710_p6), %v8893_v6 }
 0x40c   : > { %v8895_v7 = vld [vmem:[%s4440_s15 + $0x8] sm:$0xff] (%p10710_p6) }
 0x40d   : > { %8844 = vst [vmem:[%s4440_s15 + $0x18] sm:$0xff] %v9636_v5  ;;  %8896 = vst [vmem:[%s8859_s6 + $0x10] sm:$0xff] (%p10710_p6), %v8895_v7 }
 0x412   : > { %v8897_v56 = vld [vmem:[%s4440_s15 + $0x10] sm:$0xff] }
 0x413   : > { %8898 = vst [vmem:[%s8859_s6 + $0x20] sm:$0xff] %v8897_v56 }
 0x414   : > { %v8899_v61 = vld [vmem:[%s4440_s15 + $0x18] sm:$0xff] }
 0x415   : > { %8900 = vst [vmem:[%s8859_s6 + $0x30] sm:$0xff] %v8899_v61 }
 0x416 PF: > { %s14_s21 = sadd.s32 1, %s10635_s21   ;;  %s12504_s15 = smov %s10615_s16 }
 0x417   : > { %p11_p0 = scmp.ge.s32.totalorder %s14_s21, 10   ;;  %s12505_s16 = smov %s10718_s30 }
 0x418   : > { %s12506_s17 = smov %s10627_s19  ;;  %s12507_s18 = smov %s10631_s20 }
 0x419   : > { %s12508_s19 = smov %s12511_s22  ;;  %s12509_s20 = smov %s12515_s23 }
 0x41a   :  { %13 = sbr.rel (!%p11_p0) target bundleno = 4 (0x4), region = 176 }

// kernel: generator_forward.7
= control target key start
LH: loop header
LB: loop body
LE: loop exit
PB: predicated region body
PF: predicated region fallthrough
CT: control target
= control target key end

     0   :  { %s5043_s15 = smov 0   ;;  %s5045_s16 = smov 0   ;;  %s5568_s0 = inlined_call_operand.vmem [shape: bf16[4,128,2048], index: 0, kind: input, shape index: {}]   ;;  %s5569_s1 = inlined_call_operand.vmem [shape: bf16[4,2048,256], index: 1, kind: input, shape index: {}]   ;;  %s5570_s2 = inlined_call_operand.vmem [shape: f32[1,256], index: 2, kind: input, shape index: {}]   ;;  %s5571_s3 = inlined_call_operand.vmem [shape: f32[1,256], index: 3, kind: input, shape index: {}]   ;;  %s5572_s4 = inlined_call_operand.vmem [shape: bf16[4,128,256], index: 4, kind: output, shape index: {}]  }
   0x1   :  { %s5047_s17 = smov 0  }
   0x2 LB: > { %s33_s18 = sadd.s32 1, %s5012_s16  ;;  %p3934_p0 = scmp.ge.s32.totalorder %s5016_s17, 1  ;;  %s5016_s17 = sphi %s5047_s17, %s14_s17   ;;  %s5012_s16 = sphi %s5045_s16, %s5574_s16   ;;  %s5008_s15 = sphi %s5043_s15, %s5573_s15  }
   0x3   : > { %p35_p1 = scmp.ge.s32.totalorder %s33_s18, 4  ;;  %p230_p2 = scmp.lt.s32.totalorder %s5016_s17, 5 }
   0x5   : > { %s5576_s18 = smov (%p35_p1, %s33_s18), 0  ;;  %p231_p3 = pnand %p3934_p0, %p230_p2 }
   0x6   : > { %p288_p4 = scmp.lt.s32.totalorder (!%p231_p3), %s5008_s15, 3 }
   0x7   : > { %234 = sbr.rel (%p231_p3) target bundleno = 557 (0x22d), region = 36 }
   0xe   : > { %s5578_s15 = smov (!%p288_p4, %s5008_s15), 3 }
   0xf   : > { %s4344_s19 = sshll.u32 %s5578_s15, 11  ;;  %s4343_s23 = sshll.u32 %s5578_s15, 10 }
  0x10   : > { %s5067_s22 = scalar_lea.vmem %s5569_s1, %s4344_s19  ;;  %s5117_s26 = scalar_lea.vmem %s5568_s0, %s4343_s23 }
  0x11   : > { %v4610_v0 = vld [vmem:[%s5067_s22 + $0x4] ss:$8 sps:$4 sm:$0xff]   ;;  %v4614_v2 = vld [vmem:[%s5067_s22] ss:$8 sps:$4 sm:$0xff]   ;;  %v4616_v4 = vld [vmem:[%s5067_s22 + $0x14] ss:$8 sps:$4 sm:$0xff]  }
  0x12   : > { %v4612_v1 = vld [vmem:[%s5067_s22 + $0x404] ss:$8 sps:$4 sm:$0xff]   ;;  %2638 = vmatprep.subr.bf16.mxu1 %v4610_v0  ;;  %v4615_v3 = vld [vmem:[%s5067_s22 + $0x400] ss:$8 sps:$4 sm:$0xff]   ;;  %v4618_v5 = vld [vmem:[%s5067_s22 + $0x414] ss:$8 sps:$4 sm:$0xff]  }
  0x13   : > { %3090 = vmatprep.subr.bf16.mxu0 %v4612_v1  ;;  %2639 = vmatpush1.bf16.msra.mxu1 %v4614_v2  ;;  %v4620_v6 = vld [vmem:[%s5067_s22 + $0x10] ss:$8 sps:$4 sm:$0xff]   ;;  %v4622_v8 = vld [vmem:[%s5067_s22 + $0x24] ss:$8 sps:$4 sm:$0xff]   ;;  %v4626_v10 = vld [vmem:[%s5067_s22 + $0x20] ss:$8 sps:$4 sm:$0xff]  }
  0x14   : > { %3091 = vmatpush1.bf16.msra.mxu0 %v4615_v3  ;;  %2640 = vmatprep.subr.bf16.mxu1 %v4616_v4  ;;  %v4621_v7 = vld [vmem:[%s5067_s22 + $0x410] ss:$8 sps:$4 sm:$0xff]   ;;  %v4624_v9 = vld [vmem:[%s5067_s22 + $0x424] ss:$8 sps:$4 sm:$0xff]   ;;  %v4627_v11 = vld [vmem:[%s5067_s22 + $0x420] ss:$8 sps:$4 sm:$0xff]  }
  0x15   : > { %3092 = vmatprep.subr.bf16.mxu0 %v4618_v5  ;;  %v4628_v12 = vld [vmem:[%s5067_s22 + $0x34] ss:$8 sps:$4 sm:$0xff]   ;;  %v4632_v14 = vld [vmem:[%s5067_s22 + $0x30] ss:$8 sps:$4 sm:$0xff]   ;;  %v4634_v16 = vld [vmem:[%s5067_s22 + $0x44] ss:$8 sps:$4 sm:$0xff]  }
  0x16   : > { %v4630_v13 = vld [vmem:[%s5067_s22 + $0x434] ss:$8 sps:$4 sm:$0xff]   ;;  %v4633_v15 = vld [vmem:[%s5067_s22 + $0x430] ss:$8 sps:$4 sm:$0xff]   ;;  %v4636_v17 = vld [vmem:[%s5067_s22 + $0x444] ss:$8 sps:$4 sm:$0xff]  }
  0x17   : > { %2641 = vmatpush1.bf16.msra.mxu1 %v4620_v6  ;;  %v4638_v18 = vld [vmem:[%s5067_s22 + $0x40] ss:$8 sps:$4 sm:$0xff]   ;;  %v4640_v20 = vld [vmem:[%s5067_s22 + $0x54] ss:$8 sps:$4 sm:$0xff]   ;;  %v4644_v22 = vld [vmem:[%s5067_s22 + $0x50] ss:$8 sps:$4 sm:$0xff]  }
  0x18   : > { %3093 = vmatpush1.bf16.msra.mxu0 %v4621_v7  ;;  %2642 = vmatprep.subr.bf16.mxu1 %v4622_v8  ;;  %v4639_v19 = vld [vmem:[%s5067_s22 + $0x440] ss:$8 sps:$4 sm:$0xff]   ;;  %v4642_v21 = vld [vmem:[%s5067_s22 + $0x454] ss:$8 sps:$4 sm:$0xff]   ;;  %v4645_v23 = vld [vmem:[%s5067_s22 + $0x450] ss:$8 sps:$4 sm:$0xff]  }
  0x19   : > { %3094 = vmatprep.subr.bf16.mxu0 %v4624_v9  ;;  %v4646_v24 = vld [vmem:[%s5067_s22 + $0x64] ss:$8 sps:$4 sm:$0xff]   ;;  %v4650_v26 = vld [vmem:[%s5067_s22 + $0x60] ss:$8 sps:$4 sm:$0xff]   ;;  %v4652_v28 = vld [vmem:[%s5067_s22 + $0x74] ss:$8 sps:$4 sm:$0xff]  }
  0x1a   : > { %v4648_v25 = vld [vmem:[%s5067_s22 + $0x464] ss:$8 sps:$4 sm:$0xff]   ;;  %v4651_v27 = vld [vmem:[%s5067_s22 + $0x460] ss:$8 sps:$4 sm:$0xff]   ;;  %v4654_v29 = vld [vmem:[%s5067_s22 + $0x474] ss:$8 sps:$4 sm:$0xff]  }
  0x1b   : > { %2643 = vmatpush1.bf16.msra.mxu1 %v4626_v10  ;;  %v4656_v30 = vld [vmem:[%s5067_s22 + $0x70] ss:$8 sps:$4 sm:$0xff]   ;;  %v4658_v32 = vld [vmem:[%s5067_s22 + $0x84] ss:$8 sps:$4 sm:$0xff]   ;;  %v4662_v34 = vld [vmem:[%s5067_s22 + $0x80] ss:$8 sps:$4 sm:$0xff]  }
  0x1c   : > { %3095 = vmatpush1.bf16.msra.mxu0 %v4627_v11  ;;  %2644 = vmatprep.subr.bf16.mxu1 %v4628_v12  ;;  %v4657_v31 = vld [vmem:[%s5067_s22 + $0x470] ss:$8 sps:$4 sm:$0xff]   ;;  %v4660_v33 = vld [vmem:[%s5067_s22 + $0x484] ss:$8 sps:$4 sm:$0xff]   ;;  %v4663_v35 = vld [vmem:[%s5067_s22 + $0x480] ss:$8 sps:$4 sm:$0xff]  }
  0x1d   : > { %3096 = vmatprep.subr.bf16.mxu0 %v4630_v13  ;;  %v4664_v36 = vld [vmem:[%s5067_s22 + $0x94] ss:$8 sps:$4 sm:$0xff]   ;;  %v4668_v38 = vld [vmem:[%s5067_s22 + $0x90] ss:$8 sps:$4 sm:$0xff]   ;;  %v4670_v40 = vld [vmem:[%s5067_s22 + $0xa4] ss:$8 sps:$4 sm:$0xff]  }
  0x1e   : > { %v4666_v37 = vld [vmem:[%s5067_s22 + $0x494] ss:$8 sps:$4 sm:$0xff]   ;;  %v4669_v39 = vld [vmem:[%s5067_s22 + $0x490] ss:$8 sps:$4 sm:$0xff]   ;;  %v4672_v41 = vld [vmem:[%s5067_s22 + $0x4a4] ss:$8 sps:$4 sm:$0xff]  }
  0x1f   : > { %2645 = vmatpush1.bf16.msra.mxu1 %v4632_v14  ;;  %v4674_v42 = vld [vmem:[%s5067_s22 + $0xa0] ss:$8 sps:$4 sm:$0xff]   ;;  %v4676_v44 = vld [vmem:[%s5067_s22 + $0xb4] ss:$8 sps:$4 sm:$0xff]   ;;  %v4680_v46 = vld [vmem:[%s5067_s22 + $0xb0] ss:$8 sps:$4 sm:$0xff]  }
  0x20   : > { %3097 = vmatpush1.bf16.msra.mxu0 %v4633_v15  ;;  %2646 = vmatprep.subr.bf16.mxu1 %v4634_v16  ;;  %v4675_v43 = vld [vmem:[%s5067_s22 + $0x4a0] ss:$8 sps:$4 sm:$0xff]   ;;  %v4678_v45 = vld [vmem:[%s5067_s22 + $0x4b4] ss:$8 sps:$4 sm:$0xff]   ;;  %v4681_v47 = vld [vmem:[%s5067_s22 + $0x4b0] ss:$8 sps:$4 sm:$0xff]  }
  0x21   : > { %3098 = vmatprep.subr.bf16.mxu0 %v4636_v17  ;;  %v334_v48 = vld [vmem:[%s5117_s26] sm:$0xff]  ;;  %v4688_v58 = vld [vmem:[%s5067_s22 + $0xd4] ss:$8 sps:$4 sm:$0xff]   ;;  %v4692_v60 = vld [vmem:[%s5067_s22 + $0xd0] ss:$8 sps:$4 sm:$0xff]   ;;  %s4345_s5 = sshll.u32 %s5578_s15, 7 }
  0x22   : > { %v342_v49 = vld [vmem:[%s5117_s26 + $0x40] sm:$0xff]  ;;  %v4690_v59 = vld [vmem:[%s5067_s22 + $0x4d4] ss:$8 sps:$4 sm:$0xff]   ;;  %v4693_v61 = vld [vmem:[%s5067_s22 + $0x4d0] ss:$8 sps:$4 sm:$0xff]   ;;  %s5485_s8 = scalar_lea.vmem %s5572_s4, %s4345_s5 }
  0x23   : > { %2647 = vmatpush1.bf16.msra.mxu1 %v4638_v18  ;;  %v338_v50 = vld [vmem:[%s5117_s26 + $0x20] sm:$0xff]  ;;  %v3942_v53 = vcombine.high %v334_v48, %v342_v49  ;;  %v4700_v2 = vld [vmem:[%s5067_s22 + $0xf4] ss:$8 sps:$4 sm:$0xff]   ;;  %v4704_v4 = vld [vmem:[%s5067_s22 + $0xf0] ss:$8 sps:$4 sm:$0xff]   ;;  %v3941_v11 = vcombine.low %v334_v48, %v342_v49 }
  0x24   : > { %3099 = vmatpush1.bf16.msra.mxu0 %v4639_v19  ;;  %2648 = vmatprep.subr.bf16.mxu1 %v4640_v20  ;;  %v346_v51 = vld [vmem:[%s5117_s26 + $0x60] sm:$0xff]  ;;  %v4702_v3 = vld [vmem:[%s5067_s22 + $0x4f4] ss:$8 sps:$4 sm:$0xff]   ;;  %v4705_v5 = vld [vmem:[%s5067_s22 + $0x4f0] ss:$8 sps:$4 sm:$0xff]  }
  0x25   : > { %3100 = vmatprep.subr.bf16.mxu0 %v4642_v21  ;;  %v4682_v52 = vld [vmem:[%s5067_s22 + $0xc4] ss:$8 sps:$4 sm:$0xff]   ;;  %v3950_v55 = vcombine.high %v338_v50, %v346_v51  ;;  %2670 = vmatprep.mubr.bf16.mxu1 %v3942_v53  ;;  %v4686_v56 = vld [vmem:[%s5067_s22 + $0xc0] ss:$8 sps:$4 sm:$0xff]   ;;  %v3949_v12 = vcombine.low %v338_v50, %v346_v51  ;;  %v4714_v16 = vld [vmem:[%s5067_s22 + $0x114] ss:$8 sps:$4 sm:$0xff]  }
  0x26   : > { %v4684_v54 = vld [vmem:[%s5067_s22 + $0x4c4] ss:$8 sps:$4 sm:$0xff]   ;;  %v4687_v57 = vld [vmem:[%s5067_s22 + $0x4c0] ss:$8 sps:$4 sm:$0xff]   ;;  %v4717_v17 = vld [vmem:[%s5067_s22 + $0x514] ss:$8 sps:$4 sm:$0xff]  }
  0x27   : > { %2649 = vmatpush1.bf16.msra.mxu1 %v4644_v22  ;;  %3122 = vmatprep.mubr.bf16.mxu0 %v3950_v55  ;;  %v4694_v62 = vld [vmem:[%s5067_s22 + $0xe4] ss:$8 sps:$4 sm:$0xff]   ;;  %v4698_v0 = vld [vmem:[%s5067_s22 + $0xe0] ss:$8 sps:$4 sm:$0xff]   ;;  %v4712_v20 = vld [vmem:[%s5067_s22 + $0x110] ss:$8 sps:$4 sm:$0xff]  }
  0x28   : > { %3101 = vmatpush1.bf16.msra.mxu0 %v4645_v23  ;;  %2650 = vmatprep.subr.bf16.mxu1 %v4646_v24  ;;  %v4696_v63 = vld [vmem:[%s5067_s22 + $0x4e4] ss:$8 sps:$4 sm:$0xff]   ;;  %v4699_v1 = vld [vmem:[%s5067_s22 + $0x4e0] ss:$8 sps:$4 sm:$0xff]   ;;  %v4715_v21 = vld [vmem:[%s5067_s22 + $0x510] ss:$8 sps:$4 sm:$0xff]  }
  0x29   : > { %3102 = vmatprep.subr.bf16.mxu0 %v4648_v25  ;;  %v4708_v6 = vld [vmem:[%s5067_s22 + $0x104] ss:$8 sps:$4 sm:$0xff]   ;;  %v4706_v8 = vld [vmem:[%s5067_s22 + $0x100] ss:$8 sps:$4 sm:$0xff]   ;;  %v4738_v48 = vld [vmem:[%s5067_s22 + $0x154] ss:$8 sps:$4 sm:$0xff]  }
  0x2a   : > { %v4711_v7 = vld [vmem:[%s5067_s22 + $0x504] ss:$8 sps:$4 sm:$0xff]   ;;  %v4709_v9 = vld [vmem:[%s5067_s22 + $0x500] ss:$8 sps:$4 sm:$0xff]   ;;  %v4741_v49 = vld [vmem:[%s5067_s22 + $0x554] ss:$8 sps:$4 sm:$0xff]  }
  0x2b   : > { %2651 = vmatpush1.bf16.msra.mxu1 %v4650_v26  ;;  %v350_v10 = vld [vmem:[%s5117_s26 + $0x80] sm:$0xff]  ;;  %v4739_v53 = vld [vmem:[%s5067_s22 + $0x550] ss:$8 sps:$4 sm:$0xff]  }
  0x2c   : > { %3103 = vmatpush1.bf16.msra.mxu0 %v4651_v27  ;;  %2652 = vmatprep.subr.bf16.mxu1 %v4652_v28  ;;  %v358_v13 = vld [vmem:[%s5117_s26 + $0xc0] sm:$0xff] }
  0x2d   : > { %3104 = vmatprep.subr.bf16.mxu0 %v4654_v29  ;;  %v354_v14 = vld [vmem:[%s5117_s26 + $0xa0] sm:$0xff]  ;;  %v3958_v18 = vcombine.high %v350_v10, %v358_v13  ;;  %v3957_v28 = vcombine.low %v350_v10, %v358_v13 }
  0x2e   : > { %v362_v15 = vld [vmem:[%s5117_s26 + $0xe0] sm:$0xff] }
  0x2f   : > { %2653 = vmatpush1.bf16.msra.mxu1 %v4656_v30  ;;  %v3966_v19 = vcombine.high %v354_v14, %v362_v15  ;;  %v4720_v22 = vld [vmem:[%s5067_s22 + $0x124] ss:$8 sps:$4 sm:$0xff]   ;;  %v4718_v24 = vld [vmem:[%s5067_s22 + $0x120] ss:$8 sps:$4 sm:$0xff]   ;;  %v3965_v29 = vcombine.low %v354_v14, %v362_v15 }
  0x30   : > { %3105 = vmatpush1.bf16.msra.mxu0 %v4657_v31  ;;  %2654 = vmatprep.subr.bf16.mxu1 %v4658_v32  ;;  %v4723_v23 = vld [vmem:[%s5067_s22 + $0x524] ss:$8 sps:$4 sm:$0xff]   ;;  %v4721_v25 = vld [vmem:[%s5067_s22 + $0x520] ss:$8 sps:$4 sm:$0xff]   ;;  %v4726_v32 = vld [vmem:[%s5067_s22 + $0x134] ss:$8 sps:$4 sm:$0xff]  }
  0x31   : > { %3106 = vmatprep.subr.bf16.mxu0 %v4660_v33  ;;  %v366_v26 = vld [vmem:[%s5117_s26 + $0x100] sm:$0xff]  ;;  %v4729_v33 = vld [vmem:[%s5067_s22 + $0x534] ss:$8 sps:$4 sm:$0xff]  }
  0x32   : > { %v374_v27 = vld [vmem:[%s5117_s26 + $0x140] sm:$0xff] }
  0x33   : > { %2655 = vmatpush1.bf16.msra.mxu1 %v4662_v34  ;;  %v370_v30 = vld [vmem:[%s5117_s26 + $0x120] sm:$0xff]  ;;  %v3974_v34 = vcombine.high %v366_v26, %v374_v27 }
  0x34   : > { %3107 = vmatpush1.bf16.msra.mxu0 %v4663_v35  ;;  %2656 = vmatprep.subr.bf16.mxu1 %v4664_v36  ;;  %v378_v31 = vld [vmem:[%s5117_s26 + $0x160] sm:$0xff]  ;;  %v4724_v36 = vld [vmem:[%s5067_s22 + $0x130] ss:$8 sps:$4 sm:$0xff]  }
  0x35   : > { %3108 = vmatprep.subr.bf16.mxu0 %v4666_v37  ;;  %v3982_v35 = vcombine.high %v370_v30, %v378_v31  ;;  %v4727_v37 = vld [vmem:[%s5067_s22 + $0x530] ss:$8 sps:$4 sm:$0xff]   ;;  %v4747_v55 = vld [vmem:[%s5067_s22 + $0x564] ss:$8 sps:$4 sm:$0xff]   ;;  %v4754_v14 = vld [vmem:[%s5067_s22 + $0x180] ss:$8 sps:$4 sm:$0xff]  }
  0x36   : > { %v426_v13 = vld [vmem:[%s5117_s26 + $0x2e0] sm:$0xff] }
  0x37   : > { %2657 = vmatpush1.bf16.msra.mxu1 %v4668_v38  ;;  %v4732_v38 = vld [vmem:[%s5067_s22 + $0x144] ss:$8 sps:$4 sm:$0xff]   ;;  %v4757_v15 = vld [vmem:[%s5067_s22 + $0x580] ss:$8 sps:$4 sm:$0xff]  }
  0x38   : > { %3109 = vmatpush1.bf16.msra.mxu0 %v4669_v39  ;;  %2658 = vmatprep.subr.bf16.mxu1 %v4670_v40  ;;  %v4735_v39 = vld [vmem:[%s5067_s22 + $0x544] ss:$8 sps:$4 sm:$0xff]   ;;  %v4730_v40 = vld [vmem:[%s5067_s22 + $0x140] ss:$8 sps:$4 sm:$0xff]  }
  0x39   : > { %3110 = vmatprep.subr.bf16.mxu0 %v4672_v41  ;;  %v4733_v41 = vld [vmem:[%s5067_s22 + $0x540] ss:$8 sps:$4 sm:$0xff]  }
  0x3b   : > { %2659 = vmatpush1.bf16.msra.mxu1 %v4674_v42  ;;  %v382_v42 = vld [vmem:[%s5117_s26 + $0x180] sm:$0xff] }
  0x3c   : > { %3111 = vmatpush1.bf16.msra.mxu0 %v4675_v43  ;;  %2660 = vmatprep.subr.bf16.mxu1 %v4676_v44  ;;  %v390_v43 = vld [vmem:[%s5117_s26 + $0x1c0] sm:$0xff]  ;;  %v3973_v44 = vcombine.low %v366_v26, %v374_v27 }
  0x3d   : > { %3112 = vmatprep.subr.bf16.mxu0 %v4678_v45  ;;  %v3981_v45 = vcombine.low %v370_v30, %v378_v31  ;;  %v3990_v50 = vcombine.high %v382_v42, %v390_v43  ;;  %v430_v26 = vld [vmem:[%s5117_s26 + $0x300] sm:$0xff] }
  0x3e   : > { %v434_v30 = vld [vmem:[%s5117_s26 + $0x320] sm:$0xff] }
  0x3f   : > { %2661 = vmatpush1.bf16.msra.mxu1 %v4680_v46  ;;  %v386_v46 = vld [vmem:[%s5117_s26 + $0x1a0] sm:$0xff] }
  0x40   : > { %3113 = vmatpush1.bf16.msra.mxu0 %v4681_v47  ;;  %2662 = vmatprep.subr.bf16.mxu1 %v4682_v52  ;;  %v394_v47 = vld [vmem:[%s5117_s26 + $0x1e0] sm:$0xff]  ;;  %v4736_v52 = vld [vmem:[%s5067_s22 + $0x150] ss:$8 sps:$4 sm:$0xff]  }
  0x41   : > { %3114 = vmatprep.subr.bf16.mxu0 %v4684_v54  ;;  %v3998_v51 = vcombine.high %v386_v46, %v394_v47  ;;  %v4744_v54 = vld [vmem:[%s5067_s22 + $0x164] ss:$8 sps:$4 sm:$0xff]  }
  0x42   : > { %v442_v31 = vld [vmem:[%s5117_s26 + $0x360] sm:$0xff] }
  0x43   : > { %2663 = vmatpush1.bf16.msra.mxu1 %v4686_v56  ;;  %v4742_v56 = vld [vmem:[%s5067_s22 + $0x160] ss:$8 sps:$4 sm:$0xff]  }
  0x44   : > { %3115 = vmatpush1.bf16.msra.mxu0 %v4687_v57  ;;  %2664 = vmatprep.subr.bf16.mxu1 %v4688_v58  ;;  %v398_v57 = vld [vmem:[%s5117_s26 + $0x200] sm:$0xff] }
  0x45   : > { %3116 = vmatprep.subr.bf16.mxu0 %v4690_v59  ;;  %v406_v58 = vld [vmem:[%s5117_s26 + $0x240] sm:$0xff]  ;;  %v3989_v59 = vcombine.low %v382_v42, %v390_v43 }
  0x46   : > { %v4005_v10 = vcombine.low %v398_v57, %v406_v58  ;;  %v446_v42 = vld [vmem:[%s5117_s26 + $0x380] sm:$0xff] }
  0x47   : > { %2665 = vmatpush1.bf16.msra.mxu1 %v4692_v60  ;;  %v3997_v60 = vcombine.low %v386_v46, %v394_v47  ;;  %v454_v43 = vld [vmem:[%s5117_s26 + $0x3c0] sm:$0xff] }
  0x48   : > { %3117 = vmatpush1.bf16.msra.mxu0 %v4693_v61  ;;  %2666 = vmatprep.subr.bf16.mxu1 %v4694_v62  ;;  %v402_v61 = vld [vmem:[%s5117_s26 + $0x220] sm:$0xff] }
  0x49   : > { %3118 = vmatprep.subr.bf16.mxu0 %v4696_v63  ;;  %v410_v62 = vld [vmem:[%s5117_s26 + $0x260] sm:$0xff] }
  0x4a   : > { %v4745_v63 = vld [vmem:[%s5067_s22 + $0x560] ss:$8 sps:$4 sm:$0xff]  }
  0x4b   : > { %2667 = vmatpush1.bf16.msra.mxu1 %v4698_v0  ;;  %v4750_v0 = vld [vmem:[%s5067_s22 + $0x174] ss:$8 sps:$4 sm:$0xff]   ;;  %v450_v46 = vld [vmem:[%s5117_s26 + $0x3a0] sm:$0xff] }
  0x4c   : > { %3119 = vmatpush1.bf16.msra.mxu0 %v4699_v1  ;;  %2668 = vmatprep.subr.bf16.mxu1 %v4700_v2  ;;  %v4753_v1 = vld [vmem:[%s5067_s22 + $0x574] ss:$8 sps:$4 sm:$0xff]   ;;  %v4006_v2 = vcombine.high %v398_v57, %v406_v58  ;;  %v458_v47 = vld [vmem:[%s5117_s26 + $0x3e0] sm:$0xff]  ;;  %v335_v58 = vld [vmem:[%s5117_s26 + $0x8] sm:$0xff] }
  0x4d   : > { %3120 = vmatprep.subr.bf16.mxu0 %v4702_v3  ;;  %v4014_v3 = vcombine.high %v402_v61, %v410_v62  ;;  %v4793_v57 = vld [vmem:[%s5067_s22 + $0x5e0] ss:$8 sps:$4 sm:$0xff]  }
  0x4f   : > { %2669 = vmatpush1.bf16.msra.mxu1 %v4704_v4  ;;  %v4748_v4 = vld [vmem:[%s5067_s22 + $0x170] ss:$8 sps:$4 sm:$0xff]  }
  0x50   : > { %3121 = vmatpush1.bf16.msra.mxu0 %v4705_v5  ;;  %2751 = vmatprep.subr.bf16.mxu1 %v4708_v6  ;;  %v4751_v5 = vld [vmem:[%s5067_s22 + $0x570] ss:$8 sps:$4 sm:$0xff]   ;;  %v4756_v6 = vld [vmem:[%s5067_s22 + $0x184] ss:$8 sps:$4 sm:$0xff]  }
  0x51   : > { %3203 = vmatprep.subr.bf16.mxu0 %v4711_v7  ;;  %v4759_v7 = vld [vmem:[%s5067_s22 + $0x584] ss:$8 sps:$4 sm:$0xff]  }
  0x52   : > { %2671 = vmatmul.mubr.bf16.vlgmr.msra.gmra.mrb[0].mxu1 %v3941_v11  ;;  %v4013_v11 = vcombine.low %v402_v61, %v410_v62  ;;  %v4061_v61 = vcombine.low %v450_v46, %v458_v47  ;;  %v339_v62 = vld [vmem:[%s5117_s26 + $0x28] sm:$0xff] }
  0x53   : > { %3123 = vmatmul.mubr.bf16.vlgmr.msra.gmra.mrb[0].mxu0 %v3949_v12  ;;  %2752 = vmatpush1.bf16.msra.mxu1 %v4706_v8  ;;  %v414_v8 = vld [vmem:[%s5117_s26 + $0x280] sm:$0xff] }
  0x54   : > { %3204 = vmatpush1.bf16.msra.mxu0 %v4709_v9  ;;  %2753 = vmatprep.subr.bf16.mxu1 %v4714_v16  ;;  %v422_v9 = vld [vmem:[%s5117_s26 + $0x2c0] sm:$0xff]  ;;  %v4762_v16 = vld [vmem:[%s5067_s22 + $0x194] ss:$8 sps:$4 sm:$0xff]  }
  0x55   : > { %3205 = vmatprep.subr.bf16.mxu0 %v4717_v17  ;;  %2680 = vmatprep.mubr.bf16.mxu1 %v3958_v18  ;;  %v418_v12 = vld [vmem:[%s5117_s26 + $0x2a0] sm:$0xff]  ;;  %v4765_v17 = vld [vmem:[%s5067_s22 + $0x594] ss:$8 sps:$4 sm:$0xff]   ;;  %v4022_v18 = vcombine.high %v414_v8, %v422_v9  ;;  %v4021_v27 = vcombine.low %v414_v8, %v422_v9  ;;  %v351_v9 = vld [vmem:[%s5117_s26 + $0x88] sm:$0xff] }
  0x56   : > { %3132 = vmatprep.mubr.bf16.mxu0 %v3966_v19  ;;  %v4030_v19 = vcombine.high %v418_v12, %v426_v13  ;;  %v4802_v8 = vld [vmem:[%s5067_s22 + $0x200] ss:$8 sps:$4 sm:$0xff]  }
  0x57   : > { %2754 = vmatpush1.bf16.msra.mxu1 %v4712_v20  ;;  %v4760_v20 = vld [vmem:[%s5067_s22 + $0x190] ss:$8 sps:$4 sm:$0xff]  }
  0x58   : > { %3206 = vmatpush1.bf16.msra.mxu0 %v4715_v21  ;;  %2755 = vmatprep.subr.bf16.mxu1 %v4720_v22  ;;  %v4763_v21 = vld [vmem:[%s5067_s22 + $0x590] ss:$8 sps:$4 sm:$0xff]   ;;  %v4768_v22 = vld [vmem:[%s5067_s22 + $0x1a4] ss:$8 sps:$4 sm:$0xff]  }
  0x59   : > { %3207 = vmatprep.subr.bf16.mxu0 %v4723_v23  ;;  %v4771_v23 = vld [vmem:[%s5067_s22 + $0x5a4] ss:$8 sps:$4 sm:$0xff]  }
  0x5a   : > { %2681 = vmatmul.mubr.bf16.gmra.mrb[4].mxu1 %v3957_v28  ;;  %v4029_v28 = vcombine.low %v418_v12, %v426_v13  ;;  %v355_v13 = vld [vmem:[%s5117_s26 + $0xa8] sm:$0xff] }
  0x5b   : > { %3133 = vmatmul.mubr.bf16.gmra.mrb[4].mxu0 %v3965_v29  ;;  %2756 = vmatpush1.bf16.msra.mxu1 %v4718_v24  ;;  %v4766_v24 = vld [vmem:[%s5067_s22 + $0x1a0] ss:$8 sps:$4 sm:$0xff]  }
  0x5c   : > { %3208 = vmatpush1.bf16.msra.mxu0 %v4721_v25  ;;  %2757 = vmatprep.subr.bf16.mxu1 %v4726_v32  ;;  %v4769_v25 = vld [vmem:[%s5067_s22 + $0x5a0] ss:$8 sps:$4 sm:$0xff]   ;;  %v4774_v32 = vld [vmem:[%s5067_s22 + $0x1b4] ss:$8 sps:$4 sm:$0xff]  }
  0x5d   : > { %3209 = vmatprep.subr.bf16.mxu0 %v4729_v33  ;;  %2690 = vmatprep.mubr.bf16.mxu1 %v3974_v34  ;;  %v438_v29 = vld [vmem:[%s5117_s26 + $0x340] sm:$0xff]  ;;  %v4777_v33 = vld [vmem:[%s5067_s22 + $0x5b4] ss:$8 sps:$4 sm:$0xff]  }
  0x5e   : > { %3142 = vmatprep.mubr.bf16.mxu0 %v3982_v35  ;;  %v4038_v34 = vcombine.high %v430_v26, %v438_v29  ;;  %v4046_v35 = vcombine.high %v434_v30, %v442_v31 }
  0x5f   : > { %2758 = vmatpush1.bf16.msra.mxu1 %v4724_v36  ;;  %v4772_v36 = vld [vmem:[%s5067_s22 + $0x1b0] ss:$8 sps:$4 sm:$0xff]  }
  0x60   : > { %3210 = vmatpush1.bf16.msra.mxu0 %v4727_v37  ;;  %2759 = vmatprep.subr.bf16.mxu1 %v4732_v38  ;;  %v4775_v37 = vld [vmem:[%s5067_s22 + $0x5b0] ss:$8 sps:$4 sm:$0xff]   ;;  %v4780_v38 = vld [vmem:[%s5067_s22 + $0x1c4] ss:$8 sps:$4 sm:$0xff]  }
  0x61   : > { %3211 = vmatprep.subr.bf16.mxu0 %v4735_v39  ;;  %v4783_v39 = vld [vmem:[%s5067_s22 + $0x5c4] ss:$8 sps:$4 sm:$0xff]  }
  0x62   : > { %2691 = vmatmul.mubr.bf16.gmra.mrb[8].mxu1 %v3973_v44  ;;  %v4037_v44 = vcombine.low %v430_v26, %v438_v29  ;;  %v379_v29 = vld [vmem:[%s5117_s26 + $0x168] sm:$0xff] }
  0x63   : > { %3143 = vmatmul.mubr.bf16.gmra.mrb[8].mxu0 %v3981_v45  ;;  %2760 = vmatpush1.bf16.msra.mxu1 %v4730_v40  ;;  %v4778_v40 = vld [vmem:[%s5067_s22 + $0x1c0] ss:$8 sps:$4 sm:$0xff]   ;;  %v4045_v45 = vcombine.low %v434_v30, %v442_v31 }
  0x64   : > { %3212 = vmatpush1.bf16.msra.mxu0 %v4733_v41  ;;  %2761 = vmatprep.subr.bf16.mxu1 %v4738_v48  ;;  %v4781_v41 = vld [vmem:[%s5067_s22 + $0x5c0] ss:$8 sps:$4 sm:$0xff]   ;;  %v4786_v48 = vld [vmem:[%s5067_s22 + $0x1d4] ss:$8 sps:$4 sm:$0xff]  }
  0x65   : > { %3213 = vmatprep.subr.bf16.mxu0 %v4741_v49  ;;  %2700 = vmatprep.mubr.bf16.mxu1 %v3990_v50  ;;  %v4789_v49 = vld [vmem:[%s5067_s22 + $0x5d4] ss:$8 sps:$4 sm:$0xff]   ;;  %v4054_v50 = vcombine.high %v446_v42, %v454_v43  ;;  %v4814_v30 = vld [vmem:[%s5067_s22 + $0x220] ss:$8 sps:$4 sm:$0xff]  }
  0x66   : > { %3152 = vmatprep.mubr.bf16.mxu0 %v3998_v51  ;;  %v4062_v51 = vcombine.high %v450_v46, %v458_v47  ;;  %v4817_v31 = vld [vmem:[%s5067_s22 + $0x620] ss:$8 sps:$4 sm:$0xff]  }
  0x67   : > { %2762 = vmatpush1.bf16.msra.mxu1 %v4736_v52  ;;  %v4784_v52 = vld [vmem:[%s5067_s22 + $0x1d0] ss:$8 sps:$4 sm:$0xff]   ;;  %v387_v46 = vld [vmem:[%s5117_s26 + $0x1a8] sm:$0xff] }
  0x68   : > { %3214 = vmatpush1.bf16.msra.mxu0 %v4739_v53  ;;  %2763 = vmatprep.subr.bf16.mxu1 %v4744_v54  ;;  %v4787_v53 = vld [vmem:[%s5067_s22 + $0x5d0] ss:$8 sps:$4 sm:$0xff]   ;;  %v4792_v54 = vld [vmem:[%s5067_s22 + $0x1e4] ss:$8 sps:$4 sm:$0xff]  }
  0x69   : > { %3215 = vmatprep.subr.bf16.mxu0 %v4747_v55  ;;  %v4795_v55 = vld [vmem:[%s5067_s22 + $0x5e4] ss:$8 sps:$4 sm:$0xff]  }
  0x6a   : > { %2701 = vmatmul.mubr.bf16.gmra.mrb[12].mxu1 %v3989_v59  ;;  %v343_v59 = vld [vmem:[%s5117_s26 + $0x48] sm:$0xff] }
  0x6b   : > { %3153 = vmatmul.mubr.bf16.gmra.mrb[12].mxu0 %v3997_v60  ;;  %2764 = vmatpush1.bf16.msra.mxu1 %v4742_v56  ;;  %v4790_v56 = vld [vmem:[%s5067_s22 + $0x1e0] ss:$8 sps:$4 sm:$0xff]   ;;  %v4053_v60 = vcombine.low %v446_v42, %v454_v43 }
  0x6c   : > { %3216 = vmatpush1.bf16.msra.mxu0 %v4745_v63  ;;  %2765 = vmatprep.subr.bf16.mxu1 %v4750_v0  ;;  %v347_v63 = vld [vmem:[%s5117_s26 + $0x68] sm:$0xff]  ;;  %v4798_v0 = vld [vmem:[%s5067_s22 + $0x1f4] ss:$8 sps:$4 sm:$0xff]  }
  0x6d   : > { %3217 = vmatprep.subr.bf16.mxu0 %v4753_v1  ;;  %2710 = vmatprep.mubr.bf16.mxu1 %v4006_v2  ;;  %v4801_v1 = vld [vmem:[%s5067_s22 + $0x5f4] ss:$8 sps:$4 sm:$0xff]   ;;  %v3944_v2 = vcombine.high %v335_v58, %v343_v59  ;;  %v3951_v12 = vcombine.low %v339_v62, %v347_v63  ;;  %v383_v42 = vld [vmem:[%s5117_s26 + $0x188] sm:$0xff] }
  0x6e   : > { %3162 = vmatprep.mubr.bf16.mxu0 %v4014_v3  ;;  %v3952_v3 = vcombine.high %v339_v62, %v347_v63  ;;  %v395_v47 = vld [vmem:[%s5117_s26 + $0x1e8] sm:$0xff] }
  0x6f   : > { %2766 = vmatpush1.bf16.msra.mxu1 %v4748_v4  ;;  %v4796_v4 = vld [vmem:[%s5067_s22 + $0x1f0] ss:$8 sps:$4 sm:$0xff]   ;;  %v403_v62 = vld [vmem:[%s5117_s26 + $0x228] sm:$0xff] }
  0x70   : > { %3218 = vmatpush1.bf16.msra.mxu0 %v4751_v5  ;;  %2767 = vmatprep.subr.bf16.mxu1 %v4756_v6  ;;  %v4799_v5 = vld [vmem:[%s5067_s22 + $0x5f0] ss:$8 sps:$4 sm:$0xff]   ;;  %v4804_v6 = vld [vmem:[%s5067_s22 + $0x204] ss:$8 sps:$4 sm:$0xff]  }
  0x71   : > { %3219 = vmatprep.subr.bf16.mxu0 %v4759_v7  ;;  %v4807_v7 = vld [vmem:[%s5067_s22 + $0x604] ss:$8 sps:$4 sm:$0xff]  }
  0x72   : > { %2711 = vmatmul.mubr.bf16.gmra.mrb[16].mxu1 %v4005_v10  ;;  %v359_v10 = vld [vmem:[%s5117_s26 + $0xc8] sm:$0xff] }
  0x73   : > { %3163 = vmatmul.mubr.bf16.gmra.mrb[16].mxu0 %v4013_v11  ;;  %2768 = vmatpush1.bf16.msra.mxu1 %v4754_v14  ;;  %v3943_v11 = vcombine.low %v335_v58, %v343_v59  ;;  %v363_v14 = vld [vmem:[%s5117_s26 + $0xe8] sm:$0xff]  ;;  %v3959_v26 = vcombine.low %v351_v9, %v359_v10 }
  0x74   : > { %3220 = vmatpush1.bf16.msra.mxu0 %v4757_v15  ;;  %2769 = vmatprep.subr.bf16.mxu1 %v4762_v16  ;;  %v4805_v15 = vld [vmem:[%s5067_s22 + $0x600] ss:$8 sps:$4 sm:$0xff]   ;;  %v4810_v16 = vld [vmem:[%s5067_s22 + $0x214] ss:$8 sps:$4 sm:$0xff]  }
  0x75   : > { %3221 = vmatprep.subr.bf16.mxu0 %v4765_v17  ;;  %2720 = vmatprep.mubr.bf16.mxu1 %v4022_v18  ;;  %v4813_v17 = vld [vmem:[%s5067_s22 + $0x614] ss:$8 sps:$4 sm:$0xff]   ;;  %v3960_v18 = vcombine.high %v351_v9, %v359_v10  ;;  %v399_v58 = vld [vmem:[%s5117_s26 + $0x208] sm:$0xff] }
  0x76   : > { %3172 = vmatprep.mubr.bf16.mxu0 %v4030_v19  ;;  %v3968_v19 = vcombine.high %v355_v13, %v363_v14  ;;  %v407_v59 = vld [vmem:[%s5117_s26 + $0x248] sm:$0xff] }
  0x77   : > { %2770 = vmatpush1.bf16.msra.mxu1 %v4760_v20  ;;  %v4808_v20 = vld [vmem:[%s5067_s22 + $0x210] ss:$8 sps:$4 sm:$0xff]   ;;  %v411_v63 = vld [vmem:[%s5117_s26 + $0x268] sm:$0xff] }
  0x78   : > { %3222 = vmatpush1.bf16.msra.mxu0 %v4763_v21  ;;  %2771 = vmatprep.subr.bf16.mxu1 %v4768_v22  ;;  %v4811_v21 = vld [vmem:[%s5067_s22 + $0x610] ss:$8 sps:$4 sm:$0xff]   ;;  %v4816_v22 = vld [vmem:[%s5067_s22 + $0x224] ss:$8 sps:$4 sm:$0xff]   ;;  %v4853_v9 = vld [vmem:[%s5067_s22 + $0x680] ss:$8 sps:$4 sm:$0xff]  }
  0x79   : > { %3223 = vmatprep.subr.bf16.mxu0 %v4771_v23  ;;  %v4819_v23 = vld [vmem:[%s5067_s22 + $0x624] ss:$8 sps:$4 sm:$0xff]  }
  0x7a   : > { %2721 = vmatmul.mubr.bf16.gmra.mrb[20].mxu1 %v4021_v27  ;;  %v3967_v27 = vcombine.low %v355_v13, %v363_v14  ;;  %v415_v10 = vld [vmem:[%s5117_s26 + $0x288] sm:$0xff]  ;;  %v4015_v13 = vcombine.low %v403_v62, %v411_v63 }
  0x7b   : > { %3173 = vmatmul.mubr.bf16.gmra.mrb[20].mxu0 %v4029_v28  ;;  %2772 = vmatpush1.bf16.msra.mxu1 %v4766_v24  ;;  %v367_v24 = vld [vmem:[%s5117_s26 + $0x108] sm:$0xff] }
  0x7c   : > { %3224 = vmatpush1.bf16.msra.mxu0 %v4769_v25  ;;  %2773 = vmatprep.subr.bf16.mxu1 %v4774_v32  ;;  %v375_v25 = vld [vmem:[%s5117_s26 + $0x148] sm:$0xff]  ;;  %v4822_v32 = vld [vmem:[%s5067_s22 + $0x234] ss:$8 sps:$4 sm:$0xff]  }
  0x7d   : > { %3225 = vmatprep.subr.bf16.mxu0 %v4777_v33  ;;  %2730 = vmatprep.mubr.bf16.mxu1 %v4038_v34  ;;  %v371_v28 = vld [vmem:[%s5117_s26 + $0x128] sm:$0xff]  ;;  %v4825_v33 = vld [vmem:[%s5067_s22 + $0x634] ss:$8 sps:$4 sm:$0xff]   ;;  %v3976_v34 = vcombine.high %v367_v24, %v375_v25  ;;  %v3975_v43 = vcombine.low %v367_v24, %v375_v25 }
  0x7e   : > { %3182 = vmatprep.mubr.bf16.mxu0 %v4046_v35  ;;  %v3984_v35 = vcombine.high %v371_v28, %v379_v29  ;;  %v419_v14 = vld [vmem:[%s5117_s26 + $0x2a8] sm:$0xff] }
  0x7f   : > { %2774 = vmatpush1.bf16.msra.mxu1 %v4772_v36  ;;  %v4820_v36 = vld [vmem:[%s5067_s22 + $0x230] ss:$8 sps:$4 sm:$0xff]   ;;  %v4862_v24 = vld [vmem:[%s5067_s22 + $0x2a0] ss:$8 sps:$4 sm:$0xff]  }
  0x80   : > { %3226 = vmatpush1.bf16.msra.mxu0 %v4775_v37  ;;  %2775 = vmatprep.subr.bf16.mxu1 %v4780_v38  ;;  %v4823_v37 = vld [vmem:[%s5067_s22 + $0x630] ss:$8 sps:$4 sm:$0xff]   ;;  %v4828_v38 = vld [vmem:[%s5067_s22 + $0x244] ss:$8 sps:$4 sm:$0xff]  }
  0x81   : > { %3227 = vmatprep.subr.bf16.mxu0 %v4783_v39  ;;  %v4831_v39 = vld [vmem:[%s5067_s22 + $0x644] ss:$8 sps:$4 sm:$0xff]  }
  0x82   : > { %2731 = vmatmul.mubr.bf16.gmra.mrb[24].mxu1 %v4037_v44  ;;  %v3983_v44 = vcombine.low %v371_v28, %v379_v29  ;;  %v431_v25 = vld [vmem:[%s5117_s26 + $0x308] sm:$0xff] }
  0x83   : > { %3183 = vmatmul.mubr.bf16.gmra.mrb[24].mxu0 %v4045_v45  ;;  %2776 = vmatpush1.bf16.msra.mxu1 %v4778_v40  ;;  %v4826_v40 = vld [vmem:[%s5067_s22 + $0x240] ss:$8 sps:$4 sm:$0xff]  }
  0x84   : > { %3228 = vmatpush1.bf16.msra.mxu0 %v4781_v41  ;;  %2777 = vmatprep.subr.bf16.mxu1 %v4786_v48  ;;  %v4829_v41 = vld [vmem:[%s5067_s22 + $0x640] ss:$8 sps:$4 sm:$0xff]   ;;  %v4834_v48 = vld [vmem:[%s5067_s22 + $0x254] ss:$8 sps:$4 sm:$0xff]  }
  0x85   : > { %3229 = vmatprep.subr.bf16.mxu0 %v4789_v49  ;;  %2740 = vmatprep.mubr.bf16.mxu1 %v4054_v50  ;;  %v391_v45 = vld [vmem:[%s5117_s26 + $0x1c8] sm:$0xff]  ;;  %v4837_v49 = vld [vmem:[%s5067_s22 + $0x654] ss:$8 sps:$4 sm:$0xff]  }
  0x86   : > { %3192 = vmatprep.mubr.bf16.mxu0 %v4062_v51  ;;  %v3992_v50 = vcombine.high %v383_v42, %v391_v45  ;;  %v4000_v51 = vcombine.high %v387_v46, %v395_v47  ;;  %v435_v29 = vld [vmem:[%s5117_s26 + $0x328] sm:$0xff] }
  0x87   : > { %2778 = vmatpush1.bf16.msra.mxu1 %v4784_v52  ;;  %v4832_v52 = vld [vmem:[%s5067_s22 + $0x250] ss:$8 sps:$4 sm:$0xff]  }
  0x88   : > { %3230 = vmatpush1.bf16.msra.mxu0 %v4787_v53  ;;  %2779 = vmatprep.subr.bf16.mxu1 %v4792_v54  ;;  %v4835_v53 = vld [vmem:[%s5067_s22 + $0x650] ss:$8 sps:$4 sm:$0xff]   ;;  %v4840_v54 = vld [vmem:[%s5067_s22 + $0x264] ss:$8 sps:$4 sm:$0xff]  }
  0x89   : > { %3231 = vmatprep.subr.bf16.mxu0 %v4795_v55  ;;  %v4843_v55 = vld [vmem:[%s5067_s22 + $0x664] ss:$8 sps:$4 sm:$0xff]  }
  0x8a   : > { %2741 = vmatmul.mubr.bf16.gmra.mrb[28].mxu1 %v4053_v60  ;;  %v3991_v60 = vcombine.low %v383_v42, %v391_v45  ;;  %v459_v45 = vld [vmem:[%s5117_s26 + $0x3e8] sm:$0xff] }
  0x8b   : > { %3193 = vmatmul.mubr.bf16.gmra.mrb[28].mxu0 %v4061_v61  ;;  %2780 = vmatpush1.bf16.msra.mxu1 %v4790_v56  ;;  %v4838_v56 = vld [vmem:[%s5067_s22 + $0x260] ss:$8 sps:$4 sm:$0xff]   ;;  %v3999_v61 = vcombine.low %v387_v46, %v395_v47 }
  0x8c   : > { %3232 = vmatpush1.bf16.msra.mxu0 %v4793_v57  ;;  %2781 = vmatprep.subr.bf16.mxu1 %v4798_v0  ;;  %v4841_v57 = vld [vmem:[%s5067_s22 + $0x660] ss:$8 sps:$4 sm:$0xff]   ;;  %v4846_v0 = vld [vmem:[%s5067_s22 + $0x274] ss:$8 sps:$4 sm:$0xff]  }
  0x8d   : > { %3233 = vmatprep.subr.bf16.mxu0 %v4801_v1  ;;  %2783 = vmatprep.mubr.bf16.mxu1 %v3944_v2  ;;  %v4849_v1 = vld [vmem:[%s5067_s22 + $0x674] ss:$8 sps:$4 sm:$0xff]   ;;  %v4008_v2 = vcombine.high %v399_v58, %v407_v59  ;;  %v4874_v46 = vld [vmem:[%s5067_s22 + $0x2c0] ss:$8 sps:$4 sm:$0xff]  }
  0x8e   : > { %3235 = vmatprep.mubr.bf16.mxu0 %v3952_v3  ;;  %v4016_v3 = vcombine.high %v403_v62, %v411_v63  ;;  %v4877_v47 = vld [vmem:[%s5067_s22 + $0x6c0] ss:$8 sps:$4 sm:$0xff]   ;;  %v340_v62 = vld [vmem:[%s5117_s26 + $0x30] sm:$0xff] }
  0x8f   : > { %2782 = vmatpush1.bf16.msra.mxu1 %v4796_v4  ;;  %v4844_v4 = vld [vmem:[%s5067_s22 + $0x270] ss:$8 sps:$4 sm:$0xff]  }
  0x90   : > { %3234 = vmatpush1.bf16.msra.mxu0 %v4799_v5  ;;  %2864 = vmatprep.subr.bf16.mxu1 %v4804_v6  ;;  %v4847_v5 = vld [vmem:[%s5067_s22 + $0x670] ss:$8 sps:$4 sm:$0xff]   ;;  %v4852_v6 = vld [vmem:[%s5067_s22 + $0x284] ss:$8 sps:$4 sm:$0xff]  }
  0x91   : > { %3316 = vmatprep.subr.bf16.mxu0 %v4807_v7  ;;  %v4855_v7 = vld [vmem:[%s5067_s22 + $0x684] ss:$8 sps:$4 sm:$0xff]   ;;  %v348_v63 = vld [vmem:[%s5117_s26 + $0x70] sm:$0xff] }
  0x92   : > { %2784 = vmatmul.mubr.bf16.vlgmr.msra.gmra.mrb[0].mxu1 %v3943_v11  ;;  %v423_v11 = vld [vmem:[%s5117_s26 + $0x2c8] sm:$0xff] }
  0x93   : > { %3236 = vmatmul.mubr.bf16.vlgmr.msra.gmra.mrb[0].mxu0 %v3951_v12  ;;  %2865 = vmatpush1.bf16.msra.mxu1 %v4802_v8  ;;  %v4850_v8 = vld [vmem:[%s5067_s22 + $0x280] ss:$8 sps:$4 sm:$0xff]   ;;  %v4007_v12 = vcombine.low %v399_v58, %v407_v59  ;;  %v336_v58 = vld [vmem:[%s5117_s26 + $0x10] sm:$0xff] }
  0x94   : > { %3317 = vmatpush1.bf16.msra.mxu0 %v4805_v15  ;;  %2866 = vmatprep.subr.bf16.mxu1 %v4810_v16  ;;  %v427_v15 = vld [vmem:[%s5117_s26 + $0x2e8] sm:$0xff]  ;;  %v4858_v16 = vld [vmem:[%s5067_s22 + $0x294] ss:$8 sps:$4 sm:$0xff]  }
  0x95   : > { %3318 = vmatprep.subr.bf16.mxu0 %v4813_v17  ;;  %2793 = vmatprep.mubr.bf16.mxu1 %v3960_v18  ;;  %v4861_v17 = vld [vmem:[%s5067_s22 + $0x694] ss:$8 sps:$4 sm:$0xff]   ;;  %v4024_v18 = vcombine.high %v415_v10, %v423_v11  ;;  %v4031_v28 = vcombine.low %v419_v14, %v427_v15 }
  0x96   : > { %3245 = vmatprep.mubr.bf16.mxu0 %v3968_v19  ;;  %v4032_v19 = vcombine.high %v419_v14, %v427_v15  ;;  %v356_v14 = vld [vmem:[%s5117_s26 + $0xb0] sm:$0xff] }
  0x97   : > { %2867 = vmatpush1.bf16.msra.mxu1 %v4808_v20  ;;  %v4856_v20 = vld [vmem:[%s5067_s22 + $0x290] ss:$8 sps:$4 sm:$0xff]  }
  0x98   : > { %3319 = vmatpush1.bf16.msra.mxu0 %v4811_v21  ;;  %2868 = vmatprep.subr.bf16.mxu1 %v4816_v22  ;;  %v4859_v21 = vld [vmem:[%s5067_s22 + $0x690] ss:$8 sps:$4 sm:$0xff]   ;;  %v4864_v22 = vld [vmem:[%s5067_s22 + $0x2a4] ss:$8 sps:$4 sm:$0xff]  }
  0x99   : > { %3320 = vmatprep.subr.bf16.mxu0 %v4819_v23  ;;  %v4867_v23 = vld [vmem:[%s5067_s22 + $0x6a4] ss:$8 sps:$4 sm:$0xff]   ;;  %v364_v15 = vld [vmem:[%s5117_s26 + $0xf0] sm:$0xff] }
  0x9a   : > { %2794 = vmatmul.mubr.bf16.gmra.mrb[4].mxu1 %v3959_v26  ;;  %v439_v26 = vld [vmem:[%s5117_s26 + $0x348] sm:$0xff] }
  0x9b   : > { %3246 = vmatmul.mubr.bf16.gmra.mrb[4].mxu0 %v3967_v27  ;;  %2869 = vmatpush1.bf16.msra.mxu1 %v4814_v30  ;;  %v4023_v27 = vcombine.low %v415_v10, %v423_v11  ;;  %v443_v30 = vld [vmem:[%s5117_s26 + $0x368] sm:$0xff]  ;;  %v4039_v42 = vcombine.low %v431_v25, %v439_v26  ;;  %v352_v10 = vld [vmem:[%s5117_s26 + $0x90] sm:$0xff] }
  0x9c   : > { %3321 = vmatpush1.bf16.msra.mxu0 %v4817_v31  ;;  %2870 = vmatprep.subr.bf16.mxu1 %v4822_v32  ;;  %v4865_v31 = vld [vmem:[%s5067_s22 + $0x6a0] ss:$8 sps:$4 sm:$0xff]   ;;  %v4870_v32 = vld [vmem:[%s5067_s22 + $0x2b4] ss:$8 sps:$4 sm:$0xff]  }
  0x9d   : > { %3322 = vmatprep.subr.bf16.mxu0 %v4825_v33  ;;  %2803 = vmatprep.mubr.bf16.mxu1 %v3976_v34  ;;  %v4873_v33 = vld [vmem:[%s5067_s22 + $0x6b4] ss:$8 sps:$4 sm:$0xff]   ;;  %v4040_v34 = vcombine.high %v431_v25, %v439_v26  ;;  %v4913_v25 = vld [vmem:[%s5067_s22 + $0x720] ss:$8 sps:$4 sm:$0xff]  }
  0x9e   : > { %3255 = vmatprep.mubr.bf16.mxu0 %v3984_v35  ;;  %v4048_v35 = vcombine.high %v435_v29, %v443_v30  ;;  %v360_v11 = vld [vmem:[%s5117_s26 + $0xd0] sm:$0xff] }
  0x9f   : > { %2871 = vmatpush1.bf16.msra.mxu1 %v4820_v36  ;;  %v4868_v36 = vld [vmem:[%s5067_s22 + $0x2b0] ss:$8 sps:$4 sm:$0xff]  }
  0xa0   : > { %3323 = vmatpush1.bf16.msra.mxu0 %v4823_v37  ;;  %2872 = vmatprep.subr.bf16.mxu1 %v4828_v38  ;;  %v4871_v37 = vld [vmem:[%s5067_s22 + $0x6b0] ss:$8 sps:$4 sm:$0xff]   ;;  %v4876_v38 = vld [vmem:[%s5067_s22 + $0x2c4] ss:$8 sps:$4 sm:$0xff]  }
  0xa1   : > { %3324 = vmatprep.subr.bf16.mxu0 %v4831_v39  ;;  %v4879_v39 = vld [vmem:[%s5067_s22 + $0x6c4] ss:$8 sps:$4 sm:$0xff]   ;;  %v368_v26 = vld [vmem:[%s5117_s26 + $0x110] sm:$0xff] }
  0xa2   : > { %2804 = vmatmul.mubr.bf16.gmra.mrb[8].mxu1 %v3975_v43  ;;  %v4047_v43 = vcombine.low %v435_v29, %v443_v30  ;;  %v3969_v29 = vcombine.low %v356_v14, %v364_v15  ;;  %v372_v30 = vld [vmem:[%s5117_s26 + $0x130] sm:$0xff] }
  0xa3   : > { %3256 = vmatmul.mubr.bf16.gmra.mrb[8].mxu0 %v3983_v44  ;;  %2873 = vmatpush1.bf16.msra.mxu1 %v4826_v40  ;;  %v447_v40 = vld [vmem:[%s5117_s26 + $0x388] sm:$0xff] }
  0xa4   : > { %3325 = vmatpush1.bf16.msra.mxu0 %v4829_v41  ;;  %2874 = vmatprep.subr.bf16.mxu1 %v4834_v48  ;;  %v455_v41 = vld [vmem:[%s5117_s26 + $0x3c8] sm:$0xff]  ;;  %v4882_v48 = vld [vmem:[%s5067_s22 + $0x2d4] ss:$8 sps:$4 sm:$0xff]  }
  0xa5   : > { %3326 = vmatprep.subr.bf16.mxu0 %v4837_v49  ;;  %2813 = vmatprep.mubr.bf16.mxu1 %v3992_v50  ;;  %v451_v44 = vld [vmem:[%s5117_s26 + $0x3a8] sm:$0xff]  ;;  %v4885_v49 = vld [vmem:[%s5067_s22 + $0x6d4] ss:$8 sps:$4 sm:$0xff]   ;;  %v4056_v50 = vcombine.high %v447_v40, %v455_v41  ;;  %v4055_v59 = vcombine.low %v447_v40, %v455_v41 }
  0xa6   : > { %3265 = vmatprep.mubr.bf16.mxu0 %v4000_v51  ;;  %v4064_v51 = vcombine.high %v451_v44, %v459_v45  ;;  %v384_v40 = vld [vmem:[%s5117_s26 + $0x190] sm:$0xff] }
  0xa7   : > { %2875 = vmatpush1.bf16.msra.mxu1 %v4832_v52  ;;  %v4880_v52 = vld [vmem:[%s5067_s22 + $0x2d0] ss:$8 sps:$4 sm:$0xff]  }
  0xa8   : > { %3327 = vmatpush1.bf16.msra.mxu0 %v4835_v53  ;;  %2876 = vmatprep.subr.bf16.mxu1 %v4840_v54  ;;  %v4883_v53 = vld [vmem:[%s5067_s22 + $0x6d0] ss:$8 sps:$4 sm:$0xff]   ;;  %v4888_v54 = vld [vmem:[%s5067_s22 + $0x2e4] ss:$8 sps:$4 sm:$0xff]  }
  0xa9   : > { %3328 = vmatprep.subr.bf16.mxu0 %v4843_v55  ;;  %v4891_v55 = vld [vmem:[%s5067_s22 + $0x6e4] ss:$8 sps:$4 sm:$0xff]  }
  0xaa   : > { %2814 = vmatmul.mubr.bf16.gmra.mrb[12].mxu1 %v3991_v60  ;;  %v4063_v60 = vcombine.low %v451_v44, %v459_v45  ;;  %v388_v44 = vld [vmem:[%s5117_s26 + $0x1b0] sm:$0xff] }
  0xab   : > { %3266 = vmatmul.mubr.bf16.gmra.mrb[12].mxu0 %v3999_v61  ;;  %2877 = vmatpush1.bf16.msra.mxu1 %v4838_v56  ;;  %v4886_v56 = vld [vmem:[%s5067_s22 + $0x2e0] ss:$8 sps:$4 sm:$0xff]   ;;  %v344_v61 = vld [vmem:[%s5117_s26 + $0x50] sm:$0xff] }
  0xac   : > { %3329 = vmatpush1.bf16.msra.mxu0 %v4841_v57  ;;  %2878 = vmatprep.subr.bf16.mxu1 %v4846_v0  ;;  %v4889_v57 = vld [vmem:[%s5067_s22 + $0x6e0] ss:$8 sps:$4 sm:$0xff]   ;;  %v4894_v0 = vld [vmem:[%s5067_s22 + $0x2f4] ss:$8 sps:$4 sm:$0xff]  }
  0xad   : > { %3330 = vmatprep.subr.bf16.mxu0 %v4849_v1  ;;  %2823 = vmatprep.mubr.bf16.mxu1 %v4008_v2  ;;  %v4897_v1 = vld [vmem:[%s5067_s22 + $0x6f4] ss:$8 sps:$4 sm:$0xff]   ;;  %v3946_v2 = vcombine.high %v336_v58, %v344_v61 }
  0xae   : > { %3275 = vmatprep.mubr.bf16.mxu0 %v4016_v3  ;;  %v3954_v3 = vcombine.high %v340_v62, %v348_v63  ;;  %v396_v45 = vld [vmem:[%s5117_s26 + $0x1f0] sm:$0xff] }
  0xaf   : > { %2879 = vmatpush1.bf16.msra.mxu1 %v4844_v4  ;;  %v4892_v4 = vld [vmem:[%s5067_s22 + $0x2f0] ss:$8 sps:$4 sm:$0xff]  }
  0xb0   : > { %3331 = vmatpush1.bf16.msra.mxu0 %v4847_v5  ;;  %2880 = vmatprep.subr.bf16.mxu1 %v4852_v6  ;;  %v4895_v5 = vld [vmem:[%s5067_s22 + $0x6f0] ss:$8 sps:$4 sm:$0xff]   ;;  %v4900_v6 = vld [vmem:[%s5067_s22 + $0x304] ss:$8 sps:$4 sm:$0xff]  }
  0xb1   : > { %3332 = vmatprep.subr.bf16.mxu0 %v4855_v7  ;;  %v4903_v7 = vld [vmem:[%s5067_s22 + $0x704] ss:$8 sps:$4 sm:$0xff]  }
  0xb2   : > { %2824 = vmatmul.mubr.bf16.gmra.mrb[16].mxu1 %v4007_v12  ;;  %v3945_v12 = vcombine.low %v336_v58, %v344_v61  ;;  %v4001_v58 = vcombine.low %v388_v44, %v396_v45  ;;  %v412_v61 = vld [vmem:[%s5117_s26 + $0x270] sm:$0xff] }
  0xb3   : > { %3276 = vmatmul.mubr.bf16.gmra.mrb[16].mxu0 %v4015_v13  ;;  %2881 = vmatpush1.bf16.msra.mxu1 %v4850_v8  ;;  %v4898_v8 = vld [vmem:[%s5067_s22 + $0x300] ss:$8 sps:$4 sm:$0xff]   ;;  %v3953_v13 = vcombine.low %v340_v62, %v348_v63 }
  0xb4   : > { %3333 = vmatpush1.bf16.msra.mxu0 %v4853_v9  ;;  %2882 = vmatprep.subr.bf16.mxu1 %v4858_v16  ;;  %v4901_v9 = vld [vmem:[%s5067_s22 + $0x700] ss:$8 sps:$4 sm:$0xff]   ;;  %v4906_v16 = vld [vmem:[%s5067_s22 + $0x314] ss:$8 sps:$4 sm:$0xff]  }
  0xb5   : > { %3334 = vmatprep.subr.bf16.mxu0 %v4861_v17  ;;  %2833 = vmatprep.mubr.bf16.mxu1 %v4024_v18  ;;  %v4909_v17 = vld [vmem:[%s5067_s22 + $0x714] ss:$8 sps:$4 sm:$0xff]   ;;  %v3962_v18 = vcombine.high %v352_v10, %v360_v11  ;;  %v4934_v62 = vld [vmem:[%s5067_s22 + $0x360] ss:$8 sps:$4 sm:$0xff]  }
  0xb6   : > { %3285 = vmatprep.mubr.bf16.mxu0 %v4032_v19  ;;  %v3970_v19 = vcombine.high %v356_v14, %v364_v15  ;;  %v4937_v63 = vld [vmem:[%s5067_s22 + $0x760] ss:$8 sps:$4 sm:$0xff]  }
  0xb7   : > { %2883 = vmatpush1.bf16.msra.mxu1 %v4856_v20  ;;  %v4904_v20 = vld [vmem:[%s5067_s22 + $0x310] ss:$8 sps:$4 sm:$0xff]   ;;  %v4946_v14 = vld [vmem:[%s5067_s22 + $0x380] ss:$8 sps:$4 sm:$0xff]  }
  0xb8   : > { %3335 = vmatpush1.bf16.msra.mxu0 %v4859_v21  ;;  %2884 = vmatprep.subr.bf16.mxu1 %v4864_v22  ;;  %v4907_v21 = vld [vmem:[%s5067_s22 + $0x710] ss:$8 sps:$4 sm:$0xff]   ;;  %v4912_v22 = vld [vmem:[%s5067_s22 + $0x324] ss:$8 sps:$4 sm:$0xff]   ;;  %v4949_v15 = vld [vmem:[%s5067_s22 + $0x780] ss:$8 sps:$4 sm:$0xff]  }
  0xb9   : > { %3336 = vmatprep.subr.bf16.mxu0 %v4867_v23  ;;  %v4915_v23 = vld [vmem:[%s5067_s22 + $0x724] ss:$8 sps:$4 sm:$0xff]  }
  0xba   : > { %2834 = vmatmul.mubr.bf16.gmra.mrb[20].mxu1 %v4023_v27  ;;  %v376_v27 = vld [vmem:[%s5117_s26 + $0x150] sm:$0xff] }
  0xbb   : > { %3286 = vmatmul.mubr.bf16.gmra.mrb[20].mxu0 %v4031_v28  ;;  %2885 = vmatpush1.bf16.msra.mxu1 %v4862_v24  ;;  %v4910_v24 = vld [vmem:[%s5067_s22 + $0x320] ss:$8 sps:$4 sm:$0xff]   ;;  %v3961_v28 = vcombine.low %v352_v10, %v360_v11  ;;  %v3977_v41 = vcombine.low %v368_v26, %v376_v27  ;;  %v424_v11 = vld [vmem:[%s5117_s26 + $0x2d0] sm:$0xff] }
  0xbc   : > { %3337 = vmatpush1.bf16.msra.mxu0 %v4865_v31  ;;  %2886 = vmatprep.subr.bf16.mxu1 %v4870_v32  ;;  %v380_v31 = vld [vmem:[%s5117_s26 + $0x170] sm:$0xff] }
  0xbd   : > { %3338 = vmatprep.subr.bf16.mxu0 %v4873_v33  ;;  %2843 = vmatprep.mubr.bf16.mxu1 %v4040_v34  ;;  %v4918_v32 = vld [vmem:[%s5067_s22 + $0x334] ss:$8 sps:$4 sm:$0xff]   ;;  %v3978_v34 = vcombine.high %v368_v26, %v376_v27 }
  0xbe   : > { %3295 = vmatprep.mubr.bf16.mxu0 %v4048_v35  ;;  %v4921_v33 = vld [vmem:[%s5067_s22 + $0x734] ss:$8 sps:$4 sm:$0xff]   ;;  %v3986_v35 = vcombine.high %v372_v30, %v380_v31 }
  0xbf   : > { %2887 = vmatpush1.bf16.msra.mxu1 %v4868_v36  ;;  %v4916_v36 = vld [vmem:[%s5067_s22 + $0x330] ss:$8 sps:$4 sm:$0xff]  }
  0xc0   : > { %3339 = vmatpush1.bf16.msra.mxu0 %v4871_v37  ;;  %2888 = vmatprep.subr.bf16.mxu1 %v4876_v38  ;;  %v4919_v37 = vld [vmem:[%s5067_s22 + $0x730] ss:$8 sps:$4 sm:$0xff]   ;;  %v4924_v38 = vld [vmem:[%s5067_s22 + $0x344] ss:$8 sps:$4 sm:$0xff]  }
  0xc1   : > { %3340 = vmatprep.subr.bf16.mxu0 %v4879_v39  ;;  %v4927_v39 = vld [vmem:[%s5067_s22 + $0x744] ss:$8 sps:$4 sm:$0xff]   ;;  %v440_v27 = vld [vmem:[%s5117_s26 + $0x350] sm:$0xff] }
  0xc2   : > { %2844 = vmatmul.mubr.bf16.gmra.mrb[24].mxu1 %v4039_v42  ;;  %v3985_v42 = vcombine.low %v372_v30, %v380_v31  ;;  %v4958_v30 = vld [vmem:[%s5067_s22 + $0x3a0] ss:$8 sps:$4 sm:$0xff]  }
  0xc3   : > { %3296 = vmatmul.mubr.bf16.gmra.mrb[24].mxu0 %v4047_v43  ;;  %2889 = vmatpush1.bf16.msra.mxu1 %v4874_v46  ;;  %v392_v43 = vld [vmem:[%s5117_s26 + $0x1d0] sm:$0xff]  ;;  %v4922_v46 = vld [vmem:[%s5067_s22 + $0x340] ss:$8 sps:$4 sm:$0xff]  }
  0xc4   : > { %3341 = vmatpush1.bf16.msra.mxu0 %v4877_v47  ;;  %2890 = vmatprep.subr.bf16.mxu1 %v4882_v48  ;;  %v4925_v47 = vld [vmem:[%s5067_s22 + $0x740] ss:$8 sps:$4 sm:$0xff]   ;;  %v4930_v48 = vld [vmem:[%s5067_s22 + $0x354] ss:$8 sps:$4 sm:$0xff]  }
  0xc5   : > { %3342 = vmatprep.subr.bf16.mxu0 %v4885_v49  ;;  %2853 = vmatprep.mubr.bf16.mxu1 %v4056_v50  ;;  %v4933_v49 = vld [vmem:[%s5067_s22 + $0x754] ss:$8 sps:$4 sm:$0xff]   ;;  %v3994_v50 = vcombine.high %v384_v40, %v392_v43  ;;  %v4961_v31 = vld [vmem:[%s5067_s22 + $0x7a0] ss:$8 sps:$4 sm:$0xff]  }
  0xc6   : > { %3305 = vmatprep.mubr.bf16.mxu0 %v4064_v51  ;;  %v4002_v51 = vcombine.high %v388_v44, %v396_v45  ;;  %v452_v44 = vld [vmem:[%s5117_s26 + $0x3b0] sm:$0xff] }
  0xc7   : > { %2891 = vmatpush1.bf16.msra.mxu1 %v4880_v52  ;;  %v4928_v52 = vld [vmem:[%s5067_s22 + $0x350] ss:$8 sps:$4 sm:$0xff]  }
  0xc8   : > { %3343 = vmatpush1.bf16.msra.mxu0 %v4883_v53  ;;  %2892 = vmatprep.subr.bf16.mxu1 %v4888_v54  ;;  %v4931_v53 = vld [vmem:[%s5067_s22 + $0x750] ss:$8 sps:$4 sm:$0xff]   ;;  %v4936_v54 = vld [vmem:[%s5067_s22 + $0x364] ss:$8 sps:$4 sm:$0xff]  }
  0xc9   : > { %3344 = vmatprep.subr.bf16.mxu0 %v4891_v55  ;;  %v4939_v55 = vld [vmem:[%s5067_s22 + $0x764] ss:$8 sps:$4 sm:$0xff]   ;;  %v460_v45 = vld [vmem:[%s5117_s26 + $0x3f0] sm:$0xff] }
  0xca   : > { %2854 = vmatmul.mubr.bf16.gmra.mrb[28].mxu1 %v4055_v59  ;;  %v408_v59 = vld [vmem:[%s5117_s26 + $0x250] sm:$0xff] }
  0xcb   : > { %3306 = vmatmul.mubr.bf16.gmra.mrb[28].mxu0 %v4063_v60  ;;  %2893 = vmatpush1.bf16.msra.mxu1 %v4886_v56  ;;  %v400_v56 = vld [vmem:[%s5117_s26 + $0x210] sm:$0xff] }
  0xcc   : > { %3345 = vmatpush1.bf16.msra.mxu0 %v4889_v57  ;;  %2894 = vmatprep.subr.bf16.mxu1 %v4894_v0  ;;  %v3993_v57 = vcombine.low %v384_v40, %v392_v43  ;;  %v404_v60 = vld [vmem:[%s5117_s26 + $0x230] sm:$0xff] }
  0xcd   : > { %3346 = vmatprep.subr.bf16.mxu0 %v4897_v1  ;;  %2896 = vmatprep.mubr.bf16.mxu1 %v3946_v2  ;;  %v4942_v0 = vld [vmem:[%s5067_s22 + $0x374] ss:$8 sps:$4 sm:$0xff]   ;;  %v4010_v2 = vcombine.high %v400_v56, %v408_v59  ;;  %v4017_v10 = vcombine.low %v404_v60, %v412_v61 }
  0xce   : > { %3348 = vmatprep.mubr.bf16.mxu0 %v3954_v3  ;;  %v4945_v1 = vld [vmem:[%s5067_s22 + $0x774] ss:$8 sps:$4 sm:$0xff]   ;;  %v4018_v3 = vcombine.high %v404_v60, %v412_v61 }
  0xcf   : > { %2895 = vmatpush1.bf16.msra.mxu1 %v4892_v4  ;;  %v4940_v4 = vld [vmem:[%s5067_s22 + $0x370] ss:$8 sps:$4 sm:$0xff]  }
  0xd0   : > { %3347 = vmatpush1.bf16.msra.mxu0 %v4895_v5  ;;  %2977 = vmatprep.subr.bf16.mxu1 %v4900_v6  ;;  %v4943_v5 = vld [vmem:[%s5067_s22 + $0x770] ss:$8 sps:$4 sm:$0xff]   ;;  %v4948_v6 = vld [vmem:[%s5067_s22 + $0x384] ss:$8 sps:$4 sm:$0xff]  }
  0xd1   : > { %3429 = vmatprep.subr.bf16.mxu0 %v4903_v7  ;;  %v4951_v7 = vld [vmem:[%s5067_s22 + $0x784] ss:$8 sps:$4 sm:$0xff]   ;;  %v448_v40 = vld [vmem:[%s5117_s26 + $0x390] sm:$0xff]  ;;  %v341_v60 = vld [vmem:[%s5117_s26 + $0x38] sm:$0xff] }
  0xd2   : > { %2897 = vmatmul.mubr.bf16.vlgmr.msra.gmra.mrb[0].mxu1 %v3945_v12  ;;  %v420_v12 = vld [vmem:[%s5117_s26 + $0x2b0] sm:$0xff]  ;;  %v349_v61 = vld [vmem:[%s5117_s26 + $0x78] sm:$0xff] }
  0xd3   : > { %3349 = vmatmul.mubr.bf16.vlgmr.msra.gmra.mrb[0].mxu0 %v3953_v13  ;;  %2978 = vmatpush1.bf16.msra.mxu1 %v4898_v8  ;;  %v416_v8 = vld [vmem:[%s5117_s26 + $0x290] sm:$0xff] }
  0xd4   : > { %3430 = vmatpush1.bf16.msra.mxu0 %v4901_v9  ;;  %2979 = vmatprep.subr.bf16.mxu1 %v4906_v16  ;;  %v4009_v9 = vcombine.low %v400_v56, %v408_v59  ;;  %v428_v13 = vld [vmem:[%s5117_s26 + $0x2f0] sm:$0xff]  ;;  %v337_v56 = vld [vmem:[%s5117_s26 + $0x18] sm:$0xff] }
  0xd5   : > { %3431 = vmatprep.subr.bf16.mxu0 %v4909_v17  ;;  %2906 = vmatprep.mubr.bf16.mxu1 %v3962_v18  ;;  %v4954_v16 = vld [vmem:[%s5067_s22 + $0x394] ss:$8 sps:$4 sm:$0xff]   ;;  %v4026_v18 = vcombine.high %v416_v8, %v424_v11  ;;  %v4033_v26 = vcombine.low %v420_v12, %v428_v13 }
  0xd6   : > { %3358 = vmatprep.mubr.bf16.mxu0 %v3970_v19  ;;  %v4957_v17 = vld [vmem:[%s5067_s22 + $0x794] ss:$8 sps:$4 sm:$0xff]   ;;  %v4034_v19 = vcombine.high %v420_v12, %v428_v13 }
  0xd7   : > { %2980 = vmatpush1.bf16.msra.mxu1 %v4904_v20  ;;  %v4952_v20 = vld [vmem:[%s5067_s22 + $0x390] ss:$8 sps:$4 sm:$0xff]  }
  0xd8   : > { %3432 = vmatpush1.bf16.msra.mxu0 %v4907_v21  ;;  %2981 = vmatprep.subr.bf16.mxu1 %v4912_v22  ;;  %v4955_v21 = vld [vmem:[%s5067_s22 + $0x790] ss:$8 sps:$4 sm:$0xff]   ;;  %v4960_v22 = vld [vmem:[%s5067_s22 + $0x3a4] ss:$8 sps:$4 sm:$0xff]  }
  0xd9   : > { %3433 = vmatprep.subr.bf16.mxu0 %v4915_v23  ;;  %v4963_v23 = vld [vmem:[%s5067_s22 + $0x7a4] ss:$8 sps:$4 sm:$0xff]   ;;  %v456_v43 = vld [vmem:[%s5117_s26 + $0x3d0] sm:$0xff]  ;;  %v345_v59 = vld [vmem:[%s5117_s26 + $0x58] sm:$0xff] }
  0xda   : > { %2907 = vmatmul.mubr.bf16.gmra.mrb[4].mxu1 %v3961_v28  ;;  %v436_v28 = vld [vmem:[%s5117_s26 + $0x330] sm:$0xff] }
  0xdb   : > { %3359 = vmatmul.mubr.bf16.gmra.mrb[4].mxu0 %v3969_v29  ;;  %2982 = vmatpush1.bf16.msra.mxu1 %v4910_v24  ;;  %v432_v24 = vld [vmem:[%s5117_s26 + $0x310] sm:$0xff] }
  0xdc   : > { %3434 = vmatpush1.bf16.msra.mxu0 %v4913_v25  ;;  %2983 = vmatprep.subr.bf16.mxu1 %v4918_v32  ;;  %v4025_v25 = vcombine.low %v416_v8, %v424_v11  ;;  %v444_v29 = vld [vmem:[%s5117_s26 + $0x370] sm:$0xff]  ;;  %v357_v8 = vld [vmem:[%s5117_s26 + $0xb8] sm:$0xff]  ;;  %v3955_v11 = vcombine.low %v341_v60, %v349_v61 }
  0xdd   : > { %3435 = vmatprep.subr.bf16.mxu0 %v4921_v33  ;;  %2916 = vmatprep.mubr.bf16.mxu1 %v3978_v34  ;;  %v4966_v32 = vld [vmem:[%s5067_s22 + $0x3b4] ss:$8 sps:$4 sm:$0xff]   ;;  %v4042_v34 = vcombine.high %v432_v24, %v440_v27 }
  0xde   : > { %3368 = vmatprep.mubr.bf16.mxu0 %v3986_v35  ;;  %v4969_v33 = vld [vmem:[%s5067_s22 + $0x7b4] ss:$8 sps:$4 sm:$0xff]   ;;  %v4050_v35 = vcombine.high %v436_v28, %v444_v29 }
  0xdf   : > { %2984 = vmatpush1.bf16.msra.mxu1 %v4916_v36  ;;  %v4964_v36 = vld [vmem:[%s5067_s22 + $0x3b0] ss:$8 sps:$4 sm:$0xff]  }
  0xe0   : > { %3436 = vmatpush1.bf16.msra.mxu0 %v4919_v37  ;;  %2985 = vmatprep.subr.bf16.mxu1 %v4924_v38  ;;  %v4967_v37 = vld [vmem:[%s5067_s22 + $0x7b0] ss:$8 sps:$4 sm:$0xff]   ;;  %v4972_v38 = vld [vmem:[%s5067_s22 + $0x3c4] ss:$8 sps:$4 sm:$0xff]  }
  0xe1   : > { %3437 = vmatprep.subr.bf16.mxu0 %v4927_v39  ;;  %v4975_v39 = vld [vmem:[%s5067_s22 + $0x7c4] ss:$8 sps:$4 sm:$0xff]  }
  0xe2   : > { %2917 = vmatmul.mubr.bf16.gmra.mrb[8].mxu1 %v3977_v41  ;;  %v4041_v41 = vcombine.low %v432_v24, %v440_v27  ;;  %v389_v24 = vld [vmem:[%s5117_s26 + $0x1b8] sm:$0xff] }
  0xe3   : > { %3369 = vmatmul.mubr.bf16.gmra.mrb[8].mxu0 %v3985_v42  ;;  %2986 = vmatpush1.bf16.msra.mxu1 %v4922_v46  ;;  %v4049_v42 = vcombine.low %v436_v28, %v444_v29  ;;  %v4970_v46 = vld [vmem:[%s5067_s22 + $0x3c0] ss:$8 sps:$4 sm:$0xff]  }
  0xe4   : > { %3438 = vmatpush1.bf16.msra.mxu0 %v4925_v47  ;;  %2987 = vmatprep.subr.bf16.mxu1 %v4930_v48  ;;  %v4973_v47 = vld [vmem:[%s5067_s22 + $0x7c0] ss:$8 sps:$4 sm:$0xff]   ;;  %v4978_v48 = vld [vmem:[%s5067_s22 + $0x3d4] ss:$8 sps:$4 sm:$0xff]  }
  0xe5   : > { %3439 = vmatprep.subr.bf16.mxu0 %v4933_v49  ;;  %2926 = vmatprep.mubr.bf16.mxu1 %v3994_v50  ;;  %v4981_v49 = vld [vmem:[%s5067_s22 + $0x7d4] ss:$8 sps:$4 sm:$0xff]   ;;  %v4058_v50 = vcombine.high %v448_v40, %v456_v43 }
  0xe6   : > { %3378 = vmatprep.mubr.bf16.mxu0 %v4002_v51  ;;  %v4066_v51 = vcombine.high %v452_v44, %v460_v45 }
  0xe7   : > { %2988 = vmatpush1.bf16.msra.mxu1 %v4928_v52  ;;  %v4976_v52 = vld [vmem:[%s5067_s22 + $0x3d0] ss:$8 sps:$4 sm:$0xff]  }
  0xe8   : > { %3440 = vmatpush1.bf16.msra.mxu0 %v4931_v53  ;;  %2989 = vmatprep.subr.bf16.mxu1 %v4936_v54  ;;  %v4979_v53 = vld [vmem:[%s5067_s22 + $0x7d0] ss:$8 sps:$4 sm:$0xff]   ;;  %v4984_v54 = vld [vmem:[%s5067_s22 + $0x3e4] ss:$8 sps:$4 sm:$0xff]  }
  0xe9   : > { %3441 = vmatprep.subr.bf16.mxu0 %v4939_v55  ;;  %v4987_v55 = vld [vmem:[%s5067_s22 + $0x7e4] ss:$8 sps:$4 sm:$0xff]  }
  0xea   : > { %2927 = vmatmul.mubr.bf16.gmra.mrb[12].mxu1 %v3993_v57  ;;  %v4057_v57 = vcombine.low %v448_v40, %v456_v43  ;;  %v421_v40 = vld [vmem:[%s5117_s26 + $0x2b8] sm:$0xff] }
  0xeb   : > { %3379 = vmatmul.mubr.bf16.gmra.mrb[12].mxu0 %v4001_v58  ;;  %2990 = vmatpush1.bf16.msra.mxu1 %v4934_v62  ;;  %v4065_v58 = vcombine.low %v452_v44, %v460_v45  ;;  %v4982_v62 = vld [vmem:[%s5067_s22 + $0x3e0] ss:$8 sps:$4 sm:$0xff]  }
  0xec   : > { %3442 = vmatpush1.bf16.msra.mxu0 %v4937_v63  ;;  %2991 = vmatprep.subr.bf16.mxu1 %v4942_v0  ;;  %v4985_v63 = vld [vmem:[%s5067_s22 + $0x7e0] ss:$8 sps:$4 sm:$0xff]   ;;  %v4990_v0 = vld [vmem:[%s5067_s22 + $0x3f4] ss:$8 sps:$4 sm:$0xff]  }
  0xed   : > { %3443 = vmatprep.subr.bf16.mxu0 %v4945_v1  ;;  %2936 = vmatprep.mubr.bf16.mxu1 %v4010_v2  ;;  %v4993_v1 = vld [vmem:[%s5067_s22 + $0x7f4] ss:$8 sps:$4 sm:$0xff]   ;;  %v3948_v2 = vcombine.high %v337_v56, %v345_v59 }
  0xee   : > { %3388 = vmatprep.mubr.bf16.mxu0 %v4018_v3  ;;  %v3956_v3 = vcombine.high %v341_v60, %v349_v61 }
  0xef   : > { %2992 = vmatpush1.bf16.msra.mxu1 %v4940_v4  ;;  %v4988_v4 = vld [vmem:[%s5067_s22 + $0x3f0] ss:$8 sps:$4 sm:$0xff]  }
  0xf0   : > { %3444 = vmatpush1.bf16.msra.mxu0 %v4943_v5  ;;  %2993 = vmatprep.subr.bf16.mxu1 %v4948_v6  ;;  %v4991_v5 = vld [vmem:[%s5067_s22 + $0x7f0] ss:$8 sps:$4 sm:$0xff]  }
  0xf1   : > { %3445 = vmatprep.subr.bf16.mxu0 %v4951_v7  ;;  %v353_v6 = vld [vmem:[%s5117_s26 + $0x98] sm:$0xff] }
  0xf2   : > { %2937 = vmatmul.mubr.bf16.gmra.mrb[16].mxu1 %v4009_v9  ;;  %v361_v7 = vld [vmem:[%s5117_s26 + $0xd8] sm:$0xff] }
  0xf3   : > { %3389 = vmatmul.mubr.bf16.gmra.mrb[16].mxu0 %v4017_v10  ;;  %2994 = vmatpush1.bf16.msra.mxu1 %v4946_v14  ;;  %v365_v9 = vld [vmem:[%s5117_s26 + $0xf8] sm:$0xff]  ;;  %v3947_v10 = vcombine.low %v337_v56, %v345_v59  ;;  %v3964_v12 = vcombine.high %v353_v6, %v361_v7 }
  0xf4   : > { %3446 = vmatpush1.bf16.msra.mxu0 %v4949_v15  ;;  %2995 = vmatprep.subr.bf16.mxu1 %v4954_v16  ;;  %v3972_v13 = vcombine.high %v357_v8, %v365_v9  ;;  %v369_v14 = vld [vmem:[%s5117_s26 + $0x118] sm:$0xff] }
  0xf5   : > { %3447 = vmatprep.subr.bf16.mxu0 %v4957_v17  ;;  %2946 = vmatprep.mubr.bf16.mxu1 %v4026_v18  ;;  %v377_v15 = vld [vmem:[%s5117_s26 + $0x158] sm:$0xff]  ;;  %v3963_v18 = vcombine.low %v353_v6, %v361_v7 }
  0xf6   : > { %3398 = vmatprep.mubr.bf16.mxu0 %v4034_v19  ;;  %v373_v16 = vld [vmem:[%s5117_s26 + $0x138] sm:$0xff]  ;;  %v3971_v19 = vcombine.low %v357_v8, %v365_v9 }
  0xf7   : > { %2996 = vmatpush1.bf16.msra.mxu1 %v4952_v20  ;;  %v381_v17 = vld [vmem:[%s5117_s26 + $0x178] sm:$0xff]  ;;  %v3980_v20 = vcombine.high %v369_v14, %v377_v15 }
  0xf8   : > { %3448 = vmatpush1.bf16.msra.mxu0 %v4955_v21  ;;  %2997 = vmatprep.subr.bf16.mxu1 %v4960_v22  ;;  %v3988_v21 = vcombine.high %v373_v16, %v381_v17  ;;  %v385_v22 = vld [vmem:[%s5117_s26 + $0x198] sm:$0xff]  ;;  %v3987_v27 = vcombine.low %v373_v16, %v381_v17 }
  0xf9   : > { %3449 = vmatprep.subr.bf16.mxu0 %v4963_v23  ;;  %v393_v23 = vld [vmem:[%s5117_s26 + $0x1d8] sm:$0xff] }
  0xfa   : > { %2947 = vmatmul.mubr.bf16.gmra.mrb[20].mxu1 %v4025_v25  ;;  %v397_v25 = vld [vmem:[%s5117_s26 + $0x1f8] sm:$0xff]  ;;  %v3996_v28 = vcombine.high %v385_v22, %v393_v23 }
  0xfb   : > { %3399 = vmatmul.mubr.bf16.gmra.mrb[20].mxu0 %v4033_v26  ;;  %2998 = vmatpush1.bf16.msra.mxu1 %v4958_v30  ;;  %v3979_v26 = vcombine.low %v369_v14, %v377_v15  ;;  %v4004_v29 = vcombine.high %v389_v24, %v397_v25  ;;  %v401_v30 = vld [vmem:[%s5117_s26 + $0x218] sm:$0xff] }
  0xfc   : > { %3450 = vmatpush1.bf16.msra.mxu0 %v4961_v31  ;;  %2999 = vmatprep.subr.bf16.mxu1 %v4966_v32  ;;  %v409_v31 = vld [vmem:[%s5117_s26 + $0x258] sm:$0xff] }
  0xfd   : > { %3451 = vmatprep.subr.bf16.mxu0 %v4969_v33  ;;  %2956 = vmatprep.mubr.bf16.mxu1 %v4042_v34  ;;  %v405_v32 = vld [vmem:[%s5117_s26 + $0x238] sm:$0xff]  ;;  %v3995_v34 = vcombine.low %v385_v22, %v393_v23 }
  0xfe   : > { %3408 = vmatprep.mubr.bf16.mxu0 %v4050_v35  ;;  %v413_v33 = vld [vmem:[%s5117_s26 + $0x278] sm:$0xff]  ;;  %v4003_v35 = vcombine.low %v389_v24, %v397_v25 }
  0xff   : > { %3000 = vmatpush1.bf16.msra.mxu1 %v4964_v36  ;;  %v4012_v36 = vcombine.high %v401_v30, %v409_v31  ;;  %v4019_v43 = vcombine.low %v405_v32, %v413_v33  ;;  %v453_v56 = vld [vmem:[%s5117_s26 + $0x3b8] sm:$0xff] }
 0x100   : > { %3452 = vmatpush1.bf16.msra.mxu0 %v4967_v37  ;;  %3001 = vmatprep.subr.bf16.mxu1 %v4972_v38  ;;  %v4020_v37 = vcombine.high %v405_v32, %v413_v33  ;;  %v417_v38 = vld [vmem:[%s5117_s26 + $0x298] sm:$0xff] }
 0x101   : > { %3453 = vmatprep.subr.bf16.mxu0 %v4975_v39  ;;  %v425_v39 = vld [vmem:[%s5117_s26 + $0x2d8] sm:$0xff] }
 0x102   : > { %2957 = vmatmul.mubr.bf16.gmra.mrb[24].mxu1 %v4041_v41  ;;  %v429_v41 = vld [vmem:[%s5117_s26 + $0x2f8] sm:$0xff]  ;;  %v4028_v44 = vcombine.high %v417_v38, %v425_v39 }
 0x103   : > { %3409 = vmatmul.mubr.bf16.gmra.mrb[24].mxu0 %v4049_v42  ;;  %3002 = vmatpush1.bf16.msra.mxu1 %v4970_v46  ;;  %v4011_v42 = vcombine.low %v401_v30, %v409_v31  ;;  %v4036_v45 = vcombine.high %v421_v40, %v429_v41  ;;  %v433_v46 = vld [vmem:[%s5117_s26 + $0x318] sm:$0xff] }
 0x104   : > { %3454 = vmatpush1.bf16.msra.mxu0 %v4973_v47  ;;  %3003 = vmatprep.subr.bf16.mxu1 %v4978_v48  ;;  %v441_v47 = vld [vmem:[%s5117_s26 + $0x358] sm:$0xff] }
 0x105   : > { %3455 = vmatprep.subr.bf16.mxu0 %v4981_v49  ;;  %2966 = vmatprep.mubr.bf16.mxu1 %v4058_v50  ;;  %v437_v48 = vld [vmem:[%s5117_s26 + $0x338] sm:$0xff]  ;;  %v4027_v50 = vcombine.low %v417_v38, %v425_v39 }
 0x106   : > { %3418 = vmatprep.mubr.bf16.mxu0 %v4066_v51  ;;  %v445_v49 = vld [vmem:[%s5117_s26 + $0x378] sm:$0xff]  ;;  %v4035_v51 = vcombine.low %v421_v40, %v429_v41 }
 0x107   : > { %3004 = vmatpush1.bf16.msra.mxu1 %v4976_v52  ;;  %v4044_v52 = vcombine.high %v433_v46, %v441_v47  ;;  %v4051_v59 = vcombine.low %v437_v48, %v445_v49 }
 0x108   : > { %3456 = vmatpush1.bf16.msra.mxu0 %v4979_v53  ;;  %3005 = vmatprep.subr.bf16.mxu1 %v4984_v54  ;;  %v4052_v53 = vcombine.high %v437_v48, %v445_v49  ;;  %v449_v54 = vld [vmem:[%s5117_s26 + $0x398] sm:$0xff] }
 0x109   : > { %3457 = vmatprep.subr.bf16.mxu0 %v4987_v55  ;;  %v457_v55 = vld [vmem:[%s5117_s26 + $0x3d8] sm:$0xff] }
 0x10a   : > { %2967 = vmatmul.mubr.bf16.gmra.mrb[28].mxu1 %v4057_v57  ;;  %v461_v57 = vld [vmem:[%s5117_s26 + $0x3f8] sm:$0xff]  ;;  %v4060_v60 = vcombine.high %v449_v54, %v457_v55 }
 0x10b   : > { %3419 = vmatmul.mubr.bf16.gmra.mrb[28].mxu0 %v4065_v58  ;;  %3006 = vmatpush1.bf16.msra.mxu1 %v4982_v62  ;;  %v4043_v58 = vcombine.low %v433_v46, %v441_v47  ;;  %v4068_v61 = vcombine.high %v453_v56, %v461_v57  ;;  %v4059_v62 = vcombine.low %v449_v54, %v457_v55 }
 0x10c   : > { %3458 = vmatpush1.bf16.msra.mxu0 %v4985_v63  ;;  %3007 = vmatprep.subr.bf16.mxu1 %v4990_v0  ;;  %v4067_v63 = vcombine.low %v453_v56, %v461_v57  ;;  %v3544_v0 = vlaneseq }
 0x10d   : > { %3459 = vmatprep.subr.bf16.mxu0 %v4993_v1  ;;  %3009 = vmatprep.mubr.bf16.mxu1 %v3948_v2 }
 0x10e   : > { %3461 = vmatprep.mubr.bf16.mxu0 %v3956_v3  ;;  %v3545_v1 = vshrl.u32 %v3544_v0, 7  ;;  %v3542_v3 = vld [vmem:[%s5570_s2] sm:$0x3] }
 0x10f   : > { %3008 = vmatpush1.bf16.msra.mxu1 %v4988_v4 }
 0x110   : > { %3460 = vmatpush1.bf16.msra.mxu0 %v4991_v5  ;;  %v3546_v2 = vsub.s32 0, %v3545_v1  ;;  %v3550_v4 = vsub.s32 1, %v3545_v1  ;;  %v3586_v5 = vld [vmem:[%s5571_s3] sm:$0x3] }
 0x112   : > { %3010 = vmatmul.mubr.bf16.vlgmr.msra.gmra.mrb[0].mxu1 %v3947_v10  ;;  %v5465_v6 = vrot.slane %v3542_v3, %v3546_v2  ;;  %v5467_v9 = vrot.slane %v3542_v3, %v3550_v4  ;;  %v5471_v15 = vrot.slane %v3586_v5, %v3550_v4 }
 0x113   : > { %3462 = vmatmul.mubr.bf16.vlgmr.msra.gmra.mrb[0].mxu0 %v3955_v11  ;;  %3019 = vmatprep.mubr.bf16.mxu1 %v3964_v12  ;;  %v5469_v11 = vrot.slane %v3586_v5, %v3546_v2 }
 0x114   : > { %3471 = vmatprep.mubr.bf16.mxu0 %v3972_v13 }
 0x11a   : > { %3020 = vmatmul.mubr.bf16.gmra.mrb[4].mxu1 %v3963_v18 }
 0x11b   : > { %3472 = vmatmul.mubr.bf16.gmra.mrb[4].mxu0 %v3971_v19  ;;  %3029 = vmatprep.mubr.bf16.mxu1 %v3980_v20 }
 0x11c   : > { %3481 = vmatprep.mubr.bf16.mxu0 %v3988_v21 }
 0x122   : > { %3030 = vmatmul.mubr.bf16.gmra.mrb[8].mxu1 %v3979_v26 }
 0x123   : > { %3482 = vmatmul.mubr.bf16.gmra.mrb[8].mxu0 %v3987_v27  ;;  %3039 = vmatprep.mubr.bf16.mxu1 %v3996_v28 }
 0x124   : > { %3491 = vmatprep.mubr.bf16.mxu0 %v4004_v29 }
 0x12a   : > { %3040 = vmatmul.mubr.bf16.gmra.mrb[12].mxu1 %v3995_v34 }
 0x12b   : > { %3492 = vmatmul.mubr.bf16.gmra.mrb[12].mxu0 %v4003_v35  ;;  %3049 = vmatprep.mubr.bf16.mxu1 %v4012_v36 }
 0x12c   : > { %3501 = vmatprep.mubr.bf16.mxu0 %v4020_v37 }
 0x132   : > { %3050 = vmatmul.mubr.bf16.gmra.mrb[16].mxu1 %v4011_v42 }
 0x133   : > { %3502 = vmatmul.mubr.bf16.gmra.mrb[16].mxu0 %v4019_v43  ;;  %3059 = vmatprep.mubr.bf16.mxu1 %v4028_v44 }
 0x134   : > { %3511 = vmatprep.mubr.bf16.mxu0 %v4036_v45 }
 0x13a   : > { %3060 = vmatmul.mubr.bf16.gmra.mrb[20].mxu1 %v4027_v50 }
 0x13b   : > { %3512 = vmatmul.mubr.bf16.gmra.mrb[20].mxu0 %v4035_v51  ;;  %3069 = vmatprep.mubr.bf16.mxu1 %v4044_v52 }
 0x13c   : > { %3521 = vmatprep.mubr.bf16.mxu0 %v4052_v53 }
 0x142   : > { %3070 = vmatmul.mubr.bf16.gmra.mrb[24].mxu1 %v4043_v58 }
 0x143   : > { %3522 = vmatmul.mubr.bf16.gmra.mrb[24].mxu0 %v4051_v59  ;;  %3079 = vmatprep.mubr.bf16.mxu1 %v4060_v60 }
 0x144   : > { %3531 = vmatprep.mubr.bf16.mxu0 %v4068_v61 }
 0x14a   : > { %3080 = vmatmul.mubr.bf16.gmra.mrb[28].mxu1 %v4059_v62 }
 0x14b   : > { %3532 = vmatmul.mubr.bf16.gmra.mrb[28].mxu0 %v4067_v63 }
 0x1e5   : > { %v3011_v7 = vpop.f32.mrb[0].mxu1 }
 0x1e6   : > { %v3463_v8 = vpop.f32.mrb[0].mxu0  ;;  %v3013_v12 = vpop.f32.mrb[1].mxu1 }
 0x1e7   : > { %v4362_v10 = vadd.f32 %v3463_v8, %v3011_v7  ;;  %v3465_v13 = vpop.f32.mrb[1].mxu0  ;;  %v3015_v16 = vpop.f32.mrb[2].mxu1 }
 0x1e8   : > { %v4363_v14 = vadd.f32 %v3465_v13, %v3013_v12  ;;  %v3467_v17 = vpop.f32.mrb[2].mxu0  ;;  %v3017_v20 = vpop.f32.mrb[3].mxu1 }
 0x1e9   : > { %v3554_v18 = vmul.f32 %v4362_v10, %v5465_v6  ;;  %v4364_v19 = vadd.f32 %v3467_v17, %v3015_v16  ;;  %v3469_v21 = vpop.f32.mrb[3].mxu0 }
 0x1ea   : > { %v3555_v22 = vmul.f32 %v4363_v14, %v5467_v9  ;;  %v4365_v23 = vadd.f32 %v3469_v21, %v3017_v20 }
 0x1eb   : > { %v3598_v24 = vadd.f32 %v5469_v11, %v3554_v18  ;;  %v3556_v25 = vmul.f32 %v4364_v19, %v5465_v6 }
 0x1ec   : > { %v3599_v26 = vadd.f32 %v5471_v15, %v3555_v22  ;;  %v3557_v27 = vmul.f32 %v4365_v23, %v5467_v9 }
 0x1ed   : > { %v3630_v28 = vmax.f32 %v3598_v24, 0.0  ;;  %v3600_v29 = vadd.f32 %v5469_v11, %v3556_v25  ;;  %v3021_v32 = vpop.f32.mrb[4].mxu1 }
 0x1ee   : > { %v3631_v30 = vmax.f32 %v3599_v26, 0.0  ;;  %v3601_v31 = vadd.f32 %v5471_v15, %v3557_v27  ;;  %v3473_v33 = vpop.f32.mrb[4].mxu0  ;;  %v3023_v36 = vpop.f32.mrb[5].mxu1 }
 0x1ef   : > { %v3632_v34 = vmax.f32 %v3600_v29, 0.0  ;;  %v4366_v35 = vadd.f32 %v3473_v33, %v3021_v32  ;;  %v3475_v37 = vpop.f32.mrb[5].mxu0  ;;  %v3025_v41 = vpop.f32.mrb[6].mxu1 }
 0x1f0   : > { %v4346_v38 = vpack.c.bf16 %v3631_v30, %v3630_v28  ;;  %v3633_v39 = vmax.f32 %v3601_v31, 0.0  ;;  %v4367_v40 = vadd.f32 %v3475_v37, %v3023_v36  ;;  %v3477_v42 = vpop.f32.mrb[6].mxu0  ;;  %v3027_v45 = vpop.f32.mrb[7].mxu1 }
 0x1f1   : > { %v3558_v43 = vmul.f32 %v4366_v35, %v5465_v6  ;;  %v4368_v44 = vadd.f32 %v3477_v42, %v3025_v41  ;;  %v3479_v46 = vpop.f32.mrb[7].mxu0 }
 0x1f2   : > { %3758 = vst [vmem:[%s5485_s8] sm:$0xff] %v4346_v38  ;;  %v4347_v47 = vpack.c.bf16 %v3633_v39, %v3632_v34  ;;  %v3559_v48 = vmul.f32 %v4367_v40, %v5467_v9  ;;  %v4369_v49 = vadd.f32 %v3479_v46, %v3027_v45 }
 0x1f3   : > { %v3602_v50 = vadd.f32 %v5469_v11, %v3558_v43  ;;  %v3560_v51 = vmul.f32 %v4368_v44, %v5465_v6 }
 0x1f4   : > { %3759 = vst [vmem:[%s5485_s8 + $0x8] sm:$0xff] %v4347_v47  ;;  %v3603_v52 = vadd.f32 %v5471_v15, %v3559_v48  ;;  %v3561_v53 = vmul.f32 %v4369_v49, %v5467_v9 }
 0x1f5   : > { %v3634_v54 = vmax.f32 %v3602_v50, 0.0  ;;  %v3604_v55 = vadd.f32 %v5469_v11, %v3560_v51  ;;  %v3031_v58 = vpop.f32.mrb[8].mxu1 }
 0x1f6   : > { %v3635_v56 = vmax.f32 %v3603_v52, 0.0  ;;  %v3605_v57 = vadd.f32 %v5471_v15, %v3561_v53  ;;  %v3483_v59 = vpop.f32.mrb[8].mxu0  ;;  %v3033_v62 = vpop.f32.mrb[9].mxu1 }
 0x1f7   : > { %v3636_v60 = vmax.f32 %v3604_v55, 0.0  ;;  %v4370_v61 = vadd.f32 %v3483_v59, %v3031_v58  ;;  %v3485_v63 = vpop.f32.mrb[9].mxu0  ;;  %v3035_v3 = vpop.f32.mrb[10].mxu1 }
 0x1f8   : > { %v4348_v0 = vpack.c.bf16 %v3635_v56, %v3634_v54  ;;  %v3637_v1 = vmax.f32 %v3605_v57, 0.0  ;;  %v4371_v2 = vadd.f32 %v3485_v63, %v3033_v62  ;;  %v3487_v4 = vpop.f32.mrb[10].mxu0  ;;  %v3037_v8 = vpop.f32.mrb[11].mxu1 }
 0x1f9   : > { %v3562_v5 = vmul.f32 %v4370_v61, %v5465_v6  ;;  %v4372_v7 = vadd.f32 %v3487_v4, %v3035_v3  ;;  %v3489_v10 = vpop.f32.mrb[11].mxu0 }
 0x1fa   : > { %3760 = vst [vmem:[%s5485_s8 + $0x10] sm:$0xff] %v4348_v0  ;;  %v4349_v12 = vpack.c.bf16 %v3637_v1, %v3636_v60  ;;  %v3563_v13 = vmul.f32 %v4371_v2, %v5467_v9  ;;  %v4373_v14 = vadd.f32 %v3489_v10, %v3037_v8 }
 0x1fb   : > { %v3606_v16 = vadd.f32 %v5469_v11, %v3562_v5  ;;  %v3564_v17 = vmul.f32 %v4372_v7, %v5465_v6 }
 0x1fc   : > { %3761 = vst [vmem:[%s5485_s8 + $0x18] sm:$0xff] %v4349_v12  ;;  %v3607_v18 = vadd.f32 %v5471_v15, %v3563_v13  ;;  %v3565_v19 = vmul.f32 %v4373_v14, %v5467_v9 }
 0x1fd   : > { %v3638_v20 = vmax.f32 %v3606_v16, 0.0  ;;  %v3608_v21 = vadd.f32 %v5469_v11, %v3564_v17  ;;  %v3041_v24 = vpop.f32.mrb[12].mxu1 }
 0x1fe   : > { %v3639_v22 = vmax.f32 %v3607_v18, 0.0  ;;  %v3609_v23 = vadd.f32 %v5471_v15, %v3565_v19  ;;  %v3493_v25 = vpop.f32.mrb[12].mxu0  ;;  %v3043_v28 = vpop.f32.mrb[13].mxu1 }
 0x1ff   : > { %v3640_v26 = vmax.f32 %v3608_v21, 0.0  ;;  %v4374_v27 = vadd.f32 %v3493_v25, %v3041_v24  ;;  %v3495_v29 = vpop.f32.mrb[13].mxu0  ;;  %v3045_v33 = vpop.f32.mrb[14].mxu1 }
 0x200   : > { %v4350_v30 = vpack.c.bf16 %v3639_v22, %v3638_v20  ;;  %v3641_v31 = vmax.f32 %v3609_v23, 0.0  ;;  %v4375_v32 = vadd.f32 %v3495_v29, %v3043_v28  ;;  %v3497_v34 = vpop.f32.mrb[14].mxu0  ;;  %v3047_v37 = vpop.f32.mrb[15].mxu1 }
 0x201   : > { %v3566_v35 = vmul.f32 %v4374_v27, %v5465_v6  ;;  %v4376_v36 = vadd.f32 %v3497_v34, %v3045_v33  ;;  %v3499_v38 = vpop.f32.mrb[15].mxu0 }
 0x202   : > { %3762 = vst [vmem:[%s5485_s8 + $0x20] sm:$0xff] %v4350_v30  ;;  %v4351_v39 = vpack.c.bf16 %v3641_v31, %v3640_v26  ;;  %v3567_v40 = vmul.f32 %v4375_v32, %v5467_v9  ;;  %v4377_v41 = vadd.f32 %v3499_v38, %v3047_v37 }
 0x203   : > { %v3610_v42 = vadd.f32 %v5469_v11, %v3566_v35  ;;  %v3568_v43 = vmul.f32 %v4376_v36, %v5465_v6 }
 0x204   : > { %3763 = vst [vmem:[%s5485_s8 + $0x28] sm:$0xff] %v4351_v39  ;;  %v3611_v44 = vadd.f32 %v5471_v15, %v3567_v40  ;;  %v3569_v45 = vmul.f32 %v4377_v41, %v5467_v9 }
 0x205   : > { %v3642_v46 = vmax.f32 %v3610_v42, 0.0  ;;  %v3612_v47 = vadd.f32 %v5469_v11, %v3568_v43  ;;  %v3051_v50 = vpop.f32.mrb[16].mxu1 }
 0x206   : > { %v3643_v48 = vmax.f32 %v3611_v44, 0.0  ;;  %v3613_v49 = vadd.f32 %v5471_v15, %v3569_v45  ;;  %v3503_v51 = vpop.f32.mrb[16].mxu0  ;;  %v3053_v54 = vpop.f32.mrb[17].mxu1 }
 0x207   : > { %v3644_v52 = vmax.f32 %v3612_v47, 0.0  ;;  %v4378_v53 = vadd.f32 %v3503_v51, %v3051_v50  ;;  %v3505_v55 = vpop.f32.mrb[17].mxu0  ;;  %v3055_v59 = vpop.f32.mrb[18].mxu1 }
 0x208   : > { %v4352_v56 = vpack.c.bf16 %v3643_v48, %v3642_v46  ;;  %v3645_v57 = vmax.f32 %v3613_v49, 0.0  ;;  %v4379_v58 = vadd.f32 %v3505_v55, %v3053_v54  ;;  %v3507_v60 = vpop.f32.mrb[18].mxu0  ;;  %v3057_v63 = vpop.f32.mrb[19].mxu1 }
 0x209   : > { %v3570_v61 = vmul.f32 %v4378_v53, %v5465_v6  ;;  %v4380_v62 = vadd.f32 %v3507_v60, %v3055_v59  ;;  %v3509_v0 = vpop.f32.mrb[19].mxu0 }
 0x20a   : > { %3764 = vst [vmem:[%s5485_s8 + $0x30] sm:$0xff] %v4352_v56  ;;  %v4353_v1 = vpack.c.bf16 %v3645_v57, %v3644_v52  ;;  %v3571_v2 = vmul.f32 %v4379_v58, %v5467_v9  ;;  %v4381_v3 = vadd.f32 %v3509_v0, %v3057_v63 }
 0x20b   : > { %v3614_v4 = vadd.f32 %v5469_v11, %v3570_v61  ;;  %v3572_v5 = vmul.f32 %v4380_v62, %v5465_v6 }
 0x20c   : > { %3765 = vst [vmem:[%s5485_s8 + $0x38] sm:$0xff] %v4353_v1  ;;  %v3615_v7 = vadd.f32 %v5471_v15, %v3571_v2  ;;  %v3573_v8 = vmul.f32 %v4381_v3, %v5467_v9 }
 0x20d   : > { %v3646_v10 = vmax.f32 %v3614_v4, 0.0  ;;  %v3616_v12 = vadd.f32 %v5469_v11, %v3572_v5  ;;  %v3061_v16 = vpop.f32.mrb[20].mxu1 }
 0x20e   : > { %v3647_v13 = vmax.f32 %v3615_v7, 0.0  ;;  %v3617_v14 = vadd.f32 %v5471_v15, %v3573_v8  ;;  %v3513_v17 = vpop.f32.mrb[20].mxu0  ;;  %v3063_v20 = vpop.f32.mrb[21].mxu1 }
 0x20f   : > { %v3648_v18 = vmax.f32 %v3616_v12, 0.0  ;;  %v4382_v19 = vadd.f32 %v3513_v17, %v3061_v16  ;;  %v3515_v21 = vpop.f32.mrb[21].mxu0  ;;  %v3065_v25 = vpop.f32.mrb[22].mxu1 }
 0x210   : > { %v4354_v22 = vpack.c.bf16 %v3647_v13, %v3646_v10  ;;  %v3649_v23 = vmax.f32 %v3617_v14, 0.0  ;;  %v4383_v24 = vadd.f32 %v3515_v21, %v3063_v20  ;;  %v3517_v26 = vpop.f32.mrb[22].mxu0  ;;  %v3067_v29 = vpop.f32.mrb[23].mxu1 }
 0x211   : > { %v3574_v27 = vmul.f32 %v4382_v19, %v5465_v6  ;;  %v4384_v28 = vadd.f32 %v3517_v26, %v3065_v25  ;;  %v3519_v30 = vpop.f32.mrb[23].mxu0 }
 0x212   : > { %3766 = vst [vmem:[%s5485_s8 + $0x40] sm:$0xff] %v4354_v22  ;;  %v4355_v31 = vpack.c.bf16 %v3649_v23, %v3648_v18  ;;  %v3575_v32 = vmul.f32 %v4383_v24, %v5467_v9  ;;  %v4385_v33 = vadd.f32 %v3519_v30, %v3067_v29 }
 0x213   : > { %v3618_v34 = vadd.f32 %v5469_v11, %v3574_v27  ;;  %v3576_v35 = vmul.f32 %v4384_v28, %v5465_v6 }
 0x214   : > { %3767 = vst [vmem:[%s5485_s8 + $0x48] sm:$0xff] %v4355_v31  ;;  %v3619_v36 = vadd.f32 %v5471_v15, %v3575_v32  ;;  %v3577_v37 = vmul.f32 %v4385_v33, %v5467_v9 }
 0x215   : > { %v3650_v38 = vmax.f32 %v3618_v34, 0.0  ;;  %v3620_v39 = vadd.f32 %v5469_v11, %v3576_v35  ;;  %v3071_v42 = vpop.f32.mrb[24].mxu1 }
 0x216   : > { %v3651_v40 = vmax.f32 %v3619_v36, 0.0  ;;  %v3621_v41 = vadd.f32 %v5471_v15, %v3577_v37  ;;  %v3523_v43 = vpop.f32.mrb[24].mxu0  ;;  %v3073_v46 = vpop.f32.mrb[25].mxu1 }
 0x217   : > { %v3652_v44 = vmax.f32 %v3620_v39, 0.0  ;;  %v4386_v45 = vadd.f32 %v3523_v43, %v3071_v42  ;;  %v3525_v47 = vpop.f32.mrb[25].mxu0  ;;  %v3075_v51 = vpop.f32.mrb[26].mxu1 }
 0x218   : > { %v4356_v48 = vpack.c.bf16 %v3651_v40, %v3650_v38  ;;  %v3653_v49 = vmax.f32 %v3621_v41, 0.0  ;;  %v4387_v50 = vadd.f32 %v3525_v47, %v3073_v46  ;;  %v3527_v52 = vpop.f32.mrb[26].mxu0  ;;  %v3077_v55 = vpop.f32.mrb[27].mxu1 }
 0x219   : > { %v3578_v53 = vmul.f32 %v4386_v45, %v5465_v6  ;;  %v4388_v54 = vadd.f32 %v3527_v52, %v3075_v51  ;;  %v3529_v56 = vpop.f32.mrb[27].mxu0 }
 0x21a   : > { %3768 = vst [vmem:[%s5485_s8 + $0x50] sm:$0xff] %v4356_v48  ;;  %v4357_v57 = vpack.c.bf16 %v3653_v49, %v3652_v44  ;;  %v3579_v58 = vmul.f32 %v4387_v50, %v5467_v9  ;;  %v4389_v59 = vadd.f32 %v3529_v56, %v3077_v55 }
 0x21b   : > { %v3622_v60 = vadd.f32 %v5469_v11, %v3578_v53  ;;  %v3580_v61 = vmul.f32 %v4388_v54, %v5465_v6 }
 0x21c   : > { %3769 = vst [vmem:[%s5485_s8 + $0x58] sm:$0xff] %v4357_v57  ;;  %v3623_v62 = vadd.f32 %v5471_v15, %v3579_v58  ;;  %v3581_v63 = vmul.f32 %v4389_v59, %v5467_v9 }
 0x21d   : > { %v3654_v0 = vmax.f32 %v3622_v60, 0.0  ;;  %v3624_v1 = vadd.f32 %v5469_v11, %v3580_v61  ;;  %v3081_v4 = vpop.f32.mrb[28].mxu1 }
 0x21e   : > { %v3655_v2 = vmax.f32 %v3623_v62, 0.0  ;;  %v3625_v3 = vadd.f32 %v5471_v15, %v3581_v63  ;;  %v3533_v5 = vpop.f32.mrb[28].mxu0  ;;  %v3083_v10 = vpop.f32.mrb[29].mxu1 }
 0x21f   : > { %v3656_v7 = vmax.f32 %v3624_v1, 0.0  ;;  %v4390_v8 = vadd.f32 %v3533_v5, %v3081_v4  ;;  %v3535_v12 = vpop.f32.mrb[29].mxu0  ;;  %v3085_v17 = vpop.f32.mrb[30].mxu1 }
 0x220   : > { %v4358_v13 = vpack.c.bf16 %v3655_v2, %v3654_v0  ;;  %v3657_v14 = vmax.f32 %v3625_v3, 0.0  ;;  %v4391_v16 = vadd.f32 %v3535_v12, %v3083_v10  ;;  %v3537_v18 = vpop.f32.mrb[30].mxu0  ;;  %v3087_v21 = vpop.f32.mrb[31].mxu1 }
 0x221   : > { %v3582_v19 = vmul.f32 %v4390_v8, %v5465_v6  ;;  %v4392_v20 = vadd.f32 %v3537_v18, %v3085_v17  ;;  %v3539_v22 = vpop.f32.mrb[31].mxu0 }
 0x222   : > { %3770 = vst [vmem:[%s5485_s8 + $0x60] sm:$0xff] %v4358_v13  ;;  %v4359_v23 = vpack.c.bf16 %v3657_v14, %v3656_v7  ;;  %v3583_v24 = vmul.f32 %v4391_v16, %v5467_v9  ;;  %v4393_v25 = vadd.f32 %v3539_v22, %v3087_v21 }
 0x223   : > { %v3626_v26 = vadd.f32 %v5469_v11, %v3582_v19  ;;  %v3584_v27 = vmul.f32 %v4392_v20, %v5465_v6 }
 0x224   : > { %3771 = vst [vmem:[%s5485_s8 + $0x68] sm:$0xff] %v4359_v23  ;;  %v3627_v28 = vadd.f32 %v5471_v15, %v3583_v24  ;;  %v3585_v29 = vmul.f32 %v4393_v25, %v5467_v9 }
 0x225   : > { %v3658_v30 = vmax.f32 %v3626_v26, 0.0  ;;  %v3628_v31 = vadd.f32 %v5469_v11, %v3584_v27 }
 0x226   : > { %v3659_v32 = vmax.f32 %v3627_v28, 0.0  ;;  %v3629_v33 = vadd.f32 %v5471_v15, %v3585_v29 }
 0x227   : > { %v3660_v34 = vmax.f32 %v3628_v31, 0.0 }
 0x228   : > { %v4360_v35 = vpack.c.bf16 %v3659_v32, %v3658_v30  ;;  %v3661_v36 = vmax.f32 %v3629_v33, 0.0 }
 0x22a   : > { %3772 = vst [vmem:[%s5485_s8 + $0x70] sm:$0xff] %v4360_v35  ;;  %v4361_v37 = vpack.c.bf16 %v3661_v36, %v3660_v34 }
 0x22c   : > { %3773 = vst [vmem:[%s5485_s8 + $0x78] sm:$0xff] %v4361_v37 }
 0x22d PF: > { %s14_s17 = sadd.s32 1, %s5016_s17   ;;  %s5573_s15 = smov %s5012_s16 }
 0x22e   : > { %p11_p5 = scmp.ge.s32.totalorder %s14_s17, 6   ;;  %s5574_s16 = smov %s5576_s18 }
 0x230   :  { %13 = sbr.rel (!%p11_p5) target bundleno = 2 (0x2), region = 75 }

// kernel: generator_forward.8
= control target key start
LH: loop header
LB: loop body
LE: loop exit
PB: predicated region body
PF: predicated region fallthrough
CT: control target
= control target key end

     0   :  { %s3646_s15 = smov 0   ;;  %s3648_s16 = smov 0   ;;  %s4099_s0 = inlined_call_operand.vmem [shape: bf16[4,512,1024], index: 0, kind: input, shape index: {}]   ;;  %s4100_s1 = inlined_call_operand.vmem [shape: bf16[4,1024,128], index: 1, kind: input, shape index: {}]   ;;  %s4101_s2 = inlined_call_operand.vmem [shape: f32[1,128], index: 2, kind: input, shape index: {}]   ;;  %s4102_s3 = inlined_call_operand.vmem [shape: f32[1,128], index: 3, kind: input, shape index: {}]   ;;  %s4103_s4 = inlined_call_operand.vmem [shape: bf16[4,512,128], index: 4, kind: output, shape index: {}]  }
   0x1   :  { %s3650_s17 = smov 0   ;;  %s3652_s18 = smov 0  }
   0x2   :  { %s3654_s19 = smov 0  }
   0x3 LB: > { %s29_s20 = sadd.s32 1, %s3611_s17  ;;  %s33_s21 = sadd.s32 1, %s3615_s18  ;;  %s3619_s19 = sphi %s3654_s19, %s14_s19   ;;  %s3615_s18 = sphi %s3652_s18, %s4107_s18   ;;  %s3611_s17 = sphi %s3650_s17, %s4106_s17   ;;  %s3607_s16 = sphi %s3648_s16, %s4105_s16   ;;  %s3603_s15 = sphi %s3646_s15, %s4104_s15  }
   0x4   : > { %p31_p0 = scmp.ge.s32.totalorder %s29_s20, 2  ;;  %p2663_p1 = scmp.ge.s32.totalorder %s3619_s19, 1 }
   0x5   : > { %p224_p2 = scmp.lt.s32.totalorder %s3619_s19, 9 }
   0x6   : > { %s4109_s20 = smov (%p31_p0, %s29_s20), 0  ;;  %s4111_s21 = smov (!%p31_p0, %s33_s21), %s3615_s18 }
   0x7   : > { %p225_p3 = pnand %p2663_p1, %p224_p2  ;;  %p35_p4 = scmp.ge.s32.totalorder %s4111_s21, 4 }
   0x8   : > { %p277_p5 = scmp.lt.s32.totalorder (!%p225_p3), %s3607_s16, 3  ;;  %s2664_s26 = sshll.u32 (!%p225_p3), %s3603_s15, 5 }
   0x9   : > { %s4113_s21 = smov (%p35_p4, %s4111_s21), 0  ;;  %228 = sbr.rel (%p225_p3) target bundleno = 531 (0x213), region = 36 }
   0xa   : > { %p279_p6 = scmp.lt.s32.totalorder (!%p225_p3), %s2664_s26, 63 }
  0x10   : > { %s4115_s16 = smov (!%p277_p5, %s3607_s16), 3  ;;  %s4117_s26 = smov (!%p279_p6, %s2664_s26), 63 }
  0x11   : > { %s2666_s22 = sshll.u32 %s4115_s16, 9  ;;  %s2665_s27 = sshll.u32 %s4117_s26, 3 }
  0x12   : > { %s3686_s25 = scalar_lea.vmem %s4100_s1, %s2666_s22  ;;  %s283_s28 = sadd.s32 %s2666_s22, %s2665_s27 }
  0x13   : > { %v3517_v0 = vld [vmem:[%s3686_s25 + $0x40] sm:$0xff]   ;;  %v3521_v4 = vld [vmem:[%s3686_s25 + $0x48] sm:$0xff]   ;;  %v3525_v8 = vld [vmem:[%s3686_s25 + $0x50] sm:$0xff]   ;;  %s2667_s29 = sshll.u32 %s283_s28, 2  ;;  %s2671_s9 = sshll.u32 %s4115_s16, 6 }
  0x14   : > { %v3518_v1 = vld [vmem:[%s3686_s25 + $0xc0] sm:$0xff]   ;;  %3029 = vmatprep.subr.bf16.mxu0 %v3517_v0  ;;  %v3522_v5 = vld [vmem:[%s3686_s25 + $0xc8] sm:$0xff]   ;;  %v3526_v9 = vld [vmem:[%s3686_s25 + $0xd0] sm:$0xff]   ;;  %s3727_s6 = scalar_lea.vmem %s4099_s0, %s2667_s29  ;;  %s310_s12 = sadd.s32 %s2671_s9, %s4117_s26 }
  0x15   : > { %v3519_v2 = vld [vmem:[%s3686_s25] sm:$0xff]   ;;  %3141 = vmatprep.subr.bf16.mxu1 %v3518_v1  ;;  %v3523_v6 = vld [vmem:[%s3686_s25 + $0x8] sm:$0xff]   ;;  %v3527_v10 = vld [vmem:[%s3686_s25 + $0x10] sm:$0xff]   ;;  %s2672_s13 = sshll.u32 %s310_s12, 2 }
  0x16   : > { %v3520_v3 = vld [vmem:[%s3686_s25 + $0x80] sm:$0xff]   ;;  %3030 = vmatpush3.bf16.msra.mxu0 %v3519_v2  ;;  %v3524_v7 = vld [vmem:[%s3686_s25 + $0x88] sm:$0xff]   ;;  %v3528_v11 = vld [vmem:[%s3686_s25 + $0x90] sm:$0xff]   ;;  %s3978_s16 = scalar_lea.vmem %s4103_s4, %s2672_s13 }
  0x17   : > { %3142 = vmatpush3.bf16.msra.mxu1 %v3520_v3  ;;  %3031 = vmatprep.subr.bf16.mxu0 %v3521_v4  ;;  %v3529_v12 = vld [vmem:[%s3686_s25 + $0x58] sm:$0xff]   ;;  %v3533_v16 = vld [vmem:[%s3686_s25 + $0x60] sm:$0xff]   ;;  %v3537_v20 = vld [vmem:[%s3686_s25 + $0x68] sm:$0xff]  }
  0x18   : > { %3143 = vmatprep.subr.bf16.mxu1 %v3522_v5  ;;  %v3530_v13 = vld [vmem:[%s3686_s25 + $0xd8] sm:$0xff]   ;;  %v3534_v17 = vld [vmem:[%s3686_s25 + $0xe0] sm:$0xff]   ;;  %v3538_v21 = vld [vmem:[%s3686_s25 + $0xe8] sm:$0xff]  }
  0x19   : > { %v3531_v14 = vld [vmem:[%s3686_s25 + $0x18] sm:$0xff]   ;;  %v3535_v18 = vld [vmem:[%s3686_s25 + $0x20] sm:$0xff]   ;;  %v3539_v22 = vld [vmem:[%s3686_s25 + $0x28] sm:$0xff]  }
  0x1a   : > { %3032 = vmatpush3.bf16.msra.mxu0 %v3523_v6  ;;  %v3532_v15 = vld [vmem:[%s3686_s25 + $0x98] sm:$0xff]   ;;  %v3536_v19 = vld [vmem:[%s3686_s25 + $0xa0] sm:$0xff]   ;;  %v3540_v23 = vld [vmem:[%s3686_s25 + $0xa8] sm:$0xff]  }
  0x1b   : > { %3144 = vmatpush3.bf16.msra.mxu1 %v3524_v7  ;;  %3033 = vmatprep.subr.bf16.mxu0 %v3525_v8  ;;  %v3541_v24 = vld [vmem:[%s3686_s25 + $0x70] sm:$0xff]   ;;  %v3545_v28 = vld [vmem:[%s3686_s25 + $0x78] sm:$0xff]   ;;  %v315_v32 = vld [vmem:[%s3727_s6] sm:$0xff] }
  0x1c   : > { %3145 = vmatprep.subr.bf16.mxu1 %v3526_v9  ;;  %v3542_v25 = vld [vmem:[%s3686_s25 + $0xf0] sm:$0xff]   ;;  %v3546_v29 = vld [vmem:[%s3686_s25 + $0xf8] sm:$0xff]   ;;  %v319_v33 = vld [vmem:[%s3727_s6 + $0x20] sm:$0xff] }
  0x1d   : > { %v3543_v26 = vld [vmem:[%s3686_s25 + $0x30] sm:$0xff]   ;;  %v3547_v30 = vld [vmem:[%s3686_s25 + $0x38] sm:$0xff]   ;;  %v316_v34 = vld [vmem:[%s3727_s6 + $0x8] sm:$0xff]  ;;  %v2673_v35 = vcombine.low %v315_v32, %v319_v33  ;;  %v2674_v36 = vcombine.high %v315_v32, %v319_v33 }
  0x1e   : > { %3034 = vmatpush3.bf16.msra.mxu0 %v3527_v10  ;;  %v3544_v27 = vld [vmem:[%s3686_s25 + $0xb0] sm:$0xff]   ;;  %v3548_v31 = vld [vmem:[%s3686_s25 + $0xb8] sm:$0xff]   ;;  %v320_v37 = vld [vmem:[%s3727_s6 + $0x28] sm:$0xff] }
  0x1f   : > { %3146 = vmatpush3.bf16.msra.mxu1 %v3528_v11  ;;  %3035 = vmatprep.subr.bf16.mxu0 %v3529_v12  ;;  %v2675_v38 = vcombine.low %v316_v34, %v320_v37  ;;  %v2676_v39 = vcombine.high %v316_v34, %v320_v37  ;;  %v3549_v40 = vld [vmem:[%s3686_s25 + $0x140] sm:$0xff]   ;;  %v324_v47 = vld [vmem:[%s3727_s6 + $0x48] sm:$0xff]  ;;  %v3557_v2 = vld [vmem:[%s3686_s25 + $0x150] sm:$0xff]  }
  0x20   : > { %3147 = vmatprep.subr.bf16.mxu1 %v3530_v13  ;;  %1627 = vmatprep.mubr.bf16.mxu0 %v2674_v36  ;;  %v3550_v41 = vld [vmem:[%s3686_s25 + $0x100] sm:$0xff]   ;;  %v328_v48 = vld [vmem:[%s3727_s6 + $0x68] sm:$0xff]  ;;  %v3558_v4 = vld [vmem:[%s3686_s25 + $0x110] sm:$0xff]  }
  0x21   : > { %1788 = vmatprep.mubr.bf16.mxu1 %v2676_v39  ;;  %v3551_v42 = vld [vmem:[%s3686_s25 + $0x1c0] sm:$0xff]   ;;  %v2684_v50 = vcombine.high %v324_v47, %v328_v48  ;;  %v332_v52 = vld [vmem:[%s3727_s6 + $0x88] sm:$0xff]  ;;  %v2683_v56 = vcombine.low %v324_v47, %v328_v48  ;;  %v3559_v7 = vld [vmem:[%s3686_s25 + $0x1d0] sm:$0xff]  }
  0x22   : > { %3036 = vmatpush3.bf16.msra.mxu0 %v3531_v14  ;;  %v3552_v43 = vld [vmem:[%s3686_s25 + $0x180] sm:$0xff]   ;;  %v336_v53 = vld [vmem:[%s3727_s6 + $0xa8] sm:$0xff]  ;;  %v3560_v9 = vld [vmem:[%s3686_s25 + $0x190] sm:$0xff]  }
  0x23   : > { %3148 = vmatpush3.bf16.msra.mxu1 %v3532_v15  ;;  %3037 = vmatprep.subr.bf16.mxu0 %v3533_v16  ;;  %v323_v44 = vld [vmem:[%s3727_s6 + $0x40] sm:$0xff]  ;;  %v3553_v55 = vld [vmem:[%s3686_s25 + $0x148] sm:$0xff]   ;;  %v2692_v59 = vcombine.high %v332_v52, %v336_v53  ;;  %v2691_v5 = vcombine.low %v332_v52, %v336_v53  ;;  %v3561_v14 = vld [vmem:[%s3686_s25 + $0x158] sm:$0xff]  }
  0x24   : > { %3149 = vmatprep.subr.bf16.mxu1 %v3534_v17  ;;  %v327_v45 = vld [vmem:[%s3727_s6 + $0x60] sm:$0xff]  ;;  %v3554_v58 = vld [vmem:[%s3686_s25 + $0x108] sm:$0xff]   ;;  %v3562_v15 = vld [vmem:[%s3686_s25 + $0x118] sm:$0xff]  }
  0x25   : > { %v2682_v46 = vcombine.high %v323_v44, %v327_v45  ;;  %v331_v49 = vld [vmem:[%s3727_s6 + $0x80] sm:$0xff]  ;;  %v2681_v54 = vcombine.low %v323_v44, %v327_v45  ;;  %v3555_v60 = vld [vmem:[%s3686_s25 + $0x1c8] sm:$0xff]   ;;  %v3563_v17 = vld [vmem:[%s3686_s25 + $0x1d8] sm:$0xff]  }
  0x26   : > { %3038 = vmatpush3.bf16.msra.mxu0 %v3535_v18  ;;  %v335_v51 = vld [vmem:[%s3727_s6 + $0xa0] sm:$0xff]  ;;  %v3556_v61 = vld [vmem:[%s3686_s25 + $0x188] sm:$0xff]   ;;  %v3574_v47 = vld [vmem:[%s3686_s25 + $0x130] sm:$0xff]  }
  0x27   : > { %3150 = vmatpush3.bf16.msra.mxu1 %v3536_v19  ;;  %3039 = vmatprep.subr.bf16.mxu0 %v3537_v20  ;;  %v2690_v57 = vcombine.high %v331_v49, %v335_v51  ;;  %v339_v62 = vld [vmem:[%s3727_s6 + $0xc0] sm:$0xff]  ;;  %v340_v0 = vld [vmem:[%s3727_s6 + $0xc8] sm:$0xff]  ;;  %v2689_v3 = vcombine.low %v331_v49, %v335_v51  ;;  %v3564_v20 = vld [vmem:[%s3686_s25 + $0x198] sm:$0xff]  }
  0x28   : > { %3151 = vmatprep.subr.bf16.mxu1 %v3538_v21  ;;  %v343_v63 = vld [vmem:[%s3727_s6 + $0xe0] sm:$0xff]  ;;  %v344_v1 = vld [vmem:[%s3727_s6 + $0xe8] sm:$0xff]  ;;  %v3575_v48 = vld [vmem:[%s3686_s25 + $0x1f0] sm:$0xff]  }
  0x29   : > { %v2698_v6 = vcombine.high %v339_v62, %v343_v63  ;;  %v2700_v8 = vcombine.high %v340_v0, %v344_v1  ;;  %v347_v10 = vld [vmem:[%s3727_s6 + $0x100] sm:$0xff]  ;;  %v348_v12 = vld [vmem:[%s3727_s6 + $0x108] sm:$0xff]  ;;  %v2697_v16 = vcombine.low %v339_v62, %v343_v63  ;;  %v2699_v18 = vcombine.low %v340_v0, %v344_v1  ;;  %v3576_v49 = vld [vmem:[%s3686_s25 + $0x1b0] sm:$0xff]  }
  0x2a   : > { %3040 = vmatpush3.bf16.msra.mxu0 %v3539_v22  ;;  %v351_v11 = vld [vmem:[%s3727_s6 + $0x120] sm:$0xff]  ;;  %v352_v13 = vld [vmem:[%s3727_s6 + $0x128] sm:$0xff] }
  0x2b   : > { %3152 = vmatpush3.bf16.msra.mxu1 %v3540_v23  ;;  %3041 = vmatprep.subr.bf16.mxu0 %v3541_v24  ;;  %v2706_v19 = vcombine.high %v347_v10, %v351_v11  ;;  %v2708_v21 = vcombine.high %v348_v12, %v352_v13  ;;  %v355_v22 = vld [vmem:[%s3727_s6 + $0x140] sm:$0xff]  ;;  %v3569_v34 = vld [vmem:[%s3686_s25 + $0x168] sm:$0xff]  }
  0x2c   : > { %3153 = vmatprep.subr.bf16.mxu1 %v3542_v25  ;;  %v359_v23 = vld [vmem:[%s3727_s6 + $0x160] sm:$0xff]  ;;  %v356_v25 = vld [vmem:[%s3727_s6 + $0x148] sm:$0xff] }
  0x2d   : > { %v3565_v24 = vld [vmem:[%s3686_s25 + $0x160] sm:$0xff]   ;;  %v2714_v32 = vcombine.high %v355_v22, %v359_v23  ;;  %v3570_v36 = vld [vmem:[%s3686_s25 + $0x128] sm:$0xff]  }
  0x2e   : > { %3042 = vmatpush3.bf16.msra.mxu0 %v3543_v26  ;;  %v360_v26 = vld [vmem:[%s3727_s6 + $0x168] sm:$0xff]  ;;  %v375_v51 = vld [vmem:[%s3727_s6 + $0x1e0] sm:$0xff] }
  0x2f   : > { %3154 = vmatpush3.bf16.msra.mxu1 %v3544_v27  ;;  %3043 = vmatprep.subr.bf16.mxu0 %v3545_v28  ;;  %v3566_v27 = vld [vmem:[%s3686_s25 + $0x120] sm:$0xff]   ;;  %v2716_v33 = vcombine.high %v356_v25, %v360_v26  ;;  %v3571_v37 = vld [vmem:[%s3686_s25 + $0x1e8] sm:$0xff]  }
  0x30   : > { %3155 = vmatprep.subr.bf16.mxu1 %v3546_v29  ;;  %v3567_v28 = vld [vmem:[%s3686_s25 + $0x1e0] sm:$0xff]   ;;  %v3572_v39 = vld [vmem:[%s3686_s25 + $0x1a8] sm:$0xff]  }
  0x31   : > { %v3568_v29 = vld [vmem:[%s3686_s25 + $0x1a0] sm:$0xff]   ;;  %v372_v52 = vld [vmem:[%s3727_s6 + $0x1c8] sm:$0xff] }
  0x32   : > { %3044 = vmatpush3.bf16.msra.mxu0 %v3547_v30  ;;  %v2705_v30 = vcombine.low %v347_v10, %v351_v11  ;;  %v376_v53 = vld [vmem:[%s3727_s6 + $0x1e8] sm:$0xff]  ;;  %v379_v62 = vld [vmem:[%s3727_s6 + $0x200] sm:$0xff] }
  0x33   : > { %3156 = vmatpush3.bf16.msra.mxu1 %v3548_v31  ;;  %3253 = vmatprep.subr.bf16.mxu0 %v3549_v40  ;;  %v2707_v31 = vcombine.low %v348_v12, %v352_v13  ;;  %v364_v40 = vld [vmem:[%s3727_s6 + $0x188] sm:$0xff]  ;;  %v383_v63 = vld [vmem:[%s3727_s6 + $0x220] sm:$0xff] }
  0x34   : > { %3365 = vmatprep.subr.bf16.mxu1 %v3551_v42  ;;  %v2713_v42 = vcombine.low %v355_v22, %v359_v23  ;;  %v380_v0 = vld [vmem:[%s3727_s6 + $0x208] sm:$0xff]  ;;  %v2737_v10 = vcombine.low %v379_v62, %v383_v63  ;;  %v403_v22 = vld [vmem:[%s3727_s6 + $0x2c0] sm:$0xff] }
  0x35   : > { %1628 = vmatmul.mubr.bf16.vlgmr.msra.gmra.mrb[0].mxu0 %v2673_v35  ;;  %v363_v35 = vld [vmem:[%s3727_s6 + $0x180] sm:$0xff]  ;;  %v384_v1 = vld [vmem:[%s3727_s6 + $0x228] sm:$0xff] }
  0x36   : > { %1789 = vmatmul.mubr.bf16.vlgmr.msra.gmra.mrb[0].mxu1 %v2675_v38  ;;  %3254 = vmatpush3.bf16.msra.mxu0 %v3550_v41  ;;  %v367_v38 = vld [vmem:[%s3727_s6 + $0x1a0] sm:$0xff]  ;;  %v368_v41 = vld [vmem:[%s3727_s6 + $0x1a8] sm:$0xff]  ;;  %v2739_v11 = vcombine.low %v380_v0, %v384_v1 }
  0x37   : > { %3366 = vmatpush3.bf16.msra.mxu1 %v3552_v43  ;;  %1635 = vmatprep.mubr.bf16.mxu0 %v2682_v46  ;;  %v2715_v43 = vcombine.low %v356_v25, %v360_v26  ;;  %v2722_v44 = vcombine.high %v363_v35, %v367_v38  ;;  %v2724_v45 = vcombine.high %v364_v40, %v368_v41  ;;  %v3573_v46 = vld [vmem:[%s3686_s25 + $0x170] sm:$0xff]   ;;  %v407_v23 = vld [vmem:[%s3727_s6 + $0x2e0] sm:$0xff]  ;;  %v408_v25 = vld [vmem:[%s3727_s6 + $0x2e8] sm:$0xff] }
  0x38   : > { %1796 = vmatprep.mubr.bf16.mxu1 %v2684_v50  ;;  %3255 = vmatprep.subr.bf16.mxu0 %v3553_v55  ;;  %v371_v50 = vld [vmem:[%s3727_s6 + $0x1c0] sm:$0xff]  ;;  %v3577_v55 = vld [vmem:[%s3686_s25 + $0x178] sm:$0xff]  }
  0x39   : > { %3367 = vmatprep.subr.bf16.mxu1 %v3555_v60  ;;  %v3579_v60 = vld [vmem:[%s3686_s25 + $0x1f8] sm:$0xff]  }
  0x3a   : > { %3256 = vmatpush3.bf16.msra.mxu0 %v3554_v58  ;;  %v3578_v58 = vld [vmem:[%s3686_s25 + $0x138] sm:$0xff]  }
  0x3b   : > { %3368 = vmatpush3.bf16.msra.mxu1 %v3556_v61  ;;  %3257 = vmatprep.subr.bf16.mxu0 %v3557_v2  ;;  %v3580_v61 = vld [vmem:[%s3686_s25 + $0x1b8] sm:$0xff]   ;;  %v2729_v2 = vcombine.low %v371_v50, %v375_v51 }
  0x3c   : > { %3369 = vmatprep.subr.bf16.mxu1 %v3559_v7  ;;  %v391_v7 = vld [vmem:[%s3727_s6 + $0x260] sm:$0xff] }
  0x3d   : > { %1636 = vmatmul.mubr.bf16.gmra.mrb[4].mxu0 %v2681_v54  ;;  %v2721_v54 = vcombine.low %v363_v35, %v367_v38  ;;  %v419_v38 = vld [vmem:[%s3727_s6 + $0x340] sm:$0xff] }
  0x3e   : > { %1797 = vmatmul.mubr.bf16.gmra.mrb[4].mxu1 %v2683_v56  ;;  %1643 = vmatprep.mubr.bf16.mxu0 %v2690_v57  ;;  %v2723_v56 = vcombine.low %v364_v40, %v368_v41  ;;  %v2730_v57 = vcombine.high %v371_v50, %v375_v51  ;;  %v420_v40 = vld [vmem:[%s3727_s6 + $0x348] sm:$0xff] }
  0x3f   : > { %1804 = vmatprep.mubr.bf16.mxu1 %v2692_v59  ;;  %3258 = vmatpush3.bf16.msra.mxu0 %v3558_v4  ;;  %v2732_v59 = vcombine.high %v372_v52, %v376_v53  ;;  %v2738_v4 = vcombine.high %v379_v62, %v383_v63  ;;  %v424_v41 = vld [vmem:[%s3727_s6 + $0x368] sm:$0xff]  ;;  %v317_v62 = vld [vmem:[%s3727_s6 + $0x10] sm:$0xff] }
  0x40   : > { %3370 = vmatpush3.bf16.msra.mxu1 %v3560_v9  ;;  %3259 = vmatprep.subr.bf16.mxu0 %v3561_v14  ;;  %v392_v9 = vld [vmem:[%s3727_s6 + $0x268] sm:$0xff]  ;;  %v395_v14 = vld [vmem:[%s3727_s6 + $0x280] sm:$0xff]  ;;  %v2779_v51 = vcombine.low %v420_v40, %v424_v41  ;;  %v321_v63 = vld [vmem:[%s3727_s6 + $0x30] sm:$0xff] }
  0x41   : > { %3371 = vmatprep.subr.bf16.mxu1 %v3563_v17  ;;  %v400_v17 = vld [vmem:[%s3727_s6 + $0x2a8] sm:$0xff] }
  0x43   : > { %3260 = vmatpush3.bf16.msra.mxu0 %v3562_v15  ;;  %v399_v15 = vld [vmem:[%s3727_s6 + $0x2a0] sm:$0xff] }
  0x44   : > { %3372 = vmatpush3.bf16.msra.mxu1 %v3564_v20  ;;  %3261 = vmatprep.subr.bf16.mxu0 %v3565_v24  ;;  %v2754_v20 = vcombine.high %v395_v14, %v399_v15  ;;  %v404_v24 = vld [vmem:[%s3727_s6 + $0x2c8] sm:$0xff]  ;;  %v2753_v26 = vcombine.low %v395_v14, %v399_v15  ;;  %v333_v14 = vld [vmem:[%s3727_s6 + $0x90] sm:$0xff] }
  0x45   : > { %1644 = vmatmul.mubr.bf16.gmra.mrb[8].mxu0 %v2689_v3  ;;  %3373 = vmatprep.subr.bf16.mxu1 %v3567_v28  ;;  %v2731_v3 = vcombine.low %v372_v52, %v376_v53  ;;  %v2762_v28 = vcombine.high %v403_v22, %v407_v23  ;;  %v2763_v35 = vcombine.low %v404_v24, %v408_v25  ;;  %v337_v15 = vld [vmem:[%s3727_s6 + $0xb0] sm:$0xff] }
  0x46   : > { %1805 = vmatmul.mubr.bf16.gmra.mrb[8].mxu1 %v2691_v5  ;;  %1651 = vmatprep.mubr.bf16.mxu0 %v2698_v6  ;;  %v2740_v5 = vcombine.high %v380_v0, %v384_v1  ;;  %v387_v6 = vld [vmem:[%s3727_s6 + $0x240] sm:$0xff]  ;;  %v318_v0 = vld [vmem:[%s3727_s6 + $0x18] sm:$0xff] }
  0x47   : > { %1812 = vmatprep.mubr.bf16.mxu1 %v2700_v8  ;;  %3262 = vmatpush3.bf16.msra.mxu0 %v3566_v27  ;;  %v388_v8 = vld [vmem:[%s3727_s6 + $0x248] sm:$0xff]  ;;  %v2746_v12 = vcombine.high %v387_v6, %v391_v7  ;;  %v322_v1 = vld [vmem:[%s3727_s6 + $0x38] sm:$0xff] }
  0x48   : > { %3374 = vmatpush3.bf16.msra.mxu1 %v3568_v29  ;;  %3263 = vmatprep.subr.bf16.mxu0 %v3569_v34  ;;  %v2748_v13 = vcombine.high %v388_v8, %v392_v9  ;;  %v2764_v29 = vcombine.high %v404_v24, %v408_v25  ;;  %v2761_v34 = vcombine.low %v403_v22, %v407_v23  ;;  %v341_v22 = vld [vmem:[%s3727_s6 + $0xd0] sm:$0xff]  ;;  %v342_v24 = vld [vmem:[%s3727_s6 + $0xd8] sm:$0xff] }
  0x49   : > { %3375 = vmatprep.subr.bf16.mxu1 %v3571_v37  ;;  %v345_v23 = vld [vmem:[%s3727_s6 + $0xf0] sm:$0xff]  ;;  %v346_v25 = vld [vmem:[%s3727_s6 + $0xf8] sm:$0xff] }
  0x4b   : > { %3264 = vmatpush3.bf16.msra.mxu0 %v3570_v36 }
  0x4c   : > { %3376 = vmatpush3.bf16.msra.mxu1 %v3572_v39  ;;  %3265 = vmatprep.subr.bf16.mxu0 %v3573_v46  ;;  %v423_v39 = vld [vmem:[%s3727_s6 + $0x360] sm:$0xff] }
  0x4d   : > { %1652 = vmatmul.mubr.bf16.gmra.mrb[12].mxu0 %v2697_v16  ;;  %3377 = vmatprep.subr.bf16.mxu1 %v3575_v48  ;;  %v396_v16 = vld [vmem:[%s3727_s6 + $0x288] sm:$0xff]  ;;  %v427_v46 = vld [vmem:[%s3727_s6 + $0x380] sm:$0xff]  ;;  %v2777_v50 = vcombine.low %v419_v38, %v423_v39 }
  0x4e   : > { %1813 = vmatmul.mubr.bf16.gmra.mrb[12].mxu1 %v2699_v18  ;;  %1659 = vmatprep.mubr.bf16.mxu0 %v2706_v19  ;;  %v2745_v18 = vcombine.low %v387_v6, %v391_v7  ;;  %v2747_v19 = vcombine.low %v388_v8, %v392_v9  ;;  %v2755_v27 = vcombine.low %v396_v16, %v400_v17  ;;  %v428_v48 = vld [vmem:[%s3727_s6 + $0x388] sm:$0xff]  ;;  %v325_v6 = vld [vmem:[%s3727_s6 + $0x50] sm:$0xff]  ;;  %v326_v8 = vld [vmem:[%s3727_s6 + $0x58] sm:$0xff] }
  0x4f   : > { %1820 = vmatprep.mubr.bf16.mxu1 %v2708_v21  ;;  %3266 = vmatpush3.bf16.msra.mxu0 %v3574_v47  ;;  %v2756_v21 = vcombine.high %v396_v16, %v400_v17  ;;  %v431_v47 = vld [vmem:[%s3727_s6 + $0x3a0] sm:$0xff]  ;;  %v329_v7 = vld [vmem:[%s3727_s6 + $0x70] sm:$0xff]  ;;  %v330_v9 = vld [vmem:[%s3727_s6 + $0x78] sm:$0xff] }
  0x50   : > { %3378 = vmatpush3.bf16.msra.mxu1 %v3576_v49  ;;  %3267 = vmatprep.subr.bf16.mxu0 %v3577_v55  ;;  %v432_v49 = vld [vmem:[%s3727_s6 + $0x3a8] sm:$0xff]  ;;  %v2786_v52 = vcombine.high %v427_v46, %v431_v47  ;;  %v439_v55 = vld [vmem:[%s3727_s6 + $0x3e0] sm:$0xff]  ;;  %v334_v16 = vld [vmem:[%s3727_s6 + $0x98] sm:$0xff] }
  0x51   : > { %3379 = vmatprep.subr.bf16.mxu1 %v3579_v60  ;;  %v2788_v53 = vcombine.high %v428_v48, %v432_v49  ;;  %v338_v17 = vld [vmem:[%s3727_s6 + $0xb8] sm:$0xff] }
  0x53   : > { %3268 = vmatpush3.bf16.msra.mxu0 %v3578_v58  ;;  %v2785_v58 = vcombine.low %v427_v46, %v431_v47  ;;  %v365_v46 = vld [vmem:[%s3727_s6 + $0x190] sm:$0xff] }
  0x54   : > { %3380 = vmatpush3.bf16.msra.mxu1 %v3580_v61  ;;  %v369_v47 = vld [vmem:[%s3727_s6 + $0x1b0] sm:$0xff] }
  0x55   : > { %1660 = vmatmul.mubr.bf16.gmra.mrb[16].mxu0 %v2705_v30  ;;  %v411_v30 = vld [vmem:[%s3727_s6 + $0x300] sm:$0xff] }
  0x56   : > { %1821 = vmatmul.mubr.bf16.gmra.mrb[16].mxu1 %v2707_v31  ;;  %1667 = vmatprep.mubr.bf16.mxu0 %v2714_v32  ;;  %v415_v31 = vld [vmem:[%s3727_s6 + $0x320] sm:$0xff]  ;;  %v412_v32 = vld [vmem:[%s3727_s6 + $0x308] sm:$0xff] }
  0x57   : > { %1828 = vmatprep.mubr.bf16.mxu1 %v2716_v33  ;;  %v416_v33 = vld [vmem:[%s3727_s6 + $0x328] sm:$0xff]  ;;  %v2770_v36 = vcombine.high %v411_v30, %v415_v31 }
  0x58   : > { %v2772_v37 = vcombine.high %v412_v32, %v416_v33 }
  0x5d   : > { %1668 = vmatmul.mubr.bf16.gmra.mrb[20].mxu0 %v2713_v42  ;;  %v2769_v42 = vcombine.low %v411_v30, %v415_v31  ;;  %v349_v30 = vld [vmem:[%s3727_s6 + $0x110] sm:$0xff] }
  0x5e   : > { %1829 = vmatmul.mubr.bf16.gmra.mrb[20].mxu1 %v2715_v43  ;;  %1675 = vmatprep.mubr.bf16.mxu0 %v2722_v44  ;;  %v2771_v43 = vcombine.low %v412_v32, %v416_v33  ;;  %v2778_v44 = vcombine.high %v419_v38, %v423_v39  ;;  %v353_v31 = vld [vmem:[%s3727_s6 + $0x130] sm:$0xff]  ;;  %v350_v32 = vld [vmem:[%s3727_s6 + $0x118] sm:$0xff] }
  0x5f   : > { %1836 = vmatprep.mubr.bf16.mxu1 %v2724_v45  ;;  %v2780_v45 = vcombine.high %v420_v40, %v424_v41  ;;  %v354_v33 = vld [vmem:[%s3727_s6 + $0x138] sm:$0xff]  ;;  %v357_v38 = vld [vmem:[%s3727_s6 + $0x150] sm:$0xff] }
  0x60   : > { %v361_v39 = vld [vmem:[%s3727_s6 + $0x170] sm:$0xff]  ;;  %v358_v40 = vld [vmem:[%s3727_s6 + $0x158] sm:$0xff] }
  0x61   : > { %v362_v41 = vld [vmem:[%s3727_s6 + $0x178] sm:$0xff] }
  0x65   : > { %1676 = vmatmul.mubr.bf16.gmra.mrb[24].mxu0 %v2721_v54  ;;  %v435_v54 = vld [vmem:[%s3727_s6 + $0x3c0] sm:$0xff] }
  0x66   : > { %1837 = vmatmul.mubr.bf16.gmra.mrb[24].mxu1 %v2723_v56  ;;  %1683 = vmatprep.mubr.bf16.mxu0 %v2730_v57  ;;  %v436_v56 = vld [vmem:[%s3727_s6 + $0x3c8] sm:$0xff]  ;;  %v2794_v60 = vcombine.high %v435_v54, %v439_v55 }
  0x67   : > { %1844 = vmatprep.mubr.bf16.mxu1 %v2732_v59  ;;  %v440_v57 = vld [vmem:[%s3727_s6 + $0x3e8] sm:$0xff]  ;;  %v2787_v59 = vcombine.low %v428_v48, %v432_v49  ;;  %v366_v48 = vld [vmem:[%s3727_s6 + $0x198] sm:$0xff] }
  0x68   : > { %v2796_v61 = vcombine.high %v436_v56, %v440_v57  ;;  %v370_v49 = vld [vmem:[%s3727_s6 + $0x1b8] sm:$0xff] }
  0x6d   : > { %1684 = vmatmul.mubr.bf16.gmra.mrb[28].mxu0 %v2729_v2  ;;  %v2793_v2 = vcombine.low %v435_v54, %v439_v55  ;;  %v373_v54 = vld [vmem:[%s3727_s6 + $0x1d0] sm:$0xff] }
  0x6e   : > { %1845 = vmatmul.mubr.bf16.gmra.mrb[28].mxu1 %v2731_v3  ;;  %1691 = vmatprep.mubr.bf16.mxu0 %v2738_v4  ;;  %v2795_v3 = vcombine.low %v436_v56, %v440_v57  ;;  %v2678_v4 = vcombine.high %v317_v62, %v321_v63  ;;  %v377_v55 = vld [vmem:[%s3727_s6 + $0x1f0] sm:$0xff]  ;;  %v374_v56 = vld [vmem:[%s3727_s6 + $0x1d8] sm:$0xff] }
  0x6f   : > { %1852 = vmatprep.mubr.bf16.mxu1 %v2740_v5  ;;  %v2680_v5 = vcombine.high %v318_v0, %v322_v1  ;;  %v378_v57 = vld [vmem:[%s3727_s6 + $0x1f8] sm:$0xff] }
  0x75   : > { %1692 = vmatmul.mubr.bf16.gmra.mrb[32].mxu0 %v2737_v10  ;;  %v2677_v10 = vcombine.low %v317_v62, %v321_v63  ;;  %v381_v62 = vld [vmem:[%s3727_s6 + $0x210] sm:$0xff] }
  0x76   : > { %1853 = vmatmul.mubr.bf16.gmra.mrb[32].mxu1 %v2739_v11  ;;  %1699 = vmatprep.mubr.bf16.mxu0 %v2746_v12  ;;  %v2679_v11 = vcombine.low %v318_v0, %v322_v1  ;;  %v2686_v12 = vcombine.high %v325_v6, %v329_v7  ;;  %v385_v63 = vld [vmem:[%s3727_s6 + $0x230] sm:$0xff]  ;;  %v382_v0 = vld [vmem:[%s3727_s6 + $0x218] sm:$0xff] }
  0x77   : > { %1860 = vmatprep.mubr.bf16.mxu1 %v2748_v13  ;;  %v2688_v13 = vcombine.high %v326_v8, %v330_v9  ;;  %v386_v1 = vld [vmem:[%s3727_s6 + $0x238] sm:$0xff] }
  0x7d   : > { %1700 = vmatmul.mubr.bf16.gmra.mrb[36].mxu0 %v2745_v18  ;;  %v2685_v18 = vcombine.low %v325_v6, %v329_v7  ;;  %v389_v6 = vld [vmem:[%s3727_s6 + $0x250] sm:$0xff] }
  0x7e   : > { %1861 = vmatmul.mubr.bf16.gmra.mrb[36].mxu1 %v2747_v19  ;;  %1707 = vmatprep.mubr.bf16.mxu0 %v2754_v20  ;;  %v2687_v19 = vcombine.low %v326_v8, %v330_v9  ;;  %v2694_v20 = vcombine.high %v333_v14, %v337_v15  ;;  %v393_v7 = vld [vmem:[%s3727_s6 + $0x270] sm:$0xff]  ;;  %v390_v8 = vld [vmem:[%s3727_s6 + $0x258] sm:$0xff] }
  0x7f   : > { %1868 = vmatprep.mubr.bf16.mxu1 %v2756_v21  ;;  %v2696_v21 = vcombine.high %v334_v16, %v338_v17  ;;  %v394_v9 = vld [vmem:[%s3727_s6 + $0x278] sm:$0xff] }
  0x85   : > { %1708 = vmatmul.mubr.bf16.gmra.mrb[40].mxu0 %v2753_v26  ;;  %v2693_v26 = vcombine.low %v333_v14, %v337_v15  ;;  %v397_v14 = vld [vmem:[%s3727_s6 + $0x290] sm:$0xff] }
  0x86   : > { %1869 = vmatmul.mubr.bf16.gmra.mrb[40].mxu1 %v2755_v27  ;;  %1715 = vmatprep.mubr.bf16.mxu0 %v2762_v28  ;;  %v2695_v27 = vcombine.low %v334_v16, %v338_v17  ;;  %v2702_v28 = vcombine.high %v341_v22, %v345_v23  ;;  %v401_v15 = vld [vmem:[%s3727_s6 + $0x2b0] sm:$0xff]  ;;  %v398_v16 = vld [vmem:[%s3727_s6 + $0x298] sm:$0xff] }
  0x87   : > { %1876 = vmatprep.mubr.bf16.mxu1 %v2764_v29  ;;  %v2704_v29 = vcombine.high %v342_v24, %v346_v25  ;;  %v402_v17 = vld [vmem:[%s3727_s6 + $0x2b8] sm:$0xff] }
  0x8d   : > { %1716 = vmatmul.mubr.bf16.gmra.mrb[44].mxu0 %v2761_v34  ;;  %v2701_v34 = vcombine.low %v341_v22, %v345_v23  ;;  %v405_v22 = vld [vmem:[%s3727_s6 + $0x2d0] sm:$0xff] }
  0x8e   : > { %1877 = vmatmul.mubr.bf16.gmra.mrb[44].mxu1 %v2763_v35  ;;  %1723 = vmatprep.mubr.bf16.mxu0 %v2770_v36  ;;  %v2703_v35 = vcombine.low %v342_v24, %v346_v25  ;;  %v2710_v36 = vcombine.high %v349_v30, %v353_v31  ;;  %v409_v23 = vld [vmem:[%s3727_s6 + $0x2f0] sm:$0xff]  ;;  %v406_v24 = vld [vmem:[%s3727_s6 + $0x2d8] sm:$0xff] }
  0x8f   : > { %1884 = vmatprep.mubr.bf16.mxu1 %v2772_v37  ;;  %v2712_v37 = vcombine.high %v350_v32, %v354_v33  ;;  %v410_v25 = vld [vmem:[%s3727_s6 + $0x2f8] sm:$0xff] }
  0x95   : > { %1724 = vmatmul.mubr.bf16.gmra.mrb[48].mxu0 %v2769_v42  ;;  %v2709_v42 = vcombine.low %v349_v30, %v353_v31  ;;  %v413_v30 = vld [vmem:[%s3727_s6 + $0x310] sm:$0xff] }
  0x96   : > { %1885 = vmatmul.mubr.bf16.gmra.mrb[48].mxu1 %v2771_v43  ;;  %1731 = vmatprep.mubr.bf16.mxu0 %v2778_v44  ;;  %v2711_v43 = vcombine.low %v350_v32, %v354_v33  ;;  %v2718_v44 = vcombine.high %v357_v38, %v361_v39  ;;  %v417_v31 = vld [vmem:[%s3727_s6 + $0x330] sm:$0xff]  ;;  %v414_v33 = vld [vmem:[%s3727_s6 + $0x318] sm:$0xff] }
  0x97   : > { %1892 = vmatprep.mubr.bf16.mxu1 %v2780_v45  ;;  %v2720_v45 = vcombine.high %v358_v40, %v362_v41 }
  0x9d   : > { %1732 = vmatmul.mubr.bf16.gmra.mrb[52].mxu0 %v2777_v50  ;;  %v2717_v50 = vcombine.low %v357_v38, %v361_v39 }
  0x9e   : > { %1893 = vmatmul.mubr.bf16.gmra.mrb[52].mxu1 %v2779_v51  ;;  %1739 = vmatprep.mubr.bf16.mxu0 %v2786_v52  ;;  %v2719_v51 = vcombine.low %v358_v40, %v362_v41  ;;  %v2726_v52 = vcombine.high %v365_v46, %v369_v47  ;;  %v2767_v41 = vcombine.low %v406_v24, %v410_v25 }
  0x9f   : > { %1900 = vmatprep.mubr.bf16.mxu1 %v2788_v53  ;;  %v2728_v53 = vcombine.high %v366_v48, %v370_v49 }
  0xa5   : > { %1740 = vmatmul.mubr.bf16.gmra.mrb[56].mxu0 %v2785_v58  ;;  %v2725_v58 = vcombine.low %v365_v46, %v369_v47 }
  0xa6   : > { %1901 = vmatmul.mubr.bf16.gmra.mrb[56].mxu1 %v2787_v59  ;;  %1747 = vmatprep.mubr.bf16.mxu0 %v2794_v60  ;;  %v2727_v59 = vcombine.low %v366_v48, %v370_v49  ;;  %v2734_v60 = vcombine.high %v373_v54, %v377_v55 }
  0xa7   : > { %1908 = vmatprep.mubr.bf16.mxu1 %v2796_v61  ;;  %v2736_v61 = vcombine.high %v374_v56, %v378_v57 }
  0xad   : > { %1748 = vmatmul.mubr.bf16.gmra.mrb[60].mxu0 %v2793_v2  ;;  %v2733_v2 = vcombine.low %v373_v54, %v377_v55  ;;  %v422_v55 = vld [vmem:[%s3727_s6 + $0x358] sm:$0xff] }
  0xae   : > { %1909 = vmatmul.mubr.bf16.gmra.mrb[60].mxu1 %v2795_v3  ;;  %1949 = vmatprep.mubr.bf16.mxu0 %v2678_v4  ;;  %v2735_v3 = vcombine.low %v374_v56, %v378_v57  ;;  %v2742_v4 = vcombine.high %v381_v62, %v385_v63  ;;  %v426_v56 = vld [vmem:[%s3727_s6 + $0x378] sm:$0xff] }
  0xaf   : > { %2110 = vmatprep.mubr.bf16.mxu1 %v2680_v5  ;;  %v2744_v5 = vcombine.high %v382_v0, %v386_v1 }
  0xb5   : > { %1950 = vmatmul.mubr.bf16.vlgmr.msra.gmra.mrb[64].mxu0 %v2677_v10  ;;  %v2741_v10 = vcombine.low %v381_v62, %v385_v63 }
  0xb6   : > { %2111 = vmatmul.mubr.bf16.vlgmr.msra.gmra.mrb[64].mxu1 %v2679_v11  ;;  %1957 = vmatprep.mubr.bf16.mxu0 %v2686_v12  ;;  %v2743_v11 = vcombine.low %v382_v0, %v386_v1  ;;  %v2750_v12 = vcombine.high %v389_v6, %v393_v7 }
  0xb7   : > { %2118 = vmatprep.mubr.bf16.mxu1 %v2688_v13  ;;  %v2752_v13 = vcombine.high %v390_v8, %v394_v9 }
  0xbd   : > { %1958 = vmatmul.mubr.bf16.gmra.mrb[68].mxu0 %v2685_v18  ;;  %v2749_v18 = vcombine.low %v389_v6, %v393_v7 }
  0xbe   : > { %2119 = vmatmul.mubr.bf16.gmra.mrb[68].mxu1 %v2687_v19  ;;  %1965 = vmatprep.mubr.bf16.mxu0 %v2694_v20  ;;  %v2751_v19 = vcombine.low %v390_v8, %v394_v9  ;;  %v2758_v20 = vcombine.high %v397_v14, %v401_v15 }
  0xbf   : > { %2126 = vmatprep.mubr.bf16.mxu1 %v2696_v21  ;;  %v2760_v21 = vcombine.high %v398_v16, %v402_v17 }
  0xc5   : > { %1966 = vmatmul.mubr.bf16.gmra.mrb[72].mxu0 %v2693_v26  ;;  %v2757_v26 = vcombine.low %v397_v14, %v401_v15  ;;  %v434_v14 = vld [vmem:[%s3727_s6 + $0x3b8] sm:$0xff] }
  0xc6   : > { %2127 = vmatmul.mubr.bf16.gmra.mrb[72].mxu1 %v2695_v27  ;;  %1973 = vmatprep.mubr.bf16.mxu0 %v2702_v28  ;;  %v2759_v27 = vcombine.low %v398_v16, %v402_v17  ;;  %v2766_v28 = vcombine.high %v405_v22, %v409_v23 }
  0xc7   : > { %2134 = vmatprep.mubr.bf16.mxu1 %v2704_v29  ;;  %v2768_v29 = vcombine.high %v406_v24, %v410_v25 }
  0xcd   : > { %1974 = vmatmul.mubr.bf16.gmra.mrb[76].mxu0 %v2701_v34  ;;  %v418_v34 = vld [vmem:[%s3727_s6 + $0x338] sm:$0xff] }
  0xce   : > { %2135 = vmatmul.mubr.bf16.gmra.mrb[76].mxu1 %v2703_v35  ;;  %1981 = vmatprep.mubr.bf16.mxu0 %v2710_v36  ;;  %v2776_v46 = vcombine.high %v414_v33, %v418_v34  ;;  %v2775_v63 = vcombine.low %v414_v33, %v418_v34  ;;  %v441_v33 = vld [vmem:[%s3727_s6 + $0x3f0] sm:$0xff] }
  0xcf   : > { %2142 = vmatprep.mubr.bf16.mxu1 %v2712_v37  ;;  %v2765_v37 = vcombine.low %v405_v22, %v409_v23 }
  0xd5   : > { %1982 = vmatmul.mubr.bf16.gmra.mrb[80].mxu0 %v2709_v42  ;;  %v2774_v42 = vcombine.high %v413_v30, %v417_v31 }
  0xd6   : > { %2143 = vmatmul.mubr.bf16.gmra.mrb[80].mxu1 %v2711_v43  ;;  %1989 = vmatprep.mubr.bf16.mxu0 %v2718_v44 }
  0xd7   : > { %2150 = vmatprep.mubr.bf16.mxu1 %v2720_v45 }
  0xdd   : > { %1990 = vmatmul.mubr.bf16.gmra.mrb[84].mxu0 %v2717_v50 }
  0xde   : > { %2151 = vmatmul.mubr.bf16.gmra.mrb[84].mxu1 %v2719_v51  ;;  %1997 = vmatprep.mubr.bf16.mxu0 %v2726_v52  ;;  %v421_v52 = vld [vmem:[%s3727_s6 + $0x350] sm:$0xff] }
  0xdf   : > { %2158 = vmatprep.mubr.bf16.mxu1 %v2728_v53  ;;  %v425_v53 = vld [vmem:[%s3727_s6 + $0x370] sm:$0xff] }
  0xe0   : > { %v2782_v0 = vcombine.high %v421_v52, %v425_v53  ;;  %v2781_v17 = vcombine.low %v421_v52, %v425_v53 }
  0xe5   : > { %1998 = vmatmul.mubr.bf16.gmra.mrb[88].mxu0 %v2725_v58 }
  0xe6   : > { %2159 = vmatmul.mubr.bf16.gmra.mrb[88].mxu1 %v2727_v59  ;;  %2005 = vmatprep.mubr.bf16.mxu0 %v2734_v60  ;;  %v2773_v59 = vcombine.low %v413_v30, %v417_v31 }
  0xe7   : > { %2166 = vmatprep.mubr.bf16.mxu1 %v2736_v61 }
  0xed   : > { %2006 = vmatmul.mubr.bf16.gmra.mrb[92].mxu0 %v2733_v2 }
  0xee   : > { %2167 = vmatmul.mubr.bf16.gmra.mrb[92].mxu1 %v2735_v3  ;;  %2013 = vmatprep.mubr.bf16.mxu0 %v2742_v4  ;;  %v2784_v4 = vcombine.high %v422_v55, %v426_v56 }
  0xef   : > { %2174 = vmatprep.mubr.bf16.mxu1 %v2744_v5 }
  0xf5   : > { %2014 = vmatmul.mubr.bf16.gmra.mrb[96].mxu0 %v2741_v10  ;;  %v429_v10 = vld [vmem:[%s3727_s6 + $0x390] sm:$0xff] }
  0xf6   : > { %2175 = vmatmul.mubr.bf16.gmra.mrb[96].mxu1 %v2743_v11  ;;  %2021 = vmatprep.mubr.bf16.mxu0 %v2750_v12  ;;  %v433_v11 = vld [vmem:[%s3727_s6 + $0x3b0] sm:$0xff] }
  0xf7   : > { %2182 = vmatprep.mubr.bf16.mxu1 %v2752_v13  ;;  %v430_v13 = vld [vmem:[%s3727_s6 + $0x398] sm:$0xff]  ;;  %v2790_v22 = vcombine.high %v429_v10, %v433_v11 }
  0xfd   : > { %2022 = vmatmul.mubr.bf16.gmra.mrb[100].mxu0 %v2749_v18 }
  0xfe   : > { %2183 = vmatmul.mubr.bf16.gmra.mrb[100].mxu1 %v2751_v19  ;;  %2029 = vmatprep.mubr.bf16.mxu0 %v2758_v20 }
  0xff   : > { %2190 = vmatprep.mubr.bf16.mxu1 %v2760_v21  ;;  %v2783_v21 = vcombine.low %v422_v55, %v426_v56 }
 0x105   : > { %2030 = vmatmul.mubr.bf16.gmra.mrb[104].mxu0 %v2757_v26  ;;  %v2792_v26 = vcombine.high %v430_v13, %v434_v14 }
 0x106   : > { %2191 = vmatmul.mubr.bf16.gmra.mrb[104].mxu1 %v2759_v27  ;;  %2037 = vmatprep.mubr.bf16.mxu0 %v2766_v28 }
 0x107   : > { %2198 = vmatprep.mubr.bf16.mxu1 %v2768_v29 }
 0x108   : > { %v3045_v32 = vpop.f32.mrb[0].mxu0 }
 0x109   : > { %v3157_v35 = vpop.f32.mrb[0].mxu1  ;;  %v3046_v36 = vpop.f32.mrb[1].mxu0 }
 0x10a   : > { %v3047_v38 = vadd.f32 %v3046_v36, %v3045_v32  ;;  %v3158_v39 = vpop.f32.mrb[1].mxu1  ;;  %v3048_v40 = vpop.f32.mrb[2].mxu0  ;;  %v437_v32 = vld [vmem:[%s3727_s6 + $0x3d0] sm:$0xff]  ;;  %v442_v36 = vld [vmem:[%s3727_s6 + $0x3f8] sm:$0xff] }
 0x10b   : > { %v3159_v43 = vadd.f32 %v3158_v39, %v3157_v35  ;;  %v3160_v44 = vpop.f32.mrb[2].mxu1  ;;  %v3049_v45 = vpop.f32.mrb[3].mxu0  ;;  %v438_v35 = vld [vmem:[%s3727_s6 + $0x3d8] sm:$0xff]  ;;  %v2789_v39 = vcombine.low %v429_v10, %v433_v11 }
 0x10c   : > { %v3050_v47 = vadd.f32 %v3049_v45, %v3048_v40  ;;  %v3161_v48 = vpop.f32.mrb[3].mxu1 }
 0x10d   : > { %v3879_v49 = vadd.f32 %v3159_v43, %v3047_v38  ;;  %v3162_v50 = vadd.f32 %v3161_v48, %v3160_v44  ;;  %2038 = vmatmul.mubr.bf16.gmra.mrb[108].mxu0 %v2765_v37  ;;  %v2791_v43 = vcombine.low %v430_v13, %v434_v14  ;;  %v2798_v44 = vcombine.high %v437_v32, %v441_v33 }
 0x10e   : > { %2199 = vmatmul.mubr.bf16.gmra.mrb[108].mxu1 %v2767_v41  ;;  %2045 = vmatprep.mubr.bf16.mxu0 %v2774_v42  ;;  %v2800_v48 = vcombine.high %v438_v35, %v442_v36 }
 0x10f   : > { %v3881_v51 = vadd.f32 %v3162_v50, %v3050_v47  ;;  %2206 = vmatprep.mubr.bf16.mxu1 %v2776_v46 }
 0x110   : > { %v3051_v54 = vpop.f32.mrb[4].mxu0 }
 0x111   : > { %v3163_v57 = vpop.f32.mrb[4].mxu1  ;;  %v3052_v58 = vpop.f32.mrb[5].mxu0 }
 0x112   : > { %v3053_v60 = vadd.f32 %v3052_v58, %v3051_v54  ;;  %v3164_v61 = vpop.f32.mrb[5].mxu1  ;;  %v3054_v62 = vpop.f32.mrb[6].mxu0 }
 0x113   : > { %v3165_v1 = vadd.f32 %v3164_v61, %v3163_v57  ;;  %v3166_v2 = vpop.f32.mrb[6].mxu1  ;;  %v3055_v3 = vpop.f32.mrb[7].mxu0 }
 0x114   : > { %v3056_v5 = vadd.f32 %v3055_v3, %v3054_v62  ;;  %v3167_v6 = vpop.f32.mrb[7].mxu1 }
 0x115   : > { %v3887_v7 = vadd.f32 %v3165_v1, %v3053_v60  ;;  %v3168_v8 = vadd.f32 %v3167_v6, %v3166_v2  ;;  %2046 = vmatmul.mubr.bf16.gmra.mrb[112].mxu0 %v2773_v59  ;;  %v2797_v59 = vcombine.low %v437_v32, %v441_v33 }
 0x116   : > { %2207 = vmatmul.mubr.bf16.gmra.mrb[112].mxu1 %v2775_v63  ;;  %2053 = vmatprep.mubr.bf16.mxu0 %v2782_v0  ;;  %v2799_v63 = vcombine.low %v438_v35, %v442_v36 }
 0x117   : > { %v3889_v9 = vadd.f32 %v3168_v8, %v3056_v5  ;;  %2214 = vmatprep.mubr.bf16.mxu1 %v2784_v4 }
 0x118   : > { %v3057_v12 = vpop.f32.mrb[8].mxu0 }
 0x119   : > { %v3169_v15 = vpop.f32.mrb[8].mxu1  ;;  %v3058_v16 = vpop.f32.mrb[9].mxu0 }
 0x11a   : > { %v3059_v18 = vadd.f32 %v3058_v16, %v3057_v12  ;;  %v3170_v19 = vpop.f32.mrb[9].mxu1  ;;  %v3060_v20 = vpop.f32.mrb[10].mxu0 }
 0x11b   : > { %v3171_v23 = vadd.f32 %v3170_v19, %v3169_v15  ;;  %v3172_v24 = vpop.f32.mrb[10].mxu1  ;;  %v3061_v25 = vpop.f32.mrb[11].mxu0 }
 0x11c   : > { %v3062_v27 = vadd.f32 %v3061_v25, %v3060_v20  ;;  %v3173_v28 = vpop.f32.mrb[11].mxu1 }
 0x11d   : > { %v3895_v29 = vadd.f32 %v3171_v23, %v3059_v18  ;;  %v3174_v30 = vadd.f32 %v3173_v28, %v3172_v24  ;;  %2054 = vmatmul.mubr.bf16.gmra.mrb[116].mxu0 %v2781_v17 }
 0x11e   : > { %2215 = vmatmul.mubr.bf16.gmra.mrb[116].mxu1 %v2783_v21  ;;  %2061 = vmatprep.mubr.bf16.mxu0 %v2790_v22 }
 0x11f   : > { %v3897_v31 = vadd.f32 %v3174_v30, %v3062_v27  ;;  %2222 = vmatprep.mubr.bf16.mxu1 %v2792_v26 }
 0x120   : > { %v3063_v34 = vpop.f32.mrb[12].mxu0 }
 0x121   : > { %v3175_v37 = vpop.f32.mrb[12].mxu1  ;;  %v3064_v38 = vpop.f32.mrb[13].mxu0 }
 0x122   : > { %v3065_v40 = vadd.f32 %v3064_v38, %v3063_v34  ;;  %v3176_v41 = vpop.f32.mrb[13].mxu1  ;;  %v3066_v42 = vpop.f32.mrb[14].mxu0 }
 0x123   : > { %v3177_v45 = vadd.f32 %v3176_v41, %v3175_v37  ;;  %v3178_v46 = vpop.f32.mrb[14].mxu1  ;;  %v3067_v47 = vpop.f32.mrb[15].mxu0 }
 0x124   : > { %v3068_v50 = vadd.f32 %v3067_v47, %v3066_v42  ;;  %v3179_v52 = vpop.f32.mrb[15].mxu1 }
 0x125   : > { %v3903_v53 = vadd.f32 %v3177_v45, %v3065_v40  ;;  %v3180_v54 = vadd.f32 %v3179_v52, %v3178_v46  ;;  %2062 = vmatmul.mubr.bf16.gmra.mrb[120].mxu0 %v2789_v39 }
 0x126   : > { %2223 = vmatmul.mubr.bf16.gmra.mrb[120].mxu1 %v2791_v43  ;;  %2069 = vmatprep.mubr.bf16.mxu0 %v2798_v44 }
 0x127   : > { %v3905_v55 = vadd.f32 %v3180_v54, %v3068_v50  ;;  %2230 = vmatprep.mubr.bf16.mxu1 %v2800_v48 }
 0x128   : > { %v3069_v56 = vpop.f32.mrb[16].mxu0 }
 0x129   : > { %v3181_v57 = vpop.f32.mrb[16].mxu1  ;;  %v3070_v58 = vpop.f32.mrb[17].mxu0 }
 0x12a   : > { %v3071_v60 = vadd.f32 %v3070_v58, %v3069_v56  ;;  %v3182_v61 = vpop.f32.mrb[17].mxu1  ;;  %v3072_v62 = vpop.f32.mrb[18].mxu0 }
 0x12b   : > { %v3183_v0 = vadd.f32 %v3182_v61, %v3181_v57  ;;  %v3184_v1 = vpop.f32.mrb[18].mxu1  ;;  %v3073_v2 = vpop.f32.mrb[19].mxu0 }
 0x12c   : > { %v3074_v3 = vadd.f32 %v3073_v2, %v3072_v62  ;;  %v3185_v4 = vpop.f32.mrb[19].mxu1 }
 0x12d   : > { %v3907_v5 = vadd.f32 %v3183_v0, %v3071_v60  ;;  %v3186_v6 = vadd.f32 %v3185_v4, %v3184_v1  ;;  %2070 = vmatmul.mubr.bf16.gmra.mrb[124].mxu0 %v2797_v59 }
 0x12e   : > { %2231 = vmatmul.mubr.bf16.gmra.mrb[124].mxu1 %v2799_v63 }
 0x12f   : > { %v3909_v8 = vadd.f32 %v3186_v6, %v3074_v3 }
 0x130   : > { %v3075_v10 = vpop.f32.mrb[20].mxu0 }
 0x131   : > { %v3187_v11 = vpop.f32.mrb[20].mxu1  ;;  %v3076_v12 = vpop.f32.mrb[21].mxu0 }
 0x132   : > { %v3077_v13 = vadd.f32 %v3076_v12, %v3075_v10  ;;  %v3188_v14 = vpop.f32.mrb[21].mxu1  ;;  %v3078_v15 = vpop.f32.mrb[22].mxu0 }
 0x133   : > { %v3189_v16 = vadd.f32 %v3188_v14, %v3187_v11  ;;  %v3190_v17 = vpop.f32.mrb[22].mxu1  ;;  %v3079_v18 = vpop.f32.mrb[23].mxu0 }
 0x134   : > { %v3080_v19 = vadd.f32 %v3079_v18, %v3078_v15  ;;  %v3191_v20 = vpop.f32.mrb[23].mxu1 }
 0x135   : > { %v3911_v21 = vadd.f32 %v3189_v16, %v3077_v13  ;;  %v3192_v22 = vadd.f32 %v3191_v20, %v3190_v17 }
 0x137   : > { %v3913_v23 = vadd.f32 %v3192_v22, %v3080_v19 }
 0x138   : > { %v3081_v24 = vpop.f32.mrb[24].mxu0 }
 0x139   : > { %v3193_v25 = vpop.f32.mrb[24].mxu1  ;;  %v3082_v26 = vpop.f32.mrb[25].mxu0 }
 0x13a   : > { %v3083_v27 = vadd.f32 %v3082_v26, %v3081_v24  ;;  %v3194_v28 = vpop.f32.mrb[25].mxu1  ;;  %v3084_v30 = vpop.f32.mrb[26].mxu0 }
 0x13b   : > { %v3195_v32 = vadd.f32 %v3194_v28, %v3193_v25  ;;  %v3196_v33 = vpop.f32.mrb[26].mxu1  ;;  %v3085_v34 = vpop.f32.mrb[27].mxu0 }
 0x13c   : > { %v3086_v35 = vadd.f32 %v3085_v34, %v3084_v30  ;;  %v3197_v36 = vpop.f32.mrb[27].mxu1 }
 0x13d   : > { %v3915_v37 = vadd.f32 %v3195_v32, %v3083_v27  ;;  %v3198_v38 = vadd.f32 %v3197_v36, %v3196_v33 }
 0x13f   : > { %v3917_v39 = vadd.f32 %v3198_v38, %v3086_v35 }
 0x140   : > { %v3087_v40 = vpop.f32.mrb[28].mxu0 }
 0x141   : > { %v3199_v41 = vpop.f32.mrb[28].mxu1  ;;  %v3088_v42 = vpop.f32.mrb[29].mxu0 }
 0x142   : > { %v3089_v43 = vadd.f32 %v3088_v42, %v3087_v40  ;;  %v3200_v44 = vpop.f32.mrb[29].mxu1  ;;  %v3090_v45 = vpop.f32.mrb[30].mxu0 }
 0x143   : > { %v3201_v46 = vadd.f32 %v3200_v44, %v3199_v41  ;;  %v3202_v47 = vpop.f32.mrb[30].mxu1  ;;  %v3091_v48 = vpop.f32.mrb[31].mxu0 }
 0x144   : > { %v3092_v50 = vadd.f32 %v3091_v48, %v3090_v45  ;;  %v3203_v52 = vpop.f32.mrb[31].mxu1 }
 0x145   : > { %v3919_v54 = vadd.f32 %v3201_v46, %v3089_v43  ;;  %v3204_v56 = vadd.f32 %v3203_v52, %v3202_v47 }
 0x147   : > { %v3921_v57 = vadd.f32 %v3204_v56, %v3092_v50 }
 0x148   : > { %v3093_v58 = vpop.f32.mrb[32].mxu0 }
 0x149   : > { %v3205_v59 = vpop.f32.mrb[32].mxu1  ;;  %v3094_v60 = vpop.f32.mrb[33].mxu0 }
 0x14a   : > { %v3095_v61 = vadd.f32 %v3094_v60, %v3093_v58  ;;  %v3206_v62 = vpop.f32.mrb[33].mxu1  ;;  %v3096_v63 = vpop.f32.mrb[34].mxu0 }
 0x14b   : > { %v3207_v0 = vadd.f32 %v3206_v62, %v3205_v59  ;;  %v3208_v1 = vpop.f32.mrb[34].mxu1  ;;  %v3097_v2 = vpop.f32.mrb[35].mxu0 }
 0x14c   : > { %v3098_v3 = vadd.f32 %v3097_v2, %v3096_v63  ;;  %v3209_v4 = vpop.f32.mrb[35].mxu1 }
 0x14d   : > { %v3923_v6 = vadd.f32 %v3207_v0, %v3095_v61  ;;  %v3210_v10 = vadd.f32 %v3209_v4, %v3208_v1 }
 0x14f   : > { %v3925_v11 = vadd.f32 %v3210_v10, %v3098_v3 }
 0x150   : > { %v3099_v12 = vpop.f32.mrb[36].mxu0 }
 0x151   : > { %v3211_v13 = vpop.f32.mrb[36].mxu1  ;;  %v3100_v14 = vpop.f32.mrb[37].mxu0 }
 0x152   : > { %v3101_v15 = vadd.f32 %v3100_v14, %v3099_v12  ;;  %v3212_v16 = vpop.f32.mrb[37].mxu1  ;;  %v3102_v17 = vpop.f32.mrb[38].mxu0 }
 0x153   : > { %v3213_v18 = vadd.f32 %v3212_v16, %v3211_v13  ;;  %v3214_v19 = vpop.f32.mrb[38].mxu1  ;;  %v3103_v20 = vpop.f32.mrb[39].mxu0 }
 0x154   : > { %v3104_v22 = vadd.f32 %v3103_v20, %v3102_v17  ;;  %v3215_v24 = vpop.f32.mrb[39].mxu1 }
 0x155   : > { %v3927_v25 = vadd.f32 %v3213_v18, %v3101_v15  ;;  %v3216_v26 = vadd.f32 %v3215_v24, %v3214_v19 }
 0x157   : > { %v3929_v27 = vadd.f32 %v3216_v26, %v3104_v22 }
 0x158   : > { %v3105_v28 = vpop.f32.mrb[40].mxu0 }
 0x159   : > { %v3217_v30 = vpop.f32.mrb[40].mxu1  ;;  %v3106_v32 = vpop.f32.mrb[41].mxu0 }
 0x15a   : > { %v3107_v33 = vadd.f32 %v3106_v32, %v3105_v28  ;;  %v3218_v34 = vpop.f32.mrb[41].mxu1  ;;  %v3108_v35 = vpop.f32.mrb[42].mxu0 }
 0x15b   : > { %v3219_v36 = vadd.f32 %v3218_v34, %v3217_v30  ;;  %v3220_v38 = vpop.f32.mrb[42].mxu1  ;;  %v3109_v40 = vpop.f32.mrb[43].mxu0 }
 0x15c   : > { %v3110_v41 = vadd.f32 %v3109_v40, %v3108_v35  ;;  %v3221_v42 = vpop.f32.mrb[43].mxu1 }
 0x15d   : > { %v3931_v43 = vadd.f32 %v3219_v36, %v3107_v33  ;;  %v3222_v44 = vadd.f32 %v3221_v42, %v3220_v38 }
 0x15f   : > { %v3933_v45 = vadd.f32 %v3222_v44, %v3110_v41 }
 0x160   : > { %v3111_v46 = vpop.f32.mrb[44].mxu0 }
 0x161   : > { %v3223_v47 = vpop.f32.mrb[44].mxu1  ;;  %v3112_v48 = vpop.f32.mrb[45].mxu0 }
 0x162   : > { %v3113_v50 = vadd.f32 %v3112_v48, %v3111_v46  ;;  %v3224_v52 = vpop.f32.mrb[45].mxu1  ;;  %v3114_v56 = vpop.f32.mrb[46].mxu0 }
 0x163   : > { %v3225_v58 = vadd.f32 %v3224_v52, %v3223_v47  ;;  %v3226_v59 = vpop.f32.mrb[46].mxu1  ;;  %v3115_v60 = vpop.f32.mrb[47].mxu0 }
 0x164   : > { %v3116_v61 = vadd.f32 %v3115_v60, %v3114_v56  ;;  %v3227_v62 = vpop.f32.mrb[47].mxu1 }
 0x165   : > { %v3935_v63 = vadd.f32 %v3225_v58, %v3113_v50  ;;  %v3228_v0 = vadd.f32 %v3227_v62, %v3226_v59 }
 0x167   : > { %v3937_v1 = vadd.f32 %v3228_v0, %v3116_v61 }
 0x168   : > { %v3117_v2 = vpop.f32.mrb[48].mxu0 }
 0x169   : > { %v3229_v3 = vpop.f32.mrb[48].mxu1  ;;  %v3118_v4 = vpop.f32.mrb[49].mxu0 }
 0x16a   : > { %v3119_v10 = vadd.f32 %v3118_v4, %v3117_v2  ;;  %v3230_v12 = vpop.f32.mrb[49].mxu1  ;;  %v3120_v13 = vpop.f32.mrb[50].mxu0 }
 0x16b   : > { %v3231_v14 = vadd.f32 %v3230_v12, %v3229_v3  ;;  %v3232_v15 = vpop.f32.mrb[50].mxu1  ;;  %v3121_v16 = vpop.f32.mrb[51].mxu0 }
 0x16c   : > { %v3122_v17 = vadd.f32 %v3121_v16, %v3120_v13  ;;  %v3233_v18 = vpop.f32.mrb[51].mxu1 }
 0x16d   : > { %v3939_v19 = vadd.f32 %v3231_v14, %v3119_v10  ;;  %v3234_v20 = vadd.f32 %v3233_v18, %v3232_v15 }
 0x16f   : > { %v3941_v22 = vadd.f32 %v3234_v20, %v3122_v17 }
 0x170   : > { %v3123_v24 = vpop.f32.mrb[52].mxu0 }
 0x171   : > { %v3235_v26 = vpop.f32.mrb[52].mxu1  ;;  %v3124_v28 = vpop.f32.mrb[53].mxu0 }
 0x172   : > { %v3125_v30 = vadd.f32 %v3124_v28, %v3123_v24  ;;  %v3236_v32 = vpop.f32.mrb[53].mxu1  ;;  %v3126_v33 = vpop.f32.mrb[54].mxu0 }
 0x173   : > { %v3237_v34 = vadd.f32 %v3236_v32, %v3235_v26  ;;  %v3238_v35 = vpop.f32.mrb[54].mxu1  ;;  %v3127_v36 = vpop.f32.mrb[55].mxu0 }
 0x174   : > { %v3128_v38 = vadd.f32 %v3127_v36, %v3126_v33  ;;  %v3239_v40 = vpop.f32.mrb[55].mxu1 }
 0x175   : > { %v3943_v41 = vadd.f32 %v3237_v34, %v3125_v30  ;;  %v3240_v42 = vadd.f32 %v3239_v40, %v3238_v35 }
 0x177   : > { %v3945_v44 = vadd.f32 %v3240_v42, %v3128_v38 }
 0x178   : > { %v3129_v46 = vpop.f32.mrb[56].mxu0 }
 0x179   : > { %v3241_v47 = vpop.f32.mrb[56].mxu1  ;;  %v3130_v48 = vpop.f32.mrb[57].mxu0 }
 0x17a   : > { %v3131_v50 = vadd.f32 %v3130_v48, %v3129_v46  ;;  %v3242_v52 = vpop.f32.mrb[57].mxu1  ;;  %v3132_v56 = vpop.f32.mrb[58].mxu0 }
 0x17b   : > { %v3243_v58 = vadd.f32 %v3242_v52, %v3241_v47  ;;  %v3244_v59 = vpop.f32.mrb[58].mxu1  ;;  %v3133_v60 = vpop.f32.mrb[59].mxu0  ;;  %v3959_v52 = vld [vmem:[%s4101_s2] ss:$0 sm:$0xff] }
 0x17c   : > { %v3134_v61 = vadd.f32 %v3133_v60, %v3132_v56  ;;  %v3245_v62 = vpop.f32.mrb[59].mxu1  ;;  %v3966_v60 = vld [vmem:[%s4102_s3] ss:$0 sm:$0xff] }
 0x17d   : > { %v3947_v0 = vadd.f32 %v3243_v58, %v3131_v50  ;;  %v3246_v2 = vadd.f32 %v3245_v62, %v3244_v59 }
 0x17f   : > { %v3949_v3 = vadd.f32 %v3246_v2, %v3134_v61 }
 0x180   : > { %v3135_v4 = vpop.f32.mrb[60].mxu0 }
 0x181   : > { %v3247_v10 = vpop.f32.mrb[60].mxu1  ;;  %v3136_v12 = vpop.f32.mrb[61].mxu0 }
 0x182   : > { %v3137_v13 = vadd.f32 %v3136_v12, %v3135_v4  ;;  %v3248_v14 = vpop.f32.mrb[61].mxu1  ;;  %v3138_v15 = vpop.f32.mrb[62].mxu0 }
 0x183   : > { %v3249_v16 = vadd.f32 %v3248_v14, %v3247_v10  ;;  %v3250_v17 = vpop.f32.mrb[62].mxu1  ;;  %v3139_v18 = vpop.f32.mrb[63].mxu0 }
 0x184   : > { %v3140_v20 = vadd.f32 %v3139_v18, %v3138_v15  ;;  %v3251_v24 = vpop.f32.mrb[63].mxu1 }
 0x185   : > { %v3951_v26 = vadd.f32 %v3249_v16, %v3137_v13  ;;  %v3252_v28 = vadd.f32 %v3251_v24, %v3250_v17 }
 0x187   : > { %v3953_v30 = vadd.f32 %v3252_v28, %v3140_v20 }
 0x188   : > { %v3269_v32 = vpop.f32.mrb[64].mxu0 }
 0x189   : > { %v3381_v33 = vpop.f32.mrb[64].mxu1  ;;  %v3270_v34 = vpop.f32.mrb[65].mxu0 }
 0x18a   : > { %v3271_v35 = vadd.f32 %v3270_v34, %v3269_v32  ;;  %v3382_v36 = vpop.f32.mrb[65].mxu1  ;;  %v3272_v38 = vpop.f32.mrb[66].mxu0 }
 0x18b   : > { %v3383_v40 = vadd.f32 %v3382_v36, %v3381_v33  ;;  %v3384_v42 = vpop.f32.mrb[66].mxu1  ;;  %v3273_v46 = vpop.f32.mrb[67].mxu0 }
 0x18c   : > { %v1952_v47 = vadd.f32 %v3271_v35, %v3879_v49  ;;  %v3274_v48 = vadd.f32 %v3273_v46, %v3272_v38  ;;  %v3385_v50 = vpop.f32.mrb[67].mxu1 }
 0x18d   : > { %v3386_v56 = vadd.f32 %v3385_v50, %v3384_v42 }
 0x18e   : > { %v2113_v58 = vadd.f32 %v3383_v40, %v1952_v47  ;;  %v1955_v59 = vadd.f32 %v3274_v48, %v3881_v51 }
 0x190   : > { %v2246_v61 = vmul.f32 %v3959_v52, %v2113_v58  ;;  %v2116_v49 = vadd.f32 %v3386_v56, %v1955_v59  ;;  %v3275_v62 = vpop.f32.mrb[68].mxu0 }
 0x191   : > { %v3387_v2 = vpop.f32.mrb[68].mxu1  ;;  %v3276_v4 = vpop.f32.mrb[69].mxu0 }
 0x192   : > { %v2285_v10 = vadd.f32 %v3966_v60, %v2246_v61  ;;  %v2247_v12 = vmul.f32 %v3959_v52, %v2116_v49  ;;  %v3277_v13 = vadd.f32 %v3276_v4, %v3275_v62  ;;  %v3388_v14 = vpop.f32.mrb[69].mxu1  ;;  %v3278_v51 = vpop.f32.mrb[70].mxu0 }
 0x193   : > { %v3389_v15 = vadd.f32 %v3388_v14, %v3387_v2  ;;  %v3390_v16 = vpop.f32.mrb[70].mxu1  ;;  %v3279_v17 = vpop.f32.mrb[71].mxu0 }
 0x194   : > { %v2286_v18 = vadd.f32 %v3966_v60, %v2247_v12  ;;  %v1960_v20 = vadd.f32 %v3277_v13, %v3887_v7  ;;  %v3280_v24 = vadd.f32 %v3279_v17, %v3278_v51  ;;  %v3391_v28 = vpop.f32.mrb[71].mxu1  ;;  %v2317_v33 = vmax.f32 %v2285_v10, 0.0 }
 0x195   : > { %v3392_v32 = vadd.f32 %v3391_v28, %v3390_v16 }
 0x196   : > { %v2318_v34 = vmax.f32 %v2286_v18, 0.0  ;;  %v2121_v35 = vadd.f32 %v3389_v15, %v1960_v20  ;;  %v1963_v36 = vadd.f32 %v3280_v24, %v3889_v9 }
 0x198   : > { %v2937_v38 = vpack.c.bf16 %v2318_v34, %v2317_v33  ;;  %v2248_v40 = vmul.f32 %v3959_v52, %v2121_v35  ;;  %v2124_v42 = vadd.f32 %v3392_v32, %v1963_v36  ;;  %v3281_v46 = vpop.f32.mrb[72].mxu0 }
 0x199   : > { %v3393_v7 = vpop.f32.mrb[72].mxu1  ;;  %v3282_v47 = vpop.f32.mrb[73].mxu0 }
 0x19a   : > { %2938 = vst [vmem:[%s3978_s16] sm:$0xff] %v2937_v38   ;;  %v2287_v48 = vadd.f32 %v3966_v60, %v2248_v40  ;;  %v2249_v50 = vmul.f32 %v3959_v52, %v2124_v42  ;;  %v3283_v56 = vadd.f32 %v3282_v47, %v3281_v46  ;;  %v3394_v9 = vpop.f32.mrb[73].mxu1  ;;  %v3284_v58 = vpop.f32.mrb[74].mxu0 }
 0x19b   : > { %v3395_v59 = vadd.f32 %v3394_v9, %v3393_v7  ;;  %v3396_v61 = vpop.f32.mrb[74].mxu1  ;;  %v3285_v49 = vpop.f32.mrb[75].mxu0 }
 0x19c   : > { %v2288_v62 = vadd.f32 %v3966_v60, %v2249_v50  ;;  %v1968_v2 = vadd.f32 %v3283_v56, %v3895_v29  ;;  %v3286_v4 = vadd.f32 %v3285_v49, %v3284_v58  ;;  %v3397_v10 = vpop.f32.mrb[75].mxu1  ;;  %v2319_v13 = vmax.f32 %v2287_v48, 0.0 }
 0x19d   : > { %v3398_v12 = vadd.f32 %v3397_v10, %v3396_v61 }
 0x19e   : > { %v2320_v14 = vmax.f32 %v2288_v62, 0.0  ;;  %v2129_v51 = vadd.f32 %v3395_v59, %v1968_v2  ;;  %v1971_v15 = vadd.f32 %v3286_v4, %v3897_v31 }
 0x1a0   : > { %v2942_v16 = vpack.c.bf16 %v2320_v14, %v2319_v13  ;;  %v2250_v17 = vmul.f32 %v3959_v52, %v2129_v51  ;;  %v2132_v18 = vadd.f32 %v3398_v12, %v1971_v15  ;;  %v3287_v20 = vpop.f32.mrb[76].mxu0 }
 0x1a1   : > { %v3399_v24 = vpop.f32.mrb[76].mxu1  ;;  %v3288_v28 = vpop.f32.mrb[77].mxu0 }
 0x1a2   : > { %3014 = vst [vmem:[%s3978_s16 + $0x8] sm:$0xff] %v2942_v16   ;;  %v2289_v32 = vadd.f32 %v3966_v60, %v2250_v17  ;;  %v2251_v29 = vmul.f32 %v3959_v52, %v2132_v18  ;;  %v3289_v33 = vadd.f32 %v3288_v28, %v3287_v20  ;;  %v3400_v34 = vpop.f32.mrb[77].mxu1  ;;  %v3290_v35 = vpop.f32.mrb[78].mxu0 }
 0x1a3   : > { %v3401_v36 = vadd.f32 %v3400_v34, %v3399_v24  ;;  %v3402_v38 = vpop.f32.mrb[78].mxu1  ;;  %v3291_v40 = vpop.f32.mrb[79].mxu0 }
 0x1a4   : > { %v2290_v31 = vadd.f32 %v3966_v60, %v2251_v29  ;;  %v1976_v42 = vadd.f32 %v3289_v33, %v3903_v53  ;;  %v3292_v46 = vadd.f32 %v3291_v40, %v3290_v35  ;;  %v3403_v7 = vpop.f32.mrb[79].mxu1  ;;  %v2321_v48 = vmax.f32 %v2289_v32, 0.0 }
 0x1a5   : > { %v3404_v47 = vadd.f32 %v3403_v7, %v3402_v38 }
 0x1a6   : > { %v2322_v50 = vmax.f32 %v2290_v31, 0.0  ;;  %v2137_v56 = vadd.f32 %v3401_v36, %v1976_v42  ;;  %v1979_v9 = vadd.f32 %v3292_v46, %v3905_v55 }
 0x1a8   : > { %v2947_v58 = vpack.c.bf16 %v2322_v50, %v2321_v48  ;;  %v2252_v59 = vmul.f32 %v3959_v52, %v2137_v56  ;;  %v2140_v61 = vadd.f32 %v3404_v47, %v1979_v9  ;;  %v3293_v49 = vpop.f32.mrb[80].mxu0 }
 0x1a9   : > { %v3405_v62 = vpop.f32.mrb[80].mxu1  ;;  %v3294_v2 = vpop.f32.mrb[81].mxu0 }
 0x1aa   : > { %3015 = vst [vmem:[%s3978_s16 + $0x10] sm:$0xff] %v2947_v58   ;;  %v2291_v4 = vadd.f32 %v3966_v60, %v2252_v59  ;;  %v2253_v53 = vmul.f32 %v3959_v52, %v2140_v61  ;;  %v3295_v10 = vadd.f32 %v3294_v2, %v3293_v49  ;;  %v3406_v12 = vpop.f32.mrb[81].mxu1  ;;  %v3296_v13 = vpop.f32.mrb[82].mxu0 }
 0x1ab   : > { %v3407_v14 = vadd.f32 %v3406_v12, %v3405_v62  ;;  %v3408_v51 = vpop.f32.mrb[82].mxu1  ;;  %v3297_v15 = vpop.f32.mrb[83].mxu0 }
 0x1ac   : > { %v2292_v55 = vadd.f32 %v3966_v60, %v2253_v53  ;;  %v1984_v16 = vadd.f32 %v3295_v10, %v3907_v5  ;;  %v3298_v17 = vadd.f32 %v3297_v15, %v3296_v13  ;;  %v3409_v18 = vpop.f32.mrb[83].mxu1  ;;  %v2323_v24 = vmax.f32 %v2291_v4, 0.0 }
 0x1ad   : > { %v3410_v20 = vadd.f32 %v3409_v18, %v3408_v51 }
 0x1ae   : > { %v2324_v28 = vmax.f32 %v2292_v55, 0.0  ;;  %v2145_v32 = vadd.f32 %v3407_v14, %v1984_v16  ;;  %v1987_v29 = vadd.f32 %v3298_v17, %v3909_v8 }
 0x1b0   : > { %v2952_v33 = vpack.c.bf16 %v2324_v28, %v2323_v24  ;;  %v2254_v34 = vmul.f32 %v3959_v52, %v2145_v32  ;;  %v2148_v35 = vadd.f32 %v3410_v20, %v1987_v29  ;;  %v3299_v36 = vpop.f32.mrb[84].mxu0 }
 0x1b1   : > { %v3411_v38 = vpop.f32.mrb[84].mxu1  ;;  %v3300_v40 = vpop.f32.mrb[85].mxu0 }
 0x1b2   : > { %3016 = vst [vmem:[%s3978_s16 + $0x18] sm:$0xff] %v2952_v33   ;;  %v2293_v31 = vadd.f32 %v3966_v60, %v2254_v34  ;;  %v2255_v5 = vmul.f32 %v3959_v52, %v2148_v35  ;;  %v3301_v42 = vadd.f32 %v3300_v40, %v3299_v36  ;;  %v3412_v46 = vpop.f32.mrb[85].mxu1  ;;  %v3302_v7 = vpop.f32.mrb[86].mxu0 }
 0x1b3   : > { %v3413_v47 = vadd.f32 %v3412_v46, %v3411_v38  ;;  %v3414_v48 = vpop.f32.mrb[86].mxu1  ;;  %v3303_v50 = vpop.f32.mrb[87].mxu0 }
 0x1b4   : > { %v2294_v8 = vadd.f32 %v3966_v60, %v2255_v5  ;;  %v1992_v56 = vadd.f32 %v3301_v42, %v3911_v21  ;;  %v3304_v9 = vadd.f32 %v3303_v50, %v3302_v7  ;;  %v3415_v58 = vpop.f32.mrb[87].mxu1  ;;  %v2325_v61 = vmax.f32 %v2293_v31, 0.0 }
 0x1b5   : > { %v3416_v59 = vadd.f32 %v3415_v58, %v3414_v48 }
 0x1b6   : > { %v2326_v49 = vmax.f32 %v2294_v8, 0.0  ;;  %v2153_v62 = vadd.f32 %v3413_v47, %v1992_v56  ;;  %v1995_v2 = vadd.f32 %v3304_v9, %v3913_v23 }
 0x1b8   : > { %v2957_v4 = vpack.c.bf16 %v2326_v49, %v2325_v61  ;;  %v2256_v53 = vmul.f32 %v3959_v52, %v2153_v62  ;;  %v2156_v10 = vadd.f32 %v3416_v59, %v1995_v2  ;;  %v3305_v12 = vpop.f32.mrb[88].mxu0 }
 0x1b9   : > { %v3417_v13 = vpop.f32.mrb[88].mxu1  ;;  %v3306_v14 = vpop.f32.mrb[89].mxu0 }
 0x1ba   : > { %3017 = vst [vmem:[%s3978_s16 + $0x20] sm:$0xff] %v2957_v4   ;;  %v2295_v51 = vadd.f32 %v3966_v60, %v2256_v53  ;;  %v2257_v21 = vmul.f32 %v3959_v52, %v2156_v10  ;;  %v3307_v15 = vadd.f32 %v3306_v14, %v3305_v12  ;;  %v3418_v55 = vpop.f32.mrb[89].mxu1  ;;  %v3308_v16 = vpop.f32.mrb[90].mxu0 }
 0x1bb   : > { %v3419_v17 = vadd.f32 %v3418_v55, %v3417_v13  ;;  %v3420_v18 = vpop.f32.mrb[90].mxu1  ;;  %v3309_v20 = vpop.f32.mrb[91].mxu0 }
 0x1bc   : > { %v2296_v23 = vadd.f32 %v3966_v60, %v2257_v21  ;;  %v2000_v24 = vadd.f32 %v3307_v15, %v3915_v37  ;;  %v3310_v28 = vadd.f32 %v3309_v20, %v3308_v16  ;;  %v3421_v32 = vpop.f32.mrb[91].mxu1  ;;  %v2327_v33 = vmax.f32 %v2295_v51, 0.0 }
 0x1bd   : > { %v3422_v29 = vadd.f32 %v3421_v32, %v3420_v18 }
 0x1be   : > { %v2328_v34 = vmax.f32 %v2296_v23, 0.0  ;;  %v2161_v35 = vadd.f32 %v3419_v17, %v2000_v24  ;;  %v2003_v36 = vadd.f32 %v3310_v28, %v3917_v39 }
 0x1c0   : > { %v2962_v38 = vpack.c.bf16 %v2328_v34, %v2327_v33  ;;  %v2258_v40 = vmul.f32 %v3959_v52, %v2161_v35  ;;  %v2164_v31 = vadd.f32 %v3422_v29, %v2003_v36  ;;  %v3311_v5 = vpop.f32.mrb[92].mxu0 }
 0x1c1   : > { %v3423_v42 = vpop.f32.mrb[92].mxu1  ;;  %v3312_v46 = vpop.f32.mrb[93].mxu0 }
 0x1c2   : > { %3018 = vst [vmem:[%s3978_s16 + $0x28] sm:$0xff] %v2962_v38   ;;  %v2297_v7 = vadd.f32 %v3966_v60, %v2258_v40  ;;  %v2259_v37 = vmul.f32 %v3959_v52, %v2164_v31  ;;  %v3313_v47 = vadd.f32 %v3312_v46, %v3311_v5  ;;  %v3424_v48 = vpop.f32.mrb[93].mxu1  ;;  %v3314_v50 = vpop.f32.mrb[94].mxu0 }
 0x1c3   : > { %v3425_v8 = vadd.f32 %v3424_v48, %v3423_v42  ;;  %v3426_v56 = vpop.f32.mrb[94].mxu1  ;;  %v3315_v9 = vpop.f32.mrb[95].mxu0 }
 0x1c4   : > { %v2298_v39 = vadd.f32 %v3966_v60, %v2259_v37  ;;  %v2008_v58 = vadd.f32 %v3313_v47, %v3919_v54  ;;  %v3316_v59 = vadd.f32 %v3315_v9, %v3314_v50  ;;  %v3427_v61 = vpop.f32.mrb[95].mxu1  ;;  %v2329_v62 = vmax.f32 %v2297_v7, 0.0 }
 0x1c5   : > { %v3428_v49 = vadd.f32 %v3427_v61, %v3426_v56 }
 0x1c6   : > { %v2330_v2 = vmax.f32 %v2298_v39, 0.0  ;;  %v2169_v4 = vadd.f32 %v3425_v8, %v2008_v58  ;;  %v2011_v53 = vadd.f32 %v3316_v59, %v3921_v57 }
 0x1c8   : > { %v2967_v10 = vpack.c.bf16 %v2330_v2, %v2329_v62  ;;  %v2260_v12 = vmul.f32 %v3959_v52, %v2169_v4  ;;  %v2172_v13 = vadd.f32 %v3428_v49, %v2011_v53  ;;  %v3317_v14 = vpop.f32.mrb[96].mxu0 }
 0x1c9   : > { %v3429_v51 = vpop.f32.mrb[96].mxu1  ;;  %v3318_v21 = vpop.f32.mrb[97].mxu0 }
 0x1ca   : > { %3019 = vst [vmem:[%s3978_s16 + $0x30] sm:$0xff] %v2967_v10   ;;  %v2299_v15 = vadd.f32 %v3966_v60, %v2260_v12  ;;  %v2261_v54 = vmul.f32 %v3959_v52, %v2172_v13  ;;  %v3319_v55 = vadd.f32 %v3318_v21, %v3317_v14  ;;  %v3430_v16 = vpop.f32.mrb[97].mxu1  ;;  %v3320_v17 = vpop.f32.mrb[98].mxu0 }
 0x1cb   : > { %v3431_v18 = vadd.f32 %v3430_v16, %v3429_v51  ;;  %v3432_v20 = vpop.f32.mrb[98].mxu1  ;;  %v3321_v23 = vpop.f32.mrb[99].mxu0 }
 0x1cc   : > { %v2300_v57 = vadd.f32 %v3966_v60, %v2261_v54  ;;  %v2016_v24 = vadd.f32 %v3319_v55, %v3923_v6  ;;  %v3322_v28 = vadd.f32 %v3321_v23, %v3320_v17  ;;  %v3433_v32 = vpop.f32.mrb[99].mxu1  ;;  %v2331_v33 = vmax.f32 %v2299_v15, 0.0 }
 0x1cd   : > { %v3434_v29 = vadd.f32 %v3433_v32, %v3432_v20 }
 0x1ce   : > { %v2332_v34 = vmax.f32 %v2300_v57, 0.0  ;;  %v2177_v35 = vadd.f32 %v3431_v18, %v2016_v24  ;;  %v2019_v36 = vadd.f32 %v3322_v28, %v3925_v11 }
 0x1d0   : > { %v2972_v38 = vpack.c.bf16 %v2332_v34, %v2331_v33  ;;  %v2262_v40 = vmul.f32 %v3959_v52, %v2177_v35  ;;  %v2180_v31 = vadd.f32 %v3434_v29, %v2019_v36  ;;  %v3323_v5 = vpop.f32.mrb[100].mxu0 }
 0x1d1   : > { %v3435_v42 = vpop.f32.mrb[100].mxu1  ;;  %v3324_v46 = vpop.f32.mrb[101].mxu0 }
 0x1d2   : > { %3020 = vst [vmem:[%s3978_s16 + $0x38] sm:$0xff] %v2972_v38   ;;  %v2301_v7 = vadd.f32 %v3966_v60, %v2262_v40  ;;  %v2263_v6 = vmul.f32 %v3959_v52, %v2180_v31  ;;  %v3325_v37 = vadd.f32 %v3324_v46, %v3323_v5  ;;  %v3436_v47 = vpop.f32.mrb[101].mxu1  ;;  %v3326_v48 = vpop.f32.mrb[102].mxu0 }
 0x1d3   : > { %v3437_v50 = vadd.f32 %v3436_v47, %v3435_v42  ;;  %v3438_v8 = vpop.f32.mrb[102].mxu1  ;;  %v3327_v56 = vpop.f32.mrb[103].mxu0 }
 0x1d4   : > { %v2302_v11 = vadd.f32 %v3966_v60, %v2263_v6  ;;  %v2024_v9 = vadd.f32 %v3325_v37, %v3927_v25  ;;  %v3328_v39 = vadd.f32 %v3327_v56, %v3326_v48  ;;  %v3439_v58 = vpop.f32.mrb[103].mxu1  ;;  %v2333_v61 = vmax.f32 %v2301_v7, 0.0 }
 0x1d5   : > { %v3440_v59 = vadd.f32 %v3439_v58, %v3438_v8 }
 0x1d6   : > { %v2334_v49 = vmax.f32 %v2302_v11, 0.0  ;;  %v2185_v62 = vadd.f32 %v3437_v50, %v2024_v9  ;;  %v2027_v2 = vadd.f32 %v3328_v39, %v3929_v27 }
 0x1d8   : > { %v2977_v4 = vpack.c.bf16 %v2334_v49, %v2333_v61  ;;  %v2264_v53 = vmul.f32 %v3959_v52, %v2185_v62  ;;  %v2188_v10 = vadd.f32 %v3440_v59, %v2027_v2  ;;  %v3329_v12 = vpop.f32.mrb[104].mxu0 }
 0x1d9   : > { %v3441_v13 = vpop.f32.mrb[104].mxu1  ;;  %v3330_v14 = vpop.f32.mrb[105].mxu0 }
 0x1da   : > { %3021 = vst [vmem:[%s3978_s16 + $0x40] sm:$0xff] %v2977_v4   ;;  %v2303_v51 = vadd.f32 %v3966_v60, %v2264_v53  ;;  %v2265_v25 = vmul.f32 %v3959_v52, %v2188_v10  ;;  %v3331_v21 = vadd.f32 %v3330_v14, %v3329_v12  ;;  %v3442_v15 = vpop.f32.mrb[105].mxu1  ;;  %v3332_v54 = vpop.f32.mrb[106].mxu0 }
 0x1db   : > { %v3443_v55 = vadd.f32 %v3442_v15, %v3441_v13  ;;  %v3444_v16 = vpop.f32.mrb[106].mxu1  ;;  %v3333_v17 = vpop.f32.mrb[107].mxu0 }
 0x1dc   : > { %v2304_v27 = vadd.f32 %v3966_v60, %v2265_v25  ;;  %v2032_v18 = vadd.f32 %v3331_v21, %v3931_v43  ;;  %v3334_v20 = vadd.f32 %v3333_v17, %v3332_v54  ;;  %v3445_v23 = vpop.f32.mrb[107].mxu1  ;;  %v2335_v24 = vmax.f32 %v2303_v51, 0.0 }
 0x1dd   : > { %v3446_v57 = vadd.f32 %v3445_v23, %v3444_v16 }
 0x1de   : > { %v2336_v28 = vmax.f32 %v2304_v27, 0.0  ;;  %v2193_v32 = vadd.f32 %v3443_v55, %v2032_v18  ;;  %v2035_v29 = vadd.f32 %v3334_v20, %v3933_v45 }
 0x1e0   : > { %v2982_v33 = vpack.c.bf16 %v2336_v28, %v2335_v24  ;;  %v2266_v34 = vmul.f32 %v3959_v52, %v2193_v32  ;;  %v2196_v35 = vadd.f32 %v3446_v57, %v2035_v29  ;;  %v3335_v36 = vpop.f32.mrb[108].mxu0 }
 0x1e1   : > { %v3447_v38 = vpop.f32.mrb[108].mxu1  ;;  %v3336_v40 = vpop.f32.mrb[109].mxu0 }
 0x1e2   : > { %3022 = vst [vmem:[%s3978_s16 + $0x48] sm:$0xff] %v2982_v33   ;;  %v2305_v31 = vadd.f32 %v3966_v60, %v2266_v34  ;;  %v2267_v43 = vmul.f32 %v3959_v52, %v2196_v35  ;;  %v3337_v5 = vadd.f32 %v3336_v40, %v3335_v36  ;;  %v3448_v42 = vpop.f32.mrb[109].mxu1  ;;  %v3338_v46 = vpop.f32.mrb[110].mxu0 }
 0x1e3   : > { %v3449_v7 = vadd.f32 %v3448_v42, %v3447_v38  ;;  %v3450_v6 = vpop.f32.mrb[110].mxu1  ;;  %v3339_v37 = vpop.f32.mrb[111].mxu0 }
 0x1e4   : > { %v2306_v45 = vadd.f32 %v3966_v60, %v2267_v43  ;;  %v2040_v47 = vadd.f32 %v3337_v5, %v3935_v63  ;;  %v3340_v48 = vadd.f32 %v3339_v37, %v3338_v46  ;;  %v3451_v50 = vpop.f32.mrb[111].mxu1  ;;  %v2337_v56 = vmax.f32 %v2305_v31, 0.0 }
 0x1e5   : > { %v3452_v8 = vadd.f32 %v3451_v50, %v3450_v6 }
 0x1e6   : > { %v2338_v11 = vmax.f32 %v2306_v45, 0.0  ;;  %v2201_v9 = vadd.f32 %v3449_v7, %v2040_v47  ;;  %v2043_v39 = vadd.f32 %v3340_v48, %v3937_v1 }
 0x1e8   : > { %v2987_v58 = vpack.c.bf16 %v2338_v11, %v2337_v56  ;;  %v2268_v59 = vmul.f32 %v3959_v52, %v2201_v9  ;;  %v2204_v61 = vadd.f32 %v3452_v8, %v2043_v39  ;;  %v3341_v49 = vpop.f32.mrb[112].mxu0 }
 0x1e9   : > { %v3453_v62 = vpop.f32.mrb[112].mxu1  ;;  %v3342_v2 = vpop.f32.mrb[113].mxu0 }
 0x1ea   : > { %3023 = vst [vmem:[%s3978_s16 + $0x50] sm:$0xff] %v2987_v58   ;;  %v2307_v4 = vadd.f32 %v3966_v60, %v2268_v59  ;;  %v2269_v63 = vmul.f32 %v3959_v52, %v2204_v61  ;;  %v3343_v53 = vadd.f32 %v3342_v2, %v3341_v49  ;;  %v3454_v10 = vpop.f32.mrb[113].mxu1  ;;  %v3344_v12 = vpop.f32.mrb[114].mxu0 }
 0x1eb   : > { %v3455_v13 = vadd.f32 %v3454_v10, %v3453_v62  ;;  %v3456_v14 = vpop.f32.mrb[114].mxu1  ;;  %v3345_v51 = vpop.f32.mrb[115].mxu0 }
 0x1ec   : > { %v2308_v1 = vadd.f32 %v3966_v60, %v2269_v63  ;;  %v2048_v25 = vadd.f32 %v3343_v53, %v3939_v19  ;;  %v3346_v21 = vadd.f32 %v3345_v51, %v3344_v12  ;;  %v3457_v15 = vpop.f32.mrb[115].mxu1  ;;  %v2339_v55 = vmax.f32 %v2307_v4, 0.0 }
 0x1ed   : > { %v3458_v54 = vadd.f32 %v3457_v15, %v3456_v14 }
 0x1ee   : > { %v2340_v16 = vmax.f32 %v2308_v1, 0.0  ;;  %v2209_v17 = vadd.f32 %v3455_v13, %v2048_v25  ;;  %v2051_v27 = vadd.f32 %v3346_v21, %v3941_v22 }
 0x1f0   : > { %v2992_v18 = vpack.c.bf16 %v2340_v16, %v2339_v55  ;;  %v2270_v20 = vmul.f32 %v3959_v52, %v2209_v17  ;;  %v2212_v23 = vadd.f32 %v3458_v54, %v2051_v27  ;;  %v3347_v57 = vpop.f32.mrb[116].mxu0 }
 0x1f1   : > { %v3459_v24 = vpop.f32.mrb[116].mxu1  ;;  %v3348_v28 = vpop.f32.mrb[117].mxu0 }
 0x1f2   : > { %3024 = vst [vmem:[%s3978_s16 + $0x58] sm:$0xff] %v2992_v18   ;;  %v2309_v32 = vadd.f32 %v3966_v60, %v2270_v20  ;;  %v2271_v19 = vmul.f32 %v3959_v52, %v2212_v23  ;;  %v3349_v29 = vadd.f32 %v3348_v28, %v3347_v57  ;;  %v3460_v33 = vpop.f32.mrb[117].mxu1  ;;  %v3350_v34 = vpop.f32.mrb[118].mxu0 }
 0x1f3   : > { %v3461_v35 = vadd.f32 %v3460_v33, %v3459_v24  ;;  %v3462_v36 = vpop.f32.mrb[118].mxu1  ;;  %v3351_v38 = vpop.f32.mrb[119].mxu0 }
 0x1f4   : > { %v2310_v22 = vadd.f32 %v3966_v60, %v2271_v19  ;;  %v2056_v40 = vadd.f32 %v3349_v29, %v3943_v41  ;;  %v3352_v31 = vadd.f32 %v3351_v38, %v3350_v34  ;;  %v3463_v43 = vpop.f32.mrb[119].mxu1  ;;  %v2341_v42 = vmax.f32 %v2309_v32, 0.0 }
 0x1f5   : > { %v3464_v5 = vadd.f32 %v3463_v43, %v3462_v36 }
 0x1f6   : > { %v2342_v46 = vmax.f32 %v2310_v22, 0.0  ;;  %v2217_v7 = vadd.f32 %v3461_v35, %v2056_v40  ;;  %v2059_v6 = vadd.f32 %v3352_v31, %v3945_v44 }
 0x1f8   : > { %v2997_v37 = vpack.c.bf16 %v2342_v46, %v2341_v42  ;;  %v2272_v45 = vmul.f32 %v3959_v52, %v2217_v7  ;;  %v2220_v47 = vadd.f32 %v3464_v5, %v2059_v6  ;;  %v3353_v48 = vpop.f32.mrb[120].mxu0 }
 0x1f9   : > { %v3465_v50 = vpop.f32.mrb[120].mxu1  ;;  %v3354_v8 = vpop.f32.mrb[121].mxu0 }
 0x1fa   : > { %3025 = vst [vmem:[%s3978_s16 + $0x60] sm:$0xff] %v2997_v37   ;;  %v2311_v56 = vadd.f32 %v3966_v60, %v2272_v45  ;;  %v2273_v41 = vmul.f32 %v3959_v52, %v2220_v47  ;;  %v3355_v11 = vadd.f32 %v3354_v8, %v3353_v48  ;;  %v3466_v9 = vpop.f32.mrb[121].mxu1  ;;  %v3356_v39 = vpop.f32.mrb[122].mxu0 }
 0x1fb   : > { %v3467_v58 = vadd.f32 %v3466_v9, %v3465_v50  ;;  %v3468_v59 = vpop.f32.mrb[122].mxu1  ;;  %v3357_v61 = vpop.f32.mrb[123].mxu0 }
 0x1fc   : > { %v2312_v44 = vadd.f32 %v3966_v60, %v2273_v41  ;;  %v2064_v49 = vadd.f32 %v3355_v11, %v3947_v0  ;;  %v3358_v62 = vadd.f32 %v3357_v61, %v3356_v39  ;;  %v3469_v2 = vpop.f32.mrb[123].mxu1  ;;  %v2343_v63 = vmax.f32 %v2311_v56, 0.0 }
 0x1fd   : > { %v3470_v4 = vadd.f32 %v3469_v2, %v3468_v59 }
 0x1fe   : > { %v2344_v53 = vmax.f32 %v2312_v44, 0.0  ;;  %v2225_v10 = vadd.f32 %v3467_v58, %v2064_v49  ;;  %v2067_v12 = vadd.f32 %v3358_v62, %v3949_v3 }
 0x200   : > { %v3002_v13 = vpack.c.bf16 %v2344_v53, %v2343_v63  ;;  %v2274_v14 = vmul.f32 %v3959_v52, %v2225_v10  ;;  %v2228_v51 = vadd.f32 %v3470_v4, %v2067_v12  ;;  %v3359_v1 = vpop.f32.mrb[124].mxu0 }
 0x201   : > { %v3471_v25 = vpop.f32.mrb[124].mxu1  ;;  %v3360_v21 = vpop.f32.mrb[125].mxu0 }
 0x202   : > { %3026 = vst [vmem:[%s3978_s16 + $0x68] sm:$0xff] %v3002_v13   ;;  %v2313_v15 = vadd.f32 %v3966_v60, %v2274_v14  ;;  %v2275_v0 = vmul.f32 %v3959_v52, %v2228_v51  ;;  %v3361_v54 = vadd.f32 %v3360_v21, %v3359_v1  ;;  %v3472_v55 = vpop.f32.mrb[125].mxu1  ;;  %v3362_v16 = vpop.f32.mrb[126].mxu0 }
 0x203   : > { %v3473_v17 = vadd.f32 %v3472_v55, %v3471_v25  ;;  %v3474_v27 = vpop.f32.mrb[126].mxu1  ;;  %v3363_v18 = vpop.f32.mrb[127].mxu0 }
 0x204   : > { %v2314_v3 = vadd.f32 %v3966_v60, %v2275_v0  ;;  %v2072_v20 = vadd.f32 %v3361_v54, %v3951_v26  ;;  %v3364_v23 = vadd.f32 %v3363_v18, %v3362_v16  ;;  %v3475_v57 = vpop.f32.mrb[127].mxu1  ;;  %v2345_v28 = vmax.f32 %v2313_v15, 0.0 }
 0x205   : > { %v3476_v24 = vadd.f32 %v3475_v57, %v3474_v27 }
 0x206   : > { %v2346_v32 = vmax.f32 %v2314_v3, 0.0  ;;  %v2233_v19 = vadd.f32 %v3473_v17, %v2072_v20  ;;  %v2075_v29 = vadd.f32 %v3364_v23, %v3953_v30 }
 0x208   : > { %v3007_v33 = vpack.c.bf16 %v2346_v32, %v2345_v28  ;;  %v2276_v34 = vmul.f32 %v3959_v52, %v2233_v19  ;;  %v2236_v35 = vadd.f32 %v3476_v24, %v2075_v29 }
 0x20a   : > { %3027 = vst [vmem:[%s3978_s16 + $0x70] sm:$0xff] %v3007_v33   ;;  %v2315_v36 = vadd.f32 %v3966_v60, %v2276_v34  ;;  %v2277_v38 = vmul.f32 %v3959_v52, %v2236_v35 }
 0x20c   : > { %v2316_v26 = vadd.f32 %v3966_v60, %v2277_v38  ;;  %v2347_v22 = vmax.f32 %v2315_v36, 0.0 }
 0x20e   : > { %v2348_v40 = vmax.f32 %v2316_v26, 0.0 }
 0x210   : > { %v3012_v31 = vpack.c.bf16 %v2348_v40, %v2347_v22 }
 0x212   : > { %3028 = vst [vmem:[%s3978_s16 + $0x78] sm:$0xff] %v3012_v31  }
 0x213 PF: > { %s14_s19 = sadd.s32 1, %s3619_s19   ;;  %s4104_s15 = smov %s3611_s17 }
 0x214   : > { %p11_p7 = scmp.ge.s32.totalorder %s14_s19, 10   ;;  %s4105_s16 = smov %s3615_s18 }
 0x215   : > { %s4106_s17 = smov %s4109_s20  ;;  %s4107_s18 = smov %s4113_s21 }
 0x216   :  { %13 = sbr.rel (!%p11_p7) target bundleno = 3 (0x3), region = 75 }

// kernel: generator_forward.9
= control target key start
LH: loop header
LB: loop body
LE: loop exit
PB: predicated region body
PF: predicated region fallthrough
CT: control target
= control target key end

     0   :  { %s2492_s15 = smov 0   ;;  %s2494_s16 = smov 0   ;;  %s2753_s0 = inlined_call_operand.vmem [shape: bf16[4,2048,512], index: 0, kind: input, shape index: {}]   ;;  %s2754_s1 = inlined_call_operand.vmem [shape: bf16[4,512,128], index: 1, kind: input, shape index: {}]   ;;  %s2755_s2 = inlined_call_operand.vmem [shape: f32[1,128], index: 2, kind: input, shape index: {}]   ;;  %s2756_s3 = inlined_call_operand.vmem [shape: f32[1,128], index: 3, kind: input, shape index: {}]   ;;  %s2757_s4 = inlined_call_operand.vmem [shape: bf16[4,2048,128], index: 4, kind: output, shape index: {}]  }
   0x1   :  { %s2496_s17 = smov 0   ;;  %s2498_s18 = smov 0  }
   0x2   :  { %s2500_s19 = smov 0  }
   0x3 LB: > { %s29_s20 = sadd.s32 1, %s2457_s17  ;;  %s33_s21 = sadd.s32 1, %s2461_s18  ;;  %s2465_s19 = sphi %s2500_s19, %s14_s19   ;;  %s2461_s18 = sphi %s2498_s18, %s2761_s18   ;;  %s2457_s17 = sphi %s2496_s17, %s2760_s17   ;;  %s2453_s16 = sphi %s2494_s16, %s2759_s16   ;;  %s2449_s15 = sphi %s2492_s15, %s2758_s15  }
   0x4   : > { %p31_p0 = scmp.ge.s32.totalorder %s29_s20, 8  ;;  %p1701_p1 = scmp.ge.s32.totalorder %s2465_s19, 1 }
   0x5   : > { %p224_p2 = scmp.lt.s32.totalorder %s2465_s19, 33 }
   0x6   : > { %s2763_s20 = smov (%p31_p0, %s29_s20), 0  ;;  %s2765_s21 = smov (!%p31_p0, %s33_s21), %s2461_s18 }
   0x7   : > { %p225_p3 = pnand %p1701_p1, %p224_p2  ;;  %p35_p4 = scmp.ge.s32.totalorder %s2765_s21, 4 }
   0x8   : > { %p277_p5 = scmp.lt.s32.totalorder (!%p225_p3), %s2453_s16, 3  ;;  %s1702_s26 = sshll.u32 (!%p225_p3), %s2449_s15, 5 }
   0x9   : > { %s2767_s21 = smov (%p35_p4, %s2765_s21), 0  ;;  %228 = sbr.rel (%p225_p3) target bundleno = 411 (0x19b), region = 36 }
   0xa   : > { %p279_p6 = scmp.lt.s32.totalorder (!%p225_p3), %s1702_s26, 255 }
  0x10   : > { %s2769_s16 = smov (!%p277_p5, %s2453_s16), 3  ;;  %s2771_s26 = smov (!%p279_p6, %s1702_s26), 255 }
  0x11   : > { %s1843_s22 = sshll.u32 %s2769_s16, 8  ;;  %s1704_s27 = sshll.u32 %s2769_s16, 10 }
  0x12   : > { %s2532_s25 = scalar_lea.vmem %s2754_s1, %s1843_s22  ;;  %s1703_s28 = sshll.u32 %s2771_s26, 2 }
  0x13   : > { %v2235_v0 = vld [vmem:[%s2532_s25 + $0x40] sm:$0xff]   ;;  %v2239_v4 = vld [vmem:[%s2532_s25 + $0x48] sm:$0xff]   ;;  %v2243_v8 = vld [vmem:[%s2532_s25 + $0x50] sm:$0xff]   ;;  %s283_s29 = sadd.s32 %s1704_s27, %s1703_s28  ;;  %s310_s12 = sadd.s32 %s1843_s22, %s2771_s26 }
  0x14   : > { %v2236_v1 = vld [vmem:[%s2532_s25 + $0xc0] sm:$0xff]   ;;  %1971 = vmatprep.subr.bf16.mxu0 %v2235_v0  ;;  %v2240_v5 = vld [vmem:[%s2532_s25 + $0xc8] sm:$0xff]   ;;  %v2244_v9 = vld [vmem:[%s2532_s25 + $0xd0] sm:$0xff]   ;;  %s1705_s30 = sshll.u32 %s283_s29, 2  ;;  %s1710_s13 = sshll.u32 %s310_s12, 2 }
  0x15   : > { %v2237_v2 = vld [vmem:[%s2532_s25] sm:$0xff]   ;;  %2083 = vmatprep.subr.bf16.mxu1 %v2236_v1  ;;  %v2241_v6 = vld [vmem:[%s2532_s25 + $0x8] sm:$0xff]   ;;  %v2245_v10 = vld [vmem:[%s2532_s25 + $0x10] sm:$0xff]   ;;  %s2572_s7 = scalar_lea.vmem %s2753_s0, %s1705_s30  ;;  %s2664_s16 = scalar_lea.vmem %s2757_s4, %s1710_s13 }
  0x16   : > { %v2238_v3 = vld [vmem:[%s2532_s25 + $0x80] sm:$0xff]   ;;  %1972 = vmatpush3.bf16.msra.mxu0 %v2237_v2  ;;  %v2242_v7 = vld [vmem:[%s2532_s25 + $0x88] sm:$0xff]   ;;  %v2246_v11 = vld [vmem:[%s2532_s25 + $0x90] sm:$0xff]  }
  0x17   : > { %2084 = vmatpush3.bf16.msra.mxu1 %v2238_v3  ;;  %1973 = vmatprep.subr.bf16.mxu0 %v2239_v4  ;;  %v2247_v12 = vld [vmem:[%s2532_s25 + $0x58] sm:$0xff]   ;;  %v2251_v16 = vld [vmem:[%s2532_s25 + $0x60] sm:$0xff]   ;;  %v2255_v20 = vld [vmem:[%s2532_s25 + $0x68] sm:$0xff]  }
  0x18   : > { %2085 = vmatprep.subr.bf16.mxu1 %v2240_v5  ;;  %v2248_v13 = vld [vmem:[%s2532_s25 + $0xd8] sm:$0xff]   ;;  %v2252_v17 = vld [vmem:[%s2532_s25 + $0xe0] sm:$0xff]   ;;  %v2256_v21 = vld [vmem:[%s2532_s25 + $0xe8] sm:$0xff]  }
  0x19   : > { %v2249_v14 = vld [vmem:[%s2532_s25 + $0x18] sm:$0xff]   ;;  %v2253_v18 = vld [vmem:[%s2532_s25 + $0x20] sm:$0xff]   ;;  %v2257_v22 = vld [vmem:[%s2532_s25 + $0x28] sm:$0xff]  }
  0x1a   : > { %1974 = vmatpush3.bf16.msra.mxu0 %v2241_v6  ;;  %v2250_v15 = vld [vmem:[%s2532_s25 + $0x98] sm:$0xff]   ;;  %v2254_v19 = vld [vmem:[%s2532_s25 + $0xa0] sm:$0xff]   ;;  %v2258_v23 = vld [vmem:[%s2532_s25 + $0xa8] sm:$0xff]  }
  0x1b   : > { %2086 = vmatpush3.bf16.msra.mxu1 %v2242_v7  ;;  %1975 = vmatprep.subr.bf16.mxu0 %v2243_v8  ;;  %v2259_v24 = vld [vmem:[%s2532_s25 + $0x70] sm:$0xff]   ;;  %v2263_v28 = vld [vmem:[%s2532_s25 + $0x78] sm:$0xff]  }
  0x1c   : > { %2087 = vmatprep.subr.bf16.mxu1 %v2244_v9  ;;  %v2260_v25 = vld [vmem:[%s2532_s25 + $0xf0] sm:$0xff]   ;;  %v2264_v29 = vld [vmem:[%s2532_s25 + $0xf8] sm:$0xff]  }
  0x1d   : > { %v2261_v26 = vld [vmem:[%s2532_s25 + $0x30] sm:$0xff]   ;;  %v2265_v30 = vld [vmem:[%s2532_s25 + $0x38] sm:$0xff]  }
  0x1e   : > { %1976 = vmatpush3.bf16.msra.mxu0 %v2245_v10  ;;  %v2262_v27 = vld [vmem:[%s2532_s25 + $0xb0] sm:$0xff]   ;;  %v2266_v31 = vld [vmem:[%s2532_s25 + $0xb8] sm:$0xff]  }
  0x1f   : > { %2088 = vmatpush3.bf16.msra.mxu1 %v2246_v11  ;;  %1977 = vmatprep.subr.bf16.mxu0 %v2247_v12  ;;  %v2267_v32 = vld [vmem:[%s2572_s7] ss:$16 sps:$4 sm:$0xff]   ;;  %v2269_v33 = vld [vmem:[%s2572_s7 + $0x4] ss:$16 sps:$4 sm:$0xff]   ;;  %v2270_v34 = vld [vmem:[%s2572_s7 + $0x8] ss:$16 sps:$4 sm:$0xff]  }
  0x20   : > { %2089 = vmatprep.subr.bf16.mxu1 %v2248_v13  ;;  %v2272_v35 = vld [vmem:[%s2572_s7 + $0xc] ss:$16 sps:$4 sm:$0xff]   ;;  %987 = vmatprep.mubr.bf16.mxu0 %v2269_v33  ;;  %v2273_v36 = vld [vmem:[%s2572_s7 + $0x24] ss:$16 sps:$4 sm:$0xff]   ;;  %v2277_v38 = vld [vmem:[%s2572_s7 + $0x20] ss:$16 sps:$4 sm:$0xff]  }
  0x21   : > { %1148 = vmatprep.mubr.bf16.mxu1 %v2272_v35  ;;  %v2275_v37 = vld [vmem:[%s2572_s7 + $0x2c] ss:$16 sps:$4 sm:$0xff]   ;;  %v2278_v39 = vld [vmem:[%s2572_s7 + $0x28] ss:$16 sps:$4 sm:$0xff]   ;;  %v2279_v40 = vld [vmem:[%s2572_s7 + $0x44] ss:$16 sps:$4 sm:$0xff]  }
  0x22   : > { %1978 = vmatpush3.bf16.msra.mxu0 %v2249_v14  ;;  %v2281_v41 = vld [vmem:[%s2572_s7 + $0x4c] ss:$16 sps:$4 sm:$0xff]   ;;  %v2283_v42 = vld [vmem:[%s2572_s7 + $0x40] ss:$16 sps:$4 sm:$0xff]   ;;  %v2284_v43 = vld [vmem:[%s2572_s7 + $0x48] ss:$16 sps:$4 sm:$0xff]  }
  0x23   : > { %2090 = vmatpush3.bf16.msra.mxu1 %v2250_v15  ;;  %1979 = vmatprep.subr.bf16.mxu0 %v2251_v16  ;;  %v2285_v44 = vld [vmem:[%s2572_s7 + $0x64] ss:$16 sps:$4 sm:$0xff]   ;;  %v2287_v45 = vld [vmem:[%s2572_s7 + $0x6c] ss:$16 sps:$4 sm:$0xff]   ;;  %v2289_v46 = vld [vmem:[%s2572_s7 + $0x60] ss:$16 sps:$4 sm:$0xff]  }
  0x24   : > { %2091 = vmatprep.subr.bf16.mxu1 %v2252_v17  ;;  %v2290_v47 = vld [vmem:[%s2572_s7 + $0x68] ss:$16 sps:$4 sm:$0xff]   ;;  %v2291_v48 = vld [vmem:[%s2572_s7 + $0x84] ss:$16 sps:$4 sm:$0xff]   ;;  %v2293_v49 = vld [vmem:[%s2572_s7 + $0x8c] ss:$16 sps:$4 sm:$0xff]  }
  0x25   : > { %v2295_v50 = vld [vmem:[%s2572_s7 + $0x80] ss:$16 sps:$4 sm:$0xff]   ;;  %v2296_v51 = vld [vmem:[%s2572_s7 + $0x88] ss:$16 sps:$4 sm:$0xff]   ;;  %v2297_v52 = vld [vmem:[%s2572_s7 + $0xa4] ss:$16 sps:$4 sm:$0xff]  }
  0x26   : > { %1980 = vmatpush3.bf16.msra.mxu0 %v2253_v18  ;;  %v2299_v53 = vld [vmem:[%s2572_s7 + $0xac] ss:$16 sps:$4 sm:$0xff]   ;;  %v2301_v54 = vld [vmem:[%s2572_s7 + $0xa0] ss:$16 sps:$4 sm:$0xff]   ;;  %v2302_v55 = vld [vmem:[%s2572_s7 + $0xa8] ss:$16 sps:$4 sm:$0xff]  }
  0x27   : > { %2092 = vmatpush3.bf16.msra.mxu1 %v2254_v19  ;;  %1981 = vmatprep.subr.bf16.mxu0 %v2255_v20  ;;  %v2303_v56 = vld [vmem:[%s2572_s7 + $0xc4] ss:$16 sps:$4 sm:$0xff]   ;;  %v2305_v57 = vld [vmem:[%s2572_s7 + $0xcc] ss:$16 sps:$4 sm:$0xff]   ;;  %v2307_v58 = vld [vmem:[%s2572_s7 + $0xc0] ss:$16 sps:$4 sm:$0xff]  }
  0x28   : > { %2093 = vmatprep.subr.bf16.mxu1 %v2256_v21  ;;  %v2308_v59 = vld [vmem:[%s2572_s7 + $0xc8] ss:$16 sps:$4 sm:$0xff]   ;;  %v2309_v60 = vld [vmem:[%s2572_s7 + $0xe4] ss:$16 sps:$4 sm:$0xff]   ;;  %v2311_v61 = vld [vmem:[%s2572_s7 + $0xec] ss:$16 sps:$4 sm:$0xff]  }
  0x29   : > { %v2313_v62 = vld [vmem:[%s2572_s7 + $0xe0] ss:$16 sps:$4 sm:$0xff]   ;;  %v2314_v63 = vld [vmem:[%s2572_s7 + $0xe8] ss:$16 sps:$4 sm:$0xff]   ;;  %v2315_v0 = vld [vmem:[%s2572_s7 + $0x104] ss:$16 sps:$4 sm:$0xff]  }
  0x2a   : > { %1982 = vmatpush3.bf16.msra.mxu0 %v2257_v22  ;;  %v2317_v1 = vld [vmem:[%s2572_s7 + $0x10c] ss:$16 sps:$4 sm:$0xff]   ;;  %v2319_v2 = vld [vmem:[%s2572_s7 + $0x100] ss:$16 sps:$4 sm:$0xff]   ;;  %v2320_v3 = vld [vmem:[%s2572_s7 + $0x108] ss:$16 sps:$4 sm:$0xff]  }
  0x2b   : > { %2094 = vmatpush3.bf16.msra.mxu1 %v2258_v23  ;;  %1983 = vmatprep.subr.bf16.mxu0 %v2259_v24  ;;  %v2321_v4 = vld [vmem:[%s2572_s7 + $0x124] ss:$16 sps:$4 sm:$0xff]   ;;  %v2323_v5 = vld [vmem:[%s2572_s7 + $0x12c] ss:$16 sps:$4 sm:$0xff]   ;;  %v2325_v6 = vld [vmem:[%s2572_s7 + $0x120] ss:$16 sps:$4 sm:$0xff]  }
  0x2c   : > { %2095 = vmatprep.subr.bf16.mxu1 %v2260_v25  ;;  %v2326_v7 = vld [vmem:[%s2572_s7 + $0x128] ss:$16 sps:$4 sm:$0xff]   ;;  %v2327_v8 = vld [vmem:[%s2572_s7 + $0x144] ss:$16 sps:$4 sm:$0xff]   ;;  %v2329_v9 = vld [vmem:[%s2572_s7 + $0x14c] ss:$16 sps:$4 sm:$0xff]  }
  0x2d   : > { %v2331_v10 = vld [vmem:[%s2572_s7 + $0x140] ss:$16 sps:$4 sm:$0xff]   ;;  %v2332_v11 = vld [vmem:[%s2572_s7 + $0x148] ss:$16 sps:$4 sm:$0xff]   ;;  %v2333_v12 = vld [vmem:[%s2572_s7 + $0x164] ss:$16 sps:$4 sm:$0xff]  }
  0x2e   : > { %1984 = vmatpush3.bf16.msra.mxu0 %v2261_v26  ;;  %v2335_v13 = vld [vmem:[%s2572_s7 + $0x16c] ss:$16 sps:$4 sm:$0xff]   ;;  %v2337_v14 = vld [vmem:[%s2572_s7 + $0x160] ss:$16 sps:$4 sm:$0xff]   ;;  %v2338_v15 = vld [vmem:[%s2572_s7 + $0x168] ss:$16 sps:$4 sm:$0xff]  }
  0x2f   : > { %2096 = vmatpush3.bf16.msra.mxu1 %v2262_v27  ;;  %1985 = vmatprep.subr.bf16.mxu0 %v2263_v28  ;;  %v2339_v16 = vld [vmem:[%s2572_s7 + $0x184] ss:$16 sps:$4 sm:$0xff]   ;;  %v2341_v17 = vld [vmem:[%s2572_s7 + $0x18c] ss:$16 sps:$4 sm:$0xff]   ;;  %v2343_v18 = vld [vmem:[%s2572_s7 + $0x180] ss:$16 sps:$4 sm:$0xff]  }
  0x30   : > { %2097 = vmatprep.subr.bf16.mxu1 %v2264_v29  ;;  %v2344_v19 = vld [vmem:[%s2572_s7 + $0x188] ss:$16 sps:$4 sm:$0xff]   ;;  %v2345_v20 = vld [vmem:[%s2572_s7 + $0x1a4] ss:$16 sps:$4 sm:$0xff]   ;;  %v2347_v21 = vld [vmem:[%s2572_s7 + $0x1ac] ss:$16 sps:$4 sm:$0xff]  }
  0x31   : > { %v2349_v22 = vld [vmem:[%s2572_s7 + $0x1a0] ss:$16 sps:$4 sm:$0xff]   ;;  %v2350_v23 = vld [vmem:[%s2572_s7 + $0x1a8] ss:$16 sps:$4 sm:$0xff]   ;;  %v2351_v24 = vld [vmem:[%s2572_s7 + $0x1c4] ss:$16 sps:$4 sm:$0xff]  }
  0x32   : > { %1986 = vmatpush3.bf16.msra.mxu0 %v2265_v30  ;;  %v2353_v25 = vld [vmem:[%s2572_s7 + $0x1cc] ss:$16 sps:$4 sm:$0xff]   ;;  %v2355_v26 = vld [vmem:[%s2572_s7 + $0x1c0] ss:$16 sps:$4 sm:$0xff]   ;;  %v2356_v27 = vld [vmem:[%s2572_s7 + $0x1c8] ss:$16 sps:$4 sm:$0xff]  }
  0x33   : > { %2098 = vmatpush3.bf16.msra.mxu1 %v2266_v31  ;;  %v2357_v28 = vld [vmem:[%s2572_s7 + $0x1e4] ss:$16 sps:$4 sm:$0xff]   ;;  %v2359_v29 = vld [vmem:[%s2572_s7 + $0x1ec] ss:$16 sps:$4 sm:$0xff]   ;;  %v2361_v30 = vld [vmem:[%s2572_s7 + $0x1e0] ss:$16 sps:$4 sm:$0xff]  }
  0x34   : > { %v2362_v31 = vld [vmem:[%s2572_s7 + $0x1e8] ss:$16 sps:$4 sm:$0xff]  }
  0x35   : > { %988 = vmatmul.mubr.bf16.vlgmr.msra.gmra.mrb[0].mxu0 %v2267_v32 }
  0x36   : > { %1149 = vmatmul.mubr.bf16.vlgmr.msra.gmra.mrb[0].mxu1 %v2270_v34  ;;  %995 = vmatprep.mubr.bf16.mxu0 %v2273_v36 }
  0x37   : > { %1156 = vmatprep.mubr.bf16.mxu1 %v2275_v37 }
  0x3d   : > { %996 = vmatmul.mubr.bf16.gmra.mrb[4].mxu0 %v2277_v38 }
  0x3e   : > { %1157 = vmatmul.mubr.bf16.gmra.mrb[4].mxu1 %v2278_v39  ;;  %1003 = vmatprep.mubr.bf16.mxu0 %v2279_v40 }
  0x3f   : > { %1164 = vmatprep.mubr.bf16.mxu1 %v2281_v41  ;;  %v2643_v41 = vld [vmem:[%s2755_s2] ss:$0 sm:$0xff] }
  0x45   : > { %1004 = vmatmul.mubr.bf16.gmra.mrb[8].mxu0 %v2283_v42 }
  0x46   : > { %1165 = vmatmul.mubr.bf16.gmra.mrb[8].mxu1 %v2284_v43  ;;  %1011 = vmatprep.mubr.bf16.mxu0 %v2285_v44 }
  0x47   : > { %1172 = vmatprep.mubr.bf16.mxu1 %v2287_v45 }
  0x4d   : > { %1012 = vmatmul.mubr.bf16.gmra.mrb[12].mxu0 %v2289_v46  ;;  %v2648_v46 = vld [vmem:[%s2756_s3] ss:$0 sm:$0xff] }
  0x4e   : > { %1173 = vmatmul.mubr.bf16.gmra.mrb[12].mxu1 %v2290_v47  ;;  %1019 = vmatprep.mubr.bf16.mxu0 %v2291_v48 }
  0x4f   : > { %1180 = vmatprep.mubr.bf16.mxu1 %v2293_v49 }
  0x55   : > { %1020 = vmatmul.mubr.bf16.gmra.mrb[16].mxu0 %v2295_v50 }
  0x56   : > { %1181 = vmatmul.mubr.bf16.gmra.mrb[16].mxu1 %v2296_v51  ;;  %1027 = vmatprep.mubr.bf16.mxu0 %v2297_v52 }
  0x57   : > { %1188 = vmatprep.mubr.bf16.mxu1 %v2299_v53 }
  0x5d   : > { %1028 = vmatmul.mubr.bf16.gmra.mrb[20].mxu0 %v2301_v54 }
  0x5e   : > { %1189 = vmatmul.mubr.bf16.gmra.mrb[20].mxu1 %v2302_v55  ;;  %1035 = vmatprep.mubr.bf16.mxu0 %v2303_v56 }
  0x5f   : > { %1196 = vmatprep.mubr.bf16.mxu1 %v2305_v57 }
  0x65   : > { %1036 = vmatmul.mubr.bf16.gmra.mrb[24].mxu0 %v2307_v58 }
  0x66   : > { %1197 = vmatmul.mubr.bf16.gmra.mrb[24].mxu1 %v2308_v59  ;;  %1043 = vmatprep.mubr.bf16.mxu0 %v2309_v60 }
  0x67   : > { %1204 = vmatprep.mubr.bf16.mxu1 %v2311_v61 }
  0x6d   : > { %1044 = vmatmul.mubr.bf16.gmra.mrb[28].mxu0 %v2313_v62 }
  0x6e   : > { %1205 = vmatmul.mubr.bf16.gmra.mrb[28].mxu1 %v2314_v63  ;;  %1051 = vmatprep.mubr.bf16.mxu0 %v2315_v0 }
  0x6f   : > { %1212 = vmatprep.mubr.bf16.mxu1 %v2317_v1 }
  0x75   : > { %1052 = vmatmul.mubr.bf16.gmra.mrb[32].mxu0 %v2319_v2 }
  0x76   : > { %1213 = vmatmul.mubr.bf16.gmra.mrb[32].mxu1 %v2320_v3  ;;  %1059 = vmatprep.mubr.bf16.mxu0 %v2321_v4 }
  0x77   : > { %1220 = vmatprep.mubr.bf16.mxu1 %v2323_v5 }
  0x7d   : > { %1060 = vmatmul.mubr.bf16.gmra.mrb[36].mxu0 %v2325_v6 }
  0x7e   : > { %1221 = vmatmul.mubr.bf16.gmra.mrb[36].mxu1 %v2326_v7  ;;  %1067 = vmatprep.mubr.bf16.mxu0 %v2327_v8 }
  0x7f   : > { %1228 = vmatprep.mubr.bf16.mxu1 %v2329_v9 }
  0x85   : > { %1068 = vmatmul.mubr.bf16.gmra.mrb[40].mxu0 %v2331_v10 }
  0x86   : > { %1229 = vmatmul.mubr.bf16.gmra.mrb[40].mxu1 %v2332_v11  ;;  %1075 = vmatprep.mubr.bf16.mxu0 %v2333_v12 }
  0x87   : > { %1236 = vmatprep.mubr.bf16.mxu1 %v2335_v13 }
  0x8d   : > { %1076 = vmatmul.mubr.bf16.gmra.mrb[44].mxu0 %v2337_v14 }
  0x8e   : > { %1237 = vmatmul.mubr.bf16.gmra.mrb[44].mxu1 %v2338_v15  ;;  %1083 = vmatprep.mubr.bf16.mxu0 %v2339_v16 }
  0x8f   : > { %1244 = vmatprep.mubr.bf16.mxu1 %v2341_v17 }
  0x95   : > { %1084 = vmatmul.mubr.bf16.gmra.mrb[48].mxu0 %v2343_v18 }
  0x96   : > { %1245 = vmatmul.mubr.bf16.gmra.mrb[48].mxu1 %v2344_v19  ;;  %1091 = vmatprep.mubr.bf16.mxu0 %v2345_v20 }
  0x97   : > { %1252 = vmatprep.mubr.bf16.mxu1 %v2347_v21 }
  0x9d   : > { %1092 = vmatmul.mubr.bf16.gmra.mrb[52].mxu0 %v2349_v22 }
  0x9e   : > { %1253 = vmatmul.mubr.bf16.gmra.mrb[52].mxu1 %v2350_v23  ;;  %1099 = vmatprep.mubr.bf16.mxu0 %v2351_v24 }
  0x9f   : > { %1260 = vmatprep.mubr.bf16.mxu1 %v2353_v25 }
  0xa5   : > { %1100 = vmatmul.mubr.bf16.gmra.mrb[56].mxu0 %v2355_v26 }
  0xa6   : > { %1261 = vmatmul.mubr.bf16.gmra.mrb[56].mxu1 %v2356_v27  ;;  %1107 = vmatprep.mubr.bf16.mxu0 %v2357_v28 }
  0xa7   : > { %1268 = vmatprep.mubr.bf16.mxu1 %v2359_v29 }
  0xad   : > { %1108 = vmatmul.mubr.bf16.gmra.mrb[60].mxu0 %v2361_v30 }
  0xae   : > { %1269 = vmatmul.mubr.bf16.gmra.mrb[60].mxu1 %v2362_v31 }
 0x108   : > { %v1987_v32 = vpop.f32.mrb[0].mxu0 }
 0x109   : > { %v2099_v33 = vpop.f32.mrb[0].mxu1  ;;  %v1988_v34 = vpop.f32.mrb[1].mxu0 }
 0x10a   : > { %v1989_v35 = vadd.f32 %v1988_v34, %v1987_v32  ;;  %v2100_v36 = vpop.f32.mrb[1].mxu1  ;;  %v1990_v37 = vpop.f32.mrb[2].mxu0 }
 0x10b   : > { %v2101_v38 = vadd.f32 %v2100_v36, %v2099_v33  ;;  %v2102_v39 = vpop.f32.mrb[2].mxu1  ;;  %v1991_v40 = vpop.f32.mrb[3].mxu0 }
 0x10c   : > { %v1992_v42 = vadd.f32 %v1991_v40, %v1990_v37  ;;  %v2103_v43 = vpop.f32.mrb[3].mxu1 }
 0x10d   : > { %v1151_v44 = vadd.f32 %v2101_v38, %v1989_v35  ;;  %v2104_v45 = vadd.f32 %v2103_v43, %v2102_v39 }
 0x10f   : > { %v1284_v47 = vmul.f32 %v2643_v41, %v1151_v44  ;;  %v1154_v48 = vadd.f32 %v2104_v45, %v1992_v42 }
 0x110   : > { %v1993_v49 = vpop.f32.mrb[4].mxu0 }
 0x111   : > { %v1323_v50 = vadd.f32 %v2648_v46, %v1284_v47  ;;  %v1285_v51 = vmul.f32 %v2643_v41, %v1154_v48  ;;  %v2105_v52 = vpop.f32.mrb[4].mxu1  ;;  %v1994_v53 = vpop.f32.mrb[5].mxu0 }
 0x112   : > { %v1995_v54 = vadd.f32 %v1994_v53, %v1993_v49  ;;  %v2106_v55 = vpop.f32.mrb[5].mxu1  ;;  %v1996_v56 = vpop.f32.mrb[6].mxu0 }
 0x113   : > { %v1324_v57 = vadd.f32 %v2648_v46, %v1285_v51  ;;  %v2107_v58 = vadd.f32 %v2106_v55, %v2105_v52  ;;  %v2108_v59 = vpop.f32.mrb[6].mxu1  ;;  %v1997_v60 = vpop.f32.mrb[7].mxu0  ;;  %2363 = vtanh.f32 %v1323_v50 }
 0x114   : > { %v1998_v61 = vadd.f32 %v1997_v60, %v1996_v56  ;;  %v2109_v62 = vpop.f32.mrb[7].mxu1 }
 0x115   : > { %2365 = vtanh.f32 %v1324_v57  ;;  %v1159_v63 = vadd.f32 %v2107_v58, %v1995_v54  ;;  %v2110_v0 = vadd.f32 %v2109_v62, %v2108_v59 }
 0x117   : > { %v1286_v1 = vmul.f32 %v2643_v41, %v1159_v63  ;;  %v1162_v2 = vadd.f32 %v2110_v0, %v1998_v61 }
 0x118   : > { %v1999_v3 = vpop.f32.mrb[8].mxu0 }
 0x119   : > { %v1325_v4 = vadd.f32 %v2648_v46, %v1286_v1  ;;  %v1287_v5 = vmul.f32 %v2643_v41, %v1162_v2  ;;  %v2111_v6 = vpop.f32.mrb[8].mxu1  ;;  %v2000_v7 = vpop.f32.mrb[9].mxu0 }
 0x11a   : > { %v2001_v8 = vadd.f32 %v2000_v7, %v1999_v3  ;;  %v2112_v9 = vpop.f32.mrb[9].mxu1  ;;  %v2002_v10 = vpop.f32.mrb[10].mxu0 }
 0x11b   : > { %v1326_v11 = vadd.f32 %v2648_v46, %v1287_v5  ;;  %v2113_v12 = vadd.f32 %v2112_v9, %v2111_v6  ;;  %v2114_v13 = vpop.f32.mrb[10].mxu1  ;;  %v2003_v14 = vpop.f32.mrb[11].mxu0  ;;  %2367 = vtanh.f32 %v1325_v4 }
 0x11c   : > { %v2004_v15 = vadd.f32 %v2003_v14, %v2002_v10  ;;  %v2115_v16 = vpop.f32.mrb[11].mxu1 }
 0x11d   : > { %2369 = vtanh.f32 %v1326_v11  ;;  %v1167_v17 = vadd.f32 %v2113_v12, %v2001_v8  ;;  %v2116_v18 = vadd.f32 %v2115_v16, %v2114_v13  ;;  %v2364_v19 = vpop.eup %2363 }
 0x11f   : > { %v2366_v20 = vpop.eup %2365  ;;  %v1288_v21 = vmul.f32 %v2643_v41, %v1167_v17  ;;  %v1170_v22 = vadd.f32 %v2116_v18, %v2004_v15 }
 0x120   : > { %v1879_v23 = vpack.c.bf16 %v2366_v20, %v2364_v19  ;;  %v2005_v24 = vpop.f32.mrb[12].mxu0 }
 0x121   : > { %v1327_v25 = vadd.f32 %v2648_v46, %v1288_v21  ;;  %v1289_v26 = vmul.f32 %v2643_v41, %v1170_v22  ;;  %v2117_v27 = vpop.f32.mrb[12].mxu1  ;;  %v2006_v28 = vpop.f32.mrb[13].mxu0 }
 0x122   : > { %1880 = vst [vmem:[%s2664_s16] sm:$0xff] %v1879_v23   ;;  %v2007_v29 = vadd.f32 %v2006_v28, %v2005_v24  ;;  %v2118_v30 = vpop.f32.mrb[13].mxu1  ;;  %v2008_v31 = vpop.f32.mrb[14].mxu0 }
 0x123   : > { %v1328_v32 = vadd.f32 %v2648_v46, %v1289_v26  ;;  %v2119_v33 = vadd.f32 %v2118_v30, %v2117_v27  ;;  %v2120_v34 = vpop.f32.mrb[14].mxu1  ;;  %v2009_v35 = vpop.f32.mrb[15].mxu0  ;;  %2371 = vtanh.f32 %v1327_v25 }
 0x124   : > { %v2010_v36 = vadd.f32 %v2009_v35, %v2008_v31  ;;  %v2121_v37 = vpop.f32.mrb[15].mxu1 }
 0x125   : > { %2373 = vtanh.f32 %v1328_v32  ;;  %v1175_v38 = vadd.f32 %v2119_v33, %v2007_v29  ;;  %v2122_v39 = vadd.f32 %v2121_v37, %v2120_v34  ;;  %v2368_v40 = vpop.eup %2367 }
 0x127   : > { %v2370_v42 = vpop.eup %2369  ;;  %v1290_v43 = vmul.f32 %v2643_v41, %v1175_v38  ;;  %v1178_v44 = vadd.f32 %v2122_v39, %v2010_v36 }
 0x128   : > { %v1884_v45 = vpack.c.bf16 %v2370_v42, %v2368_v40  ;;  %v2011_v47 = vpop.f32.mrb[16].mxu0 }
 0x129   : > { %v1329_v48 = vadd.f32 %v2648_v46, %v1290_v43  ;;  %v1291_v49 = vmul.f32 %v2643_v41, %v1178_v44  ;;  %v2123_v50 = vpop.f32.mrb[16].mxu1  ;;  %v2012_v51 = vpop.f32.mrb[17].mxu0 }
 0x12a   : > { %1956 = vst [vmem:[%s2664_s16 + $0x8] sm:$0xff] %v1884_v45   ;;  %v2013_v52 = vadd.f32 %v2012_v51, %v2011_v47  ;;  %v2124_v53 = vpop.f32.mrb[17].mxu1  ;;  %v2014_v54 = vpop.f32.mrb[18].mxu0 }
 0x12b   : > { %v1330_v55 = vadd.f32 %v2648_v46, %v1291_v49  ;;  %v2125_v56 = vadd.f32 %v2124_v53, %v2123_v50  ;;  %v2126_v57 = vpop.f32.mrb[18].mxu1  ;;  %v2015_v58 = vpop.f32.mrb[19].mxu0  ;;  %2375 = vtanh.f32 %v1329_v48 }
 0x12c   : > { %v2016_v59 = vadd.f32 %v2015_v58, %v2014_v54  ;;  %v2127_v60 = vpop.f32.mrb[19].mxu1 }
 0x12d   : > { %2377 = vtanh.f32 %v1330_v55  ;;  %v1183_v61 = vadd.f32 %v2125_v56, %v2013_v52  ;;  %v2128_v62 = vadd.f32 %v2127_v60, %v2126_v57  ;;  %v2372_v63 = vpop.eup %2371 }
 0x12f   : > { %v2374_v0 = vpop.eup %2373  ;;  %v1292_v1 = vmul.f32 %v2643_v41, %v1183_v61  ;;  %v1186_v2 = vadd.f32 %v2128_v62, %v2016_v59 }
 0x130   : > { %v1889_v3 = vpack.c.bf16 %v2374_v0, %v2372_v63  ;;  %v2017_v4 = vpop.f32.mrb[20].mxu0 }
 0x131   : > { %v1331_v5 = vadd.f32 %v2648_v46, %v1292_v1  ;;  %v1293_v6 = vmul.f32 %v2643_v41, %v1186_v2  ;;  %v2129_v7 = vpop.f32.mrb[20].mxu1  ;;  %v2018_v8 = vpop.f32.mrb[21].mxu0 }
 0x132   : > { %1957 = vst [vmem:[%s2664_s16 + $0x10] sm:$0xff] %v1889_v3   ;;  %v2019_v9 = vadd.f32 %v2018_v8, %v2017_v4  ;;  %v2130_v10 = vpop.f32.mrb[21].mxu1  ;;  %v2020_v11 = vpop.f32.mrb[22].mxu0 }
 0x133   : > { %v1332_v12 = vadd.f32 %v2648_v46, %v1293_v6  ;;  %v2131_v13 = vadd.f32 %v2130_v10, %v2129_v7  ;;  %v2132_v14 = vpop.f32.mrb[22].mxu1  ;;  %v2021_v15 = vpop.f32.mrb[23].mxu0  ;;  %2379 = vtanh.f32 %v1331_v5 }
 0x134   : > { %v2022_v16 = vadd.f32 %v2021_v15, %v2020_v11  ;;  %v2133_v17 = vpop.f32.mrb[23].mxu1 }
 0x135   : > { %2381 = vtanh.f32 %v1332_v12  ;;  %v1191_v18 = vadd.f32 %v2131_v13, %v2019_v9  ;;  %v2134_v19 = vadd.f32 %v2133_v17, %v2132_v14  ;;  %v2376_v20 = vpop.eup %2375 }
 0x137   : > { %v2378_v21 = vpop.eup %2377  ;;  %v1294_v22 = vmul.f32 %v2643_v41, %v1191_v18  ;;  %v1194_v23 = vadd.f32 %v2134_v19, %v2022_v16 }
 0x138   : > { %v1894_v24 = vpack.c.bf16 %v2378_v21, %v2376_v20  ;;  %v2023_v25 = vpop.f32.mrb[24].mxu0 }
 0x139   : > { %v1333_v26 = vadd.f32 %v2648_v46, %v1294_v22  ;;  %v1295_v27 = vmul.f32 %v2643_v41, %v1194_v23  ;;  %v2135_v28 = vpop.f32.mrb[24].mxu1  ;;  %v2024_v29 = vpop.f32.mrb[25].mxu0 }
 0x13a   : > { %1958 = vst [vmem:[%s2664_s16 + $0x18] sm:$0xff] %v1894_v24   ;;  %v2025_v30 = vadd.f32 %v2024_v29, %v2023_v25  ;;  %v2136_v31 = vpop.f32.mrb[25].mxu1  ;;  %v2026_v32 = vpop.f32.mrb[26].mxu0 }
 0x13b   : > { %v1334_v33 = vadd.f32 %v2648_v46, %v1295_v27  ;;  %v2137_v34 = vadd.f32 %v2136_v31, %v2135_v28  ;;  %v2138_v35 = vpop.f32.mrb[26].mxu1  ;;  %v2027_v36 = vpop.f32.mrb[27].mxu0  ;;  %2383 = vtanh.f32 %v1333_v26 }
 0x13c   : > { %v2028_v37 = vadd.f32 %v2027_v36, %v2026_v32  ;;  %v2139_v38 = vpop.f32.mrb[27].mxu1 }
 0x13d   : > { %2385 = vtanh.f32 %v1334_v33  ;;  %v1199_v39 = vadd.f32 %v2137_v34, %v2025_v30  ;;  %v2140_v40 = vadd.f32 %v2139_v38, %v2138_v35  ;;  %v2380_v42 = vpop.eup %2379 }
 0x13f   : > { %v2382_v43 = vpop.eup %2381  ;;  %v1296_v44 = vmul.f32 %v2643_v41, %v1199_v39  ;;  %v1202_v45 = vadd.f32 %v2140_v40, %v2028_v37 }
 0x140   : > { %v1899_v47 = vpack.c.bf16 %v2382_v43, %v2380_v42  ;;  %v2029_v48 = vpop.f32.mrb[28].mxu0 }
 0x141   : > { %v1335_v49 = vadd.f32 %v2648_v46, %v1296_v44  ;;  %v1297_v50 = vmul.f32 %v2643_v41, %v1202_v45  ;;  %v2141_v51 = vpop.f32.mrb[28].mxu1  ;;  %v2030_v52 = vpop.f32.mrb[29].mxu0 }
 0x142   : > { %1959 = vst [vmem:[%s2664_s16 + $0x20] sm:$0xff] %v1899_v47   ;;  %v2031_v53 = vadd.f32 %v2030_v52, %v2029_v48  ;;  %v2142_v54 = vpop.f32.mrb[29].mxu1  ;;  %v2032_v55 = vpop.f32.mrb[30].mxu0 }
 0x143   : > { %v1336_v56 = vadd.f32 %v2648_v46, %v1297_v50  ;;  %v2143_v57 = vadd.f32 %v2142_v54, %v2141_v51  ;;  %v2144_v58 = vpop.f32.mrb[30].mxu1  ;;  %v2033_v59 = vpop.f32.mrb[31].mxu0  ;;  %2387 = vtanh.f32 %v1335_v49 }
 0x144   : > { %v2034_v60 = vadd.f32 %v2033_v59, %v2032_v55  ;;  %v2145_v61 = vpop.f32.mrb[31].mxu1 }
 0x145   : > { %2389 = vtanh.f32 %v1336_v56  ;;  %v1207_v62 = vadd.f32 %v2143_v57, %v2031_v53  ;;  %v2146_v63 = vadd.f32 %v2145_v61, %v2144_v58  ;;  %v2384_v0 = vpop.eup %2383 }
 0x147   : > { %v2386_v1 = vpop.eup %2385  ;;  %v1298_v2 = vmul.f32 %v2643_v41, %v1207_v62  ;;  %v1210_v3 = vadd.f32 %v2146_v63, %v2034_v60 }
 0x148   : > { %v1904_v4 = vpack.c.bf16 %v2386_v1, %v2384_v0  ;;  %v2035_v5 = vpop.f32.mrb[32].mxu0 }
 0x149   : > { %v1337_v6 = vadd.f32 %v2648_v46, %v1298_v2  ;;  %v1299_v7 = vmul.f32 %v2643_v41, %v1210_v3  ;;  %v2147_v8 = vpop.f32.mrb[32].mxu1  ;;  %v2036_v9 = vpop.f32.mrb[33].mxu0 }
 0x14a   : > { %1960 = vst [vmem:[%s2664_s16 + $0x28] sm:$0xff] %v1904_v4   ;;  %v2037_v10 = vadd.f32 %v2036_v9, %v2035_v5  ;;  %v2148_v11 = vpop.f32.mrb[33].mxu1  ;;  %v2038_v12 = vpop.f32.mrb[34].mxu0 }
 0x14b   : > { %v1338_v13 = vadd.f32 %v2648_v46, %v1299_v7  ;;  %v2149_v14 = vadd.f32 %v2148_v11, %v2147_v8  ;;  %v2150_v15 = vpop.f32.mrb[34].mxu1  ;;  %v2039_v16 = vpop.f32.mrb[35].mxu0  ;;  %2391 = vtanh.f32 %v1337_v6 }
 0x14c   : > { %v2040_v17 = vadd.f32 %v2039_v16, %v2038_v12  ;;  %v2151_v18 = vpop.f32.mrb[35].mxu1 }
 0x14d   : > { %2393 = vtanh.f32 %v1338_v13  ;;  %v1215_v19 = vadd.f32 %v2149_v14, %v2037_v10  ;;  %v2152_v20 = vadd.f32 %v2151_v18, %v2150_v15  ;;  %v2388_v21 = vpop.eup %2387 }
 0x14f   : > { %v2390_v22 = vpop.eup %2389  ;;  %v1300_v23 = vmul.f32 %v2643_v41, %v1215_v19  ;;  %v1218_v24 = vadd.f32 %v2152_v20, %v2040_v17 }
 0x150   : > { %v1909_v25 = vpack.c.bf16 %v2390_v22, %v2388_v21  ;;  %v2041_v26 = vpop.f32.mrb[36].mxu0 }
 0x151   : > { %v1339_v27 = vadd.f32 %v2648_v46, %v1300_v23  ;;  %v1301_v28 = vmul.f32 %v2643_v41, %v1218_v24  ;;  %v2153_v29 = vpop.f32.mrb[36].mxu1  ;;  %v2042_v30 = vpop.f32.mrb[37].mxu0 }
 0x152   : > { %1961 = vst [vmem:[%s2664_s16 + $0x30] sm:$0xff] %v1909_v25   ;;  %v2043_v31 = vadd.f32 %v2042_v30, %v2041_v26  ;;  %v2154_v32 = vpop.f32.mrb[37].mxu1  ;;  %v2044_v33 = vpop.f32.mrb[38].mxu0 }
 0x153   : > { %v1340_v34 = vadd.f32 %v2648_v46, %v1301_v28  ;;  %v2155_v35 = vadd.f32 %v2154_v32, %v2153_v29  ;;  %v2156_v36 = vpop.f32.mrb[38].mxu1  ;;  %v2045_v37 = vpop.f32.mrb[39].mxu0  ;;  %2395 = vtanh.f32 %v1339_v27 }
 0x154   : > { %v2046_v38 = vadd.f32 %v2045_v37, %v2044_v33  ;;  %v2157_v39 = vpop.f32.mrb[39].mxu1 }
 0x155   : > { %2397 = vtanh.f32 %v1340_v34  ;;  %v1223_v40 = vadd.f32 %v2155_v35, %v2043_v31  ;;  %v2158_v42 = vadd.f32 %v2157_v39, %v2156_v36  ;;  %v2392_v43 = vpop.eup %2391 }
 0x157   : > { %v2394_v44 = vpop.eup %2393  ;;  %v1302_v45 = vmul.f32 %v2643_v41, %v1223_v40  ;;  %v1226_v47 = vadd.f32 %v2158_v42, %v2046_v38 }
 0x158   : > { %v1914_v48 = vpack.c.bf16 %v2394_v44, %v2392_v43  ;;  %v2047_v49 = vpop.f32.mrb[40].mxu0 }
 0x159   : > { %v1341_v50 = vadd.f32 %v2648_v46, %v1302_v45  ;;  %v1303_v51 = vmul.f32 %v2643_v41, %v1226_v47  ;;  %v2159_v52 = vpop.f32.mrb[40].mxu1  ;;  %v2048_v53 = vpop.f32.mrb[41].mxu0 }
 0x15a   : > { %1962 = vst [vmem:[%s2664_s16 + $0x38] sm:$0xff] %v1914_v48   ;;  %v2049_v54 = vadd.f32 %v2048_v53, %v2047_v49  ;;  %v2160_v55 = vpop.f32.mrb[41].mxu1  ;;  %v2050_v56 = vpop.f32.mrb[42].mxu0 }
 0x15b   : > { %v1342_v57 = vadd.f32 %v2648_v46, %v1303_v51  ;;  %v2161_v58 = vadd.f32 %v2160_v55, %v2159_v52  ;;  %v2162_v59 = vpop.f32.mrb[42].mxu1  ;;  %v2051_v60 = vpop.f32.mrb[43].mxu0  ;;  %2399 = vtanh.f32 %v1341_v50 }
 0x15c   : > { %v2052_v61 = vadd.f32 %v2051_v60, %v2050_v56  ;;  %v2163_v62 = vpop.f32.mrb[43].mxu1 }
 0x15d   : > { %2401 = vtanh.f32 %v1342_v57  ;;  %v1231_v63 = vadd.f32 %v2161_v58, %v2049_v54  ;;  %v2164_v0 = vadd.f32 %v2163_v62, %v2162_v59  ;;  %v2396_v1 = vpop.eup %2395 }
 0x15f   : > { %v2398_v2 = vpop.eup %2397  ;;  %v1304_v3 = vmul.f32 %v2643_v41, %v1231_v63  ;;  %v1234_v4 = vadd.f32 %v2164_v0, %v2052_v61 }
 0x160   : > { %v1919_v5 = vpack.c.bf16 %v2398_v2, %v2396_v1  ;;  %v2053_v6 = vpop.f32.mrb[44].mxu0 }
 0x161   : > { %v1343_v7 = vadd.f32 %v2648_v46, %v1304_v3  ;;  %v1305_v8 = vmul.f32 %v2643_v41, %v1234_v4  ;;  %v2165_v9 = vpop.f32.mrb[44].mxu1  ;;  %v2054_v10 = vpop.f32.mrb[45].mxu0 }
 0x162   : > { %1963 = vst [vmem:[%s2664_s16 + $0x40] sm:$0xff] %v1919_v5   ;;  %v2055_v11 = vadd.f32 %v2054_v10, %v2053_v6  ;;  %v2166_v12 = vpop.f32.mrb[45].mxu1  ;;  %v2056_v13 = vpop.f32.mrb[46].mxu0 }
 0x163   : > { %v1344_v14 = vadd.f32 %v2648_v46, %v1305_v8  ;;  %v2167_v15 = vadd.f32 %v2166_v12, %v2165_v9  ;;  %v2168_v16 = vpop.f32.mrb[46].mxu1  ;;  %v2057_v17 = vpop.f32.mrb[47].mxu0  ;;  %2403 = vtanh.f32 %v1343_v7 }
 0x164   : > { %v2058_v18 = vadd.f32 %v2057_v17, %v2056_v13  ;;  %v2169_v19 = vpop.f32.mrb[47].mxu1 }
 0x165   : > { %2405 = vtanh.f32 %v1344_v14  ;;  %v1239_v20 = vadd.f32 %v2167_v15, %v2055_v11  ;;  %v2170_v21 = vadd.f32 %v2169_v19, %v2168_v16  ;;  %v2400_v22 = vpop.eup %2399 }
 0x167   : > { %v2402_v23 = vpop.eup %2401  ;;  %v1306_v24 = vmul.f32 %v2643_v41, %v1239_v20  ;;  %v1242_v25 = vadd.f32 %v2170_v21, %v2058_v18 }
 0x168   : > { %v1924_v26 = vpack.c.bf16 %v2402_v23, %v2400_v22  ;;  %v2059_v27 = vpop.f32.mrb[48].mxu0 }
 0x169   : > { %v1345_v28 = vadd.f32 %v2648_v46, %v1306_v24  ;;  %v1307_v29 = vmul.f32 %v2643_v41, %v1242_v25  ;;  %v2171_v30 = vpop.f32.mrb[48].mxu1  ;;  %v2060_v31 = vpop.f32.mrb[49].mxu0 }
 0x16a   : > { %1964 = vst [vmem:[%s2664_s16 + $0x48] sm:$0xff] %v1924_v26   ;;  %v2061_v32 = vadd.f32 %v2060_v31, %v2059_v27  ;;  %v2172_v33 = vpop.f32.mrb[49].mxu1  ;;  %v2062_v34 = vpop.f32.mrb[50].mxu0 }
 0x16b   : > { %v1346_v35 = vadd.f32 %v2648_v46, %v1307_v29  ;;  %v2173_v36 = vadd.f32 %v2172_v33, %v2171_v30  ;;  %v2174_v37 = vpop.f32.mrb[50].mxu1  ;;  %v2063_v38 = vpop.f32.mrb[51].mxu0  ;;  %2407 = vtanh.f32 %v1345_v28 }
 0x16c   : > { %v2064_v39 = vadd.f32 %v2063_v38, %v2062_v34  ;;  %v2175_v40 = vpop.f32.mrb[51].mxu1 }
 0x16d   : > { %2409 = vtanh.f32 %v1346_v35  ;;  %v1247_v42 = vadd.f32 %v2173_v36, %v2061_v32  ;;  %v2176_v43 = vadd.f32 %v2175_v40, %v2174_v37  ;;  %v2404_v44 = vpop.eup %2403 }
 0x16f   : > { %v2406_v45 = vpop.eup %2405  ;;  %v1308_v47 = vmul.f32 %v2643_v41, %v1247_v42  ;;  %v1250_v48 = vadd.f32 %v2176_v43, %v2064_v39 }
 0x170   : > { %v1929_v49 = vpack.c.bf16 %v2406_v45, %v2404_v44  ;;  %v2065_v50 = vpop.f32.mrb[52].mxu0 }
 0x171   : > { %v1347_v51 = vadd.f32 %v2648_v46, %v1308_v47  ;;  %v1309_v52 = vmul.f32 %v2643_v41, %v1250_v48  ;;  %v2177_v53 = vpop.f32.mrb[52].mxu1  ;;  %v2066_v54 = vpop.f32.mrb[53].mxu0 }
 0x172   : > { %1965 = vst [vmem:[%s2664_s16 + $0x50] sm:$0xff] %v1929_v49   ;;  %v2067_v55 = vadd.f32 %v2066_v54, %v2065_v50  ;;  %v2178_v56 = vpop.f32.mrb[53].mxu1  ;;  %v2068_v57 = vpop.f32.mrb[54].mxu0 }
 0x173   : > { %v1348_v58 = vadd.f32 %v2648_v46, %v1309_v52  ;;  %v2179_v59 = vadd.f32 %v2178_v56, %v2177_v53  ;;  %v2180_v60 = vpop.f32.mrb[54].mxu1  ;;  %v2069_v61 = vpop.f32.mrb[55].mxu0  ;;  %2411 = vtanh.f32 %v1347_v51 }
 0x174   : > { %v2070_v62 = vadd.f32 %v2069_v61, %v2068_v57  ;;  %v2181_v63 = vpop.f32.mrb[55].mxu1 }
 0x175   : > { %2413 = vtanh.f32 %v1348_v58  ;;  %v1255_v0 = vadd.f32 %v2179_v59, %v2067_v55  ;;  %v2182_v1 = vadd.f32 %v2181_v63, %v2180_v60  ;;  %v2408_v2 = vpop.eup %2407 }
 0x177   : > { %v2410_v3 = vpop.eup %2409  ;;  %v1310_v4 = vmul.f32 %v2643_v41, %v1255_v0  ;;  %v1258_v5 = vadd.f32 %v2182_v1, %v2070_v62 }
 0x178   : > { %v1934_v6 = vpack.c.bf16 %v2410_v3, %v2408_v2  ;;  %v2071_v7 = vpop.f32.mrb[56].mxu0 }
 0x179   : > { %v1349_v8 = vadd.f32 %v2648_v46, %v1310_v4  ;;  %v1311_v9 = vmul.f32 %v2643_v41, %v1258_v5  ;;  %v2183_v10 = vpop.f32.mrb[56].mxu1  ;;  %v2072_v11 = vpop.f32.mrb[57].mxu0 }
 0x17a   : > { %1966 = vst [vmem:[%s2664_s16 + $0x58] sm:$0xff] %v1934_v6   ;;  %v2073_v12 = vadd.f32 %v2072_v11, %v2071_v7  ;;  %v2184_v13 = vpop.f32.mrb[57].mxu1  ;;  %v2074_v14 = vpop.f32.mrb[58].mxu0 }
 0x17b   : > { %v1350_v15 = vadd.f32 %v2648_v46, %v1311_v9  ;;  %v2185_v16 = vadd.f32 %v2184_v13, %v2183_v10  ;;  %v2186_v17 = vpop.f32.mrb[58].mxu1  ;;  %v2075_v18 = vpop.f32.mrb[59].mxu0  ;;  %2415 = vtanh.f32 %v1349_v8 }
 0x17c   : > { %v2076_v19 = vadd.f32 %v2075_v18, %v2074_v14  ;;  %v2187_v20 = vpop.f32.mrb[59].mxu1 }
 0x17d   : > { %2417 = vtanh.f32 %v1350_v15  ;;  %v1263_v21 = vadd.f32 %v2185_v16, %v2073_v12  ;;  %v2188_v22 = vadd.f32 %v2187_v20, %v2186_v17  ;;  %v2412_v23 = vpop.eup %2411 }
 0x17f   : > { %v2414_v24 = vpop.eup %2413  ;;  %v1312_v25 = vmul.f32 %v2643_v41, %v1263_v21  ;;  %v1266_v26 = vadd.f32 %v2188_v22, %v2076_v19 }
 0x180   : > { %v1939_v27 = vpack.c.bf16 %v2414_v24, %v2412_v23  ;;  %v2077_v28 = vpop.f32.mrb[60].mxu0 }
 0x181   : > { %v1351_v29 = vadd.f32 %v2648_v46, %v1312_v25  ;;  %v1313_v30 = vmul.f32 %v2643_v41, %v1266_v26  ;;  %v2189_v31 = vpop.f32.mrb[60].mxu1  ;;  %v2078_v32 = vpop.f32.mrb[61].mxu0 }
 0x182   : > { %1967 = vst [vmem:[%s2664_s16 + $0x60] sm:$0xff] %v1939_v27   ;;  %v2079_v33 = vadd.f32 %v2078_v32, %v2077_v28  ;;  %v2190_v34 = vpop.f32.mrb[61].mxu1  ;;  %v2080_v35 = vpop.f32.mrb[62].mxu0 }
 0x183   : > { %v1352_v36 = vadd.f32 %v2648_v46, %v1313_v30  ;;  %v2191_v37 = vadd.f32 %v2190_v34, %v2189_v31  ;;  %v2192_v38 = vpop.f32.mrb[62].mxu1  ;;  %v2081_v39 = vpop.f32.mrb[63].mxu0  ;;  %2419 = vtanh.f32 %v1351_v29 }
 0x184   : > { %v2082_v40 = vadd.f32 %v2081_v39, %v2080_v35  ;;  %v2193_v42 = vpop.f32.mrb[63].mxu1 }
 0x185   : > { %2421 = vtanh.f32 %v1352_v36  ;;  %v1271_v43 = vadd.f32 %v2191_v37, %v2079_v33  ;;  %v2194_v44 = vadd.f32 %v2193_v42, %v2192_v38  ;;  %v2416_v45 = vpop.eup %2415 }
 0x187   : > { %v2418_v47 = vpop.eup %2417  ;;  %v1314_v48 = vmul.f32 %v2643_v41, %v1271_v43  ;;  %v1274_v49 = vadd.f32 %v2194_v44, %v2082_v40 }
 0x188   : > { %v1944_v50 = vpack.c.bf16 %v2418_v47, %v2416_v45 }
 0x189   : > { %v1353_v51 = vadd.f32 %v2648_v46, %v1314_v48  ;;  %v1315_v52 = vmul.f32 %v2643_v41, %v1274_v49 }
 0x18a   : > { %1968 = vst [vmem:[%s2664_s16 + $0x68] sm:$0xff] %v1944_v50  }
 0x18b   : > { %v1354_v53 = vadd.f32 %v2648_v46, %v1315_v52  ;;  %2423 = vtanh.f32 %v1353_v51 }
 0x18d   : > { %2425 = vtanh.f32 %v1354_v53  ;;  %v2420_v54 = vpop.eup %2419 }
 0x18f   : > { %v2422_v55 = vpop.eup %2421 }
 0x190   : > { %v1949_v56 = vpack.c.bf16 %v2422_v55, %v2420_v54 }
 0x192   : > { %1969 = vst [vmem:[%s2664_s16 + $0x70] sm:$0xff] %v1949_v56  }
 0x195   : > { %v2424_v57 = vpop.eup %2423 }
 0x197   : > { %v2426_v58 = vpop.eup %2425 }
 0x198   : > { %v1954_v59 = vpack.c.bf16 %v2426_v58, %v2424_v57 }
 0x19a   : > { %1970 = vst [vmem:[%s2664_s16 + $0x78] sm:$0xff] %v1954_v59  }
 0x19b PF: > { %s14_s19 = sadd.s32 1, %s2465_s19   ;;  %s2758_s15 = smov %s2457_s17 }
 0x19c   : > { %p11_p7 = scmp.ge.s32.totalorder %s14_s19, 34   ;;  %s2759_s16 = smov %s2461_s18 }
 0x19d   : > { %s2760_s17 = smov %s2763_s20  ;;  %s2761_s18 = smov %s2767_s21 }
 0x19e   :  { %13 = sbr.rel (!%p11_p7) target bundleno = 3 (0x3), region = 75 }

</bundles_post_ra>
